<compile_context>
chip_gen: v7x
topology: tpu7x:2x2x1
jax: 0.10.0
libtpu: 0.0.40
codegen_flags: <defaults>
</compile_context>

<pallas_src>
from functools import partial

import jax
import jax.numpy as jnp
from jax.experimental import pallas as pl
from jax.experimental.pallas import tpu as pltpu


# --------------------------------------------------------------------------------------
# Small in-kernel helpers
# --------------------------------------------------------------------------------------
def _ln(h, ln_ref, row, eps=1e-12):
    # ln_ref packs [gamma; beta] pairs row-wise; `row` is the gamma row.
    g = ln_ref[row:row + 1, :]
    b = ln_ref[row + 1:row + 2, :]
    mu = jnp.mean(h, axis=-1, keepdims=True)
    var = jnp.mean((h - mu) ** 2, axis=-1, keepdims=True)
    return (h - mu) * jax.lax.rsqrt(var + eps) * g + b


def _batchnorm_relu(h, bn_ref, eps=1e-5):
    # bn_ref rows: [gamma, beta, running_mean, running_var]  (eval-mode BatchNorm1d)
    gamma = bn_ref[0:1, :]
    beta = bn_ref[1:2, :]
    mean = bn_ref[2:3, :]
    var = bn_ref[3:4, :]
    out = (h - mean) * jax.lax.rsqrt(var + eps) * gamma + beta
    return jnp.maximum(out, 0.0)


# --------------------------------------------------------------------------------------
# Kernel A1: PoolContextEncoder + mpp_classifier (fused)
# --------------------------------------------------------------------------------------
def pool_context_kernel(emb_ref, w_ref, b_ref, bn_ref, wm_ref, bm_ref, ctx_ref, mpp_ref):
    # emb_ref: (S, B, H)  (sentence-major, == x.transpose(0,1) in PyTorch)
    S = emb_ref.shape[0]
    pooled = emb_ref[0]
    for s in range(1, S):                      # torch.max(trans_x, 0)[0]
        pooled = jnp.maximum(pooled, emb_ref[s])
    h = jnp.dot(pooled, w_ref[...], preferred_element_type=jnp.float32) + b_ref[...]
    ctx = _batchnorm_relu(h, bn_ref)
    ctx_ref[...] = ctx
    mpp_ref[...] = jnp.dot(ctx, wm_ref[...], preferred_element_type=jnp.float32) + bm_ref[...]


# --------------------------------------------------------------------------------------
# Kernel A2: GRUContextEncoder + mpp_classifier (fused)
#            Input-gate matmul hoisted out of the serial recurrence.
# --------------------------------------------------------------------------------------
def gru_context_kernel(emb_ref, wih_ref, whh_ref, bih_ref, bhh_ref,
                       w_ref, b_ref, bn_ref, wm_ref, bm_ref, ctx_ref, mpp_ref):
    # emb_ref: (S, B, H_in); gates ordered (r, z, n) like PyTorch nn.GRU
    S, B, _ = emb_ref.shape
    H = whh_ref.shape[0]

    # One (S*B, H_in) x (H_in, 3H) matmul; only the h-dependent matmul stays serial.
    x_all = jnp.concatenate([emb_ref[s] for s in range(S)], axis=0)       # (S*B, H_in)
    gi_all = jnp.dot(x_all, wih_ref[...], preferred_element_type=jnp.float32) + bih_ref[...]

    h = jnp.zeros((B, H), jnp.float32)
    for t in range(S):
        gi = gi_all[t * B:(t + 1) * B, :]
        gh = jnp.dot(h, whh_ref[...], preferred_element_type=jnp.float32) + bhh_ref[...]
        r = jax.nn.sigmoid(gi[:, :H] + gh[:, :H])
        z = jax.nn.sigmoid(gi[:, H:2 * H] + gh[:, H:2 * H])
        n = jnp.tanh(gi[:, 2 * H:] + r * gh[:, 2 * H:])
        h = (1.0 - z) * n + z * h                              # final hidden == rnn(x)[1][-1]
    hh = jnp.dot(h, w_ref[...], preferred_element_type=jnp.float32) + b_ref[...]
    ctx = _batchnorm_relu(hh, bn_ref)
    ctx_ref[...] = ctx
    mpp_ref[...] = jnp.dot(ctx, wm_ref[...], preferred_element_type=jnp.float32) + bm_ref[...]


# --------------------------------------------------------------------------------------
# Kernel B: fused greedy generation loop
#   single decoder layer (emb LN, causal self-attn w/ incremental KV cache, cross-attn
#   contribution, GELU FFN, post-LNs) + LM head + argmax, for all max_length-1 steps.
# --------------------------------------------------------------------------------------
def _make_generate_kernel(L, V, Vp, trg_start_id):
    def kernel(ctx_ref, wemb_ref, pos_ref, ln_ref, hv_ref,
               w_qkv_ref, b_qkv_ref, w_ao_ref, w_cv_ref, w_co_ref,
               w_ff1_ref, b_ff1_ref, w_ff2_ref, w_head_ref, w_voc_ref, b_voc_ref,
               gen_ref, sc_ref, k_cache, v_cache):
        B, H = ctx_ref.shape
        scale = 1.0 / (H ** 0.5)

        # hvec slab rows: [b_attn_out, b_cross_v, b_cross_out, b_ffn_out, b_head, type_emb]
        b_ao = hv_ref[0:1, :]
        b_cv = hv_ref[1:2, :]
        b_co = hv_ref[2:3, :]
        b_ff2 = hv_ref[3:4, :]
        b_head = hv_ref[4:5, :]
        type_emb = hv_ref[5:6, :]

        # Cross-attention to a single context key: softmax over one score == 1.0, so the
        # attended value is just the context's value projection -> constant per batch/step.
        vc = jnp.dot(ctx_ref[...], w_cv_ref[...], preferred_element_type=jnp.float32) + b_cv
        cross_add = jnp.dot(vc, w_co_ref[...], preferred_element_type=jnp.float32) + b_co   # (B, H)

        col_v = jax.lax.broadcasted_iota(jnp.int32, (B, Vp), 1)     # vocab lane index
        pos_j = jax.lax.broadcasted_iota(jnp.int32, (1, L), 1)      # key position index

        # init outputs / caches
        gen_ref[:, 0:1] = jnp.full((B, 1), trg_start_id, jnp.int32)     # start token
        sc_ref[0] = jnp.zeros((B, Vp), jnp.float32)                     # zeros placeholder row
        k_cache[...] = jnp.zeros((B * L, H), jnp.float32)
        v_cache[...] = jnp.zeros((B * L, H), jnp.float32)

        onehot = (col_v == trg_start_id).astype(jnp.float32)            # (B, Vp) current token

        for t in range(1, L):        # static unroll: max_length-1 greedy steps
            # ---- embed the newest token (position t-1) via one-hot matmul (== gather) ----
            x = (jnp.dot(onehot, wemb_ref[...], preferred_element_type=jnp.float32)
                 + pos_ref[t - 1:t, :] + type_emb)                      # (B, H)
            h0 = _ln(x, ln_ref, 0)

            # ---- causal self-attention for the single new row (incremental KV cache) ----
            qkv = jnp.dot(h0, w_qkv_ref[...], preferred_element_type=jnp.float32) + b_qkv_ref[...]
            q, k, v = qkv[:, :H], qkv[:, H:2 * H], qkv[:, 2 * H:]
            rows = []
            for b in range(B):                                          # B is tiny & static
                k_cache[b * L + t - 1: b * L + t, :] = k[b:b + 1, :]
                v_cache[b * L + t - 1: b * L + t, :] = v[b:b + 1, :]
                kb = k_cache[b * L:(b + 1) * L, :]                      # (L, H)
                vb = v_cache[b * L:(b + 1) * L, :]
                s = jnp.dot(q[b:b + 1, :], kb.T,
                            preferred_element_type=jnp.float32) * scale  # (1, L)
                s = jnp.where(pos_j < t, s, jnp.float32(-1e30))           # only first t keys valid
                e = jnp.exp(s - jnp.max(s, axis=-1, keepdims=True))
                w = e * pl.reciprocal(jnp.sum(e, axis=-1, keepdims=True), approx=True)
                rows.append(jnp.dot(w, vb, preferred_element_type=jnp.float32))   # (1, H)
            attn = jnp.concatenate(rows, axis=0)                         # (B, H)

            h1 = _ln(jnp.dot(attn, w_ao_ref[...], preferred_element_type=jnp.float32)
                     + b_ao + h0, ln_ref, 2)
            h2 = _ln(cross_add + h1, ln_ref, 4)

            # ---- feed-forward ----
            ff = jax.nn.gelu(jnp.dot(h2, w_ff1_ref[...], preferred_element_type=jnp.float32)
                             + b_ff1_ref[...], approximate=True)
            ff = jnp.dot(ff, w_ff2_ref[...], preferred_element_type=jnp.float32) + b_ff2
            h3 = _ln(ff + h2, ln_ref, 6)

            # ---- LM prediction head, only for the row actually consumed ----
            tr = jax.nn.gelu(jnp.dot(h3, w_head_ref[...], preferred_element_type=jnp.float32)
                             + b_head, approximate=True)
            tr = _ln(tr, ln_ref, 8)
            logits = jnp.dot(tr, w_voc_ref[...], preferred_element_type=jnp.float32) + b_voc_ref[...]
            logits = jnp.where(col_v < V, logits, jnp.float32(-1e30))    # mask lane padding

            sc_ref[t] = logits                                           # lane-dense (B, Vp) store

            # ---- greedy argmax (first-max tie break), all vector ops ----
            mx = jnp.max(logits, axis=-1, keepdims=True)
            idx = jnp.where(logits >= mx, col_v.astype(jnp.float32), jnp.float32(Vp))
            pred = jnp.min(idx, axis=-1, keepdims=True).astype(jnp.int32)   # (B, 1)
            gen_ref[:, t:t + 1] = pred
            onehot = (col_v == pred).astype(jnp.float32)                 # next-step token
    return kernel


# --------------------------------------------------------------------------------------
# pallas_call wrappers
# --------------------------------------------------------------------------------------
def _vmem_specs(n):
    return [pl.BlockSpec(memory_space=pltpu.MemorySpace.VMEM) for _ in range(n)]


def pool_context_call(emb_t, p):
    # emb_t: (S, B, H)
    _, B, H = emb_t.shape
    args = (emb_t, p["pool_w"], p["pool_b"], p["pool_bn"], p["mpp_w"], p["mpp_b"])
    return pl.pallas_call(
        pool_context_kernel,
        out_shape=(jax.ShapeDtypeStruct((B, H), jnp.float32),
                   jax.ShapeDtypeStruct((B, 5), jnp.float32)),
        in_specs=_vmem_specs(len(args)),
        out_specs=tuple(_vmem_specs(2)),
    )(*args)


def gru_context_call(emb_t, p):
    _, B, H = emb_t.shape
    args = (emb_t, p["gru_wih"], p["gru_whh"], p["gru_bih"], p["gru_bhh"],
            p["gru_w"], p["gru_b"], p["gru_bn"], p["mpp_w"], p["mpp_b"])
    return pl.pallas_call(
        gru_context_kernel,
        out_shape=(jax.ShapeDtypeStruct((B, H), jnp.float32),
                   jax.ShapeDtypeStruct((B, 5), jnp.float32)),
        in_specs=_vmem_specs(len(args)),
        out_specs=tuple(_vmem_specs(2)),
    )(*args)


def generate_call(context, p, *, max_length, vocab, trg_start_id):
    # context: (B, H) -> generated ids (B, L) int32, logits (L, B, Vp) f32
    B, H = context.shape
    L = max_length
    Vp = p["w_vocab"].shape[1]
    args = (context, p["word_emb"], p["pos_emb"], p["ln_slab"], p["hvec_slab"],
            p["w_qkv"], p["b_qkv"], p["w_attn_out"], p["w_cross_v"], p["w_cross_out"],
            p["w_ff1"], p["b_ff1"], p["w_ff2"], p["w_head"], p["w_vocab"], p["b_vocab"])
    return pl.pallas_call(
        _make_generate_kernel(L, vocab, Vp, trg_start_id),
        out_shape=(jax.ShapeDtypeStruct((B, L), jnp.int32),
                   jax.ShapeDtypeStruct((L, B, Vp), jnp.float32)),
        in_specs=_vmem_specs(len(args)),
        out_specs=tuple(_vmem_specs(2)),
        scratch_shapes=[pltpu.VMEM((B * L, H), jnp.float32),   # K cache (per batch, per pos)
                        pltpu.VMEM((B * L, H), jnp.float32)],  # V cache
    )(*args)


# --------------------------------------------------------------------------------------
# Full forward (eval / generation branch of MultiTask_StoryCompletionModel.forward)
# --------------------------------------------------------------------------------------
@partial(jax.jit, static_argnames=("context_encoder", "max_length", "vocab", "trg_start_id"))
def multitask_forward(embeddings, params, *, context_encoder="PoolContextEncoder",
                      max_length=8, vocab=64, trg_start_id=1):
    emb_t = jnp.transpose(embeddings, (1, 0, 2))          # x.transpose(0, 1): (S, B, H)
    if context_encoder == "GRUContextEncoder":
        context, mpp_outputs = gru_context_call(emb_t, params)
    else:
        context, mpp_outputs = pool_context_call(emb_t, params)

    generated, sc_p = generate_call(context, params, max_length=max_length,
                                    vocab=vocab, trg_start_id=trg_start_id)
    # kernel emits (L, B, Vp); reference layout is (B, L, V)
    sc_outputs = jnp.transpose(sc_p, (1, 0, 2))[:, :, :vocab]
    return generated, sc_outputs, mpp_outputs


# --------------------------------------------------------------------------------------
# Deterministic parameter construction (synthetic; shapes follow the module structure,
# stored pre-packed for the kernels: lane-dense vocab padding + LN/bias slabs).
# --------------------------------------------------------------------------------------
def make_params(key, *, hidden=32, ffn=64, vocab=64, max_len=8):
    H, F, V, L = hidden, ffn, vocab, max_len
    Vp = ((V + 127) // 128) * 128                          # lane-dense vocab padding
    keys = iter(jax.random.split(key, 40))

    def nrm(shape, scale=0.02):
        return jax.random.normal(next(keys), shape, jnp.float32) * scale

    def bn_init(h):  # [gamma, beta, running_mean, running_var]
        return jnp.stack([jnp.ones(h, jnp.float32), jnp.zeros(h, jnp.float32),
                          jnp.zeros(h, jnp.float32), jnp.ones(h, jnp.float32)])

    # 5 LayerNorms (emb, post-attn, post-cross, post-ffn, lm-head): rows [g, b] x 5
    ln_slab = jnp.tile(jnp.stack([jnp.ones(H, jnp.float32), jnp.zeros(H, jnp.float32)]), (5, 1))
    # H-wide vector slab: [b_attn_out, b_cross_v, b_cross_out, b_ffn_out, b_head, type_emb]
    hvec_slab = jnp.concatenate([jnp.zeros((5, H), jnp.float32), nrm((1, H))], axis=0)

    word_emb = jnp.zeros((Vp, H), jnp.float32).at[:V].set(nrm((V, H)))
    w_vocab = jnp.zeros((H, Vp), jnp.float32).at[:, :V].set(nrm((H, V)))
    b_vocab = jnp.zeros((1, Vp), jnp.float32)

    return dict(
        # PoolContextEncoder
        pool_w=nrm((H, H), 0.01), pool_b=jnp.zeros((1, H), jnp.float32), pool_bn=bn_init(H),
        # GRUContextEncoder
        gru_wih=nrm((H, 3 * H)), gru_whh=nrm((H, 3 * H)),
        gru_bih=jnp.zeros((1, 3 * H), jnp.float32), gru_bhh=jnp.zeros((1, 3 * H), jnp.float32),
        gru_w=nrm((H, H), 0.01), gru_b=jnp.zeros((1, H), jnp.float32), gru_bn=bn_init(H),
        # mpp classifier
        mpp_w=nrm((H, 5)), mpp_b=jnp.zeros((1, 5), jnp.float32),
        # decoder embeddings (word rows padded to Vp) + packed LN / bias slabs
        word_emb=word_emb, pos_emb=nrm((L, H)), ln_slab=ln_slab, hvec_slab=hvec_slab,
        # decoder layer weights
        w_qkv=nrm((H, 3 * H)), b_qkv=jnp.zeros((1, 3 * H), jnp.float32),
        w_attn_out=nrm((H, H)),
        w_cross_v=nrm((H, H)),        # value half of cross-attn KV proj (q/k projections are inert)
        w_cross_out=nrm((H, H)),
        w_ff1=nrm((H, F)), b_ff1=jnp.zeros((1, F), jnp.float32),
        w_ff2=nrm((F, H)),
        # LM head (vocab padded to Vp lanes)
        w_head=nrm((H, H)), w_vocab=w_vocab, b_vocab=b_vocab,
    )


# --------------------------------------------------------------------------------------
if __name__ == "__main__":
    B, S, H, V, L = 2, 4, 32, 64, 8        # batch, 4 sentences per story, hidden, vocab, max_length

    root = jax.random.PRNGKey(0)
    k_params, k_emb = jax.random.split(root)
    params = make_params(k_params, hidden=H, ffn=2 * H, vocab=V, max_len=L)

    # Stand-in for the SBERT sentence embeddings of the 4 story sentences per example.
    embeddings = jax.random.normal(k_emb, (B, S, H), jnp.float32)

    gen, sc, mpp = multitask_forward(embeddings, params,
                                     context_encoder="PoolContextEncoder",
                                     max_length=L, vocab=V, trg_start_id=1)
    jax.block_until_ready((gen, sc, mpp))
    assert gen.shape == (B, L) and sc.shape == (B, L, V) and mpp.shape == (B, 5)

    gen_g, sc_g, mpp_g = multitask_forward(embeddings, params,
                                           context_encoder="GRUContextEncoder",
                                           max_length=L, vocab=V, trg_start_id=1)
    jax.block_until_ready((gen_g, sc_g, mpp_g))
    assert gen_g.shape == (B, L) and sc_g.shape == (B, L, V) and mpp_g.shape == (B, 5)

    print("KERNEL_OK")
</pallas_src>

<mosaic_0001>
module attributes {stable_mosaic.version = 11 : i64} {
  func.func @pool_context_kernel(%arg0: memref<4x2x32xf32, #tpu.memory_space<vmem>>, %arg1: memref<32x32xf32, #tpu.memory_space<vmem>>, %arg2: memref<1x32xf32, #tpu.memory_space<vmem>>, %arg3: memref<4x32xf32, #tpu.memory_space<vmem>>, %arg4: memref<32x5xf32, #tpu.memory_space<vmem>>, %arg5: memref<1x5xf32, #tpu.memory_space<vmem>>, %arg6: memref<2x32xf32, #tpu.memory_space<vmem>>, %arg7: memref<2x5xf32, #tpu.memory_space<vmem>>) attributes {dimension_semantics = [], scalar_prefetch = 0 : i64, scratch_operands = 0 : i64, tpu.core_type = #tpu.core_type<tc>} {
    %c0 = arith.constant 0 : index
    %c0_0 = arith.constant 0 : index
    %c0_1 = arith.constant 0 : index
    %0 = vector.load %arg0[%c0, %c0_0, %c0_1] : memref<4x2x32xf32, #tpu.memory_space<vmem>>, vector<1x2x32xf32>
    %1 = vector.shape_cast %0 : vector<1x2x32xf32> to vector<2x32xf32>
    %c1 = arith.constant 1 : index
    %c0_2 = arith.constant 0 : index
    %c0_3 = arith.constant 0 : index
    %2 = vector.load %arg0[%c1, %c0_2, %c0_3] : memref<4x2x32xf32, #tpu.memory_space<vmem>>, vector<1x2x32xf32>
    %3 = vector.shape_cast %2 : vector<1x2x32xf32> to vector<2x32xf32>
    %4 = arith.maximumf %1, %3 : vector<2x32xf32>
    %c2 = arith.constant 2 : index
    %c0_4 = arith.constant 0 : index
    %c0_5 = arith.constant 0 : index
    %5 = vector.load %arg0[%c2, %c0_4, %c0_5] : memref<4x2x32xf32, #tpu.memory_space<vmem>>, vector<1x2x32xf32>
    %6 = vector.shape_cast %5 : vector<1x2x32xf32> to vector<2x32xf32>
    %7 = arith.maximumf %4, %6 : vector<2x32xf32>
    %c3 = arith.constant 3 : index
    %c0_6 = arith.constant 0 : index
    %c0_7 = arith.constant 0 : index
    %8 = vector.load %arg0[%c3, %c0_6, %c0_7] : memref<4x2x32xf32, #tpu.memory_space<vmem>>, vector<1x2x32xf32>
    %9 = vector.shape_cast %8 : vector<1x2x32xf32> to vector<2x32xf32>
    %10 = arith.maximumf %7, %9 : vector<2x32xf32>
    %c0_8 = arith.constant 0 : index
    %c0_9 = arith.constant 0 : index
    %11 = vector.load %arg1[%c0_8, %c0_9] : memref<32x32xf32, #tpu.memory_space<vmem>>, vector<32x32xf32>
    %cst = arith.constant dense<0.000000e+00> : vector<2x32xf32>
    %12 = tpu.matmul %10, %11, %cst {dimension_numbers = #tpu.dot_dimension_numbers<[1], [0], [0], [1], [0, 0, 1, 1], [], []>} : vector<2x32xf32>, vector<32x32xf32>, vector<2x32xf32> -> vector<2x32xf32>
    %c0_10 = arith.constant 0 : index
    %c0_11 = arith.constant 0 : index
    %13 = vector.load %arg2[%c0_10, %c0_11] : memref<1x32xf32, #tpu.memory_space<vmem>>, vector<1x32xf32>
    %14 = vector.broadcast %13 : vector<1x32xf32> to vector<2x32xf32>
    %15 = arith.addf %12, %14 : vector<2x32xf32>
    %c0_12 = arith.constant 0 : index
    %c0_13 = arith.constant 0 : index
    %16 = vector.load %arg3[%c0_12, %c0_13] : memref<4x32xf32, #tpu.memory_space<vmem>>, vector<1x32xf32>
    %c1_14 = arith.constant 1 : index
    %c0_15 = arith.constant 0 : index
    %17 = vector.load %arg3[%c1_14, %c0_15] : memref<4x32xf32, #tpu.memory_space<vmem>>, vector<1x32xf32>
    %c2_16 = arith.constant 2 : index
    %c0_17 = arith.constant 0 : index
    %18 = vector.load %arg3[%c2_16, %c0_17] : memref<4x32xf32, #tpu.memory_space<vmem>>, vector<1x32xf32>
    %c3_18 = arith.constant 3 : index
    %c0_19 = arith.constant 0 : index
    %19 = vector.load %arg3[%c3_18, %c0_19] : memref<4x32xf32, #tpu.memory_space<vmem>>, vector<1x32xf32>
    %20 = vector.broadcast %18 : vector<1x32xf32> to vector<2x32xf32>
    %21 = arith.subf %15, %20 : vector<2x32xf32>
    %cst_20 = arith.constant 9.99999974E-6 : f32
    %22 = vector.broadcast %cst_20 : f32 to vector<1x32xf32>
    %23 = arith.addf %19, %22 : vector<1x32xf32>
    %24 = math.rsqrt %23 : vector<1x32xf32>
    %25 = vector.broadcast %24 : vector<1x32xf32> to vector<2x32xf32>
    %26 = arith.mulf %21, %25 : vector<2x32xf32>
    %27 = vector.broadcast %16 : vector<1x32xf32> to vector<2x32xf32>
    %28 = arith.mulf %26, %27 : vector<2x32xf32>
    %29 = vector.broadcast %17 : vector<1x32xf32> to vector<2x32xf32>
    %30 = arith.addf %28, %29 : vector<2x32xf32>
    %cst_21 = arith.constant 0.000000e+00 : f32
    %31 = vector.broadcast %cst_21 : f32 to vector<2x32xf32>
    %32 = arith.maximumf %30, %31 : vector<2x32xf32>
    %c0_22 = arith.constant 0 : index
    %c0_23 = arith.constant 0 : index
    %33 = vector.load %arg6[%c0_22, %c0_23] : memref<2x32xf32, #tpu.memory_space<vmem>>, vector<2x32xf32>
    tpu.vector_store %arg6[%c0_22, %c0_23], %32 {strides = array<i32>} : memref<2x32xf32, #tpu.memory_space<vmem>>, vector<2x32xf32>,
    %c0_24 = arith.constant 0 : index
    %c0_25 = arith.constant 0 : index
    %34 = vector.load %arg4[%c0_24, %c0_25] : memref<32x5xf32, #tpu.memory_space<vmem>>, vector<32x5xf32>
    %cst_26 = arith.constant dense<0.000000e+00> : vector<2x5xf32>
    %35 = tpu.matmul %32, %34, %cst_26 {dimension_numbers = #tpu.dot_dimension_numbers<[1], [0], [0], [1], [0, 0, 1, 1], [], []>} : vector<2x32xf32>, vector<32x5xf32>, vector<2x5xf32> -> vector<2x5xf32>
    %c0_27 = arith.constant 0 : index
    %c0_28 = arith.constant 0 : index
    %36 = vector.load %arg5[%c0_27, %c0_28] : memref<1x5xf32, #tpu.memory_space<vmem>>, vector<1x5xf32>
    %37 = vector.broadcast %36 : vector<1x5xf32> to vector<2x5xf32>
    %38 = arith.addf %35, %37 : vector<2x5xf32>
    %c0_29 = arith.constant 0 : index
    %c0_30 = arith.constant 0 : index
    %39 = vector.load %arg7[%c0_29, %c0_30] : memref<2x5xf32, #tpu.memory_space<vmem>>, vector<2x5xf32>
    tpu.vector_store %arg7[%c0_29, %c0_30], %38 {strides = array<i32>} : memref<2x5xf32, #tpu.memory_space<vmem>>, vector<2x5xf32>,
    return
  }
}

module attributes {stable_mosaic.version = 11 : i64} {
  func.func @kernel(%arg0: memref<2x32xf32, #tpu.memory_space<vmem>>, %arg1: memref<128x32xf32, #tpu.memory_space<vmem>>, %arg2: memref<8x32xf32, #tpu.memory_space<vmem>>, %arg3: memref<10x32xf32, #tpu.memory_space<vmem>>, %arg4: memref<6x32xf32, #tpu.memory_space<vmem>>, %arg5: memref<32x96xf32, #tpu.memory_space<vmem>>, %arg6: memref<1x96xf32, #tpu.memory_space<vmem>>, %arg7: memref<32x32xf32, #tpu.memory_space<vmem>>, %arg8: memref<32x32xf32, #tpu.memory_space<vmem>>, %arg9: memref<32x32xf32, #tpu.memory_space<vmem>>, %arg10: memref<32x64xf32, #tpu.memory_space<vmem>>, %arg11: memref<1x64xf32, #tpu.memory_space<vmem>>, %arg12: memref<64x32xf32, #tpu.memory_space<vmem>>, %arg13: memref<32x32xf32, #tpu.memory_space<vmem>>, %arg14: memref<32x128xf32, #tpu.memory_space<vmem>>, %arg15: memref<1x128xf32, #tpu.memory_space<vmem>>, %arg16: memref<2x8xi32, #tpu.memory_space<vmem>>, %arg17: memref<8x2x128xf32, #tpu.memory_space<vmem>>, %arg18: memref<16x32xf32, #tpu.memory_space<vmem>>, %arg19: memref<16x32xf32, #tpu.memory_space<vmem>>) attributes {dimension_semantics = [], scalar_prefetch = 0 : i64, scratch_operands = 2 : i64, tpu.core_type = #tpu.core_type<tc>} {
    %c0 = arith.constant 0 : index
    %c0_0 = arith.constant 0 : index
    %0 = vector.load %arg4[%c0, %c0_0] : memref<6x32xf32, #tpu.memory_space<vmem>>, vector<1x32xf32>
    %c1 = arith.constant 1 : index
    %c0_1 = arith.constant 0 : index
    %1 = vector.load %arg4[%c1, %c0_1] : memref<6x32xf32, #tpu.memory_space<vmem>>, vector<1x32xf32>
    %c2 = arith.constant 2 : index
    %c0_2 = arith.constant 0 : index
    %2 = vector.load %arg4[%c2, %c0_2] : memref<6x32xf32, #tpu.memory_space<vmem>>, vector<1x32xf32>
    %c3 = arith.constant 3 : index
    %c0_3 = arith.constant 0 : index
    %3 = vector.load %arg4[%c3, %c0_3] : memref<6x32xf32, #tpu.memory_space<vmem>>, vector<1x32xf32>
    %c4 = arith.constant 4 : index
    %c0_4 = arith.constant 0 : index
    %4 = vector.load %arg4[%c4, %c0_4] : memref<6x32xf32, #tpu.memory_space<vmem>>, vector<1x32xf32>
    %c5 = arith.constant 5 : index
    %c0_5 = arith.constant 0 : index
    %5 = vector.load %arg4[%c5, %c0_5] : memref<6x32xf32, #tpu.memory_space<vmem>>, vector<1x32xf32>
    %c0_6 = arith.constant 0 : index
    %c0_7 = arith.constant 0 : index
    %6 = vector.load %arg0[%c0_6, %c0_7] : memref<2x32xf32, #tpu.memory_space<vmem>>, vector<2x32xf32>
    %c0_8 = arith.constant 0 : index
    %c0_9 = arith.constant 0 : index
    %7 = vector.load %arg8[%c0_8, %c0_9] : memref<32x32xf32, #tpu.memory_space<vmem>>, vector<32x32xf32>
    %cst = arith.constant dense<0.000000e+00> : vector<2x32xf32>
    %8 = tpu.matmul %6, %7, %cst {dimension_numbers = #tpu.dot_dimension_numbers<[1], [0], [0], [1], [0, 0, 1, 1], [], []>} : vector<2x32xf32>, vector<32x32xf32>, vector<2x32xf32> -> vector<2x32xf32>
    %9 = vector.broadcast %1 : vector<1x32xf32> to vector<2x32xf32>
    %10 = arith.addf %8, %9 : vector<2x32xf32>
    %c0_10 = arith.constant 0 : index
    %c0_11 = arith.constant 0 : index
    %11 = vector.load %arg9[%c0_10, %c0_11] : memref<32x32xf32, #tpu.memory_space<vmem>>, vector<32x32xf32>
    %cst_12 = arith.constant dense<0.000000e+00> : vector<2x32xf32>
    %12 = tpu.matmul %10, %11, %cst_12 {dimension_numbers = #tpu.dot_dimension_numbers<[1], [0], [0], [1], [0, 0, 1, 1], [], []>} : vector<2x32xf32>, vector<32x32xf32>, vector<2x32xf32> -> vector<2x32xf32>
    %13 = vector.broadcast %2 : vector<1x32xf32> to vector<2x32xf32>
    %14 = arith.addf %12, %13 : vector<2x32xf32>
    %15 = tpu.iota {dimensions = array<i32: 1>} : vector<2x128xi32>
    %16 = tpu.iota {dimensions = array<i32: 1>} : vector<1x8xi32>
    %c1_i32 = arith.constant 1 : i32
    %17 = vector.broadcast %c1_i32 : i32 to vector<2x1xi32>
    %c0_13 = arith.constant 0 : index
    %c0_14 = arith.constant 0 : index
    %18 = vector.load %arg16[%c0_13, %c0_14] : memref<2x8xi32, #tpu.memory_space<vmem>>, vector<2x1xi32>
    tpu.vector_store %arg16[%c0_13, %c0_14], %17 {strides = array<i32>} : memref<2x8xi32, #tpu.memory_space<vmem>>, vector<2x1xi32>,
    %cst_15 = arith.constant 0.000000e+00 : f32
    %19 = vector.broadcast %cst_15 : f32 to vector<2x128xf32>
    %c0_16 = arith.constant 0 : index
    %c0_17 = arith.constant 0 : index
    %c0_18 = arith.constant 0 : index
    %20 = vector.load %arg17[%c0_16, %c0_17, %c0_18] : memref<8x2x128xf32, #tpu.memory_space<vmem>>, vector<1x2x128xf32>
    %21 = vector.shape_cast %20 : vector<1x2x128xf32> to vector<2x128xf32>
    %22 = vector.shape_cast %19 : vector<2x128xf32> to vector<1x2x128xf32>
    tpu.vector_store %arg17[%c0_16, %c0_17, %c0_18], %22 {strides = array<i32>} : memref<8x2x128xf32, #tpu.memory_space<vmem>>, vector<1x2x128xf32>,
    %cst_19 = arith.constant 0.000000e+00 : f32
    %23 = vector.broadcast %cst_19 : f32 to vector<16x32xf32>
    %c0_20 = arith.constant 0 : index
    %c0_21 = arith.constant 0 : index
    %24 = vector.load %arg18[%c0_20, %c0_21] : memref<16x32xf32, #tpu.memory_space<vmem>>, vector<16x32xf32>
    tpu.vector_store %arg18[%c0_20, %c0_21], %23 {strides = array<i32>} : memref<16x32xf32, #tpu.memory_space<vmem>>, vector<16x32xf32>,
    %cst_22 = arith.constant 0.000000e+00 : f32
    %25 = vector.broadcast %cst_22 : f32 to vector<16x32xf32>
    %c0_23 = arith.constant 0 : index
    %c0_24 = arith.constant 0 : index
    %26 = vector.load %arg19[%c0_23, %c0_24] : memref<16x32xf32, #tpu.memory_space<vmem>>, vector<16x32xf32>
    tpu.vector_store %arg19[%c0_23, %c0_24], %25 {strides = array<i32>} : memref<16x32xf32, #tpu.memory_space<vmem>>, vector<16x32xf32>,
    %c1_i32_25 = arith.constant 1 : i32
    %27 = vector.broadcast %c1_i32_25 : i32 to vector<2x128xi32>
    %28 = arith.cmpi eq, %15, %27 : vector<2x128xi32>
    %29 = arith.extui %28 : vector<2x128xi1> to vector<2x128xi32>
    %30 = arith.sitofp %29 : vector<2x128xi32> to vector<2x128xf32>
    %c0_26 = arith.constant 0 : index
    %c0_27 = arith.constant 0 : index
    %31 = vector.load %arg1[%c0_26, %c0_27] : memref<128x32xf32, #tpu.memory_space<vmem>>, vector<128x32xf32>
    %cst_28 = arith.constant dense<0.000000e+00> : vector<2x32xf32>
    %32 = tpu.matmul %30, %31, %cst_28 {dimension_numbers = #tpu.dot_dimension_numbers<[1], [0], [0], [1], [0, 0, 1, 1], [], []>} : vector<2x128xf32>, vector<128x32xf32>, vector<2x32xf32> -> vector<2x32xf32>
    %c0_29 = arith.constant 0 : index
    %c0_30 = arith.constant 0 : index
    %33 = vector.load %arg2[%c0_29, %c0_30] : memref<8x32xf32, #tpu.memory_space<vmem>>, vector<1x32xf32>
    %34 = vector.broadcast %33 : vector<1x32xf32> to vector<2x32xf32>
    %35 = arith.addf %32, %34 : vector<2x32xf32>
    %36 = vector.broadcast %5 : vector<1x32xf32> to vector<2x32xf32>
    %37 = arith.addf %35, %36 : vector<2x32xf32>
    %c0_31 = arith.constant 0 : index
    %c0_32 = arith.constant 0 : index
    %38 = vector.load %arg3[%c0_31, %c0_32] : memref<10x32xf32, #tpu.memory_space<vmem>>, vector<1x32xf32>
    %c1_33 = arith.constant 1 : index
    %c0_34 = arith.constant 0 : index
    %39 = vector.load %arg3[%c1_33, %c0_34] : memref<10x32xf32, #tpu.memory_space<vmem>>, vector<1x32xf32>
    %cst_35 = arith.constant dense<0.000000e+00> : vector<2xf32>
    %40 = vector.multi_reduction <add>, %37, %cst_35 [1] : vector<2x32xf32> to vector<2xf32>
    %41 = vector.shape_cast %40 : vector<2xf32> to vector<2x1xf32>
    %cst_36 = arith.constant 3.200000e+01 : f32
    %42 = vector.broadcast %cst_36 : f32 to vector<2x1xf32>
    %43 = arith.divf %41, %42 : vector<2x1xf32>
    %44 = vector.broadcast %43 : vector<2x1xf32> to vector<2x32xf32>
    %45 = arith.subf %37, %44 : vector<2x32xf32>
    %46 = arith.mulf %45, %45 : vector<2x32xf32>
    %cst_37 = arith.constant dense<0.000000e+00> : vector<2xf32>
    %47 = vector.multi_reduction <add>, %46, %cst_37 [1] : vector<2x32xf32> to vector<2xf32>
    %48 = vector.shape_cast %47 : vector<2xf32> to vector<2x1xf32>
    %cst_38 = arith.constant 3.200000e+01 : f32
    %49 = vector.broadcast %cst_38 : f32 to vector<2x1xf32>
    %50 = arith.divf %48, %49 : vector<2x1xf32>
    %51 = vector.broadcast %43 : vector<2x1xf32> to vector<2x32xf32>
    %52 = arith.subf %37, %51 : vector<2x32xf32>
    %cst_39 = arith.constant 9.99999996E-13 : f32
    %53 = vector.broadcast %cst_39 : f32 to vector<2x1xf32>
    %54 = arith.addf %50, %53 : vector<2x1xf32>
    %55 = math.rsqrt %54 : vector<2x1xf32>
    %56 = vector.broadcast %55 : vector<2x1xf32> to vector<2x32xf32>
    %57 = arith.mulf %52, %56 : vector<2x32xf32>
    %58 = vector.broadcast %38 : vector<1x32xf32> to vector<2x32xf32>
    %59 = arith.mulf %57, %58 : vector<2x32xf32>
    %60 = vector.broadcast %39 : vector<1x32xf32> to vector<2x32xf32>
    %61 = arith.addf %59, %60 : vector<2x32xf32>
    %c0_40 = arith.constant 0 : index
    %c0_41 = arith.constant 0 : index
    %62 = vector.load %arg5[%c0_40, %c0_41] : memref<32x96xf32, #tpu.memory_space<vmem>>, vector<32x96xf32>
    %cst_42 = arith.constant dense<0.000000e+00> : vector<2x96xf32>
    %63 = tpu.matmul %61, %62, %cst_42 {dimension_numbers = #tpu.dot_dimension_numbers<[1], [0], [0], [1], [0, 0, 1, 1], [], []>} : vector<2x32xf32>, vector<32x96xf32>, vector<2x96xf32> -> vector<2x96xf32>
    %c0_43 = arith.constant 0 : index
    %c0_44 = arith.constant 0 : index
    %64 = vector.load %arg6[%c0_43, %c0_44] : memref<1x96xf32, #tpu.memory_space<vmem>>, vector<1x96xf32>
    %65 = vector.broadcast %64 : vector<1x96xf32> to vector<2x96xf32>
    %66 = arith.addf %63, %65 : vector<2x96xf32>
    %67 = vector.extract_strided_slice %66 {offsets = [0, 0], sizes = [2, 32], strides = [1, 1]} : vector<2x96xf32> to vector<2x32xf32>
    %68 = vector.extract_strided_slice %66 {offsets = [0, 32], sizes = [2, 32], strides = [1, 1]} : vector<2x96xf32> to vector<2x32xf32>
    %69 = vector.extract_strided_slice %66 {offsets = [0, 64], sizes = [2, 32], strides = [1, 1]} : vector<2x96xf32> to vector<2x32xf32>
    %70 = vector.extract_strided_slice %68 {offsets = [0, 0], sizes = [1, 32], strides = [1, 1]} : vector<2x32xf32> to vector<1x32xf32>
    %c0_45 = arith.constant 0 : index
    %c0_46 = arith.constant 0 : index
    %71 = vector.load %arg18[%c0_45, %c0_46] : memref<16x32xf32, #tpu.memory_space<vmem>>, vector<1x32xf32>
    tpu.vector_store %arg18[%c0_45, %c0_46], %70 {strides = array<i32>} : memref<16x32xf32, #tpu.memory_space<vmem>>, vector<1x32xf32>,
    %72 = vector.extract_strided_slice %69 {offsets = [0, 0], sizes = [1, 32], strides = [1, 1]} : vector<2x32xf32> to vector<1x32xf32>
    %c0_47 = arith.constant 0 : index
    %c0_48 = arith.constant 0 : index
    %73 = vector.load %arg19[%c0_47, %c0_48] : memref<16x32xf32, #tpu.memory_space<vmem>>, vector<1x32xf32>
    tpu.vector_store %arg19[%c0_47, %c0_48], %72 {strides = array<i32>} : memref<16x32xf32, #tpu.memory_space<vmem>>, vector<1x32xf32>,
    %c0_49 = arith.constant 0 : index
    %c0_50 = arith.constant 0 : index
    %74 = vector.load %arg18[%c0_49, %c0_50] : memref<16x32xf32, #tpu.memory_space<vmem>>, vector<8x32xf32>
    %c0_51 = arith.constant 0 : index
    %c0_52 = arith.constant 0 : index
    %75 = vector.load %arg19[%c0_51, %c0_52] : memref<16x32xf32, #tpu.memory_space<vmem>>, vector<8x32xf32>
    %76 = vector.extract_strided_slice %67 {offsets = [0, 0], sizes = [1, 32], strides = [1, 1]} : vector<2x32xf32> to vector<1x32xf32>
    %77 = tpu.transpose %74, [1, 0] : vector<8x32xf32> -> vector<32x8xf32>
    %cst_53 = arith.constant dense<0.000000e+00> : vector<1x8xf32>
    %78 = tpu.matmul %76, %77, %cst_53 {dimension_numbers = #tpu.dot_dimension_numbers<[1], [0], [0], [1], [0, 0, 1, 1], [], []>} : vector<1x32xf32>, vector<32x8xf32>, vector<1x8xf32> -> vector<1x8xf32>
    %cst_54 = arith.constant 0.176776692 : f32
    %79 = vector.broadcast %cst_54 : f32 to vector<1x8xf32>
    %80 = arith.mulf %78, %79 : vector<1x8xf32>
    %c1_i32_55 = arith.constant 1 : i32
    %81 = vector.broadcast %c1_i32_55 : i32 to vector<1x8xi32>
    %82 = arith.cmpi slt, %16, %81 : vector<1x8xi32>
    %cst_56 = arith.constant -1.000000e+30 : f32
    %83 = vector.broadcast %cst_56 : f32 to vector<1x8xf32>
    %84 = arith.select %82, %80, %83 : vector<1x8xi1>, vector<1x8xf32>
    %cst_57 = arith.constant dense<0xFF800000> : vector<1xf32>
    %85 = vector.multi_reduction <maximumf>, %84, %cst_57 [1] : vector<1x8xf32> to vector<1xf32>
    %86 = vector.shape_cast %85 : vector<1xf32> to vector<1x1xf32>
    %87 = vector.broadcast %86 : vector<1x1xf32> to vector<1x8xf32>
    %88 = arith.subf %84, %87 : vector<1x8xf32>
    %89 = math.exp %88 : vector<1x8xf32>
    %cst_58 = arith.constant dense<0.000000e+00> : vector<1xf32>
    %90 = vector.multi_reduction <add>, %89, %cst_58 [1] : vector<1x8xf32> to vector<1xf32>
    %91 = vector.shape_cast %90 : vector<1xf32> to vector<1x1xf32>
    %92 = tpu.reciprocal %91 {approx = true} : vector<1x1xf32> -> vector<1x1xf32>
    %93 = vector.broadcast %92 : vector<1x1xf32> to vector<1x8xf32>
    %94 = arith.mulf %89, %93 : vector<1x8xf32>
    %cst_59 = arith.constant dense<0.000000e+00> : vector<1x32xf32>
    %95 = tpu.matmul %94, %75, %cst_59 {dimension_numbers = #tpu.dot_dimension_numbers<[1], [0], [0], [1], [0, 0, 1, 1], [], []>} : vector<1x8xf32>, vector<8x32xf32>, vector<1x32xf32> -> vector<1x32xf32>
    %96 = vector.extract_strided_slice %68 {offsets = [1, 0], sizes = [1, 32], strides = [1, 1]} : vector<2x32xf32> to vector<1x32xf32>
    %c8 = arith.constant 8 : index
    %c0_60 = arith.constant 0 : index
    %97 = vector.load %arg18[%c8, %c0_60] : memref<16x32xf32, #tpu.memory_space<vmem>>, vector<1x32xf32>
    tpu.vector_store %arg18[%c8, %c0_60], %96 {strides = array<i32>} : memref<16x32xf32, #tpu.memory_space<vmem>>, vector<1x32xf32>,
    %98 = vector.extract_strided_slice %69 {offsets = [1, 0], sizes = [1, 32], strides = [1, 1]} : vector<2x32xf32> to vector<1x32xf32>
    %c8_61 = arith.constant 8 : index
    %c0_62 = arith.constant 0 : index
    %99 = vector.load %arg19[%c8_61, %c0_62] : memref<16x32xf32, #tpu.memory_space<vmem>>, vector<1x32xf32>
    tpu.vector_store %arg19[%c8_61, %c0_62], %98 {strides = array<i32>} : memref<16x32xf32, #tpu.memory_space<vmem>>, vector<1x32xf32>,
    %c8_63 = arith.constant 8 : index
    %c0_64 = arith.constant 0 : index
    %100 = vector.load %arg18[%c8_63, %c0_64] : memref<16x32xf32, #tpu.memory_space<vmem>>, vector<8x32xf32>
    %c8_65 = arith.constant 8 : index
    %c0_66 = arith.constant 0 : index
    %101 = vector.load %arg19[%c8_65, %c0_66] : memref<16x32xf32, #tpu.memory_space<vmem>>, vector<8x32xf32>
    %102 = vector.extract_strided_slice %67 {offsets = [1, 0], sizes = [1, 32], strides = [1, 1]} : vector<2x32xf32> to vector<1x32xf32>
    %103 = tpu.transpose %100, [1, 0] : vector<8x32xf32> -> vector<32x8xf32>
    %cst_67 = arith.constant dense<0.000000e+00> : vector<1x8xf32>
    %104 = tpu.matmul %102, %103, %cst_67 {dimension_numbers = #tpu.dot_dimension_numbers<[1], [0], [0], [1], [0, 0, 1, 1], [], []>} : vector<1x32xf32>, vector<32x8xf32>, vector<1x8xf32> -> vector<1x8xf32>
    %cst_68 = arith.constant 0.176776692 : f32
    %105 = vector.broadcast %cst_68 : f32 to vector<1x8xf32>
    %106 = arith.mulf %104, %105 : vector<1x8xf32>
    %c1_i32_69 = arith.constant 1 : i32
    %107 = vector.broadcast %c1_i32_69 : i32 to vector<1x8xi32>
    %108 = arith.cmpi slt, %16, %107 : vector<1x8xi32>
    %cst_70 = arith.constant -1.000000e+30 : f32
    %109 = vector.broadcast %cst_70 : f32 to vector<1x8xf32>
    %110 = arith.select %108, %106, %109 : vector<1x8xi1>, vector<1x8xf32>
    %cst_71 = arith.constant dense<0xFF800000> : vector<1xf32>
    %111 = vector.multi_reduction <maximumf>, %110, %cst_71 [1] : vector<1x8xf32> to vector<1xf32>
    %112 = vector.shape_cast %111 : vector<1xf32> to vector<1x1xf32>
    %113 = vector.broadcast %112 : vector<1x1xf32> to vector<1x8xf32>
    %114 = arith.subf %110, %113 : vector<1x8xf32>
    %115 = math.exp %114 : vector<1x8xf32>
    %cst_72 = arith.constant dense<0.000000e+00> : vector<1xf32>
    %116 = vector.multi_reduction <add>, %115, %cst_72 [1] : vector<1x8xf32> to vector<1xf32>
    %117 = vector.shape_cast %116 : vector<1xf32> to vector<1x1xf32>
    %118 = tpu.reciprocal %117 {approx = true} : vector<1x1xf32> -> vector<1x1xf32>
    %119 = vector.broadcast %118 : vector<1x1xf32> to vector<1x8xf32>
    %120 = arith.mulf %115, %119 : vector<1x8xf32>
    %cst_73 = arith.constant dense<0.000000e+00> : vector<1x32xf32>
    %121 = tpu.matmul %120, %101, %cst_73 {dimension_numbers = #tpu.dot_dimension_numbers<[1], [0], [0], [1], [0, 0, 1, 1], [], []>} : vector<1x8xf32>, vector<8x32xf32>, vector<1x32xf32> -> vector<1x32xf32>
    %122 = tpu.concatenate %95, %121 in 0 : vector<1x32xf32>, vector<1x32xf32> -> vector<2x32xf32>
    %c0_74 = arith.constant 0 : index
    %c0_75 = arith.constant 0 : index
    %123 = vector.load %arg7[%c0_74, %c0_75] : memref<32x32xf32, #tpu.memory_space<vmem>>, vector<32x32xf32>
    %cst_76 = arith.constant dense<0.000000e+00> : vector<2x32xf32>
    %124 = tpu.matmul %122, %123, %cst_76 {dimension_numbers = #tpu.dot_dimension_numbers<[1], [0], [0], [1], [0, 0, 1, 1], [], []>} : vector<2x32xf32>, vector<32x32xf32>, vector<2x32xf32> -> vector<2x32xf32>
    %125 = vector.broadcast %0 : vector<1x32xf32> to vector<2x32xf32>
    %126 = arith.addf %124, %125 : vector<2x32xf32>
    %127 = arith.addf %126, %61 : vector<2x32xf32>
    %c2_77 = arith.constant 2 : index
    %c0_78 = arith.constant 0 : index
    %128 = vector.load %arg3[%c2_77, %c0_78] : memref<10x32xf32, #tpu.memory_space<vmem>>, vector<1x32xf32>
    %c3_79 = arith.constant 3 : index
    %c0_80 = arith.constant 0 : index
    %129 = vector.load %arg3[%c3_79, %c0_80] : memref<10x32xf32, #tpu.memory_space<vmem>>, vector<1x32xf32>
    %cst_81 = arith.constant dense<0.000000e+00> : vector<2xf32>
    %130 = vector.multi_reduction <add>, %127, %cst_81 [1] : vector<2x32xf32> to vector<2xf32>
    %131 = vector.shape_cast %130 : vector<2xf32> to vector<2x1xf32>
    %cst_82 = arith.constant 3.200000e+01 : f32
    %132 = vector.broadcast %cst_82 : f32 to vector<2x1xf32>
    %133 = arith.divf %131, %132 : vector<2x1xf32>
    %134 = vector.broadcast %133 : vector<2x1xf32> to vector<2x32xf32>
    %135 = arith.subf %127, %134 : vector<2x32xf32>
    %136 = arith.mulf %135, %135 : vector<2x32xf32>
    %cst_83 = arith.constant dense<0.000000e+00> : vector<2xf32>
    %137 = vector.multi_reduction <add>, %136, %cst_83 [1] : vector<2x32xf32> to vector<2xf32>
    %138 = vector.shape_cast %137 : vector<2xf32> to vector<2x1xf32>
    %cst_84 = arith.constant 3.200000e+01 : f32
    %139 = vector.broadcast %cst_84 : f32 to vector<2x1xf32>
    %140 = arith.divf %138, %139 : vector<2x1xf32>
    %141 = vector.broadcast %133 : vector<2x1xf32> to vector<2x32xf32>
    %142 = arith.subf %127, %141 : vector<2x32xf32>
    %cst_85 = arith.constant 9.99999996E-13 : f32
    %143 = vector.broadcast %cst_85 : f32 to vector<2x1xf32>
    %144 = arith.addf %140, %143 : vector<2x1xf32>
    %145 = math.rsqrt %144 : vector<2x1xf32>
    %146 = vector.broadcast %145 : vector<2x1xf32> to vector<2x32xf32>
    %147 = arith.mulf %142, %146 : vector<2x32xf32>
    %148 = vector.broadcast %128 : vector<1x32xf32> to vector<2x32xf32>
    %149 = arith.mulf %147, %148 : vector<2x32xf32>
    %150 = vector.broadcast %129 : vector<1x32xf32> to vector<2x32xf32>
    %151 = arith.addf %149, %150 : vector<2x32xf32>
    %152 = arith.addf %14, %151 : vector<2x32xf32>
    %c4_86 = arith.constant 4 : index
    %c0_87 = arith.constant 0 : index
    %153 = vector.load %arg3[%c4_86, %c0_87] : memref<10x32xf32, #tpu.memory_space<vmem>>, vector<1x32xf32>
    %c5_88 = arith.constant 5 : index
    %c0_89 = arith.constant 0 : index
    %154 = vector.load %arg3[%c5_88, %c0_89] : memref<10x32xf32, #tpu.memory_space<vmem>>, vector<1x32xf32>
    %cst_90 = arith.constant dense<0.000000e+00> : vector<2xf32>
    %155 = vector.multi_reduction <add>, %152, %cst_90 [1] : vector<2x32xf32> to vector<2xf32>
    %156 = vector.shape_cast %155 : vector<2xf32> to vector<2x1xf32>
    %cst_91 = arith.constant 3.200000e+01 : f32
    %157 = vector.broadcast %cst_91 : f32 to vector<2x1xf32>
    %158 = arith.divf %156, %157 : vector<2x1xf32>
    %159 = vector.broadcast %158 : vector<2x1xf32> to vector<2x32xf32>
    %160 = arith.subf %152, %159 : vector<2x32xf32>
    %161 = arith.mulf %160, %160 : vector<2x32xf32>
    %cst_92 = arith.constant dense<0.000000e+00> : vector<2xf32>
    %162 = vector.multi_reduction <add>, %161, %cst_92 [1] : vector<2x32xf32> to vector<2xf32>
    %163 = vector.shape_cast %162 : vector<2xf32> to vector<2x1xf32>
    %cst_93 = arith.constant 3.200000e+01 : f32
    %164 = vector.broadcast %cst_93 : f32 to vector<2x1xf32>
    %165 = arith.divf %163, %164 : vector<2x1xf32>
    %166 = vector.broadcast %158 : vector<2x1xf32> to vector<2x32xf32>
    %167 = arith.subf %152, %166 : vector<2x32xf32>
    %cst_94 = arith.constant 9.99999996E-13 : f32
    %168 = vector.broadcast %cst_94 : f32 to vector<2x1xf32>
    %169 = arith.addf %165, %168 : vector<2x1xf32>
    %170 = math.rsqrt %169 : vector<2x1xf32>
    %171 = vector.broadcast %170 : vector<2x1xf32> to vector<2x32xf32>
    %172 = arith.mulf %167, %171 : vector<2x32xf32>
    %173 = vector.broadcast %153 : vector<1x32xf32> to vector<2x32xf32>
    %174 = arith.mulf %172, %173 : vector<2x32xf32>
    %175 = vector.broadcast %154 : vector<1x32xf32> to vector<2x32xf32>
    %176 = arith.addf %174, %175 : vector<2x32xf32>
    %c0_95 = arith.constant 0 : index
    %c0_96 = arith.constant 0 : index
    %177 = vector.load %arg10[%c0_95, %c0_96] : memref<32x64xf32, #tpu.memory_space<vmem>>, vector<32x64xf32>
    %cst_97 = arith.constant dense<0.000000e+00> : vector<2x64xf32>
    %178 = tpu.matmul %176, %177, %cst_97 {dimension_numbers = #tpu.dot_dimension_numbers<[1], [0], [0], [1], [0, 0, 1, 1], [], []>} : vector<2x32xf32>, vector<32x64xf32>, vector<2x64xf32> -> vector<2x64xf32>
    %c0_98 = arith.constant 0 : index
    %c0_99 = arith.constant 0 : index
    %179 = vector.load %arg11[%c0_98, %c0_99] : memref<1x64xf32, #tpu.memory_space<vmem>>, vector<1x64xf32>
    %180 = vector.broadcast %179 : vector<1x64xf32> to vector<2x64xf32>
    %181 = arith.addf %178, %180 : vector<2x64xf32>
    %182 = arith.mulf %181, %181 : vector<2x64xf32>
    %183 = arith.mulf %181, %182 : vector<2x64xf32>
    %cst_100 = arith.constant 4.471500e-02 : f32
    %184 = vector.broadcast %cst_100 : f32 to vector<2x64xf32>
    %185 = arith.mulf %184, %183 : vector<2x64xf32>
    %186 = arith.addf %181, %185 : vector<2x64xf32>
    %cst_101 = arith.constant 0.797884583 : f32
    %187 = vector.broadcast %cst_101 : f32 to vector<2x64xf32>
    %188 = arith.mulf %187, %186 : vector<2x64xf32>
    %189 = math.tanh %188 : vector<2x64xf32>
    %cst_102 = arith.constant 1.000000e+00 : f32
    %190 = vector.broadcast %cst_102 : f32 to vector<2x64xf32>
    %191 = arith.addf %190, %189 : vector<2x64xf32>
    %cst_103 = arith.constant 5.000000e-01 : f32
    %192 = vector.broadcast %cst_103 : f32 to vector<2x64xf32>
    %193 = arith.mulf %192, %191 : vector<2x64xf32>
    %194 = arith.mulf %181, %193 : vector<2x64xf32>
    %c0_104 = arith.constant 0 : index
    %c0_105 = arith.constant 0 : index
    %195 = vector.load %arg12[%c0_104, %c0_105] : memref<64x32xf32, #tpu.memory_space<vmem>>, vector<64x32xf32>
    %cst_106 = arith.constant dense<0.000000e+00> : vector<2x32xf32>
    %196 = tpu.matmul %194, %195, %cst_106 {dimension_numbers = #tpu.dot_dimension_numbers<[1], [0], [0], [1], [0, 0, 1, 1], [], []>} : vector<2x64xf32>, vector<64x32xf32>, vector<2x32xf32> -> vector<2x32xf32>
    %197 = vector.broadcast %3 : vector<1x32xf32> to vector<2x32xf32>
    %198 = arith.addf %196, %197 : vector<2x32xf32>
    %199 = arith.addf %198, %176 : vector<2x32xf32>
    %c6 = arith.constant 6 : index
    %c0_107 = arith.constant 0 : index
    %200 = vector.load %arg3[%c6, %c0_107] : memref<10x32xf32, #tpu.memory_space<vmem>>, vector<1x32xf32>
    %c7 = arith.constant 7 : index
    %c0_108 = arith.constant 0 : index
    %201 = vector.load %arg3[%c7, %c0_108] : memref<10x32xf32, #tpu.memory_space<vmem>>, vector<1x32xf32>
    %cst_109 = arith.constant dense<0.000000e+00> : vector<2xf32>
    %202 = vector.multi_reduction <add>, %199, %cst_109 [1] : vector<2x32xf32> to vector<2xf32>
    %203 = vector.shape_cast %202 : vector<2xf32> to vector<2x1xf32>
    %cst_110 = arith.constant 3.200000e+01 : f32
    %204 = vector.broadcast %cst_110 : f32 to vector<2x1xf32>
    %205 = arith.divf %203, %204 : vector<2x1xf32>
    %206 = vector.broadcast %205 : vector<2x1xf32> to vector<2x32xf32>
    %207 = arith.subf %199, %206 : vector<2x32xf32>
    %208 = arith.mulf %207, %207 : vector<2x32xf32>
    %cst_111 = arith.constant dense<0.000000e+00> : vector<2xf32>
    %209 = vector.multi_reduction <add>, %208, %cst_111 [1] : vector<2x32xf32> to vector<2xf32>
    %210 = vector.shape_cast %209 : vector<2xf32> to vector<2x1xf32>
    %cst_112 = arith.constant 3.200000e+01 : f32
    %211 = vector.broadcast %cst_112 : f32 to vector<2x1xf32>
    %212 = arith.divf %210, %211 : vector<2x1xf32>
    %213 = vector.broadcast %205 : vector<2x1xf32> to vector<2x32xf32>
    %214 = arith.subf %199, %213 : vector<2x32xf32>
    %cst_113 = arith.constant 9.99999996E-13 : f32
    %215 = vector.broadcast %cst_113 : f32 to vector<2x1xf32>
    %216 = arith.addf %212, %215 : vector<2x1xf32>
    %217 = math.rsqrt %216 : vector<2x1xf32>
    %218 = vector.broadcast %217 : vector<2x1xf32> to vector<2x32xf32>
    %219 = arith.mulf %214, %218 : vector<2x32xf32>
    %220 = vector.broadcast %200 : vector<1x32xf32> to vector<2x32xf32>
    %221 = arith.mulf %219, %220 : vector<2x32xf32>
    %222 = vector.broadcast %201 : vector<1x32xf32> to vector<2x32xf32>
    %223 = arith.addf %221, %222 : vector<2x32xf32>
    %c0_114 = arith.constant 0 : index
    %c0_115 = arith.constant 0 : index
    %224 = vector.load %arg13[%c0_114, %c0_115] : memref<32x32xf32, #tpu.memory_space<vmem>>, vector<32x32xf32>
    %cst_116 = arith.constant dense<0.000000e+00> : vector<2x32xf32>
    %225 = tpu.matmul %223, %224, %cst_116 {dimension_numbers = #tpu.dot_dimension_numbers<[1], [0], [0], [1], [0, 0, 1, 1], [], []>} : vector<2x32xf32>, vector<32x32xf32>, vector<2x32xf32> -> vector<2x32xf32>
    %226 = vector.broadcast %4 : vector<1x32xf32> to vector<2x32xf32>
    %227 = arith.addf %225, %226 : vector<2x32xf32>
    %228 = arith.mulf %227, %227 : vector<2x32xf32>
    %229 = arith.mulf %227, %228 : vector<2x32xf32>
    %cst_117 = arith.constant 4.471500e-02 : f32
    %230 = vector.broadcast %cst_117 : f32 to vector<2x32xf32>
    %231 = arith.mulf %230, %229 : vector<2x32xf32>
    %232 = arith.addf %227, %231 : vector<2x32xf32>
    %cst_118 = arith.constant 0.797884583 : f32
    %233 = vector.broadcast %cst_118 : f32 to vector<2x32xf32>
    %234 = arith.mulf %233, %232 : vector<2x32xf32>
    %235 = math.tanh %234 : vector<2x32xf32>
    %cst_119 = arith.constant 1.000000e+00 : f32
    %236 = vector.broadcast %cst_119 : f32 to vector<2x32xf32>
    %237 = arith.addf %236, %235 : vector<2x32xf32>
    %cst_120 = arith.constant 5.000000e-01 : f32
    %238 = vector.broadcast %cst_120 : f32 to vector<2x32xf32>
    %239 = arith.mulf %238, %237 : vector<2x32xf32>
    %240 = arith.mulf %227, %239 : vector<2x32xf32>
    %c8_121 = arith.constant 8 : index
    %c0_122 = arith.constant 0 : index
    %241 = vector.load %arg3[%c8_121, %c0_122] : memref<10x32xf32, #tpu.memory_space<vmem>>, vector<1x32xf32>
    %c9 = arith.constant 9 : index
    %c0_123 = arith.constant 0 : index
    %242 = vector.load %arg3[%c9, %c0_123] : memref<10x32xf32, #tpu.memory_space<vmem>>, vector<1x32xf32>
    %cst_124 = arith.constant dense<0.000000e+00> : vector<2xf32>
    %243 = vector.multi_reduction <add>, %240, %cst_124 [1] : vector<2x32xf32> to vector<2xf32>
    %244 = vector.shape_cast %243 : vector<2xf32> to vector<2x1xf32>
    %cst_125 = arith.constant 3.200000e+01 : f32
    %245 = vector.broadcast %cst_125 : f32 to vector<2x1xf32>
    %246 = arith.divf %244, %245 : vector<2x1xf32>
    %247 = vector.broadcast %246 : vector<2x1xf32> to vector<2x32xf32>
    %248 = arith.subf %240, %247 : vector<2x32xf32>
    %249 = arith.mulf %248, %248 : vector<2x32xf32>
    %cst_126 = arith.constant dense<0.000000e+00> : vector<2xf32>
    %250 = vector.multi_reduction <add>, %249, %cst_126 [1] : vector<2x32xf32> to vector<2xf32>
    %251 = vector.shape_cast %250 : vector<2xf32> to vector<2x1xf32>
    %cst_127 = arith.constant 3.200000e+01 : f32
    %252 = vector.broadcast %cst_127 : f32 to vector<2x1xf32>
    %253 = arith.divf %251, %252 : vector<2x1xf32>
    %254 = vector.broadcast %246 : vector<2x1xf32> to vector<2x32xf32>
    %255 = arith.subf %240, %254 : vector<2x32xf32>
    %cst_128 = arith.constant 9.99999996E-13 : f32
    %256 = vector.broadcast %cst_128 : f32 to vector<2x1xf32>
    %257 = arith.addf %253, %256 : vector<2x1xf32>
    %258 = math.rsqrt %257 : vector<2x1xf32>
    %259 = vector.broadcast %258 : vector<2x1xf32> to vector<2x32xf32>
    %260 = arith.mulf %255, %259 : vector<2x32xf32>
    %261 = vector.broadcast %241 : vector<1x32xf32> to vector<2x32xf32>
    %262 = arith.mulf %260, %261 : vector<2x32xf32>
    %263 = vector.broadcast %242 : vector<1x32xf32> to vector<2x32xf32>
    %264 = arith.addf %262, %263 : vector<2x32xf32>
    %c0_129 = arith.constant 0 : index
    %c0_130 = arith.constant 0 : index
    %265 = vector.load %arg14[%c0_129, %c0_130] : memref<32x128xf32, #tpu.memory_space<vmem>>, vector<32x128xf32>
    %cst_131 = arith.constant dense<0.000000e+00> : vector<2x128xf32>
    %266 = tpu.matmul %264, %265, %cst_131 {dimension_numbers = #tpu.dot_dimension_numbers<[1], [0], [0], [1], [0, 0, 1, 1], [], []>} : vector<2x32xf32>, vector<32x128xf32>, vector<2x128xf32> -> vector<2x128xf32>
    %c0_132 = arith.constant 0 : index
    %c0_133 = arith.constant 0 : index
    %267 = vector.load %arg15[%c0_132, %c0_133] : memref<1x128xf32, #tpu.memory_space<vmem>>, vector<1x128xf32>
    %268 = vector.broadcast %267 : vector<1x128xf32> to vector<2x128xf32>
    %269 = arith.addf %266, %268 : vector<2x128xf32>
    %c64_i32 = arith.constant 64 : i32
    %270 = vector.broadcast %c64_i32 : i32 to vector<2x128xi32>
    %271 = arith.cmpi slt, %15, %270 : vector<2x128xi32>
    %cst_134 = arith.constant -1.000000e+30 : f32
    %272 = vector.broadcast %cst_134 : f32 to vector<2x128xf32>
    %273 = arith.select %271, %269, %272 : vector<2x128xi1>, vector<2x128xf32>
    %c1_135 = arith.constant 1 : index
    %c0_136 = arith.constant 0 : index
    %c0_137 = arith.constant 0 : index
    %274 = vector.load %arg17[%c1_135, %c0_136, %c0_137] : memref<8x2x128xf32, #tpu.memory_space<vmem>>, vector<1x2x128xf32>
    %275 = vector.shape_cast %274 : vector<1x2x128xf32> to vector<2x128xf32>
    %276 = vector.shape_cast %273 : vector<2x128xf32> to vector<1x2x128xf32>
    tpu.vector_store %arg17[%c1_135, %c0_136, %c0_137], %276 {strides = array<i32>} : memref<8x2x128xf32, #tpu.memory_space<vmem>>, vector<1x2x128xf32>,
    %cst_138 = arith.constant dense<0xFF800000> : vector<2xf32>
    %277 = vector.multi_reduction <maximumf>, %273, %cst_138 [1] : vector<2x128xf32> to vector<2xf32>
    %278 = vector.shape_cast %277 : vector<2xf32> to vector<2x1xf32>
    %279 = vector.broadcast %278 : vector<2x1xf32> to vector<2x128xf32>
    %280 = arith.cmpf oge, %273, %279 : vector<2x128xf32>
    %281 = arith.sitofp %15 : vector<2x128xi32> to vector<2x128xf32>
    %cst_139 = arith.constant 1.280000e+02 : f32
    %282 = vector.broadcast %cst_139 : f32 to vector<2x128xf32>
    %283 = arith.select %280, %281, %282 : vector<2x128xi1>, vector<2x128xf32>
    %cst_140 = arith.constant dense<0x7F800000> : vector<2xf32>
    %284 = vector.multi_reduction <minimumf>, %283, %cst_140 [1] : vector<2x128xf32> to vector<2xf32>
    %285 = vector.shape_cast %284 : vector<2xf32> to vector<2x1xf32>
    %286 = arith.fptosi %285 : vector<2x1xf32> to vector<2x1xi32>
    %c0_141 = arith.constant 0 : index
    %c1_142 = arith.constant 1 : index
    %287 = vector.load %arg16[%c0_141, %c1_142] : memref<2x8xi32, #tpu.memory_space<vmem>>, vector<2x1xi32>
    tpu.vector_store %arg16[%c0_141, %c1_142], %286 {strides = array<i32>} : memref<2x8xi32, #tpu.memory_space<vmem>>, vector<2x1xi32>,
    %288 = vector.broadcast %286 : vector<2x1xi32> to vector<2x128xi32>
    %289 = arith.cmpi eq, %15, %288 : vector<2x128xi32>
    %290 = arith.extui %289 : vector<2x128xi1> to vector<2x128xi32>
    %291 = arith.sitofp %290 : vector<2x128xi32> to vector<2x128xf32>
    %c0_143 = arith.constant 0 : index
    %c0_144 = arith.constant 0 : index
    %292 = vector.load %arg1[%c0_143, %c0_144] : memref<128x32xf32, #tpu.memory_space<vmem>>, vector<128x32xf32>
    %cst_145 = arith.constant dense<0.000000e+00> : vector<2x32xf32>
    %293 = tpu.matmul %291, %292, %cst_145 {dimension_numbers = #tpu.dot_dimension_numbers<[1], [0], [0], [1], [0, 0, 1, 1], [], []>} : vector<2x128xf32>, vector<128x32xf32>, vector<2x32xf32> -> vector<2x32xf32>
    %c1_146 = arith.constant 1 : index
    %c0_147 = arith.constant 0 : index
    %294 = vector.load %arg2[%c1_146, %c0_147] : memref<8x32xf32, #tpu.memory_space<vmem>>, vector<1x32xf32>
    %295 = vector.broadcast %294 : vector<1x32xf32> to vector<2x32xf32>
    %296 = arith.addf %293, %295 : vector<2x32xf32>
    %297 = vector.broadcast %5 : vector<1x32xf32> to vector<2x32xf32>
    %298 = arith.addf %296, %297 : vector<2x32xf32>
    %c0_148 = arith.constant 0 : index
    %c0_149 = arith.constant 0 : index
    %299 = vector.load %arg3[%c0_148, %c0_149] : memref<10x32xf32, #tpu.memory_space<vmem>>, vector<1x32xf32>
    %c1_150 = arith.constant 1 : index
    %c0_151 = arith.constant 0 : index
    %300 = vector.load %arg3[%c1_150, %c0_151] : memref<10x32xf32, #tpu.memory_space<vmem>>, vector<1x32xf32>
    %cst_152 = arith.constant dense<0.000000e+00> : vector<2xf32>
    %301 = vector.multi_reduction <add>, %298, %cst_152 [1] : vector<2x32xf32> to vector<2xf32>
    %302 = vector.shape_cast %301 : vector<2xf32> to vector<2x1xf32>
    %cst_153 = arith.constant 3.200000e+01 : f32
    %303 = vector.broadcast %cst_153 : f32 to vector<2x1xf32>
    %304 = arith.divf %302, %303 : vector<2x1xf32>
    %305 = vector.broadcast %304 : vector<2x1xf32> to vector<2x32xf32>
    %306 = arith.subf %298, %305 : vector<2x32xf32>
    %307 = arith.mulf %306, %306 : vector<2x32xf32>
    %cst_154 = arith.constant dense<0.000000e+00> : vector<2xf32>
    %308 = vector.multi_reduction <add>, %307, %cst_154 [1] : vector<2x32xf32> to vector<2xf32>
    %309 = vector.shape_cast %308 : vector<2xf32> to vector<2x1xf32>
    %cst_155 = arith.constant 3.200000e+01 : f32
    %310 = vector.broadcast %cst_155 : f32 to vector<2x1xf32>
    %311 = arith.divf %309, %310 : vector<2x1xf32>
    %312 = vector.broadcast %304 : vector<2x1xf32> to vector<2x32xf32>
    %313 = arith.subf %298, %312 : vector<2x32xf32>
    %cst_156 = arith.constant 9.99999996E-13 : f32
    %314 = vector.broadcast %cst_156 : f32 to vector<2x1xf32>
    %315 = arith.addf %311, %314 : vector<2x1xf32>
    %316 = math.rsqrt %315 : vector<2x1xf32>
    %317 = vector.broadcast %316 : vector<2x1xf32> to vector<2x32xf32>
    %318 = arith.mulf %313, %317 : vector<2x32xf32>
    %319 = vector.broadcast %299 : vector<1x32xf32> to vector<2x32xf32>
    %320 = arith.mulf %318, %319 : vector<2x32xf32>
    %321 = vector.broadcast %300 : vector<1x32xf32> to vector<2x32xf32>
    %322 = arith.addf %320, %321 : vector<2x32xf32>
    %c0_157 = arith.constant 0 : index
    %c0_158 = arith.constant 0 : index
    %323 = vector.load %arg5[%c0_157, %c0_158] : memref<32x96xf32, #tpu.memory_space<vmem>>, vector<32x96xf32>
    %cst_159 = arith.constant dense<0.000000e+00> : vector<2x96xf32>
    %324 = tpu.matmul %322, %323, %cst_159 {dimension_numbers = #tpu.dot_dimension_numbers<[1], [0], [0], [1], [0, 0, 1, 1], [], []>} : vector<2x32xf32>, vector<32x96xf32>, vector<2x96xf32> -> vector<2x96xf32>
    %c0_160 = arith.constant 0 : index
    %c0_161 = arith.constant 0 : index
    %325 = vector.load %arg6[%c0_160, %c0_161] : memref<1x96xf32, #tpu.memory_space<vmem>>, vector<1x96xf32>
    %326 = vector.broadcast %325 : vector<1x96xf32> to vector<2x96xf32>
    %327 = arith.addf %324, %326 : vector<2x96xf32>
    %328 = vector.extract_strided_slice %327 {offsets = [0, 0], sizes = [2, 32], strides = [1, 1]} : vector<2x96xf32> to vector<2x32xf32>
    %329 = vector.extract_strided_slice %327 {offsets = [0, 32], sizes = [2, 32], strides = [1, 1]} : vector<2x96xf32> to vector<2x32xf32>
    %330 = vector.extract_strided_slice %327 {offsets = [0, 64], sizes = [2, 32], strides = [1, 1]} : vector<2x96xf32> to vector<2x32xf32>
    %331 = vector.extract_strided_slice %329 {offsets = [0, 0], sizes = [1, 32], strides = [1, 1]} : vector<2x32xf32> to vector<1x32xf32>
    %c1_162 = arith.constant 1 : index
    %c0_163 = arith.constant 0 : index
    %332 = vector.load %arg18[%c1_162, %c0_163] : memref<16x32xf32, #tpu.memory_space<vmem>>, vector<1x32xf32>
    tpu.vector_store %arg18[%c1_162, %c0_163], %331 {strides = array<i32>} : memref<16x32xf32, #tpu.memory_space<vmem>>, vector<1x32xf32>,
    %333 = vector.extract_strided_slice %330 {offsets = [0, 0], sizes = [1, 32], strides = [1, 1]} : vector<2x32xf32> to vector<1x32xf32>
    %c1_164 = arith.constant 1 : index
    %c0_165 = arith.constant 0 : index
    %334 = vector.load %arg19[%c1_164, %c0_165] : memref<16x32xf32, #tpu.memory_space<vmem>>, vector<1x32xf32>
    tpu.vector_store %arg19[%c1_164, %c0_165], %333 {strides = array<i32>} : memref<16x32xf32, #tpu.memory_space<vmem>>, vector<1x32xf32>,
    %c0_166 = arith.constant 0 : index
    %c0_167 = arith.constant 0 : index
    %335 = vector.load %arg18[%c0_166, %c0_167] : memref<16x32xf32, #tpu.memory_space<vmem>>, vector<8x32xf32>
    %c0_168 = arith.constant 0 : index
    %c0_169 = arith.constant 0 : index
    %336 = vector.load %arg19[%c0_168, %c0_169] : memref<16x32xf32, #tpu.memory_space<vmem>>, vector<8x32xf32>
    %337 = vector.extract_strided_slice %328 {offsets = [0, 0], sizes = [1, 32], strides = [1, 1]} : vector<2x32xf32> to vector<1x32xf32>
    %338 = tpu.transpose %335, [1, 0] : vector<8x32xf32> -> vector<32x8xf32>
    %cst_170 = arith.constant dense<0.000000e+00> : vector<1x8xf32>
    %339 = tpu.matmul %337, %338, %cst_170 {dimension_numbers = #tpu.dot_dimension_numbers<[1], [0], [0], [1], [0, 0, 1, 1], [], []>} : vector<1x32xf32>, vector<32x8xf32>, vector<1x8xf32> -> vector<1x8xf32>
    %cst_171 = arith.constant 0.176776692 : f32
    %340 = vector.broadcast %cst_171 : f32 to vector<1x8xf32>
    %341 = arith.mulf %339, %340 : vector<1x8xf32>
    %c2_i32 = arith.constant 2 : i32
    %342 = vector.broadcast %c2_i32 : i32 to vector<1x8xi32>
    %343 = arith.cmpi slt, %16, %342 : vector<1x8xi32>
    %cst_172 = arith.constant -1.000000e+30 : f32
    %344 = vector.broadcast %cst_172 : f32 to vector<1x8xf32>
    %345 = arith.select %343, %341, %344 : vector<1x8xi1>, vector<1x8xf32>
    %cst_173 = arith.constant dense<0xFF800000> : vector<1xf32>
    %346 = vector.multi_reduction <maximumf>, %345, %cst_173 [1] : vector<1x8xf32> to vector<1xf32>
    %347 = vector.shape_cast %346 : vector<1xf32> to vector<1x1xf32>
    %348 = vector.broadcast %347 : vector<1x1xf32> to vector<1x8xf32>
    %349 = arith.subf %345, %348 : vector<1x8xf32>
    %350 = math.exp %349 : vector<1x8xf32>
    %cst_174 = arith.constant dense<0.000000e+00> : vector<1xf32>
    %351 = vector.multi_reduction <add>, %350, %cst_174 [1] : vector<1x8xf32> to vector<1xf32>
    %352 = vector.shape_cast %351 : vector<1xf32> to vector<1x1xf32>
    %353 = tpu.reciprocal %352 {approx = true} : vector<1x1xf32> -> vector<1x1xf32>
    %354 = vector.broadcast %353 : vector<1x1xf32> to vector<1x8xf32>
    %355 = arith.mulf %350, %354 : vector<1x8xf32>
    %cst_175 = arith.constant dense<0.000000e+00> : vector<1x32xf32>
    %356 = tpu.matmul %355, %336, %cst_175 {dimension_numbers = #tpu.dot_dimension_numbers<[1], [0], [0], [1], [0, 0, 1, 1], [], []>} : vector<1x8xf32>, vector<8x32xf32>, vector<1x32xf32> -> vector<1x32xf32>
    %357 = vector.extract_strided_slice %329 {offsets = [1, 0], sizes = [1, 32], strides = [1, 1]} : vector<2x32xf32> to vector<1x32xf32>
    %c9_176 = arith.constant 9 : index
    %c0_177 = arith.constant 0 : index
    %358 = vector.load %arg18[%c9_176, %c0_177] : memref<16x32xf32, #tpu.memory_space<vmem>>, vector<1x32xf32>
    tpu.vector_store %arg18[%c9_176, %c0_177], %357 {strides = array<i32>} : memref<16x32xf32, #tpu.memory_space<vmem>>, vector<1x32xf32>,
    %359 = vector.extract_strided_slice %330 {offsets = [1, 0], sizes = [1, 32], strides = [1, 1]} : vector<2x32xf32> to vector<1x32xf32>
    %c9_178 = arith.constant 9 : index
    %c0_179 = arith.constant 0 : index
    %360 = vector.load %arg19[%c9_178, %c0_179] : memref<16x32xf32, #tpu.memory_space<vmem>>, vector<1x32xf32>
    tpu.vector_store %arg19[%c9_178, %c0_179], %359 {strides = array<i32>} : memref<16x32xf32, #tpu.memory_space<vmem>>, vector<1x32xf32>,
    %c8_180 = arith.constant 8 : index
    %c0_181 = arith.constant 0 : index
    %361 = vector.load %arg18[%c8_180, %c0_181] : memref<16x32xf32, #tpu.memory_space<vmem>>, vector<8x32xf32>
    %c8_182 = arith.constant 8 : index
    %c0_183 = arith.constant 0 : index
    %362 = vector.load %arg19[%c8_182, %c0_183] : memref<16x32xf32, #tpu.memory_space<vmem>>, vector<8x32xf32>
    %363 = vector.extract_strided_slice %328 {offsets = [1, 0], sizes = [1, 32], strides = [1, 1]} : vector<2x32xf32> to vector<1x32xf32>
    %364 = tpu.transpose %361, [1, 0] : vector<8x32xf32> -> vector<32x8xf32>
    %cst_184 = arith.constant dense<0.000000e+00> : vector<1x8xf32>
    %365 = tpu.matmul %363, %364, %cst_184 {dimension_numbers = #tpu.dot_dimension_numbers<[1], [0], [0], [1], [0, 0, 1, 1], [], []>} : vector<1x32xf32>, vector<32x8xf32>, vector<1x8xf32> -> vector<1x8xf32>
    %cst_185 = arith.constant 0.176776692 : f32
    %366 = vector.broadcast %cst_185 : f32 to vector<1x8xf32>
    %367 = arith.mulf %365, %366 : vector<1x8xf32>
    %c2_i32_186 = arith.constant 2 : i32
    %368 = vector.broadcast %c2_i32_186 : i32 to vector<1x8xi32>
    %369 = arith.cmpi slt, %16, %368 : vector<1x8xi32>
    %cst_187 = arith.constant -1.000000e+30 : f32
    %370 = vector.broadcast %cst_187 : f32 to vector<1x8xf32>
    %371 = arith.select %369, %367, %370 : vector<1x8xi1>, vector<1x8xf32>
    %cst_188 = arith.constant dense<0xFF800000> : vector<1xf32>
    %372 = vector.multi_reduction <maximumf>, %371, %cst_188 [1] : vector<1x8xf32> to vector<1xf32>
    %373 = vector.shape_cast %372 : vector<1xf32> to vector<1x1xf32>
    %374 = vector.broadcast %373 : vector<1x1xf32> to vector<1x8xf32>
    %375 = arith.subf %371, %374 : vector<1x8xf32>
    %376 = math.exp %375 : vector<1x8xf32>
    %cst_189 = arith.constant dense<0.000000e+00> : vector<1xf32>
    %377 = vector.multi_reduction <add>, %376, %cst_189 [1] : vector<1x8xf32> to vector<1xf32>
    %378 = vector.shape_cast %377 : vector<1xf32> to vector<1x1xf32>
    %379 = tpu.reciprocal %378 {approx = true} : vector<1x1xf32> -> vector<1x1xf32>
    %380 = vector.broadcast %379 : vector<1x1xf32> to vector<1x8xf32>
    %381 = arith.mulf %376, %380 : vector<1x8xf32>
    %cst_190 = arith.constant dense<0.000000e+00> : vector<1x32xf32>
    %382 = tpu.matmul %381, %362, %cst_190 {dimension_numbers = #tpu.dot_dimension_numbers<[1], [0], [0], [1], [0, 0, 1, 1], [], []>} : vector<1x8xf32>, vector<8x32xf32>, vector<1x32xf32> -> vector<1x32xf32>
    %383 = tpu.concatenate %356, %382 in 0 : vector<1x32xf32>, vector<1x32xf32> -> vector<2x32xf32>
    %c0_191 = arith.constant 0 : index
    %c0_192 = arith.constant 0 : index
    %384 = vector.load %arg7[%c0_191, %c0_192] : memref<32x32xf32, #tpu.memory_space<vmem>>, vector<32x32xf32>
    %cst_193 = arith.constant dense<0.000000e+00> : vector<2x32xf32>
    %385 = tpu.matmul %383, %384, %cst_193 {dimension_numbers = #tpu.dot_dimension_numbers<[1], [0], [0], [1], [0, 0, 1, 1], [], []>} : vector<2x32xf32>, vector<32x32xf32>, vector<2x32xf32> -> vector<2x32xf32>
    %386 = vector.broadcast %0 : vector<1x32xf32> to vector<2x32xf32>
    %387 = arith.addf %385, %386 : vector<2x32xf32>
    %388 = arith.addf %387, %322 : vector<2x32xf32>
    %c2_194 = arith.constant 2 : index
    %c0_195 = arith.constant 0 : index
    %389 = vector.load %arg3[%c2_194, %c0_195] : memref<10x32xf32, #tpu.memory_space<vmem>>, vector<1x32xf32>
    %c3_196 = arith.constant 3 : index
    %c0_197 = arith.constant 0 : index
    %390 = vector.load %arg3[%c3_196, %c0_197] : memref<10x32xf32, #tpu.memory_space<vmem>>, vector<1x32xf32>
    %cst_198 = arith.constant dense<0.000000e+00> : vector<2xf32>
    %391 = vector.multi_reduction <add>, %388, %cst_198 [1] : vector<2x32xf32> to vector<2xf32>
    %392 = vector.shape_cast %391 : vector<2xf32> to vector<2x1xf32>
    %cst_199 = arith.constant 3.200000e+01 : f32
    %393 = vector.broadcast %cst_199 : f32 to vector<2x1xf32>
    %394 = arith.divf %392, %393 : vector<2x1xf32>
    %395 = vector.broadcast %394 : vector<2x1xf32> to vector<2x32xf32>
    %396 = arith.subf %388, %395 : vector<2x32xf32>
    %397 = arith.mulf %396, %396 : vector<2x32xf32>
    %cst_200 = arith.constant dense<0.000000e+00> : vector<2xf32>
    %398 = vector.multi_reduction <add>, %397, %cst_200 [1] : vector<2x32xf32> to vector<2xf32>
    %399 = vector.shape_cast %398 : vector<2xf32> to vector<2x1xf32>
    %cst_201 = arith.constant 3.200000e+01 : f32
    %400 = vector.broadcast %cst_201 : f32 to vector<2x1xf32>
    %401 = arith.divf %399, %400 : vector<2x1xf32>
    %402 = vector.broadcast %394 : vector<2x1xf32> to vector<2x32xf32>
    %403 = arith.subf %388, %402 : vector<2x32xf32>
    %cst_202 = arith.constant 9.99999996E-13 : f32
    %404 = vector.broadcast %cst_202 : f32 to vector<2x1xf32>
    %405 = arith.addf %401, %404 : vector<2x1xf32>
    %406 = math.rsqrt %405 : vector<2x1xf32>
    %407 = vector.broadcast %406 : vector<2x1xf32> to vector<2x32xf32>
    %408 = arith.mulf %403, %407 : vector<2x32xf32>
    %409 = vector.broadcast %389 : vector<1x32xf32> to vector<2x32xf32>
    %410 = arith.mulf %408, %409 : vector<2x32xf32>
    %411 = vector.broadcast %390 : vector<1x32xf32> to vector<2x32xf32>
    %412 = arith.addf %410, %411 : vector<2x32xf32>
    %413 = arith.addf %14, %412 : vector<2x32xf32>
    %c4_203 = arith.constant 4 : index
    %c0_204 = arith.constant 0 : index
    %414 = vector.load %arg3[%c4_203, %c0_204] : memref<10x32xf32, #tpu.memory_space<vmem>>, vector<1x32xf32>
    %c5_205 = arith.constant 5 : index
    %c0_206 = arith.constant 0 : index
    %415 = vector.load %arg3[%c5_205, %c0_206] : memref<10x32xf32, #tpu.memory_space<vmem>>, vector<1x32xf32>
    %cst_207 = arith.constant dense<0.000000e+00> : vector<2xf32>
    %416 = vector.multi_reduction <add>, %413, %cst_207 [1] : vector<2x32xf32> to vector<2xf32>
    %417 = vector.shape_cast %416 : vector<2xf32> to vector<2x1xf32>
    %cst_208 = arith.constant 3.200000e+01 : f32
    %418 = vector.broadcast %cst_208 : f32 to vector<2x1xf32>
    %419 = arith.divf %417, %418 : vector<2x1xf32>
    %420 = vector.broadcast %419 : vector<2x1xf32> to vector<2x32xf32>
    %421 = arith.subf %413, %420 : vector<2x32xf32>
    %422 = arith.mulf %421, %421 : vector<2x32xf32>
    %cst_209 = arith.constant dense<0.000000e+00> : vector<2xf32>
    %423 = vector.multi_reduction <add>, %422, %cst_209 [1] : vector<2x32xf32> to vector<2xf32>
    %424 = vector.shape_cast %423 : vector<2xf32> to vector<2x1xf32>
    %cst_210 = arith.constant 3.200000e+01 : f32
    %425 = vector.broadcast %cst_210 : f32 to vector<2x1xf32>
    %426 = arith.divf %424, %425 : vector<2x1xf32>
    %427 = vector.broadcast %419 : vector<2x1xf32> to vector<2x32xf32>
    %428 = arith.subf %413, %427 : vector<2x32xf32>
    %cst_211 = arith.constant 9.99999996E-13 : f32
    %429 = vector.broadcast %cst_211 : f32 to vector<2x1xf32>
    %430 = arith.addf %426, %429 : vector<2x1xf32>
    %431 = math.rsqrt %430 : vector<2x1xf32>
    %432 = vector.broadcast %431 : vector<2x1xf32> to vector<2x32xf32>
    %433 = arith.mulf %428, %432 : vector<2x32xf32>
    %434 = vector.broadcast %414 : vector<1x32xf32> to vector<2x32xf32>
    %435 = arith.mulf %433, %434 : vector<2x32xf32>
    %436 = vector.broadcast %415 : vector<1x32xf32> to vector<2x32xf32>
    %437 = arith.addf %435, %436 : vector<2x32xf32>
    %c0_212 = arith.constant 0 : index
    %c0_213 = arith.constant 0 : index
    %438 = vector.load %arg10[%c0_212, %c0_213] : memref<32x64xf32, #tpu.memory_space<vmem>>, vector<32x64xf32>
    %cst_214 = arith.constant dense<0.000000e+00> : vector<2x64xf32>
    %439 = tpu.matmul %437, %438, %cst_214 {dimension_numbers = #tpu.dot_dimension_numbers<[1], [0], [0], [1], [0, 0, 1, 1], [], []>} : vector<2x32xf32>, vector<32x64xf32>, vector<2x64xf32> -> vector<2x64xf32>
    %c0_215 = arith.constant 0 : index
    %c0_216 = arith.constant 0 : index
    %440 = vector.load %arg11[%c0_215, %c0_216] : memref<1x64xf32, #tpu.memory_space<vmem>>, vector<1x64xf32>
    %441 = vector.broadcast %440 : vector<1x64xf32> to vector<2x64xf32>
    %442 = arith.addf %439, %441 : vector<2x64xf32>
    %443 = arith.mulf %442, %442 : vector<2x64xf32>
    %444 = arith.mulf %442, %443 : vector<2x64xf32>
    %cst_217 = arith.constant 4.471500e-02 : f32
    %445 = vector.broadcast %cst_217 : f32 to vector<2x64xf32>
    %446 = arith.mulf %445, %444 : vector<2x64xf32>
    %447 = arith.addf %442, %446 : vector<2x64xf32>
    %cst_218 = arith.constant 0.797884583 : f32
    %448 = vector.broadcast %cst_218 : f32 to vector<2x64xf32>
    %449 = arith.mulf %448, %447 : vector<2x64xf32>
    %450 = math.tanh %449 : vector<2x64xf32>
    %cst_219 = arith.constant 1.000000e+00 : f32
    %451 = vector.broadcast %cst_219 : f32 to vector<2x64xf32>
    %452 = arith.addf %451, %450 : vector<2x64xf32>
    %cst_220 = arith.constant 5.000000e-01 : f32
    %453 = vector.broadcast %cst_220 : f32 to vector<2x64xf32>
    %454 = arith.mulf %453, %452 : vector<2x64xf32>
    %455 = arith.mulf %442, %454 : vector<2x64xf32>
    %c0_221 = arith.constant 0 : index
    %c0_222 = arith.constant 0 : index
    %456 = vector.load %arg12[%c0_221, %c0_222] : memref<64x32xf32, #tpu.memory_space<vmem>>, vector<64x32xf32>
    %cst_223 = arith.constant dense<0.000000e+00> : vector<2x32xf32>
    %457 = tpu.matmul %455, %456, %cst_223 {dimension_numbers = #tpu.dot_dimension_numbers<[1], [0], [0], [1], [0, 0, 1, 1], [], []>} : vector<2x64xf32>, vector<64x32xf32>, vector<2x32xf32> -> vector<2x32xf32>
    %458 = vector.broadcast %3 : vector<1x32xf32> to vector<2x32xf32>
    %459 = arith.addf %457, %458 : vector<2x32xf32>
    %460 = arith.addf %459, %437 : vector<2x32xf32>
    %c6_224 = arith.constant 6 : index
    %c0_225 = arith.constant 0 : index
    %461 = vector.load %arg3[%c6_224, %c0_225] : memref<10x32xf32, #tpu.memory_space<vmem>>, vector<1x32xf32>
    %c7_226 = arith.constant 7 : index
    %c0_227 = arith.constant 0 : index
    %462 = vector.load %arg3[%c7_226, %c0_227] : memref<10x32xf32, #tpu.memory_space<vmem>>, vector<1x32xf32>
    %cst_228 = arith.constant dense<0.000000e+00> : vector<2xf32>
    %463 = vector.multi_reduction <add>, %460, %cst_228 [1] : vector<2x32xf32> to vector<2xf32>
    %464 = vector.shape_cast %463 : vector<2xf32> to vector<2x1xf32>
    %cst_229 = arith.constant 3.200000e+01 : f32
    %465 = vector.broadcast %cst_229 : f32 to vector<2x1xf32>
    %466 = arith.divf %464, %465 : vector<2x1xf32>
    %467 = vector.broadcast %466 : vector<2x1xf32> to vector<2x32xf32>
    %468 = arith.subf %460, %467 : vector<2x32xf32>
    %469 = arith.mulf %468, %468 : vector<2x32xf32>
    %cst_230 = arith.constant dense<0.000000e+00> : vector<2xf32>
    %470 = vector.multi_reduction <add>, %469, %cst_230 [1] : vector<2x32xf32> to vector<2xf32>
    %471 = vector.shape_cast %470 : vector<2xf32> to vector<2x1xf32>
    %cst_231 = arith.constant 3.200000e+01 : f32
    %472 = vector.broadcast %cst_231 : f32 to vector<2x1xf32>
    %473 = arith.divf %471, %472 : vector<2x1xf32>
    %474 = vector.broadcast %466 : vector<2x1xf32> to vector<2x32xf32>
    %475 = arith.subf %460, %474 : vector<2x32xf32>
    %cst_232 = arith.constant 9.99999996E-13 : f32
    %476 = vector.broadcast %cst_232 : f32 to vector<2x1xf32>
    %477 = arith.addf %473, %476 : vector<2x1xf32>
    %478 = math.rsqrt %477 : vector<2x1xf32>
    %479 = vector.broadcast %478 : vector<2x1xf32> to vector<2x32xf32>
    %480 = arith.mulf %475, %479 : vector<2x32xf32>
    %481 = vector.broadcast %461 : vector<1x32xf32> to vector<2x32xf32>
    %482 = arith.mulf %480, %481 : vector<2x32xf32>
    %483 = vector.broadcast %462 : vector<1x32xf32> to vector<2x32xf32>
    %484 = arith.addf %482, %483 : vector<2x32xf32>
    %c0_233 = arith.constant 0 : index
    %c0_234 = arith.constant 0 : index
    %485 = vector.load %arg13[%c0_233, %c0_234] : memref<32x32xf32, #tpu.memory_space<vmem>>, vector<32x32xf32>
    %cst_235 = arith.constant dense<0.000000e+00> : vector<2x32xf32>
    %486 = tpu.matmul %484, %485, %cst_235 {dimension_numbers = #tpu.dot_dimension_numbers<[1], [0], [0], [1], [0, 0, 1, 1], [], []>} : vector<2x32xf32>, vector<32x32xf32>, vector<2x32xf32> -> vector<2x32xf32>
    %487 = vector.broadcast %4 : vector<1x32xf32> to vector<2x32xf32>
    %488 = arith.addf %486, %487 : vector<2x32xf32>
    %489 = arith.mulf %488, %488 : vector<2x32xf32>
    %490 = arith.mulf %488, %489 : vector<2x32xf32>
    %cst_236 = arith.constant 4.471500e-02 : f32
    %491 = vector.broadcast %cst_236 : f32 to vector<2x32xf32>
    %492 = arith.mulf %491, %490 : vector<2x32xf32>
    %493 = arith.addf %488, %492 : vector<2x32xf32>
    %cst_237 = arith.constant 0.797884583 : f32
    %494 = vector.broadcast %cst_237 : f32 to vector<2x32xf32>
    %495 = arith.mulf %494, %493 : vector<2x32xf32>
    %496 = math.tanh %495 : vector<2x32xf32>
    %cst_238 = arith.constant 1.000000e+00 : f32
    %497 = vector.broadcast %cst_238 : f32 to vector<2x32xf32>
    %498 = arith.addf %497, %496 : vector<2x32xf32>
    %cst_239 = arith.constant 5.000000e-01 : f32
    %499 = vector.broadcast %cst_239 : f32 to vector<2x32xf32>
    %500 = arith.mulf %499, %498 : vector<2x32xf32>
    %501 = arith.mulf %488, %500 : vector<2x32xf32>
    %c8_240 = arith.constant 8 : index
    %c0_241 = arith.constant 0 : index
    %502 = vector.load %arg3[%c8_240, %c0_241] : memref<10x32xf32, #tpu.memory_space<vmem>>, vector<1x32xf32>
    %c9_242 = arith.constant 9 : index
    %c0_243 = arith.constant 0 : index
    %503 = vector.load %arg3[%c9_242, %c0_243] : memref<10x32xf32, #tpu.memory_space<vmem>>, vector<1x32xf32>
    %cst_244 = arith.constant dense<0.000000e+00> : vector<2xf32>
    %504 = vector.multi_reduction <add>, %501, %cst_244 [1] : vector<2x32xf32> to vector<2xf32>
    %505 = vector.shape_cast %504 : vector<2xf32> to vector<2x1xf32>
    %cst_245 = arith.constant 3.200000e+01 : f32
    %506 = vector.broadcast %cst_245 : f32 to vector<2x1xf32>
    %507 = arith.divf %505, %506 : vector<2x1xf32>
    %508 = vector.broadcast %507 : vector<2x1xf32> to vector<2x32xf32>
    %509 = arith.subf %501, %508 : vector<2x32xf32>
    %510 = arith.mulf %509, %509 : vector<2x32xf32>
    %cst_246 = arith.constant dense<0.000000e+00> : vector<2xf32>
    %511 = vector.multi_reduction <add>, %510, %cst_246 [1] : vector<2x32xf32> to vector<2xf32>
    %512 = vector.shape_cast %511 : vector<2xf32> to vector<2x1xf32>
    %cst_247 = arith.constant 3.200000e+01 : f32
    %513 = vector.broadcast %cst_247 : f32 to vector<2x1xf32>
    %514 = arith.divf %512, %513 : vector<2x1xf32>
    %515 = vector.broadcast %507 : vector<2x1xf32> to vector<2x32xf32>
    %516 = arith.subf %501, %515 : vector<2x32xf32>
    %cst_248 = arith.constant 9.99999996E-13 : f32
    %517 = vector.broadcast %cst_248 : f32 to vector<2x1xf32>
    %518 = arith.addf %514, %517 : vector<2x1xf32>
    %519 = math.rsqrt %518 : vector<2x1xf32>
    %520 = vector.broadcast %519 : vector<2x1xf32> to vector<2x32xf32>
    %521 = arith.mulf %516, %520 : vector<2x32xf32>
    %522 = vector.broadcast %502 : vector<1x32xf32> to vector<2x32xf32>
    %523 = arith.mulf %521, %522 : vector<2x32xf32>
    %524 = vector.broadcast %503 : vector<1x32xf32> to vector<2x32xf32>
    %525 = arith.addf %523, %524 : vector<2x32xf32>
    %c0_249 = arith.constant 0 : index
    %c0_250 = arith.constant 0 : index
    %526 = vector.load %arg14[%c0_249, %c0_250] : memref<32x128xf32, #tpu.memory_space<vmem>>, vector<32x128xf32>
    %cst_251 = arith.constant dense<0.000000e+00> : vector<2x128xf32>
    %527 = tpu.matmul %525, %526, %cst_251 {dimension_numbers = #tpu.dot_dimension_numbers<[1], [0], [0], [1], [0, 0, 1, 1], [], []>} : vector<2x32xf32>, vector<32x128xf32>, vector<2x128xf32> -> vector<2x128xf32>
    %c0_252 = arith.constant 0 : index
    %c0_253 = arith.constant 0 : index
    %528 = vector.load %arg15[%c0_252, %c0_253] : memref<1x128xf32, #tpu.memory_space<vmem>>, vector<1x128xf32>
    %529 = vector.broadcast %528 : vector<1x128xf32> to vector<2x128xf32>
    %530 = arith.addf %527, %529 : vector<2x128xf32>
    %c64_i32_254 = arith.constant 64 : i32
    %531 = vector.broadcast %c64_i32_254 : i32 to vector<2x128xi32>
    %532 = arith.cmpi slt, %15, %531 : vector<2x128xi32>
    %cst_255 = arith.constant -1.000000e+30 : f32
    %533 = vector.broadcast %cst_255 : f32 to vector<2x128xf32>
    %534 = arith.select %532, %530, %533 : vector<2x128xi1>, vector<2x128xf32>
    %c2_256 = arith.constant 2 : index
    %c0_257 = arith.constant 0 : index
    %c0_258 = arith.constant 0 : index
    %535 = vector.load %arg17[%c2_256, %c0_257, %c0_258] : memref<8x2x128xf32, #tpu.memory_space<vmem>>, vector<1x2x128xf32>
    %536 = vector.shape_cast %535 : vector<1x2x128xf32> to vector<2x128xf32>
    %537 = vector.shape_cast %534 : vector<2x128xf32> to vector<1x2x128xf32>
    tpu.vector_store %arg17[%c2_256, %c0_257, %c0_258], %537 {strides = array<i32>} : memref<8x2x128xf32, #tpu.memory_space<vmem>>, vector<1x2x128xf32>,
    %cst_259 = arith.constant dense<0xFF800000> : vector<2xf32>
    %538 = vector.multi_reduction <maximumf>, %534, %cst_259 [1] : vector<2x128xf32> to vector<2xf32>
    %539 = vector.shape_cast %538 : vector<2xf32> to vector<2x1xf32>
    %540 = vector.broadcast %539 : vector<2x1xf32> to vector<2x128xf32>
    %541 = arith.cmpf oge, %534, %540 : vector<2x128xf32>
    %542 = arith.sitofp %15 : vector<2x128xi32> to vector<2x128xf32>
    %cst_260 = arith.constant 1.280000e+02 : f32
    %543 = vector.broadcast %cst_260 : f32 to vector<2x128xf32>
    %544 = arith.select %541, %542, %543 : vector<2x128xi1>, vector<2x128xf32>
    %cst_261 = arith.constant dense<0x7F800000> : vector<2xf32>
    %545 = vector.multi_reduction <minimumf>, %544, %cst_261 [1] : vector<2x128xf32> to vector<2xf32>
    %546 = vector.shape_cast %545 : vector<2xf32> to vector<2x1xf32>
    %547 = arith.fptosi %546 : vector<2x1xf32> to vector<2x1xi32>
    %c0_262 = arith.constant 0 : index
    %c2_263 = arith.constant 2 : index
    %548 = vector.load %arg16[%c0_262, %c2_263] : memref<2x8xi32, #tpu.memory_space<vmem>>, vector<2x1xi32>
    tpu.vector_store %arg16[%c0_262, %c2_263], %547 {strides = array<i32>} : memref<2x8xi32, #tpu.memory_space<vmem>>, vector<2x1xi32>,
    %549 = vector.broadcast %547 : vector<2x1xi32> to vector<2x128xi32>
    %550 = arith.cmpi eq, %15, %549 : vector<2x128xi32>
    %551 = arith.extui %550 : vector<2x128xi1> to vector<2x128xi32>
    %552 = arith.sitofp %551 : vector<2x128xi32> to vector<2x128xf32>
    %c0_264 = arith.constant 0 : index
    %c0_265 = arith.constant 0 : index
    %553 = vector.load %arg1[%c0_264, %c0_265] : memref<128x32xf32, #tpu.memory_space<vmem>>, vector<128x32xf32>
    %cst_266 = arith.constant dense<0.000000e+00> : vector<2x32xf32>
    %554 = tpu.matmul %552, %553, %cst_266 {dimension_numbers = #tpu.dot_dimension_numbers<[1], [0], [0], [1], [0, 0, 1, 1], [], []>} : vector<2x128xf32>, vector<128x32xf32>, vector<2x32xf32> -> vector<2x32xf32>
    %c2_267 = arith.constant 2 : index
    %c0_268 = arith.constant 0 : index
    %555 = vector.load %arg2[%c2_267, %c0_268] : memref<8x32xf32, #tpu.memory_space<vmem>>, vector<1x32xf32>
    %556 = vector.broadcast %555 : vector<1x32xf32> to vector<2x32xf32>
    %557 = arith.addf %554, %556 : vector<2x32xf32>
    %558 = vector.broadcast %5 : vector<1x32xf32> to vector<2x32xf32>
    %559 = arith.addf %557, %558 : vector<2x32xf32>
    %c0_269 = arith.constant 0 : index
    %c0_270 = arith.constant 0 : index
    %560 = vector.load %arg3[%c0_269, %c0_270] : memref<10x32xf32, #tpu.memory_space<vmem>>, vector<1x32xf32>
    %c1_271 = arith.constant 1 : index
    %c0_272 = arith.constant 0 : index
    %561 = vector.load %arg3[%c1_271, %c0_272] : memref<10x32xf32, #tpu.memory_space<vmem>>, vector<1x32xf32>
    %cst_273 = arith.constant dense<0.000000e+00> : vector<2xf32>
    %562 = vector.multi_reduction <add>, %559, %cst_273 [1] : vector<2x32xf32> to vector<2xf32>
    %563 = vector.shape_cast %562 : vector<2xf32> to vector<2x1xf32>
    %cst_274 = arith.constant 3.200000e+01 : f32
    %564 = vector.broadcast %cst_274 : f32 to vector<2x1xf32>
    %565 = arith.divf %563, %564 : vector<2x1xf32>
    %566 = vector.broadcast %565 : vector<2x1xf32> to vector<2x32xf32>
    %567 = arith.subf %559, %566 : vector<2x32xf32>
    %568 = arith.mulf %567, %567 : vector<2x32xf32>
    %cst_275 = arith.constant dense<0.000000e+00> : vector<2xf32>
    %569 = vector.multi_reduction <add>, %568, %cst_275 [1] : vector<2x32xf32> to vector<2xf32>
    %570 = vector.shape_cast %569 : vector<2xf32> to vector<2x1xf32>
    %cst_276 = arith.constant 3.200000e+01 : f32
    %571 = vector.broadcast %cst_276 : f32 to vector<2x1xf32>
    %572 = arith.divf %570, %571 : vector<2x1xf32>
    %573 = vector.broadcast %565 : vector<2x1xf32> to vector<2x32xf32>
    %574 = arith.subf %559, %573 : vector<2x32xf32>
    %cst_277 = arith.constant 9.99999996E-13 : f32
    %575 = vector.broadcast %cst_277 : f32 to vector<2x1xf32>
    %576 = arith.addf %572, %575 : vector<2x1xf32>
    %577 = math.rsqrt %576 : vector<2x1xf32>
    %578 = vector.broadcast %577 : vector<2x1xf32> to vector<2x32xf32>
    %579 = arith.mulf %574, %578 : vector<2x32xf32>
    %580 = vector.broadcast %560 : vector<1x32xf32> to vector<2x32xf32>
    %581 = arith.mulf %579, %580 : vector<2x32xf32>
    %582 = vector.broadcast %561 : vector<1x32xf32> to vector<2x32xf32>
    %583 = arith.addf %581, %582 : vector<2x32xf32>
    %c0_278 = arith.constant 0 : index
    %c0_279 = arith.constant 0 : index
    %584 = vector.load %arg5[%c0_278, %c0_279] : memref<32x96xf32, #tpu.memory_space<vmem>>, vector<32x96xf32>
    %cst_280 = arith.constant dense<0.000000e+00> : vector<2x96xf32>
    %585 = tpu.matmul %583, %584, %cst_280 {dimension_numbers = #tpu.dot_dimension_numbers<[1], [0], [0], [1], [0, 0, 1, 1], [], []>} : vector<2x32xf32>, vector<32x96xf32>, vector<2x96xf32> -> vector<2x96xf32>
    %c0_281 = arith.constant 0 : index
    %c0_282 = arith.constant 0 : index
    %586 = vector.load %arg6[%c0_281, %c0_282] : memref<1x96xf32, #tpu.memory_space<vmem>>, vector<1x96xf32>
    %587 = vector.broadcast %586 : vector<1x96xf32> to vector<2x96xf32>
    %588 = arith.addf %585, %587 : vector<2x96xf32>
    %589 = vector.extract_strided_slice %588 {offsets = [0, 0], sizes = [2, 32], strides = [1, 1]} : vector<2x96xf32> to vector<2x32xf32>
    %590 = vector.extract_strided_slice %588 {offsets = [0, 32], sizes = [2, 32], strides = [1, 1]} : vector<2x96xf32> to vector<2x32xf32>
    %591 = vector.extract_strided_slice %588 {offsets = [0, 64], sizes = [2, 32], strides = [1, 1]} : vector<2x96xf32> to vector<2x32xf32>
    %592 = vector.extract_strided_slice %590 {offsets = [0, 0], sizes = [1, 32], strides = [1, 1]} : vector<2x32xf32> to vector<1x32xf32>
    %c2_283 = arith.constant 2 : index
    %c0_284 = arith.constant 0 : index
    %593 = vector.load %arg18[%c2_283, %c0_284] : memref<16x32xf32, #tpu.memory_space<vmem>>, vector<1x32xf32>
    tpu.vector_store %arg18[%c2_283, %c0_284], %592 {strides = array<i32>} : memref<16x32xf32, #tpu.memory_space<vmem>>, vector<1x32xf32>,
    %594 = vector.extract_strided_slice %591 {offsets = [0, 0], sizes = [1, 32], strides = [1, 1]} : vector<2x32xf32> to vector<1x32xf32>
    %c2_285 = arith.constant 2 : index
    %c0_286 = arith.constant 0 : index
    %595 = vector.load %arg19[%c2_285, %c0_286] : memref<16x32xf32, #tpu.memory_space<vmem>>, vector<1x32xf32>
    tpu.vector_store %arg19[%c2_285, %c0_286], %594 {strides = array<i32>} : memref<16x32xf32, #tpu.memory_space<vmem>>, vector<1x32xf32>,
    %c0_287 = arith.constant 0 : index
    %c0_288 = arith.constant 0 : index
    %596 = vector.load %arg18[%c0_287, %c0_288] : memref<16x32xf32, #tpu.memory_space<vmem>>, vector<8x32xf32>
    %c0_289 = arith.constant 0 : index
    %c0_290 = arith.constant 0 : index
    %597 = vector.load %arg19[%c0_289, %c0_290] : memref<16x32xf32, #tpu.memory_space<vmem>>, vector<8x32xf32>
    %598 = vector.extract_strided_slice %589 {offsets = [0, 0], sizes = [1, 32], strides = [1, 1]} : vector<2x32xf32> to vector<1x32xf32>
    %599 = tpu.transpose %596, [1, 0] : vector<8x32xf32> -> vector<32x8xf32>
    %cst_291 = arith.constant dense<0.000000e+00> : vector<1x8xf32>
    %600 = tpu.matmul %598, %599, %cst_291 {dimension_numbers = #tpu.dot_dimension_numbers<[1], [0], [0], [1], [0, 0, 1, 1], [], []>} : vector<1x32xf32>, vector<32x8xf32>, vector<1x8xf32> -> vector<1x8xf32>
    %cst_292 = arith.constant 0.176776692 : f32
    %601 = vector.broadcast %cst_292 : f32 to vector<1x8xf32>
    %602 = arith.mulf %600, %601 : vector<1x8xf32>
    %c3_i32 = arith.constant 3 : i32
    %603 = vector.broadcast %c3_i32 : i32 to vector<1x8xi32>
    %604 = arith.cmpi slt, %16, %603 : vector<1x8xi32>
    %cst_293 = arith.constant -1.000000e+30 : f32
    %605 = vector.broadcast %cst_293 : f32 to vector<1x8xf32>
    %606 = arith.select %604, %602, %605 : vector<1x8xi1>, vector<1x8xf32>
    %cst_294 = arith.constant dense<0xFF800000> : vector<1xf32>
    %607 = vector.multi_reduction <maximumf>, %606, %cst_294 [1] : vector<1x8xf32> to vector<1xf32>
    %608 = vector.shape_cast %607 : vector<1xf32> to vector<1x1xf32>
    %609 = vector.broadcast %608 : vector<1x1xf32> to vector<1x8xf32>
    %610 = arith.subf %606, %609 : vector<1x8xf32>
    %611 = math.exp %610 : vector<1x8xf32>
    %cst_295 = arith.constant dense<0.000000e+00> : vector<1xf32>
    %612 = vector.multi_reduction <add>, %611, %cst_295 [1] : vector<1x8xf32> to vector<1xf32>
    %613 = vector.shape_cast %612 : vector<1xf32> to vector<1x1xf32>
    %614 = tpu.reciprocal %613 {approx = true} : vector<1x1xf32> -> vector<1x1xf32>
    %615 = vector.broadcast %614 : vector<1x1xf32> to vector<1x8xf32>
    %616 = arith.mulf %611, %615 : vector<1x8xf32>
    %cst_296 = arith.constant dense<0.000000e+00> : vector<1x32xf32>
    %617 = tpu.matmul %616, %597, %cst_296 {dimension_numbers = #tpu.dot_dimension_numbers<[1], [0], [0], [1], [0, 0, 1, 1], [], []>} : vector<1x8xf32>, vector<8x32xf32>, vector<1x32xf32> -> vector<1x32xf32>
    %618 = vector.extract_strided_slice %590 {offsets = [1, 0], sizes = [1, 32], strides = [1, 1]} : vector<2x32xf32> to vector<1x32xf32>
    %c10 = arith.constant 10 : index
    %c0_297 = arith.constant 0 : index
    %619 = vector.load %arg18[%c10, %c0_297] : memref<16x32xf32, #tpu.memory_space<vmem>>, vector<1x32xf32>
    tpu.vector_store %arg18[%c10, %c0_297], %618 {strides = array<i32>} : memref<16x32xf32, #tpu.memory_space<vmem>>, vector<1x32xf32>,
    %620 = vector.extract_strided_slice %591 {offsets = [1, 0], sizes = [1, 32], strides = [1, 1]} : vector<2x32xf32> to vector<1x32xf32>
    %c10_298 = arith.constant 10 : index
    %c0_299 = arith.constant 0 : index
    %621 = vector.load %arg19[%c10_298, %c0_299] : memref<16x32xf32, #tpu.memory_space<vmem>>, vector<1x32xf32>
    tpu.vector_store %arg19[%c10_298, %c0_299], %620 {strides = array<i32>} : memref<16x32xf32, #tpu.memory_space<vmem>>, vector<1x32xf32>,
    %c8_300 = arith.constant 8 : index
    %c0_301 = arith.constant 0 : index
    %622 = vector.load %arg18[%c8_300, %c0_301] : memref<16x32xf32, #tpu.memory_space<vmem>>, vector<8x32xf32>
    %c8_302 = arith.constant 8 : index
    %c0_303 = arith.constant 0 : index
    %623 = vector.load %arg19[%c8_302, %c0_303] : memref<16x32xf32, #tpu.memory_space<vmem>>, vector<8x32xf32>
    %624 = vector.extract_strided_slice %589 {offsets = [1, 0], sizes = [1, 32], strides = [1, 1]} : vector<2x32xf32> to vector<1x32xf32>
    %625 = tpu.transpose %622, [1, 0] : vector<8x32xf32> -> vector<32x8xf32>
    %cst_304 = arith.constant dense<0.000000e+00> : vector<1x8xf32>
    %626 = tpu.matmul %624, %625, %cst_304 {dimension_numbers = #tpu.dot_dimension_numbers<[1], [0], [0], [1], [0, 0, 1, 1], [], []>} : vector<1x32xf32>, vector<32x8xf32>, vector<1x8xf32> -> vector<1x8xf32>
    %cst_305 = arith.constant 0.176776692 : f32
    %627 = vector.broadcast %cst_305 : f32 to vector<1x8xf32>
    %628 = arith.mulf %626, %627 : vector<1x8xf32>
    %c3_i32_306 = arith.constant 3 : i32
    %629 = vector.broadcast %c3_i32_306 : i32 to vector<1x8xi32>
    %630 = arith.cmpi slt, %16, %629 : vector<1x8xi32>
    %cst_307 = arith.constant -1.000000e+30 : f32
    %631 = vector.broadcast %cst_307 : f32 to vector<1x8xf32>
    %632 = arith.select %630, %628, %631 : vector<1x8xi1>, vector<1x8xf32>
    %cst_308 = arith.constant dense<0xFF800000> : vector<1xf32>
    %633 = vector.multi_reduction <maximumf>, %632, %cst_308 [1] : vector<1x8xf32> to vector<1xf32>
    %634 = vector.shape_cast %633 : vector<1xf32> to vector<1x1xf32>
    %635 = vector.broadcast %634 : vector<1x1xf32> to vector<1x8xf32>
    %636 = arith.subf %632, %635 : vector<1x8xf32>
    %637 = math.exp %636 : vector<1x8xf32>
    %cst_309 = arith.constant dense<0.000000e+00> : vector<1xf32>
    %638 = vector.multi_reduction <add>, %637, %cst_309 [1] : vector<1x8xf32> to vector<1xf32>
    %639 = vector.shape_cast %638 : vector<1xf32> to vector<1x1xf32>
    %640 = tpu.reciprocal %639 {approx = true} : vector<1x1xf32> -> vector<1x1xf32>
    %641 = vector.broadcast %640 : vector<1x1xf32> to vector<1x8xf32>
    %642 = arith.mulf %637, %641 : vector<1x8xf32>
    %cst_310 = arith.constant dense<0.000000e+00> : vector<1x32xf32>
    %643 = tpu.matmul %642, %623, %cst_310 {dimension_numbers = #tpu.dot_dimension_numbers<[1], [0], [0], [1], [0, 0, 1, 1], [], []>} : vector<1x8xf32>, vector<8x32xf32>, vector<1x32xf32> -> vector<1x32xf32>
    %644 = tpu.concatenate %617, %643 in 0 : vector<1x32xf32>, vector<1x32xf32> -> vector<2x32xf32>
    %c0_311 = arith.constant 0 : index
    %c0_312 = arith.constant 0 : index
    %645 = vector.load %arg7[%c0_311, %c0_312] : memref<32x32xf32, #tpu.memory_space<vmem>>, vector<32x32xf32>
    %cst_313 = arith.constant dense<0.000000e+00> : vector<2x32xf32>
    %646 = tpu.matmul %644, %645, %cst_313 {dimension_numbers = #tpu.dot_dimension_numbers<[1], [0], [0], [1], [0, 0, 1, 1], [], []>} : vector<2x32xf32>, vector<32x32xf32>, vector<2x32xf32> -> vector<2x32xf32>
    %647 = vector.broadcast %0 : vector<1x32xf32> to vector<2x32xf32>
    %648 = arith.addf %646, %647 : vector<2x32xf32>
    %649 = arith.addf %648, %583 : vector<2x32xf32>
    %c2_314 = arith.constant 2 : index
    %c0_315 = arith.constant 0 : index
    %650 = vector.load %arg3[%c2_314, %c0_315] : memref<10x32xf32, #tpu.memory_space<vmem>>, vector<1x32xf32>
    %c3_316 = arith.constant 3 : index
    %c0_317 = arith.constant 0 : index
    %651 = vector.load %arg3[%c3_316, %c0_317] : memref<10x32xf32, #tpu.memory_space<vmem>>, vector<1x32xf32>
    %cst_318 = arith.constant dense<0.000000e+00> : vector<2xf32>
    %652 = vector.multi_reduction <add>, %649, %cst_318 [1] : vector<2x32xf32> to vector<2xf32>
    %653 = vector.shape_cast %652 : vector<2xf32> to vector<2x1xf32>
    %cst_319 = arith.constant 3.200000e+01 : f32
    %654 = vector.broadcast %cst_319 : f32 to vector<2x1xf32>
    %655 = arith.divf %653, %654 : vector<2x1xf32>
    %656 = vector.broadcast %655 : vector<2x1xf32> to vector<2x32xf32>
    %657 = arith.subf %649, %656 : vector<2x32xf32>
    %658 = arith.mulf %657, %657 : vector<2x32xf32>
    %cst_320 = arith.constant dense<0.000000e+00> : vector<2xf32>
    %659 = vector.multi_reduction <add>, %658, %cst_320 [1] : vector<2x32xf32> to vector<2xf32>
    %660 = vector.shape_cast %659 : vector<2xf32> to vector<2x1xf32>
    %cst_321 = arith.constant 3.200000e+01 : f32
    %661 = vector.broadcast %cst_321 : f32 to vector<2x1xf32>
    %662 = arith.divf %660, %661 : vector<2x1xf32>
    %663 = vector.broadcast %655 : vector<2x1xf32> to vector<2x32xf32>
    %664 = arith.subf %649, %663 : vector<2x32xf32>
    %cst_322 = arith.constant 9.99999996E-13 : f32
    %665 = vector.broadcast %cst_322 : f32 to vector<2x1xf32>
    %666 = arith.addf %662, %665 : vector<2x1xf32>
    %667 = math.rsqrt %666 : vector<2x1xf32>
    %668 = vector.broadcast %667 : vector<2x1xf32> to vector<2x32xf32>
    %669 = arith.mulf %664, %668 : vector<2x32xf32>
    %670 = vector.broadcast %650 : vector<1x32xf32> to vector<2x32xf32>
    %671 = arith.mulf %669, %670 : vector<2x32xf32>
    %672 = vector.broadcast %651 : vector<1x32xf32> to vector<2x32xf32>
    %673 = arith.addf %671, %672 : vector<2x32xf32>
    %674 = arith.addf %14, %673 : vector<2x32xf32>
    %c4_323 = arith.constant 4 : index
    %c0_324 = arith.constant 0 : index
    %675 = vector.load %arg3[%c4_323, %c0_324] : memref<10x32xf32, #tpu.memory_space<vmem>>, vector<1x32xf32>
    %c5_325 = arith.constant 5 : index
    %c0_326 = arith.constant 0 : index
    %676 = vector.load %arg3[%c5_325, %c0_326] : memref<10x32xf32, #tpu.memory_space<vmem>>, vector<1x32xf32>
    %cst_327 = arith.constant dense<0.000000e+00> : vector<2xf32>
    %677 = vector.multi_reduction <add>, %674, %cst_327 [1] : vector<2x32xf32> to vector<2xf32>
    %678 = vector.shape_cast %677 : vector<2xf32> to vector<2x1xf32>
    %cst_328 = arith.constant 3.200000e+01 : f32
    %679 = vector.broadcast %cst_328 : f32 to vector<2x1xf32>
    %680 = arith.divf %678, %679 : vector<2x1xf32>
    %681 = vector.broadcast %680 : vector<2x1xf32> to vector<2x32xf32>
    %682 = arith.subf %674, %681 : vector<2x32xf32>
    %683 = arith.mulf %682, %682 : vector<2x32xf32>
    %cst_329 = arith.constant dense<0.000000e+00> : vector<2xf32>
    %684 = vector.multi_reduction <add>, %683, %cst_329 [1] : vector<2x32xf32> to vector<2xf32>
    %685 = vector.shape_cast %684 : vector<2xf32> to vector<2x1xf32>
    %cst_330 = arith.constant 3.200000e+01 : f32
    %686 = vector.broadcast %cst_330 : f32 to vector<2x1xf32>
    %687 = arith.divf %685, %686 : vector<2x1xf32>
    %688 = vector.broadcast %680 : vector<2x1xf32> to vector<2x32xf32>
    %689 = arith.subf %674, %688 : vector<2x32xf32>
    %cst_331 = arith.constant 9.99999996E-13 : f32
    %690 = vector.broadcast %cst_331 : f32 to vector<2x1xf32>
    %691 = arith.addf %687, %690 : vector<2x1xf32>
    %692 = math.rsqrt %691 : vector<2x1xf32>
    %693 = vector.broadcast %692 : vector<2x1xf32> to vector<2x32xf32>
    %694 = arith.mulf %689, %693 : vector<2x32xf32>
    %695 = vector.broadcast %675 : vector<1x32xf32> to vector<2x32xf32>
    %696 = arith.mulf %694, %695 : vector<2x32xf32>
    %697 = vector.broadcast %676 : vector<1x32xf32> to vector<2x32xf32>
    %698 = arith.addf %696, %697 : vector<2x32xf32>
    %c0_332 = arith.constant 0 : index
    %c0_333 = arith.constant 0 : index
    %699 = vector.load %arg10[%c0_332, %c0_333] : memref<32x64xf32, #tpu.memory_space<vmem>>, vector<32x64xf32>
    %cst_334 = arith.constant dense<0.000000e+00> : vector<2x64xf32>
    %700 = tpu.matmul %698, %699, %cst_334 {dimension_numbers = #tpu.dot_dimension_numbers<[1], [0], [0], [1], [0, 0, 1, 1], [], []>} : vector<2x32xf32>, vector<32x64xf32>, vector<2x64xf32> -> vector<2x64xf32>
    %c0_335 = arith.constant 0 : index
    %c0_336 = arith.constant 0 : index
    %701 = vector.load %arg11[%c0_335, %c0_336] : memref<1x64xf32, #tpu.memory_space<vmem>>, vector<1x64xf32>
    %702 = vector.broadcast %701 : vector<1x64xf32> to vector<2x64xf32>
    %703 = arith.addf %700, %702 : vector<2x64xf32>
    %704 = arith.mulf %703, %703 : vector<2x64xf32>
    %705 = arith.mulf %703, %704 : vector<2x64xf32>
    %cst_337 = arith.constant 4.471500e-02 : f32
    %706 = vector.broadcast %cst_337 : f32 to vector<2x64xf32>
    %707 = arith.mulf %706, %705 : vector<2x64xf32>
    %708 = arith.addf %703, %707 : vector<2x64xf32>
    %cst_338 = arith.constant 0.797884583 : f32
    %709 = vector.broadcast %cst_338 : f32 to vector<2x64xf32>
    %710 = arith.mulf %709, %708 : vector<2x64xf32>
    %711 = math.tanh %710 : vector<2x64xf32>
    %cst_339 = arith.constant 1.000000e+00 : f32
    %712 = vector.broadcast %cst_339 : f32 to vector<2x64xf32>
    %713 = arith.addf %712, %711 : vector<2x64xf32>
    %cst_340 = arith.constant 5.000000e-01 : f32
    %714 = vector.broadcast %cst_340 : f32 to vector<2x64xf32>
    %715 = arith.mulf %714, %713 : vector<2x64xf32>
    %716 = arith.mulf %703, %715 : vector<2x64xf32>
    %c0_341 = arith.constant 0 : index
    %c0_342 = arith.constant 0 : index
    %717 = vector.load %arg12[%c0_341, %c0_342] : memref<64x32xf32, #tpu.memory_space<vmem>>, vector<64x32xf32>
    %cst_343 = arith.constant dense<0.000000e+00> : vector<2x32xf32>
    %718 = tpu.matmul %716, %717, %cst_343 {dimension_numbers = #tpu.dot_dimension_numbers<[1], [0], [0], [1], [0, 0, 1, 1], [], []>} : vector<2x64xf32>, vector<64x32xf32>, vector<2x32xf32> -> vector<2x32xf32>
    %719 = vector.broadcast %3 : vector<1x32xf32> to vector<2x32xf32>
    %720 = arith.addf %718, %719 : vector<2x32xf32>
    %721 = arith.addf %720, %698 : vector<2x32xf32>
    %c6_344 = arith.constant 6 : index
    %c0_345 = arith.constant 0 : index
    %722 = vector.load %arg3[%c6_344, %c0_345] : memref<10x32xf32, #tpu.memory_space<vmem>>, vector<1x32xf32>
    %c7_346 = arith.constant 7 : index
    %c0_347 = arith.constant 0 : index
    %723 = vector.load %arg3[%c7_346, %c0_347] : memref<10x32xf32, #tpu.memory_space<vmem>>, vector<1x32xf32>
    %cst_348 = arith.constant dense<0.000000e+00> : vector<2xf32>
    %724 = vector.multi_reduction <add>, %721, %cst_348 [1] : vector<2x32xf32> to vector<2xf32>
    %725 = vector.shape_cast %724 : vector<2xf32> to vector<2x1xf32>
    %cst_349 = arith.constant 3.200000e+01 : f32
    %726 = vector.broadcast %cst_349 : f32 to vector<2x1xf32>
    %727 = arith.divf %725, %726 : vector<2x1xf32>
    %728 = vector.broadcast %727 : vector<2x1xf32> to vector<2x32xf32>
    %729 = arith.subf %721, %728 : vector<2x32xf32>
    %730 = arith.mulf %729, %729 : vector<2x32xf32>
    %cst_350 = arith.constant dense<0.000000e+00> : vector<2xf32>
    %731 = vector.multi_reduction <add>, %730, %cst_350 [1] : vector<2x32xf32> to vector<2xf32>
    %732 = vector.shape_cast %731 : vector<2xf32> to vector<2x1xf32>
    %cst_351 = arith.constant 3.200000e+01 : f32
    %733 = vector.broadcast %cst_351 : f32 to vector<2x1xf32>
    %734 = arith.divf %732, %733 : vector<2x1xf32>
    %735 = vector.broadcast %727 : vector<2x1xf32> to vector<2x32xf32>
    %736 = arith.subf %721, %735 : vector<2x32xf32>
    %cst_352 = arith.constant 9.99999996E-13 : f32
    %737 = vector.broadcast %cst_352 : f32 to vector<2x1xf32>
    %738 = arith.addf %734, %737 : vector<2x1xf32>
    %739 = math.rsqrt %738 : vector<2x1xf32>
    %740 = vector.broadcast %739 : vector<2x1xf32> to vector<2x32xf32>
    %741 = arith.mulf %736, %740 : vector<2x32xf32>
    %742 = vector.broadcast %722 : vector<1x32xf32> to vector<2x32xf32>
    %743 = arith.mulf %741, %742 : vector<2x32xf32>
    %744 = vector.broadcast %723 : vector<1x32xf32> to vector<2x32xf32>
    %745 = arith.addf %743, %744 : vector<2x32xf32>
    %c0_353 = arith.constant 0 : index
    %c0_354 = arith.constant 0 : index
    %746 = vector.load %arg13[%c0_353, %c0_354] : memref<32x32xf32, #tpu.memory_space<vmem>>, vector<32x32xf32>
    %cst_355 = arith.constant dense<0.000000e+00> : vector<2x32xf32>
    %747 = tpu.matmul %745, %746, %cst_355 {dimension_numbers = #tpu.dot_dimension_numbers<[1], [0], [0], [1], [0, 0, 1, 1], [], []>} : vector<2x32xf32>, vector<32x32xf32>, vector<2x32xf32> -> vector<2x32xf32>
    %748 = vector.broadcast %4 : vector<1x32xf32> to vector<2x32xf32>
    %749 = arith.addf %747, %748 : vector<2x32xf32>
    %750 = arith.mulf %749, %749 : vector<2x32xf32>
    %751 = arith.mulf %749, %750 : vector<2x32xf32>
    %cst_356 = arith.constant 4.471500e-02 : f32
    %752 = vector.broadcast %cst_356 : f32 to vector<2x32xf32>
    %753 = arith.mulf %752, %751 : vector<2x32xf32>
    %754 = arith.addf %749, %753 : vector<2x32xf32>
    %cst_357 = arith.constant 0.797884583 : f32
    %755 = vector.broadcast %cst_357 : f32 to vector<2x32xf32>
    %756 = arith.mulf %755, %754 : vector<2x32xf32>
    %757 = math.tanh %756 : vector<2x32xf32>
    %cst_358 = arith.constant 1.000000e+00 : f32
    %758 = vector.broadcast %cst_358 : f32 to vector<2x32xf32>
    %759 = arith.addf %758, %757 : vector<2x32xf32>
    %cst_359 = arith.constant 5.000000e-01 : f32
    %760 = vector.broadcast %cst_359 : f32 to vector<2x32xf32>
    %761 = arith.mulf %760, %759 : vector<2x32xf32>
    %762 = arith.mulf %749, %761 : vector<2x32xf32>
    %c8_360 = arith.constant 8 : index
    %c0_361 = arith.constant 0 : index
    %763 = vector.load %arg3[%c8_360, %c0_361] : memref<10x32xf32, #tpu.memory_space<vmem>>, vector<1x32xf32>
    %c9_362 = arith.constant 9 : index
    %c0_363 = arith.constant 0 : index
    %764 = vector.load %arg3[%c9_362, %c0_363] : memref<10x32xf32, #tpu.memory_space<vmem>>, vector<1x32xf32>
    %cst_364 = arith.constant dense<0.000000e+00> : vector<2xf32>
    %765 = vector.multi_reduction <add>, %762, %cst_364 [1] : vector<2x32xf32> to vector<2xf32>
    %766 = vector.shape_cast %765 : vector<2xf32> to vector<2x1xf32>
    %cst_365 = arith.constant 3.200000e+01 : f32
    %767 = vector.broadcast %cst_365 : f32 to vector<2x1xf32>
    %768 = arith.divf %766, %767 : vector<2x1xf32>
    %769 = vector.broadcast %768 : vector<2x1xf32> to vector<2x32xf32>
    %770 = arith.subf %762, %769 : vector<2x32xf32>
    %771 = arith.mulf %770, %770 : vector<2x32xf32>
    %cst_366 = arith.constant dense<0.000000e+00> : vector<2xf32>
    %772 = vector.multi_reduction <add>, %771, %cst_366 [1] : vector<2x32xf32> to vector<2xf32>
    %773 = vector.shape_cast %772 : vector<2xf32> to vector<2x1xf32>
    %cst_367 = arith.constant 3.200000e+01 : f32
    %774 = vector.broadcast %cst_367 : f32 to vector<2x1xf32>
    %775 = arith.divf %773, %774 : vector<2x1xf32>
    %776 = vector.broadcast %768 : vector<2x1xf32> to vector<2x32xf32>
    %777 = arith.subf %762, %776 : vector<2x32xf32>
    %cst_368 = arith.constant 9.99999996E-13 : f32
    %778 = vector.broadcast %cst_368 : f32 to vector<2x1xf32>
    %779 = arith.addf %775, %778 : vector<2x1xf32>
    %780 = math.rsqrt %779 : vector<2x1xf32>
    %781 = vector.broadcast %780 : vector<2x1xf32> to vector<2x32xf32>
    %782 = arith.mulf %777, %781 : vector<2x32xf32>
    %783 = vector.broadcast %763 : vector<1x32xf32> to vector<2x32xf32>
    %784 = arith.mulf %782, %783 : vector<2x32xf32>
    %785 = vector.broadcast %764 : vector<1x32xf32> to vector<2x32xf32>
    %786 = arith.addf %784, %785 : vector<2x32xf32>
    %c0_369 = arith.constant 0 : index
    %c0_370 = arith.constant 0 : index
    %787 = vector.load %arg14[%c0_369, %c0_370] : memref<32x128xf32, #tpu.memory_space<vmem>>, vector<32x128xf32>
    %cst_371 = arith.constant dense<0.000000e+00> : vector<2x128xf32>
    %788 = tpu.matmul %786, %787, %cst_371 {dimension_numbers = #tpu.dot_dimension_numbers<[1], [0], [0], [1], [0, 0, 1, 1], [], []>} : vector<2x32xf32>, vector<32x128xf32>, vector<2x128xf32> -> vector<2x128xf32>
    %c0_372 = arith.constant 0 : index
    %c0_373 = arith.constant 0 : index
    %789 = vector.load %arg15[%c0_372, %c0_373] : memref<1x128xf32, #tpu.memory_space<vmem>>, vector<1x128xf32>
    %790 = vector.broadcast %789 : vector<1x128xf32> to vector<2x128xf32>
    %791 = arith.addf %788, %790 : vector<2x128xf32>
    %c64_i32_374 = arith.constant 64 : i32
    %792 = vector.broadcast %c64_i32_374 : i32 to vector<2x128xi32>
    %793 = arith.cmpi slt, %15, %792 : vector<2x128xi32>
    %cst_375 = arith.constant -1.000000e+30 : f32
    %794 = vector.broadcast %cst_375 : f32 to vector<2x128xf32>
    %795 = arith.select %793, %791, %794 : vector<2x128xi1>, vector<2x128xf32>
    %c3_376 = arith.constant 3 : index
    %c0_377 = arith.constant 0 : index
    %c0_378 = arith.constant 0 : index
    %796 = vector.load %arg17[%c3_376, %c0_377, %c0_378] : memref<8x2x128xf32, #tpu.memory_space<vmem>>, vector<1x2x128xf32>
    %797 = vector.shape_cast %796 : vector<1x2x128xf32> to vector<2x128xf32>
    %798 = vector.shape_cast %795 : vector<2x128xf32> to vector<1x2x128xf32>
    tpu.vector_store %arg17[%c3_376, %c0_377, %c0_378], %798 {strides = array<i32>} : memref<8x2x128xf32, #tpu.memory_space<vmem>>, vector<1x2x128xf32>,
    %cst_379 = arith.constant dense<0xFF800000> : vector<2xf32>
    %799 = vector.multi_reduction <maximumf>, %795, %cst_379 [1] : vector<2x128xf32> to vector<2xf32>
    %800 = vector.shape_cast %799 : vector<2xf32> to vector<2x1xf32>
    %801 = vector.broadcast %800 : vector<2x1xf32> to vector<2x128xf32>
    %802 = arith.cmpf oge, %795, %801 : vector<2x128xf32>
    %803 = arith.sitofp %15 : vector<2x128xi32> to vector<2x128xf32>
    %cst_380 = arith.constant 1.280000e+02 : f32
    %804 = vector.broadcast %cst_380 : f32 to vector<2x128xf32>
    %805 = arith.select %802, %803, %804 : vector<2x128xi1>, vector<2x128xf32>
    %cst_381 = arith.constant dense<0x7F800000> : vector<2xf32>
    %806 = vector.multi_reduction <minimumf>, %805, %cst_381 [1] : vector<2x128xf32> to vector<2xf32>
    %807 = vector.shape_cast %806 : vector<2xf32> to vector<2x1xf32>
    %808 = arith.fptosi %807 : vector<2x1xf32> to vector<2x1xi32>
    %c0_382 = arith.constant 0 : index
    %c3_383 = arith.constant 3 : index
    %809 = vector.load %arg16[%c0_382, %c3_383] : memref<2x8xi32, #tpu.memory_space<vmem>>, vector<2x1xi32>
    tpu.vector_store %arg16[%c0_382, %c3_383], %808 {strides = array<i32>} : memref<2x8xi32, #tpu.memory_space<vmem>>, vector<2x1xi32>,
    %810 = vector.broadcast %808 : vector<2x1xi32> to vector<2x128xi32>
    %811 = arith.cmpi eq, %15, %810 : vector<2x128xi32>
    %812 = arith.extui %811 : vector<2x128xi1> to vector<2x128xi32>
    %813 = arith.sitofp %812 : vector<2x128xi32> to vector<2x128xf32>
    %c0_384 = arith.constant 0 : index
    %c0_385 = arith.constant 0 : index
    %814 = vector.load %arg1[%c0_384, %c0_385] : memref<128x32xf32, #tpu.memory_space<vmem>>, vector<128x32xf32>
    %cst_386 = arith.constant dense<0.000000e+00> : vector<2x32xf32>
    %815 = tpu.matmul %813, %814, %cst_386 {dimension_numbers = #tpu.dot_dimension_numbers<[1], [0], [0], [1], [0, 0, 1, 1], [], []>} : vector<2x128xf32>, vector<128x32xf32>, vector<2x32xf32> -> vector<2x32xf32>
    %c3_387 = arith.constant 3 : index
    %c0_388 = arith.constant 0 : index
    %816 = vector.load %arg2[%c3_387, %c0_388] : memref<8x32xf32, #tpu.memory_space<vmem>>, vector<1x32xf32>
    %817 = vector.broadcast %816 : vector<1x32xf32> to vector<2x32xf32>
    %818 = arith.addf %815, %817 : vector<2x32xf32>
    %819 = vector.broadcast %5 : vector<1x32xf32> to vector<2x32xf32>
    %820 = arith.addf %818, %819 : vector<2x32xf32>
    %c0_389 = arith.constant 0 : index
    %c0_390 = arith.constant 0 : index
    %821 = vector.load %arg3[%c0_389, %c0_390] : memref<10x32xf32, #tpu.memory_space<vmem>>, vector<1x32xf32>
    %c1_391 = arith.constant 1 : index
    %c0_392 = arith.constant 0 : index
    %822 = vector.load %arg3[%c1_391, %c0_392] : memref<10x32xf32, #tpu.memory_space<vmem>>, vector<1x32xf32>
    %cst_393 = arith.constant dense<0.000000e+00> : vector<2xf32>
    %823 = vector.multi_reduction <add>, %820, %cst_393 [1] : vector<2x32xf32> to vector<2xf32>
    %824 = vector.shape_cast %823 : vector<2xf32> to vector<2x1xf32>
    %cst_394 = arith.constant 3.200000e+01 : f32
    %825 = vector.broadcast %cst_394 : f32 to vector<2x1xf32>
    %826 = arith.divf %824, %825 : vector<2x1xf32>
    %827 = vector.broadcast %826 : vector<2x1xf32> to vector<2x32xf32>
    %828 = arith.subf %820, %827 : vector<2x32xf32>
    %829 = arith.mulf %828, %828 : vector<2x32xf32>
    %cst_395 = arith.constant dense<0.000000e+00> : vector<2xf32>
    %830 = vector.multi_reduction <add>, %829, %cst_395 [1] : vector<2x32xf32> to vector<2xf32>
    %831 = vector.shape_cast %830 : vector<2xf32> to vector<2x1xf32>
    %cst_396 = arith.constant 3.200000e+01 : f32
    %832 = vector.broadcast %cst_396 : f32 to vector<2x1xf32>
    %833 = arith.divf %831, %832 : vector<2x1xf32>
    %834 = vector.broadcast %826 : vector<2x1xf32> to vector<2x32xf32>
    %835 = arith.subf %820, %834 : vector<2x32xf32>
    %cst_397 = arith.constant 9.99999996E-13 : f32
    %836 = vector.broadcast %cst_397 : f32 to vector<2x1xf32>
    %837 = arith.addf %833, %836 : vector<2x1xf32>
    %838 = math.rsqrt %837 : vector<2x1xf32>
    %839 = vector.broadcast %838 : vector<2x1xf32> to vector<2x32xf32>
    %840 = arith.mulf %835, %839 : vector<2x32xf32>
    %841 = vector.broadcast %821 : vector<1x32xf32> to vector<2x32xf32>
    %842 = arith.mulf %840, %841 : vector<2x32xf32>
    %843 = vector.broadcast %822 : vector<1x32xf32> to vector<2x32xf32>
    %844 = arith.addf %842, %843 : vector<2x32xf32>
    %c0_398 = arith.constant 0 : index
    %c0_399 = arith.constant 0 : index
    %845 = vector.load %arg5[%c0_398, %c0_399] : memref<32x96xf32, #tpu.memory_space<vmem>>, vector<32x96xf32>
    %cst_400 = arith.constant dense<0.000000e+00> : vector<2x96xf32>
    %846 = tpu.matmul %844, %845, %cst_400 {dimension_numbers = #tpu.dot_dimension_numbers<[1], [0], [0], [1], [0, 0, 1, 1], [], []>} : vector<2x32xf32>, vector<32x96xf32>, vector<2x96xf32> -> vector<2x96xf32>
    %c0_401 = arith.constant 0 : index
    %c0_402 = arith.constant 0 : index
    %847 = vector.load %arg6[%c0_401, %c0_402] : memref<1x96xf32, #tpu.memory_space<vmem>>, vector<1x96xf32>
    %848 = vector.broadcast %847 : vector<1x96xf32> to vector<2x96xf32>
    %849 = arith.addf %846, %848 : vector<2x96xf32>
    %850 = vector.extract_strided_slice %849 {offsets = [0, 0], sizes = [2, 32], strides = [1, 1]} : vector<2x96xf32> to vector<2x32xf32>
    %851 = vector.extract_strided_slice %849 {offsets = [0, 32], sizes = [2, 32], strides = [1, 1]} : vector<2x96xf32> to vector<2x32xf32>
    %852 = vector.extract_strided_slice %849 {offsets = [0, 64], sizes = [2, 32], strides = [1, 1]} : vector<2x96xf32> to vector<2x32xf32>
    %853 = vector.extract_strided_slice %851 {offsets = [0, 0], sizes = [1, 32], strides = [1, 1]} : vector<2x32xf32> to vector<1x32xf32>
    %c3_403 = arith.constant 3 : index
    %c0_404 = arith.constant 0 : index
    %854 = vector.load %arg18[%c3_403, %c0_404] : memref<16x32xf32, #tpu.memory_space<vmem>>, vector<1x32xf32>
    tpu.vector_store %arg18[%c3_403, %c0_404], %853 {strides = array<i32>} : memref<16x32xf32, #tpu.memory_space<vmem>>, vector<1x32xf32>,
    %855 = vector.extract_strided_slice %852 {offsets = [0, 0], sizes = [1, 32], strides = [1, 1]} : vector<2x32xf32> to vector<1x32xf32>
    %c3_405 = arith.constant 3 : index
    %c0_406 = arith.constant 0 : index
    %856 = vector.load %arg19[%c3_405, %c0_406] : memref<16x32xf32, #tpu.memory_space<vmem>>, vector<1x32xf32>
    tpu.vector_store %arg19[%c3_405, %c0_406], %855 {strides = array<i32>} : memref<16x32xf32, #tpu.memory_space<vmem>>, vector<1x32xf32>,
    %c0_407 = arith.constant 0 : index
    %c0_408 = arith.constant 0 : index
    %857 = vector.load %arg18[%c0_407, %c0_408] : memref<16x32xf32, #tpu.memory_space<vmem>>, vector<8x32xf32>
    %c0_409 = arith.constant 0 : index
    %c0_410 = arith.constant 0 : index
    %858 = vector.load %arg19[%c0_409, %c0_410] : memref<16x32xf32, #tpu.memory_space<vmem>>, vector<8x32xf32>
    %859 = vector.extract_strided_slice %850 {offsets = [0, 0], sizes = [1, 32], strides = [1, 1]} : vector<2x32xf32> to vector<1x32xf32>
    %860 = tpu.transpose %857, [1, 0] : vector<8x32xf32> -> vector<32x8xf32>
    %cst_411 = arith.constant dense<0.000000e+00> : vector<1x8xf32>
    %861 = tpu.matmul %859, %860, %cst_411 {dimension_numbers = #tpu.dot_dimension_numbers<[1], [0], [0], [1], [0, 0, 1, 1], [], []>} : vector<1x32xf32>, vector<32x8xf32>, vector<1x8xf32> -> vector<1x8xf32>
    %cst_412 = arith.constant 0.176776692 : f32
    %862 = vector.broadcast %cst_412 : f32 to vector<1x8xf32>
    %863 = arith.mulf %861, %862 : vector<1x8xf32>
    %c4_i32 = arith.constant 4 : i32
    %864 = vector.broadcast %c4_i32 : i32 to vector<1x8xi32>
    %865 = arith.cmpi slt, %16, %864 : vector<1x8xi32>
    %cst_413 = arith.constant -1.000000e+30 : f32
    %866 = vector.broadcast %cst_413 : f32 to vector<1x8xf32>
    %867 = arith.select %865, %863, %866 : vector<1x8xi1>, vector<1x8xf32>
    %cst_414 = arith.constant dense<0xFF800000> : vector<1xf32>
    %868 = vector.multi_reduction <maximumf>, %867, %cst_414 [1] : vector<1x8xf32> to vector<1xf32>
    %869 = vector.shape_cast %868 : vector<1xf32> to vector<1x1xf32>
    %870 = vector.broadcast %869 : vector<1x1xf32> to vector<1x8xf32>
    %871 = arith.subf %867, %870 : vector<1x8xf32>
    %872 = math.exp %871 : vector<1x8xf32>
    %cst_415 = arith.constant dense<0.000000e+00> : vector<1xf32>
    %873 = vector.multi_reduction <add>, %872, %cst_415 [1] : vector<1x8xf32> to vector<1xf32>
    %874 = vector.shape_cast %873 : vector<1xf32> to vector<1x1xf32>
    %875 = tpu.reciprocal %874 {approx = true} : vector<1x1xf32> -> vector<1x1xf32>
    %876 = vector.broadcast %875 : vector<1x1xf32> to vector<1x8xf32>
    %877 = arith.mulf %872, %876 : vector<1x8xf32>
    %cst_416 = arith.constant dense<0.000000e+00> : vector<1x32xf32>
    %878 = tpu.matmul %877, %858, %cst_416 {dimension_numbers = #tpu.dot_dimension_numbers<[1], [0], [0], [1], [0, 0, 1, 1], [], []>} : vector<1x8xf32>, vector<8x32xf32>, vector<1x32xf32> -> vector<1x32xf32>
    %879 = vector.extract_strided_slice %851 {offsets = [1, 0], sizes = [1, 32], strides = [1, 1]} : vector<2x32xf32> to vector<1x32xf32>
    %c11 = arith.constant 11 : index
    %c0_417 = arith.constant 0 : index
    %880 = vector.load %arg18[%c11, %c0_417] : memref<16x32xf32, #tpu.memory_space<vmem>>, vector<1x32xf32>
    tpu.vector_store %arg18[%c11, %c0_417], %879 {strides = array<i32>} : memref<16x32xf32, #tpu.memory_space<vmem>>, vector<1x32xf32>,
    %881 = vector.extract_strided_slice %852 {offsets = [1, 0], sizes = [1, 32], strides = [1, 1]} : vector<2x32xf32> to vector<1x32xf32>
    %c11_418 = arith.constant 11 : index
    %c0_419 = arith.constant 0 : index
    %882 = vector.load %arg19[%c11_418, %c0_419] : memref<16x32xf32, #tpu.memory_space<vmem>>, vector<1x32xf32>
    tpu.vector_store %arg19[%c11_418, %c0_419], %881 {strides = array<i32>} : memref<16x32xf32, #tpu.memory_space<vmem>>, vector<1x32xf32>,
    %c8_420 = arith.constant 8 : index
    %c0_421 = arith.constant 0 : index
    %883 = vector.load %arg18[%c8_420, %c0_421] : memref<16x32xf32, #tpu.memory_space<vmem>>, vector<8x32xf32>
    %c8_422 = arith.constant 8 : index
    %c0_423 = arith.constant 0 : index
    %884 = vector.load %arg19[%c8_422, %c0_423] : memref<16x32xf32, #tpu.memory_space<vmem>>, vector<8x32xf32>
    %885 = vector.extract_strided_slice %850 {offsets = [1, 0], sizes = [1, 32], strides = [1, 1]} : vector<2x32xf32> to vector<1x32xf32>
    %886 = tpu.transpose %883, [1, 0] : vector<8x32xf32> -> vector<32x8xf32>
    %cst_424 = arith.constant dense<0.000000e+00> : vector<1x8xf32>
    %887 = tpu.matmul %885, %886, %cst_424 {dimension_numbers = #tpu.dot_dimension_numbers<[1], [0], [0], [1], [0, 0, 1, 1], [], []>} : vector<1x32xf32>, vector<32x8xf32>, vector<1x8xf32> -> vector<1x8xf32>
    %cst_425 = arith.constant 0.176776692 : f32
    %888 = vector.broadcast %cst_425 : f32 to vector<1x8xf32>
    %889 = arith.mulf %887, %888 : vector<1x8xf32>
    %c4_i32_426 = arith.constant 4 : i32
    %890 = vector.broadcast %c4_i32_426 : i32 to vector<1x8xi32>
    %891 = arith.cmpi slt, %16, %890 : vector<1x8xi32>
    %cst_427 = arith.constant -1.000000e+30 : f32
    %892 = vector.broadcast %cst_427 : f32 to vector<1x8xf32>
    %893 = arith.select %891, %889, %892 : vector<1x8xi1>, vector<1x8xf32>
    %cst_428 = arith.constant dense<0xFF800000> : vector<1xf32>
    %894 = vector.multi_reduction <maximumf>, %893, %cst_428 [1] : vector<1x8xf32> to vector<1xf32>
    %895 = vector.shape_cast %894 : vector<1xf32> to vector<1x1xf32>
    %896 = vector.broadcast %895 : vector<1x1xf32> to vector<1x8xf32>
    %897 = arith.subf %893, %896 : vector<1x8xf32>
    %898 = math.exp %897 : vector<1x8xf32>
    %cst_429 = arith.constant dense<0.000000e+00> : vector<1xf32>
    %899 = vector.multi_reduction <add>, %898, %cst_429 [1] : vector<1x8xf32> to vector<1xf32>
    %900 = vector.shape_cast %899 : vector<1xf32> to vector<1x1xf32>
    %901 = tpu.reciprocal %900 {approx = true} : vector<1x1xf32> -> vector<1x1xf32>
    %902 = vector.broadcast %901 : vector<1x1xf32> to vector<1x8xf32>
    %903 = arith.mulf %898, %902 : vector<1x8xf32>
    %cst_430 = arith.constant dense<0.000000e+00> : vector<1x32xf32>
    %904 = tpu.matmul %903, %884, %cst_430 {dimension_numbers = #tpu.dot_dimension_numbers<[1], [0], [0], [1], [0, 0, 1, 1], [], []>} : vector<1x8xf32>, vector<8x32xf32>, vector<1x32xf32> -> vector<1x32xf32>
    %905 = tpu.concatenate %878, %904 in 0 : vector<1x32xf32>, vector<1x32xf32> -> vector<2x32xf32>
    %c0_431 = arith.constant 0 : index
    %c0_432 = arith.constant 0 : index
    %906 = vector.load %arg7[%c0_431, %c0_432] : memref<32x32xf32, #tpu.memory_space<vmem>>, vector<32x32xf32>
    %cst_433 = arith.constant dense<0.000000e+00> : vector<2x32xf32>
    %907 = tpu.matmul %905, %906, %cst_433 {dimension_numbers = #tpu.dot_dimension_numbers<[1], [0], [0], [1], [0, 0, 1, 1], [], []>} : vector<2x32xf32>, vector<32x32xf32>, vector<2x32xf32> -> vector<2x32xf32>
    %908 = vector.broadcast %0 : vector<1x32xf32> to vector<2x32xf32>
    %909 = arith.addf %907, %908 : vector<2x32xf32>
    %910 = arith.addf %909, %844 : vector<2x32xf32>
    %c2_434 = arith.constant 2 : index
    %c0_435 = arith.constant 0 : index
    %911 = vector.load %arg3[%c2_434, %c0_435] : memref<10x32xf32, #tpu.memory_space<vmem>>, vector<1x32xf32>
    %c3_436 = arith.constant 3 : index
    %c0_437 = arith.constant 0 : index
    %912 = vector.load %arg3[%c3_436, %c0_437] : memref<10x32xf32, #tpu.memory_space<vmem>>, vector<1x32xf32>
    %cst_438 = arith.constant dense<0.000000e+00> : vector<2xf32>
    %913 = vector.multi_reduction <add>, %910, %cst_438 [1] : vector<2x32xf32> to vector<2xf32>
    %914 = vector.shape_cast %913 : vector<2xf32> to vector<2x1xf32>
    %cst_439 = arith.constant 3.200000e+01 : f32
    %915 = vector.broadcast %cst_439 : f32 to vector<2x1xf32>
    %916 = arith.divf %914, %915 : vector<2x1xf32>
    %917 = vector.broadcast %916 : vector<2x1xf32> to vector<2x32xf32>
    %918 = arith.subf %910, %917 : vector<2x32xf32>
    %919 = arith.mulf %918, %918 : vector<2x32xf32>
    %cst_440 = arith.constant dense<0.000000e+00> : vector<2xf32>
    %920 = vector.multi_reduction <add>, %919, %cst_440 [1] : vector<2x32xf32> to vector<2xf32>
    %921 = vector.shape_cast %920 : vector<2xf32> to vector<2x1xf32>
    %cst_441 = arith.constant 3.200000e+01 : f32
    %922 = vector.broadcast %cst_441 : f32 to vector<2x1xf32>
    %923 = arith.divf %921, %922 : vector<2x1xf32>
    %924 = vector.broadcast %916 : vector<2x1xf32> to vector<2x32xf32>
    %925 = arith.subf %910, %924 : vector<2x32xf32>
    %cst_442 = arith.constant 9.99999996E-13 : f32
    %926 = vector.broadcast %cst_442 : f32 to vector<2x1xf32>
    %927 = arith.addf %923, %926 : vector<2x1xf32>
    %928 = math.rsqrt %927 : vector<2x1xf32>
    %929 = vector.broadcast %928 : vector<2x1xf32> to vector<2x32xf32>
    %930 = arith.mulf %925, %929 : vector<2x32xf32>
    %931 = vector.broadcast %911 : vector<1x32xf32> to vector<2x32xf32>
    %932 = arith.mulf %930, %931 : vector<2x32xf32>
    %933 = vector.broadcast %912 : vector<1x32xf32> to vector<2x32xf32>
    %934 = arith.addf %932, %933 : vector<2x32xf32>
    %935 = arith.addf %14, %934 : vector<2x32xf32>
    %c4_443 = arith.constant 4 : index
    %c0_444 = arith.constant 0 : index
    %936 = vector.load %arg3[%c4_443, %c0_444] : memref<10x32xf32, #tpu.memory_space<vmem>>, vector<1x32xf32>
    %c5_445 = arith.constant 5 : index
    %c0_446 = arith.constant 0 : index
    %937 = vector.load %arg3[%c5_445, %c0_446] : memref<10x32xf32, #tpu.memory_space<vmem>>, vector<1x32xf32>
    %cst_447 = arith.constant dense<0.000000e+00> : vector<2xf32>
    %938 = vector.multi_reduction <add>, %935, %cst_447 [1] : vector<2x32xf32> to vector<2xf32>
    %939 = vector.shape_cast %938 : vector<2xf32> to vector<2x1xf32>
    %cst_448 = arith.constant 3.200000e+01 : f32
    %940 = vector.broadcast %cst_448 : f32 to vector<2x1xf32>
    %941 = arith.divf %939, %940 : vector<2x1xf32>
    %942 = vector.broadcast %941 : vector<2x1xf32> to vector<2x32xf32>
    %943 = arith.subf %935, %942 : vector<2x32xf32>
    %944 = arith.mulf %943, %943 : vector<2x32xf32>
    %cst_449 = arith.constant dense<0.000000e+00> : vector<2xf32>
    %945 = vector.multi_reduction <add>, %944, %cst_449 [1] : vector<2x32xf32> to vector<2xf32>
    %946 = vector.shape_cast %945 : vector<2xf32> to vector<2x1xf32>
    %cst_450 = arith.constant 3.200000e+01 : f32
    %947 = vector.broadcast %cst_450 : f32 to vector<2x1xf32>
    %948 = arith.divf %946, %947 : vector<2x1xf32>
    %949 = vector.broadcast %941 : vector<2x1xf32> to vector<2x32xf32>
    %950 = arith.subf %935, %949 : vector<2x32xf32>
    %cst_451 = arith.constant 9.99999996E-13 : f32
    %951 = vector.broadcast %cst_451 : f32 to vector<2x1xf32>
    %952 = arith.addf %948, %951 : vector<2x1xf32>
    %953 = math.rsqrt %952 : vector<2x1xf32>
    %954 = vector.broadcast %953 : vector<2x1xf32> to vector<2x32xf32>
    %955 = arith.mulf %950, %954 : vector<2x32xf32>
    %956 = vector.broadcast %936 : vector<1x32xf32> to vector<2x32xf32>
    %957 = arith.mulf %955, %956 : vector<2x32xf32>
    %958 = vector.broadcast %937 : vector<1x32xf32> to vector<2x32xf32>
    %959 = arith.addf %957, %958 : vector<2x32xf32>
    %c0_452 = arith.constant 0 : index
    %c0_453 = arith.constant 0 : index
    %960 = vector.load %arg10[%c0_452, %c0_453] : memref<32x64xf32, #tpu.memory_space<vmem>>, vector<32x64xf32>
    %cst_454 = arith.constant dense<0.000000e+00> : vector<2x64xf32>
    %961 = tpu.matmul %959, %960, %cst_454 {dimension_numbers = #tpu.dot_dimension_numbers<[1], [0], [0], [1], [0, 0, 1, 1], [], []>} : vector<2x32xf32>, vector<32x64xf32>, vector<2x64xf32> -> vector<2x64xf32>
    %c0_455 = arith.constant 0 : index
    %c0_456 = arith.constant 0 : index
    %962 = vector.load %arg11[%c0_455, %c0_456] : memref<1x64xf32, #tpu.memory_space<vmem>>, vector<1x64xf32>
    %963 = vector.broadcast %962 : vector<1x64xf32> to vector<2x64xf32>
    %964 = arith.addf %961, %963 : vector<2x64xf32>
    %965 = arith.mulf %964, %964 : vector<2x64xf32>
    %966 = arith.mulf %964, %965 : vector<2x64xf32>
    %cst_457 = arith.constant 4.471500e-02 : f32
    %967 = vector.broadcast %cst_457 : f32 to vector<2x64xf32>
    %968 = arith.mulf %967, %966 : vector<2x64xf32>
    %969 = arith.addf %964, %968 : vector<2x64xf32>
    %cst_458 = arith.constant 0.797884583 : f32
    %970 = vector.broadcast %cst_458 : f32 to vector<2x64xf32>
    %971 = arith.mulf %970, %969 : vector<2x64xf32>
    %972 = math.tanh %971 : vector<2x64xf32>
    %cst_459 = arith.constant 1.000000e+00 : f32
    %973 = vector.broadcast %cst_459 : f32 to vector<2x64xf32>
    %974 = arith.addf %973, %972 : vector<2x64xf32>
    %cst_460 = arith.constant 5.000000e-01 : f32
    %975 = vector.broadcast %cst_460 : f32 to vector<2x64xf32>
    %976 = arith.mulf %975, %974 : vector<2x64xf32>
    %977 = arith.mulf %964, %976 : vector<2x64xf32>
    %c0_461 = arith.constant 0 : index
    %c0_462 = arith.constant 0 : index
    %978 = vector.load %arg12[%c0_461, %c0_462] : memref<64x32xf32, #tpu.memory_space<vmem>>, vector<64x32xf32>
    %cst_463 = arith.constant dense<0.000000e+00> : vector<2x32xf32>
    %979 = tpu.matmul %977, %978, %cst_463 {dimension_numbers = #tpu.dot_dimension_numbers<[1], [0], [0], [1], [0, 0, 1, 1], [], []>} : vector<2x64xf32>, vector<64x32xf32>, vector<2x32xf32> -> vector<2x32xf32>
    %980 = vector.broadcast %3 : vector<1x32xf32> to vector<2x32xf32>
    %981 = arith.addf %979, %980 : vector<2x32xf32>
    %982 = arith.addf %981, %959 : vector<2x32xf32>
    %c6_464 = arith.constant 6 : index
    %c0_465 = arith.constant 0 : index
    %983 = vector.load %arg3[%c6_464, %c0_465] : memref<10x32xf32, #tpu.memory_space<vmem>>, vector<1x32xf32>
    %c7_466 = arith.constant 7 : index
    %c0_467 = arith.constant 0 : index
    %984 = vector.load %arg3[%c7_466, %c0_467] : memref<10x32xf32, #tpu.memory_space<vmem>>, vector<1x32xf32>
    %cst_468 = arith.constant dense<0.000000e+00> : vector<2xf32>
    %985 = vector.multi_reduction <add>, %982, %cst_468 [1] : vector<2x32xf32> to vector<2xf32>
    %986 = vector.shape_cast %985 : vector<2xf32> to vector<2x1xf32>
    %cst_469 = arith.constant 3.200000e+01 : f32
    %987 = vector.broadcast %cst_469 : f32 to vector<2x1xf32>
    %988 = arith.divf %986, %987 : vector<2x1xf32>
    %989 = vector.broadcast %988 : vector<2x1xf32> to vector<2x32xf32>
    %990 = arith.subf %982, %989 : vector<2x32xf32>
    %991 = arith.mulf %990, %990 : vector<2x32xf32>
    %cst_470 = arith.constant dense<0.000000e+00> : vector<2xf32>
    %992 = vector.multi_reduction <add>, %991, %cst_470 [1] : vector<2x32xf32> to vector<2xf32>
    %993 = vector.shape_cast %992 : vector<2xf32> to vector<2x1xf32>
    %cst_471 = arith.constant 3.200000e+01 : f32
    %994 = vector.broadcast %cst_471 : f32 to vector<2x1xf32>
    %995 = arith.divf %993, %994 : vector<2x1xf32>
    %996 = vector.broadcast %988 : vector<2x1xf32> to vector<2x32xf32>
    %997 = arith.subf %982, %996 : vector<2x32xf32>
    %cst_472 = arith.constant 9.99999996E-13 : f32
    %998 = vector.broadcast %cst_472 : f32 to vector<2x1xf32>
    %999 = arith.addf %995, %998 : vector<2x1xf32>
    %1000 = math.rsqrt %999 : vector<2x1xf32>
    %1001 = vector.broadcast %1000 : vector<2x1xf32> to vector<2x32xf32>
    %1002 = arith.mulf %997, %1001 : vector<2x32xf32>
    %1003 = vector.broadcast %983 : vector<1x32xf32> to vector<2x32xf32>
    %1004 = arith.mulf %1002, %1003 : vector<2x32xf32>
    %1005 = vector.broadcast %984 : vector<1x32xf32> to vector<2x32xf32>
    %1006 = arith.addf %1004, %1005 : vector<2x32xf32>
    %c0_473 = arith.constant 0 : index
    %c0_474 = arith.constant 0 : index
    %1007 = vector.load %arg13[%c0_473, %c0_474] : memref<32x32xf32, #tpu.memory_space<vmem>>, vector<32x32xf32>
    %cst_475 = arith.constant dense<0.000000e+00> : vector<2x32xf32>
    %1008 = tpu.matmul %1006, %1007, %cst_475 {dimension_numbers = #tpu.dot_dimension_numbers<[1], [0], [0], [1], [0, 0, 1, 1], [], []>} : vector<2x32xf32>, vector<32x32xf32>, vector<2x32xf32> -> vector<2x32xf32>
    %1009 = vector.broadcast %4 : vector<1x32xf32> to vector<2x32xf32>
    %1010 = arith.addf %1008, %1009 : vector<2x32xf32>
    %1011 = arith.mulf %1010, %1010 : vector<2x32xf32>
    %1012 = arith.mulf %1010, %1011 : vector<2x32xf32>
    %cst_476 = arith.constant 4.471500e-02 : f32
    %1013 = vector.broadcast %cst_476 : f32 to vector<2x32xf32>
    %1014 = arith.mulf %1013, %1012 : vector<2x32xf32>
    %1015 = arith.addf %1010, %1014 : vector<2x32xf32>
    %cst_477 = arith.constant 0.797884583 : f32
    %1016 = vector.broadcast %cst_477 : f32 to vector<2x32xf32>
    %1017 = arith.mulf %1016, %1015 : vector<2x32xf32>
    %1018 = math.tanh %1017 : vector<2x32xf32>
    %cst_478 = arith.constant 1.000000e+00 : f32
    %1019 = vector.broadcast %cst_478 : f32 to vector<2x32xf32>
    %1020 = arith.addf %1019, %1018 : vector<2x32xf32>
    %cst_479 = arith.constant 5.000000e-01 : f32
    %1021 = vector.broadcast %cst_479 : f32 to vector<2x32xf32>
    %1022 = arith.mulf %1021, %1020 : vector<2x32xf32>
    %1023 = arith.mulf %1010, %1022 : vector<2x32xf32>
    %c8_480 = arith.constant 8 : index
    %c0_481 = arith.constant 0 : index
    %1024 = vector.load %arg3[%c8_480, %c0_481] : memref<10x32xf32, #tpu.memory_space<vmem>>, vector<1x32xf32>
    %c9_482 = arith.constant 9 : index
    %c0_483 = arith.constant 0 : index
    %1025 = vector.load %arg3[%c9_482, %c0_483] : memref<10x32xf32, #tpu.memory_space<vmem>>, vector<1x32xf32>
    %cst_484 = arith.constant dense<0.000000e+00> : vector<2xf32>
    %1026 = vector.multi_reduction <add>, %1023, %cst_484 [1] : vector<2x32xf32> to vector<2xf32>
    %1027 = vector.shape_cast %1026 : vector<2xf32> to vector<2x1xf32>
    %cst_485 = arith.constant 3.200000e+01 : f32
    %1028 = vector.broadcast %cst_485 : f32 to vector<2x1xf32>
    %1029 = arith.divf %1027, %1028 : vector<2x1xf32>
    %1030 = vector.broadcast %1029 : vector<2x1xf32> to vector<2x32xf32>
    %1031 = arith.subf %1023, %1030 : vector<2x32xf32>
    %1032 = arith.mulf %1031, %1031 : vector<2x32xf32>
    %cst_486 = arith.constant dense<0.000000e+00> : vector<2xf32>
    %1033 = vector.multi_reduction <add>, %1032, %cst_486 [1] : vector<2x32xf32> to vector<2xf32>
    %1034 = vector.shape_cast %1033 : vector<2xf32> to vector<2x1xf32>
    %cst_487 = arith.constant 3.200000e+01 : f32
    %1035 = vector.broadcast %cst_487 : f32 to vector<2x1xf32>
    %1036 = arith.divf %1034, %1035 : vector<2x1xf32>
    %1037 = vector.broadcast %1029 : vector<2x1xf32> to vector<2x32xf32>
    %1038 = arith.subf %1023, %1037 : vector<2x32xf32>
    %cst_488 = arith.constant 9.99999996E-13 : f32
    %1039 = vector.broadcast %cst_488 : f32 to vector<2x1xf32>
    %1040 = arith.addf %1036, %1039 : vector<2x1xf32>
    %1041 = math.rsqrt %1040 : vector<2x1xf32>
    %1042 = vector.broadcast %1041 : vector<2x1xf32> to vector<2x32xf32>
    %1043 = arith.mulf %1038, %1042 : vector<2x32xf32>
    %1044 = vector.broadcast %1024 : vector<1x32xf32> to vector<2x32xf32>
    %1045 = arith.mulf %1043, %1044 : vector<2x32xf32>
    %1046 = vector.broadcast %1025 : vector<1x32xf32> to vector<2x32xf32>
    %1047 = arith.addf %1045, %1046 : vector<2x32xf32>
    %c0_489 = arith.constant 0 : index
    %c0_490 = arith.constant 0 : index
    %1048 = vector.load %arg14[%c0_489, %c0_490] : memref<32x128xf32, #tpu.memory_space<vmem>>, vector<32x128xf32>
    %cst_491 = arith.constant dense<0.000000e+00> : vector<2x128xf32>
    %1049 = tpu.matmul %1047, %1048, %cst_491 {dimension_numbers = #tpu.dot_dimension_numbers<[1], [0], [0], [1], [0, 0, 1, 1], [], []>} : vector<2x32xf32>, vector<32x128xf32>, vector<2x128xf32> -> vector<2x128xf32>
    %c0_492 = arith.constant 0 : index
    %c0_493 = arith.constant 0 : index
    %1050 = vector.load %arg15[%c0_492, %c0_493] : memref<1x128xf32, #tpu.memory_space<vmem>>, vector<1x128xf32>
    %1051 = vector.broadcast %1050 : vector<1x128xf32> to vector<2x128xf32>
    %1052 = arith.addf %1049, %1051 : vector<2x128xf32>
    %c64_i32_494 = arith.constant 64 : i32
    %1053 = vector.broadcast %c64_i32_494 : i32 to vector<2x128xi32>
    %1054 = arith.cmpi slt, %15, %1053 : vector<2x128xi32>
    %cst_495 = arith.constant -1.000000e+30 : f32
    %1055 = vector.broadcast %cst_495 : f32 to vector<2x128xf32>
    %1056 = arith.select %1054, %1052, %1055 : vector<2x128xi1>, vector<2x128xf32>
    %c4_496 = arith.constant 4 : index
    %c0_497 = arith.constant 0 : index
    %c0_498 = arith.constant 0 : index
    %1057 = vector.load %arg17[%c4_496, %c0_497, %c0_498] : memref<8x2x128xf32, #tpu.memory_space<vmem>>, vector<1x2x128xf32>
    %1058 = vector.shape_cast %1057 : vector<1x2x128xf32> to vector<2x128xf32>
    %1059 = vector.shape_cast %1056 : vector<2x128xf32> to vector<1x2x128xf32>
    tpu.vector_store %arg17[%c4_496, %c0_497, %c0_498], %1059 {strides = array<i32>} : memref<8x2x128xf32, #tpu.memory_space<vmem>>, vector<1x2x128xf32>,
    %cst_499 = arith.constant dense<0xFF800000> : vector<2xf32>
    %1060 = vector.multi_reduction <maximumf>, %1056, %cst_499 [1] : vector<2x128xf32> to vector<2xf32>
    %1061 = vector.shape_cast %1060 : vector<2xf32> to vector<2x1xf32>
    %1062 = vector.broadcast %1061 : vector<2x1xf32> to vector<2x128xf32>
    %1063 = arith.cmpf oge, %1056, %1062 : vector<2x128xf32>
    %1064 = arith.sitofp %15 : vector<2x128xi32> to vector<2x128xf32>
    %cst_500 = arith.constant 1.280000e+02 : f32
    %1065 = vector.broadcast %cst_500 : f32 to vector<2x128xf32>
    %1066 = arith.select %1063, %1064, %1065 : vector<2x128xi1>, vector<2x128xf32>
    %cst_501 = arith.constant dense<0x7F800000> : vector<2xf32>
    %1067 = vector.multi_reduction <minimumf>, %1066, %cst_501 [1] : vector<2x128xf32> to vector<2xf32>
    %1068 = vector.shape_cast %1067 : vector<2xf32> to vector<2x1xf32>
    %1069 = arith.fptosi %1068 : vector<2x1xf32> to vector<2x1xi32>
    %c0_502 = arith.constant 0 : index
    %c4_503 = arith.constant 4 : index
    %1070 = vector.load %arg16[%c0_502, %c4_503] : memref<2x8xi32, #tpu.memory_space<vmem>>, vector<2x1xi32>
    tpu.vector_store %arg16[%c0_502, %c4_503], %1069 {strides = array<i32>} : memref<2x8xi32, #tpu.memory_space<vmem>>, vector<2x1xi32>,
    %1071 = vector.broadcast %1069 : vector<2x1xi32> to vector<2x128xi32>
    %1072 = arith.cmpi eq, %15, %1071 : vector<2x128xi32>
    %1073 = arith.extui %1072 : vector<2x128xi1> to vector<2x128xi32>
    %1074 = arith.sitofp %1073 : vector<2x128xi32> to vector<2x128xf32>
    %c0_504 = arith.constant 0 : index
    %c0_505 = arith.constant 0 : index
    %1075 = vector.load %arg1[%c0_504, %c0_505] : memref<128x32xf32, #tpu.memory_space<vmem>>, vector<128x32xf32>
    %cst_506 = arith.constant dense<0.000000e+00> : vector<2x32xf32>
    %1076 = tpu.matmul %1074, %1075, %cst_506 {dimension_numbers = #tpu.dot_dimension_numbers<[1], [0], [0], [1], [0, 0, 1, 1], [], []>} : vector<2x128xf32>, vector<128x32xf32>, vector<2x32xf32> -> vector<2x32xf32>
    %c4_507 = arith.constant 4 : index
    %c0_508 = arith.constant 0 : index
    %1077 = vector.load %arg2[%c4_507, %c0_508] : memref<8x32xf32, #tpu.memory_space<vmem>>, vector<1x32xf32>
    %1078 = vector.broadcast %1077 : vector<1x32xf32> to vector<2x32xf32>
    %1079 = arith.addf %1076, %1078 : vector<2x32xf32>
    %1080 = vector.broadcast %5 : vector<1x32xf32> to vector<2x32xf32>
    %1081 = arith.addf %1079, %1080 : vector<2x32xf32>
    %c0_509 = arith.constant 0 : index
    %c0_510 = arith.constant 0 : index
    %1082 = vector.load %arg3[%c0_509, %c0_510] : memref<10x32xf32, #tpu.memory_space<vmem>>, vector<1x32xf32>
    %c1_511 = arith.constant 1 : index
    %c0_512 = arith.constant 0 : index
    %1083 = vector.load %arg3[%c1_511, %c0_512] : memref<10x32xf32, #tpu.memory_space<vmem>>, vector<1x32xf32>
    %cst_513 = arith.constant dense<0.000000e+00> : vector<2xf32>
    %1084 = vector.multi_reduction <add>, %1081, %cst_513 [1] : vector<2x32xf32> to vector<2xf32>
    %1085 = vector.shape_cast %1084 : vector<2xf32> to vector<2x1xf32>
    %cst_514 = arith.constant 3.200000e+01 : f32
    %1086 = vector.broadcast %cst_514 : f32 to vector<2x1xf32>
    %1087 = arith.divf %1085, %1086 : vector<2x1xf32>
    %1088 = vector.broadcast %1087 : vector<2x1xf32> to vector<2x32xf32>
    %1089 = arith.subf %1081, %1088 : vector<2x32xf32>
    %1090 = arith.mulf %1089, %1089 : vector<2x32xf32>
    %cst_515 = arith.constant dense<0.000000e+00> : vector<2xf32>
    %1091 = vector.multi_reduction <add>, %1090, %cst_515 [1] : vector<2x32xf32> to vector<2xf32>
    %1092 = vector.shape_cast %1091 : vector<2xf32> to vector<2x1xf32>
    %cst_516 = arith.constant 3.200000e+01 : f32
    %1093 = vector.broadcast %cst_516 : f32 to vector<2x1xf32>
    %1094 = arith.divf %1092, %1093 : vector<2x1xf32>
    %1095 = vector.broadcast %1087 : vector<2x1xf32> to vector<2x32xf32>
    %1096 = arith.subf %1081, %1095 : vector<2x32xf32>
    %cst_517 = arith.constant 9.99999996E-13 : f32
    %1097 = vector.broadcast %cst_517 : f32 to vector<2x1xf32>
    %1098 = arith.addf %1094, %1097 : vector<2x1xf32>
    %1099 = math.rsqrt %1098 : vector<2x1xf32>
    %1100 = vector.broadcast %1099 : vector<2x1xf32> to vector<2x32xf32>
    %1101 = arith.mulf %1096, %1100 : vector<2x32xf32>
    %1102 = vector.broadcast %1082 : vector<1x32xf32> to vector<2x32xf32>
    %1103 = arith.mulf %1101, %1102 : vector<2x32xf32>
    %1104 = vector.broadcast %1083 : vector<1x32xf32> to vector<2x32xf32>
    %1105 = arith.addf %1103, %1104 : vector<2x32xf32>
    %c0_518 = arith.constant 0 : index
    %c0_519 = arith.constant 0 : index
    %1106 = vector.load %arg5[%c0_518, %c0_519] : memref<32x96xf32, #tpu.memory_space<vmem>>, vector<32x96xf32>
    %cst_520 = arith.constant dense<0.000000e+00> : vector<2x96xf32>
    %1107 = tpu.matmul %1105, %1106, %cst_520 {dimension_numbers = #tpu.dot_dimension_numbers<[1], [0], [0], [1], [0, 0, 1, 1], [], []>} : vector<2x32xf32>, vector<32x96xf32>, vector<2x96xf32> -> vector<2x96xf32>
    %c0_521 = arith.constant 0 : index
    %c0_522 = arith.constant 0 : index
    %1108 = vector.load %arg6[%c0_521, %c0_522] : memref<1x96xf32, #tpu.memory_space<vmem>>, vector<1x96xf32>
    %1109 = vector.broadcast %1108 : vector<1x96xf32> to vector<2x96xf32>
    %1110 = arith.addf %1107, %1109 : vector<2x96xf32>
    %1111 = vector.extract_strided_slice %1110 {offsets = [0, 0], sizes = [2, 32], strides = [1, 1]} : vector<2x96xf32> to vector<2x32xf32>
    %1112 = vector.extract_strided_slice %1110 {offsets = [0, 32], sizes = [2, 32], strides = [1, 1]} : vector<2x96xf32> to vector<2x32xf32>
    %1113 = vector.extract_strided_slice %1110 {offsets = [0, 64], sizes = [2, 32], strides = [1, 1]} : vector<2x96xf32> to vector<2x32xf32>
    %1114 = vector.extract_strided_slice %1112 {offsets = [0, 0], sizes = [1, 32], strides = [1, 1]} : vector<2x32xf32> to vector<1x32xf32>
    %c4_523 = arith.constant 4 : index
    %c0_524 = arith.constant 0 : index
    %1115 = vector.load %arg18[%c4_523, %c0_524] : memref<16x32xf32, #tpu.memory_space<vmem>>, vector<1x32xf32>
    tpu.vector_store %arg18[%c4_523, %c0_524], %1114 {strides = array<i32>} : memref<16x32xf32, #tpu.memory_space<vmem>>, vector<1x32xf32>,
    %1116 = vector.extract_strided_slice %1113 {offsets = [0, 0], sizes = [1, 32], strides = [1, 1]} : vector<2x32xf32> to vector<1x32xf32>
    %c4_525 = arith.constant 4 : index
    %c0_526 = arith.constant 0 : index
    %1117 = vector.load %arg19[%c4_525, %c0_526] : memref<16x32xf32, #tpu.memory_space<vmem>>, vector<1x32xf32>
    tpu.vector_store %arg19[%c4_525, %c0_526], %1116 {strides = array<i32>} : memref<16x32xf32, #tpu.memory_space<vmem>>, vector<1x32xf32>,
    %c0_527 = arith.constant 0 : index
    %c0_528 = arith.constant 0 : index
    %1118 = vector.load %arg18[%c0_527, %c0_528] : memref<16x32xf32, #tpu.memory_space<vmem>>, vector<8x32xf32>
    %c0_529 = arith.constant 0 : index
    %c0_530 = arith.constant 0 : index
    %1119 = vector.load %arg19[%c0_529, %c0_530] : memref<16x32xf32, #tpu.memory_space<vmem>>, vector<8x32xf32>
    %1120 = vector.extract_strided_slice %1111 {offsets = [0, 0], sizes = [1, 32], strides = [1, 1]} : vector<2x32xf32> to vector<1x32xf32>
    %1121 = tpu.transpose %1118, [1, 0] : vector<8x32xf32> -> vector<32x8xf32>
    %cst_531 = arith.constant dense<0.000000e+00> : vector<1x8xf32>
    %1122 = tpu.matmul %1120, %1121, %cst_531 {dimension_numbers = #tpu.dot_dimension_numbers<[1], [0], [0], [1], [0, 0, 1, 1], [], []>} : vector<1x32xf32>, vector<32x8xf32>, vector<1x8xf32> -> vector<1x8xf32>
    %cst_532 = arith.constant 0.176776692 : f32
    %1123 = vector.broadcast %cst_532 : f32 to vector<1x8xf32>
    %1124 = arith.mulf %1122, %1123 : vector<1x8xf32>
    %c5_i32 = arith.constant 5 : i32
    %1125 = vector.broadcast %c5_i32 : i32 to vector<1x8xi32>
    %1126 = arith.cmpi slt, %16, %1125 : vector<1x8xi32>
    %cst_533 = arith.constant -1.000000e+30 : f32
    %1127 = vector.broadcast %cst_533 : f32 to vector<1x8xf32>
    %1128 = arith.select %1126, %1124, %1127 : vector<1x8xi1>, vector<1x8xf32>
    %cst_534 = arith.constant dense<0xFF800000> : vector<1xf32>
    %1129 = vector.multi_reduction <maximumf>, %1128, %cst_534 [1] : vector<1x8xf32> to vector<1xf32>
    %1130 = vector.shape_cast %1129 : vector<1xf32> to vector<1x1xf32>
    %1131 = vector.broadcast %1130 : vector<1x1xf32> to vector<1x8xf32>
    %1132 = arith.subf %1128, %1131 : vector<1x8xf32>
    %1133 = math.exp %1132 : vector<1x8xf32>
    %cst_535 = arith.constant dense<0.000000e+00> : vector<1xf32>
    %1134 = vector.multi_reduction <add>, %1133, %cst_535 [1] : vector<1x8xf32> to vector<1xf32>
    %1135 = vector.shape_cast %1134 : vector<1xf32> to vector<1x1xf32>
    %1136 = tpu.reciprocal %1135 {approx = true} : vector<1x1xf32> -> vector<1x1xf32>
    %1137 = vector.broadcast %1136 : vector<1x1xf32> to vector<1x8xf32>
    %1138 = arith.mulf %1133, %1137 : vector<1x8xf32>
    %cst_536 = arith.constant dense<0.000000e+00> : vector<1x32xf32>
    %1139 = tpu.matmul %1138, %1119, %cst_536 {dimension_numbers = #tpu.dot_dimension_numbers<[1], [0], [0], [1], [0, 0, 1, 1], [], []>} : vector<1x8xf32>, vector<8x32xf32>, vector<1x32xf32> -> vector<1x32xf32>
    %1140 = vector.extract_strided_slice %1112 {offsets = [1, 0], sizes = [1, 32], strides = [1, 1]} : vector<2x32xf32> to vector<1x32xf32>
    %c12 = arith.constant 12 : index
    %c0_537 = arith.constant 0 : index
    %1141 = vector.load %arg18[%c12, %c0_537] : memref<16x32xf32, #tpu.memory_space<vmem>>, vector<1x32xf32>
    tpu.vector_store %arg18[%c12, %c0_537], %1140 {strides = array<i32>} : memref<16x32xf32, #tpu.memory_space<vmem>>, vector<1x32xf32>,
    %1142 = vector.extract_strided_slice %1113 {offsets = [1, 0], sizes = [1, 32], strides = [1, 1]} : vector<2x32xf32> to vector<1x32xf32>
    %c12_538 = arith.constant 12 : index
    %c0_539 = arith.constant 0 : index
    %1143 = vector.load %arg19[%c12_538, %c0_539] : memref<16x32xf32, #tpu.memory_space<vmem>>, vector<1x32xf32>
    tpu.vector_store %arg19[%c12_538, %c0_539], %1142 {strides = array<i32>} : memref<16x32xf32, #tpu.memory_space<vmem>>, vector<1x32xf32>,
    %c8_540 = arith.constant 8 : index
    %c0_541 = arith.constant 0 : index
    %1144 = vector.load %arg18[%c8_540, %c0_541] : memref<16x32xf32, #tpu.memory_space<vmem>>, vector<8x32xf32>
    %c8_542 = arith.constant 8 : index
    %c0_543 = arith.constant 0 : index
    %1145 = vector.load %arg19[%c8_542, %c0_543] : memref<16x32xf32, #tpu.memory_space<vmem>>, vector<8x32xf32>
    %1146 = vector.extract_strided_slice %1111 {offsets = [1, 0], sizes = [1, 32], strides = [1, 1]} : vector<2x32xf32> to vector<1x32xf32>
    %1147 = tpu.transpose %1144, [1, 0] : vector<8x32xf32> -> vector<32x8xf32>
    %cst_544 = arith.constant dense<0.000000e+00> : vector<1x8xf32>
    %1148 = tpu.matmul %1146, %1147, %cst_544 {dimension_numbers = #tpu.dot_dimension_numbers<[1], [0], [0], [1], [0, 0, 1, 1], [], []>} : vector<1x32xf32>, vector<32x8xf32>, vector<1x8xf32> -> vector<1x8xf32>
    %cst_545 = arith.constant 0.176776692 : f32
    %1149 = vector.broadcast %cst_545 : f32 to vector<1x8xf32>
    %1150 = arith.mulf %1148, %1149 : vector<1x8xf32>
    %c5_i32_546 = arith.constant 5 : i32
    %1151 = vector.broadcast %c5_i32_546 : i32 to vector<1x8xi32>
    %1152 = arith.cmpi slt, %16, %1151 : vector<1x8xi32>
    %cst_547 = arith.constant -1.000000e+30 : f32
    %1153 = vector.broadcast %cst_547 : f32 to vector<1x8xf32>
    %1154 = arith.select %1152, %1150, %1153 : vector<1x8xi1>, vector<1x8xf32>
    %cst_548 = arith.constant dense<0xFF800000> : vector<1xf32>
    %1155 = vector.multi_reduction <maximumf>, %1154, %cst_548 [1] : vector<1x8xf32> to vector<1xf32>
    %1156 = vector.shape_cast %1155 : vector<1xf32> to vector<1x1xf32>
    %1157 = vector.broadcast %1156 : vector<1x1xf32> to vector<1x8xf32>
    %1158 = arith.subf %1154, %1157 : vector<1x8xf32>
    %1159 = math.exp %1158 : vector<1x8xf32>
    %cst_549 = arith.constant dense<0.000000e+00> : vector<1xf32>
    %1160 = vector.multi_reduction <add>, %1159, %cst_549 [1] : vector<1x8xf32> to vector<1xf32>
    %1161 = vector.shape_cast %1160 : vector<1xf32> to vector<1x1xf32>
    %1162 = tpu.reciprocal %1161 {approx = true} : vector<1x1xf32> -> vector<1x1xf32>
    %1163 = vector.broadcast %1162 : vector<1x1xf32> to vector<1x8xf32>
    %1164 = arith.mulf %1159, %1163 : vector<1x8xf32>
    %cst_550 = arith.constant dense<0.000000e+00> : vector<1x32xf32>
    %1165 = tpu.matmul %1164, %1145, %cst_550 {dimension_numbers = #tpu.dot_dimension_numbers<[1], [0], [0], [1], [0, 0, 1, 1], [], []>} : vector<1x8xf32>, vector<8x32xf32>, vector<1x32xf32> -> vector<1x32xf32>
    %1166 = tpu.concatenate %1139, %1165 in 0 : vector<1x32xf32>, vector<1x32xf32> -> vector<2x32xf32>
    %c0_551 = arith.constant 0 : index
    %c0_552 = arith.constant 0 : index
    %1167 = vector.load %arg7[%c0_551, %c0_552] : memref<32x32xf32, #tpu.memory_space<vmem>>, vector<32x32xf32>
    %cst_553 = arith.constant dense<0.000000e+00> : vector<2x32xf32>
    %1168 = tpu.matmul %1166, %1167, %cst_553 {dimension_numbers = #tpu.dot_dimension_numbers<[1], [0], [0], [1], [0, 0, 1, 1], [], []>} : vector<2x32xf32>, vector<32x32xf32>, vector<2x32xf32> -> vector<2x32xf32>
    %1169 = vector.broadcast %0 : vector<1x32xf32> to vector<2x32xf32>
    %1170 = arith.addf %1168, %1169 : vector<2x32xf32>
    %1171 = arith.addf %1170, %1105 : vector<2x32xf32>
    %c2_554 = arith.constant 2 : index
    %c0_555 = arith.constant 0 : index
    %1172 = vector.load %arg3[%c2_554, %c0_555] : memref<10x32xf32, #tpu.memory_space<vmem>>, vector<1x32xf32>
    %c3_556 = arith.constant 3 : index
    %c0_557 = arith.constant 0 : index
    %1173 = vector.load %arg3[%c3_556, %c0_557] : memref<10x32xf32, #tpu.memory_space<vmem>>, vector<1x32xf32>
    %cst_558 = arith.constant dense<0.000000e+00> : vector<2xf32>
    %1174 = vector.multi_reduction <add>, %1171, %cst_558 [1] : vector<2x32xf32> to vector<2xf32>
    %1175 = vector.shape_cast %1174 : vector<2xf32> to vector<2x1xf32>
    %cst_559 = arith.constant 3.200000e+01 : f32
    %1176 = vector.broadcast %cst_559 : f32 to vector<2x1xf32>
    %1177 = arith.divf %1175, %1176 : vector<2x1xf32>
    %1178 = vector.broadcast %1177 : vector<2x1xf32> to vector<2x32xf32>
    %1179 = arith.subf %1171, %1178 : vector<2x32xf32>
    %1180 = arith.mulf %1179, %1179 : vector<2x32xf32>
    %cst_560 = arith.constant dense<0.000000e+00> : vector<2xf32>
    %1181 = vector.multi_reduction <add>, %1180, %cst_560 [1] : vector<2x32xf32> to vector<2xf32>
    %1182 = vector.shape_cast %1181 : vector<2xf32> to vector<2x1xf32>
    %cst_561 = arith.constant 3.200000e+01 : f32
    %1183 = vector.broadcast %cst_561 : f32 to vector<2x1xf32>
    %1184 = arith.divf %1182, %1183 : vector<2x1xf32>
    %1185 = vector.broadcast %1177 : vector<2x1xf32> to vector<2x32xf32>
    %1186 = arith.subf %1171, %1185 : vector<2x32xf32>
    %cst_562 = arith.constant 9.99999996E-13 : f32
    %1187 = vector.broadcast %cst_562 : f32 to vector<2x1xf32>
    %1188 = arith.addf %1184, %1187 : vector<2x1xf32>
    %1189 = math.rsqrt %1188 : vector<2x1xf32>
    %1190 = vector.broadcast %1189 : vector<2x1xf32> to vector<2x32xf32>
    %1191 = arith.mulf %1186, %1190 : vector<2x32xf32>
    %1192 = vector.broadcast %1172 : vector<1x32xf32> to vector<2x32xf32>
    %1193 = arith.mulf %1191, %1192 : vector<2x32xf32>
    %1194 = vector.broadcast %1173 : vector<1x32xf32> to vector<2x32xf32>
    %1195 = arith.addf %1193, %1194 : vector<2x32xf32>
    %1196 = arith.addf %14, %1195 : vector<2x32xf32>
    %c4_563 = arith.constant 4 : index
    %c0_564 = arith.constant 0 : index
    %1197 = vector.load %arg3[%c4_563, %c0_564] : memref<10x32xf32, #tpu.memory_space<vmem>>, vector<1x32xf32>
    %c5_565 = arith.constant 5 : index
    %c0_566 = arith.constant 0 : index
    %1198 = vector.load %arg3[%c5_565, %c0_566] : memref<10x32xf32, #tpu.memory_space<vmem>>, vector<1x32xf32>
    %cst_567 = arith.constant dense<0.000000e+00> : vector<2xf32>
    %1199 = vector.multi_reduction <add>, %1196, %cst_567 [1] : vector<2x32xf32> to vector<2xf32>
    %1200 = vector.shape_cast %1199 : vector<2xf32> to vector<2x1xf32>
    %cst_568 = arith.constant 3.200000e+01 : f32
    %1201 = vector.broadcast %cst_568 : f32 to vector<2x1xf32>
    %1202 = arith.divf %1200, %1201 : vector<2x1xf32>
    %1203 = vector.broadcast %1202 : vector<2x1xf32> to vector<2x32xf32>
    %1204 = arith.subf %1196, %1203 : vector<2x32xf32>
    %1205 = arith.mulf %1204, %1204 : vector<2x32xf32>
    %cst_569 = arith.constant dense<0.000000e+00> : vector<2xf32>
    %1206 = vector.multi_reduction <add>, %1205, %cst_569 [1] : vector<2x32xf32> to vector<2xf32>
    %1207 = vector.shape_cast %1206 : vector<2xf32> to vector<2x1xf32>
    %cst_570 = arith.constant 3.200000e+01 : f32
    %1208 = vector.broadcast %cst_570 : f32 to vector<2x1xf32>
    %1209 = arith.divf %1207, %1208 : vector<2x1xf32>
    %1210 = vector.broadcast %1202 : vector<2x1xf32> to vector<2x32xf32>
    %1211 = arith.subf %1196, %1210 : vector<2x32xf32>
    %cst_571 = arith.constant 9.99999996E-13 : f32
    %1212 = vector.broadcast %cst_571 : f32 to vector<2x1xf32>
    %1213 = arith.addf %1209, %1212 : vector<2x1xf32>
    %1214 = math.rsqrt %1213 : vector<2x1xf32>
    %1215 = vector.broadcast %1214 : vector<2x1xf32> to vector<2x32xf32>
    %1216 = arith.mulf %1211, %1215 : vector<2x32xf32>
    %1217 = vector.broadcast %1197 : vector<1x32xf32> to vector<2x32xf32>
    %1218 = arith.mulf %1216, %1217 : vector<2x32xf32>
    %1219 = vector.broadcast %1198 : vector<1x32xf32> to vector<2x32xf32>
    %1220 = arith.addf %1218, %1219 : vector<2x32xf32>
    %c0_572 = arith.constant 0 : index
    %c0_573 = arith.constant 0 : index
    %1221 = vector.load %arg10[%c0_572, %c0_573] : memref<32x64xf32, #tpu.memory_space<vmem>>, vector<32x64xf32>
    %cst_574 = arith.constant dense<0.000000e+00> : vector<2x64xf32>
    %1222 = tpu.matmul %1220, %1221, %cst_574 {dimension_numbers = #tpu.dot_dimension_numbers<[1], [0], [0], [1], [0, 0, 1, 1], [], []>} : vector<2x32xf32>, vector<32x64xf32>, vector<2x64xf32> -> vector<2x64xf32>
    %c0_575 = arith.constant 0 : index
    %c0_576 = arith.constant 0 : index
    %1223 = vector.load %arg11[%c0_575, %c0_576] : memref<1x64xf32, #tpu.memory_space<vmem>>, vector<1x64xf32>
    %1224 = vector.broadcast %1223 : vector<1x64xf32> to vector<2x64xf32>
    %1225 = arith.addf %1222, %1224 : vector<2x64xf32>
    %1226 = arith.mulf %1225, %1225 : vector<2x64xf32>
    %1227 = arith.mulf %1225, %1226 : vector<2x64xf32>
    %cst_577 = arith.constant 4.471500e-02 : f32
    %1228 = vector.broadcast %cst_577 : f32 to vector<2x64xf32>
    %1229 = arith.mulf %1228, %1227 : vector<2x64xf32>
    %1230 = arith.addf %1225, %1229 : vector<2x64xf32>
    %cst_578 = arith.constant 0.797884583 : f32
    %1231 = vector.broadcast %cst_578 : f32 to vector<2x64xf32>
    %1232 = arith.mulf %1231, %1230 : vector<2x64xf32>
    %1233 = math.tanh %1232 : vector<2x64xf32>
    %cst_579 = arith.constant 1.000000e+00 : f32
    %1234 = vector.broadcast %cst_579 : f32 to vector<2x64xf32>
    %1235 = arith.addf %1234, %1233 : vector<2x64xf32>
    %cst_580 = arith.constant 5.000000e-01 : f32
    %1236 = vector.broadcast %cst_580 : f32 to vector<2x64xf32>
    %1237 = arith.mulf %1236, %1235 : vector<2x64xf32>
    %1238 = arith.mulf %1225, %1237 : vector<2x64xf32>
    %c0_581 = arith.constant 0 : index
    %c0_582 = arith.constant 0 : index
    %1239 = vector.load %arg12[%c0_581, %c0_582] : memref<64x32xf32, #tpu.memory_space<vmem>>, vector<64x32xf32>
    %cst_583 = arith.constant dense<0.000000e+00> : vector<2x32xf32>
    %1240 = tpu.matmul %1238, %1239, %cst_583 {dimension_numbers = #tpu.dot_dimension_numbers<[1], [0], [0], [1], [0, 0, 1, 1], [], []>} : vector<2x64xf32>, vector<64x32xf32>, vector<2x32xf32> -> vector<2x32xf32>
    %1241 = vector.broadcast %3 : vector<1x32xf32> to vector<2x32xf32>
    %1242 = arith.addf %1240, %1241 : vector<2x32xf32>
    %1243 = arith.addf %1242, %1220 : vector<2x32xf32>
    %c6_584 = arith.constant 6 : index
    %c0_585 = arith.constant 0 : index
    %1244 = vector.load %arg3[%c6_584, %c0_585] : memref<10x32xf32, #tpu.memory_space<vmem>>, vector<1x32xf32>
    %c7_586 = arith.constant 7 : index
    %c0_587 = arith.constant 0 : index
    %1245 = vector.load %arg3[%c7_586, %c0_587] : memref<10x32xf32, #tpu.memory_space<vmem>>, vector<1x32xf32>
    %cst_588 = arith.constant dense<0.000000e+00> : vector<2xf32>
    %1246 = vector.multi_reduction <add>, %1243, %cst_588 [1] : vector<2x32xf32> to vector<2xf32>
    %1247 = vector.shape_cast %1246 : vector<2xf32> to vector<2x1xf32>
    %cst_589 = arith.constant 3.200000e+01 : f32
    %1248 = vector.broadcast %cst_589 : f32 to vector<2x1xf32>
    %1249 = arith.divf %1247, %1248 : vector<2x1xf32>
    %1250 = vector.broadcast %1249 : vector<2x1xf32> to vector<2x32xf32>
    %1251 = arith.subf %1243, %1250 : vector<2x32xf32>
    %1252 = arith.mulf %1251, %1251 : vector<2x32xf32>
    %cst_590 = arith.constant dense<0.000000e+00> : vector<2xf32>
    %1253 = vector.multi_reduction <add>, %1252, %cst_590 [1] : vector<2x32xf32> to vector<2xf32>
    %1254 = vector.shape_cast %1253 : vector<2xf32> to vector<2x1xf32>
    %cst_591 = arith.constant 3.200000e+01 : f32
    %1255 = vector.broadcast %cst_591 : f32 to vector<2x1xf32>
    %1256 = arith.divf %1254, %1255 : vector<2x1xf32>
    %1257 = vector.broadcast %1249 : vector<2x1xf32> to vector<2x32xf32>
    %1258 = arith.subf %1243, %1257 : vector<2x32xf32>
    %cst_592 = arith.constant 9.99999996E-13 : f32
    %1259 = vector.broadcast %cst_592 : f32 to vector<2x1xf32>
    %1260 = arith.addf %1256, %1259 : vector<2x1xf32>
    %1261 = math.rsqrt %1260 : vector<2x1xf32>
    %1262 = vector.broadcast %1261 : vector<2x1xf32> to vector<2x32xf32>
    %1263 = arith.mulf %1258, %1262 : vector<2x32xf32>
    %1264 = vector.broadcast %1244 : vector<1x32xf32> to vector<2x32xf32>
    %1265 = arith.mulf %1263, %1264 : vector<2x32xf32>
    %1266 = vector.broadcast %1245 : vector<1x32xf32> to vector<2x32xf32>
    %1267 = arith.addf %1265, %1266 : vector<2x32xf32>
    %c0_593 = arith.constant 0 : index
    %c0_594 = arith.constant 0 : index
    %1268 = vector.load %arg13[%c0_593, %c0_594] : memref<32x32xf32, #tpu.memory_space<vmem>>, vector<32x32xf32>
    %cst_595 = arith.constant dense<0.000000e+00> : vector<2x32xf32>
    %1269 = tpu.matmul %1267, %1268, %cst_595 {dimension_numbers = #tpu.dot_dimension_numbers<[1], [0], [0], [1], [0, 0, 1, 1], [], []>} : vector<2x32xf32>, vector<32x32xf32>, vector<2x32xf32> -> vector<2x32xf32>
    %1270 = vector.broadcast %4 : vector<1x32xf32> to vector<2x32xf32>
    %1271 = arith.addf %1269, %1270 : vector<2x32xf32>
    %1272 = arith.mulf %1271, %1271 : vector<2x32xf32>
    %1273 = arith.mulf %1271, %1272 : vector<2x32xf32>
    %cst_596 = arith.constant 4.471500e-02 : f32
    %1274 = vector.broadcast %cst_596 : f32 to vector<2x32xf32>
    %1275 = arith.mulf %1274, %1273 : vector<2x32xf32>
    %1276 = arith.addf %1271, %1275 : vector<2x32xf32>
    %cst_597 = arith.constant 0.797884583 : f32
    %1277 = vector.broadcast %cst_597 : f32 to vector<2x32xf32>
    %1278 = arith.mulf %1277, %1276 : vector<2x32xf32>
    %1279 = math.tanh %1278 : vector<2x32xf32>
    %cst_598 = arith.constant 1.000000e+00 : f32
    %1280 = vector.broadcast %cst_598 : f32 to vector<2x32xf32>
    %1281 = arith.addf %1280, %1279 : vector<2x32xf32>
    %cst_599 = arith.constant 5.000000e-01 : f32
    %1282 = vector.broadcast %cst_599 : f32 to vector<2x32xf32>
    %1283 = arith.mulf %1282, %1281 : vector<2x32xf32>
    %1284 = arith.mulf %1271, %1283 : vector<2x32xf32>
    %c8_600 = arith.constant 8 : index
    %c0_601 = arith.constant 0 : index
    %1285 = vector.load %arg3[%c8_600, %c0_601] : memref<10x32xf32, #tpu.memory_space<vmem>>, vector<1x32xf32>
    %c9_602 = arith.constant 9 : index
    %c0_603 = arith.constant 0 : index
    %1286 = vector.load %arg3[%c9_602, %c0_603] : memref<10x32xf32, #tpu.memory_space<vmem>>, vector<1x32xf32>
    %cst_604 = arith.constant dense<0.000000e+00> : vector<2xf32>
    %1287 = vector.multi_reduction <add>, %1284, %cst_604 [1] : vector<2x32xf32> to vector<2xf32>
    %1288 = vector.shape_cast %1287 : vector<2xf32> to vector<2x1xf32>
    %cst_605 = arith.constant 3.200000e+01 : f32
    %1289 = vector.broadcast %cst_605 : f32 to vector<2x1xf32>
    %1290 = arith.divf %1288, %1289 : vector<2x1xf32>
    %1291 = vector.broadcast %1290 : vector<2x1xf32> to vector<2x32xf32>
    %1292 = arith.subf %1284, %1291 : vector<2x32xf32>
    %1293 = arith.mulf %1292, %1292 : vector<2x32xf32>
    %cst_606 = arith.constant dense<0.000000e+00> : vector<2xf32>
    %1294 = vector.multi_reduction <add>, %1293, %cst_606 [1] : vector<2x32xf32> to vector<2xf32>
    %1295 = vector.shape_cast %1294 : vector<2xf32> to vector<2x1xf32>
    %cst_607 = arith.constant 3.200000e+01 : f32
    %1296 = vector.broadcast %cst_607 : f32 to vector<2x1xf32>
    %1297 = arith.divf %1295, %1296 : vector<2x1xf32>
    %1298 = vector.broadcast %1290 : vector<2x1xf32> to vector<2x32xf32>
    %1299 = arith.subf %1284, %1298 : vector<2x32xf32>
    %cst_608 = arith.constant 9.99999996E-13 : f32
    %1300 = vector.broadcast %cst_608 : f32 to vector<2x1xf32>
    %1301 = arith.addf %1297, %1300 : vector<2x1xf32>
    %1302 = math.rsqrt %1301 : vector<2x1xf32>
    %1303 = vector.broadcast %1302 : vector<2x1xf32> to vector<2x32xf32>
    %1304 = arith.mulf %1299, %1303 : vector<2x32xf32>
    %1305 = vector.broadcast %1285 : vector<1x32xf32> to vector<2x32xf32>
    %1306 = arith.mulf %1304, %1305 : vector<2x32xf32>
    %1307 = vector.broadcast %1286 : vector<1x32xf32> to vector<2x32xf32>
    %1308 = arith.addf %1306, %1307 : vector<2x32xf32>
    %c0_609 = arith.constant 0 : index
    %c0_610 = arith.constant 0 : index
    %1309 = vector.load %arg14[%c0_609, %c0_610] : memref<32x128xf32, #tpu.memory_space<vmem>>, vector<32x128xf32>
    %cst_611 = arith.constant dense<0.000000e+00> : vector<2x128xf32>
    %1310 = tpu.matmul %1308, %1309, %cst_611 {dimension_numbers = #tpu.dot_dimension_numbers<[1], [0], [0], [1], [0, 0, 1, 1], [], []>} : vector<2x32xf32>, vector<32x128xf32>, vector<2x128xf32> -> vector<2x128xf32>
    %c0_612 = arith.constant 0 : index
    %c0_613 = arith.constant 0 : index
    %1311 = vector.load %arg15[%c0_612, %c0_613] : memref<1x128xf32, #tpu.memory_space<vmem>>, vector<1x128xf32>
    %1312 = vector.broadcast %1311 : vector<1x128xf32> to vector<2x128xf32>
    %1313 = arith.addf %1310, %1312 : vector<2x128xf32>
    %c64_i32_614 = arith.constant 64 : i32
    %1314 = vector.broadcast %c64_i32_614 : i32 to vector<2x128xi32>
    %1315 = arith.cmpi slt, %15, %1314 : vector<2x128xi32>
    %cst_615 = arith.constant -1.000000e+30 : f32
    %1316 = vector.broadcast %cst_615 : f32 to vector<2x128xf32>
    %1317 = arith.select %1315, %1313, %1316 : vector<2x128xi1>, vector<2x128xf32>
    %c5_616 = arith.constant 5 : index
    %c0_617 = arith.constant 0 : index
    %c0_618 = arith.constant 0 : index
    %1318 = vector.load %arg17[%c5_616, %c0_617, %c0_618] : memref<8x2x128xf32, #tpu.memory_space<vmem>>, vector<1x2x128xf32>
    %1319 = vector.shape_cast %1318 : vector<1x2x128xf32> to vector<2x128xf32>
    %1320 = vector.shape_cast %1317 : vector<2x128xf32> to vector<1x2x128xf32>
    tpu.vector_store %arg17[%c5_616, %c0_617, %c0_618], %1320 {strides = array<i32>} : memref<8x2x128xf32, #tpu.memory_space<vmem>>, vector<1x2x128xf32>,
    %cst_619 = arith.constant dense<0xFF800000> : vector<2xf32>
    %1321 = vector.multi_reduction <maximumf>, %1317, %cst_619 [1] : vector<2x128xf32> to vector<2xf32>
    %1322 = vector.shape_cast %1321 : vector<2xf32> to vector<2x1xf32>
    %1323 = vector.broadcast %1322 : vector<2x1xf32> to vector<2x128xf32>
    %1324 = arith.cmpf oge, %1317, %1323 : vector<2x128xf32>
    %1325 = arith.sitofp %15 : vector<2x128xi32> to vector<2x128xf32>
    %cst_620 = arith.constant 1.280000e+02 : f32
    %1326 = vector.broadcast %cst_620 : f32 to vector<2x128xf32>
    %1327 = arith.select %1324, %1325, %1326 : vector<2x128xi1>, vector<2x128xf32>
    %cst_621 = arith.constant dense<0x7F800000> : vector<2xf32>
    %1328 = vector.multi_reduction <minimumf>, %1327, %cst_621 [1] : vector<2x128xf32> to vector<2xf32>
    %1329 = vector.shape_cast %1328 : vector<2xf32> to vector<2x1xf32>
    %1330 = arith.fptosi %1329 : vector<2x1xf32> to vector<2x1xi32>
    %c0_622 = arith.constant 0 : index
    %c5_623 = arith.constant 5 : index
    %1331 = vector.load %arg16[%c0_622, %c5_623] : memref<2x8xi32, #tpu.memory_space<vmem>>, vector<2x1xi32>
    tpu.vector_store %arg16[%c0_622, %c5_623], %1330 {strides = array<i32>} : memref<2x8xi32, #tpu.memory_space<vmem>>, vector<2x1xi32>,
    %1332 = vector.broadcast %1330 : vector<2x1xi32> to vector<2x128xi32>
    %1333 = arith.cmpi eq, %15, %1332 : vector<2x128xi32>
    %1334 = arith.extui %1333 : vector<2x128xi1> to vector<2x128xi32>
    %1335 = arith.sitofp %1334 : vector<2x128xi32> to vector<2x128xf32>
    %c0_624 = arith.constant 0 : index
    %c0_625 = arith.constant 0 : index
    %1336 = vector.load %arg1[%c0_624, %c0_625] : memref<128x32xf32, #tpu.memory_space<vmem>>, vector<128x32xf32>
    %cst_626 = arith.constant dense<0.000000e+00> : vector<2x32xf32>
    %1337 = tpu.matmul %1335, %1336, %cst_626 {dimension_numbers = #tpu.dot_dimension_numbers<[1], [0], [0], [1], [0, 0, 1, 1], [], []>} : vector<2x128xf32>, vector<128x32xf32>, vector<2x32xf32> -> vector<2x32xf32>
    %c5_627 = arith.constant 5 : index
    %c0_628 = arith.constant 0 : index
    %1338 = vector.load %arg2[%c5_627, %c0_628] : memref<8x32xf32, #tpu.memory_space<vmem>>, vector<1x32xf32>
    %1339 = vector.broadcast %1338 : vector<1x32xf32> to vector<2x32xf32>
    %1340 = arith.addf %1337, %1339 : vector<2x32xf32>
    %1341 = vector.broadcast %5 : vector<1x32xf32> to vector<2x32xf32>
    %1342 = arith.addf %1340, %1341 : vector<2x32xf32>
    %c0_629 = arith.constant 0 : index
    %c0_630 = arith.constant 0 : index
    %1343 = vector.load %arg3[%c0_629, %c0_630] : memref<10x32xf32, #tpu.memory_space<vmem>>, vector<1x32xf32>
    %c1_631 = arith.constant 1 : index
    %c0_632 = arith.constant 0 : index
    %1344 = vector.load %arg3[%c1_631, %c0_632] : memref<10x32xf32, #tpu.memory_space<vmem>>, vector<1x32xf32>
    %cst_633 = arith.constant dense<0.000000e+00> : vector<2xf32>
    %1345 = vector.multi_reduction <add>, %1342, %cst_633 [1] : vector<2x32xf32> to vector<2xf32>
    %1346 = vector.shape_cast %1345 : vector<2xf32> to vector<2x1xf32>
    %cst_634 = arith.constant 3.200000e+01 : f32
    %1347 = vector.broadcast %cst_634 : f32 to vector<2x1xf32>
    %1348 = arith.divf %1346, %1347 : vector<2x1xf32>
    %1349 = vector.broadcast %1348 : vector<2x1xf32> to vector<2x32xf32>
    %1350 = arith.subf %1342, %1349 : vector<2x32xf32>
    %1351 = arith.mulf %1350, %1350 : vector<2x32xf32>
    %cst_635 = arith.constant dense<0.000000e+00> : vector<2xf32>
    %1352 = vector.multi_reduction <add>, %1351, %cst_635 [1] : vector<2x32xf32> to vector<2xf32>
    %1353 = vector.shape_cast %1352 : vector<2xf32> to vector<2x1xf32>
    %cst_636 = arith.constant 3.200000e+01 : f32
    %1354 = vector.broadcast %cst_636 : f32 to vector<2x1xf32>
    %1355 = arith.divf %1353, %1354 : vector<2x1xf32>
    %1356 = vector.broadcast %1348 : vector<2x1xf32> to vector<2x32xf32>
    %1357 = arith.subf %1342, %1356 : vector<2x32xf32>
    %cst_637 = arith.constant 9.99999996E-13 : f32
    %1358 = vector.broadcast %cst_637 : f32 to vector<2x1xf32>
    %1359 = arith.addf %1355, %1358 : vector<2x1xf32>
    %1360 = math.rsqrt %1359 : vector<2x1xf32>
    %1361 = vector.broadcast %1360 : vector<2x1xf32> to vector<2x32xf32>
    %1362 = arith.mulf %1357, %1361 : vector<2x32xf32>
    %1363 = vector.broadcast %1343 : vector<1x32xf32> to vector<2x32xf32>
    %1364 = arith.mulf %1362, %1363 : vector<2x32xf32>
    %1365 = vector.broadcast %1344 : vector<1x32xf32> to vector<2x32xf32>
    %1366 = arith.addf %1364, %1365 : vector<2x32xf32>
    %c0_638 = arith.constant 0 : index
    %c0_639 = arith.constant 0 : index
    %1367 = vector.load %arg5[%c0_638, %c0_639] : memref<32x96xf32, #tpu.memory_space<vmem>>, vector<32x96xf32>
    %cst_640 = arith.constant dense<0.000000e+00> : vector<2x96xf32>
    %1368 = tpu.matmul %1366, %1367, %cst_640 {dimension_numbers = #tpu.dot_dimension_numbers<[1], [0], [0], [1], [0, 0, 1, 1], [], []>} : vector<2x32xf32>, vector<32x96xf32>, vector<2x96xf32> -> vector<2x96xf32>
    %c0_641 = arith.constant 0 : index
    %c0_642 = arith.constant 0 : index
    %1369 = vector.load %arg6[%c0_641, %c0_642] : memref<1x96xf32, #tpu.memory_space<vmem>>, vector<1x96xf32>
    %1370 = vector.broadcast %1369 : vector<1x96xf32> to vector<2x96xf32>
    %1371 = arith.addf %1368, %1370 : vector<2x96xf32>
    %1372 = vector.extract_strided_slice %1371 {offsets = [0, 0], sizes = [2, 32], strides = [1, 1]} : vector<2x96xf32> to vector<2x32xf32>
    %1373 = vector.extract_strided_slice %1371 {offsets = [0, 32], sizes = [2, 32], strides = [1, 1]} : vector<2x96xf32> to vector<2x32xf32>
    %1374 = vector.extract_strided_slice %1371 {offsets = [0, 64], sizes = [2, 32], strides = [1, 1]} : vector<2x96xf32> to vector<2x32xf32>
    %1375 = vector.extract_strided_slice %1373 {offsets = [0, 0], sizes = [1, 32], strides = [1, 1]} : vector<2x32xf32> to vector<1x32xf32>
    %c5_643 = arith.constant 5 : index
    %c0_644 = arith.constant 0 : index
    %1376 = vector.load %arg18[%c5_643, %c0_644] : memref<16x32xf32, #tpu.memory_space<vmem>>, vector<1x32xf32>
    tpu.vector_store %arg18[%c5_643, %c0_644], %1375 {strides = array<i32>} : memref<16x32xf32, #tpu.memory_space<vmem>>, vector<1x32xf32>,
    %1377 = vector.extract_strided_slice %1374 {offsets = [0, 0], sizes = [1, 32], strides = [1, 1]} : vector<2x32xf32> to vector<1x32xf32>
    %c5_645 = arith.constant 5 : index
    %c0_646 = arith.constant 0 : index
    %1378 = vector.load %arg19[%c5_645, %c0_646] : memref<16x32xf32, #tpu.memory_space<vmem>>, vector<1x32xf32>
    tpu.vector_store %arg19[%c5_645, %c0_646], %1377 {strides = array<i32>} : memref<16x32xf32, #tpu.memory_space<vmem>>, vector<1x32xf32>,
    %c0_647 = arith.constant 0 : index
    %c0_648 = arith.constant 0 : index
    %1379 = vector.load %arg18[%c0_647, %c0_648] : memref<16x32xf32, #tpu.memory_space<vmem>>, vector<8x32xf32>
    %c0_649 = arith.constant 0 : index
    %c0_650 = arith.constant 0 : index
    %1380 = vector.load %arg19[%c0_649, %c0_650] : memref<16x32xf32, #tpu.memory_space<vmem>>, vector<8x32xf32>
    %1381 = vector.extract_strided_slice %1372 {offsets = [0, 0], sizes = [1, 32], strides = [1, 1]} : vector<2x32xf32> to vector<1x32xf32>
    %1382 = tpu.transpose %1379, [1, 0] : vector<8x32xf32> -> vector<32x8xf32>
    %cst_651 = arith.constant dense<0.000000e+00> : vector<1x8xf32>
    %1383 = tpu.matmul %1381, %1382, %cst_651 {dimension_numbers = #tpu.dot_dimension_numbers<[1], [0], [0], [1], [0, 0, 1, 1], [], []>} : vector<1x32xf32>, vector<32x8xf32>, vector<1x8xf32> -> vector<1x8xf32>
    %cst_652 = arith.constant 0.176776692 : f32
    %1384 = vector.broadcast %cst_652 : f32 to vector<1x8xf32>
    %1385 = arith.mulf %1383, %1384 : vector<1x8xf32>
    %c6_i32 = arith.constant 6 : i32
    %1386 = vector.broadcast %c6_i32 : i32 to vector<1x8xi32>
    %1387 = arith.cmpi slt, %16, %1386 : vector<1x8xi32>
    %cst_653 = arith.constant -1.000000e+30 : f32
    %1388 = vector.broadcast %cst_653 : f32 to vector<1x8xf32>
    %1389 = arith.select %1387, %1385, %1388 : vector<1x8xi1>, vector<1x8xf32>
    %cst_654 = arith.constant dense<0xFF800000> : vector<1xf32>
    %1390 = vector.multi_reduction <maximumf>, %1389, %cst_654 [1] : vector<1x8xf32> to vector<1xf32>
    %1391 = vector.shape_cast %1390 : vector<1xf32> to vector<1x1xf32>
    %1392 = vector.broadcast %1391 : vector<1x1xf32> to vector<1x8xf32>
    %1393 = arith.subf %1389, %1392 : vector<1x8xf32>
    %1394 = math.exp %1393 : vector<1x8xf32>
    %cst_655 = arith.constant dense<0.000000e+00> : vector<1xf32>
    %1395 = vector.multi_reduction <add>, %1394, %cst_655 [1] : vector<1x8xf32> to vector<1xf32>
    %1396 = vector.shape_cast %1395 : vector<1xf32> to vector<1x1xf32>
    %1397 = tpu.reciprocal %1396 {approx = true} : vector<1x1xf32> -> vector<1x1xf32>
    %1398 = vector.broadcast %1397 : vector<1x1xf32> to vector<1x8xf32>
    %1399 = arith.mulf %1394, %1398 : vector<1x8xf32>
    %cst_656 = arith.constant dense<0.000000e+00> : vector<1x32xf32>
    %1400 = tpu.matmul %1399, %1380, %cst_656 {dimension_numbers = #tpu.dot_dimension_numbers<[1], [0], [0], [1], [0, 0, 1, 1], [], []>} : vector<1x8xf32>, vector<8x32xf32>, vector<1x32xf32> -> vector<1x32xf32>
    %1401 = vector.extract_strided_slice %1373 {offsets = [1, 0], sizes = [1, 32], strides = [1, 1]} : vector<2x32xf32> to vector<1x32xf32>
    %c13 = arith.constant 13 : index
    %c0_657 = arith.constant 0 : index
    %1402 = vector.load %arg18[%c13, %c0_657] : memref<16x32xf32, #tpu.memory_space<vmem>>, vector<1x32xf32>
    tpu.vector_store %arg18[%c13, %c0_657], %1401 {strides = array<i32>} : memref<16x32xf32, #tpu.memory_space<vmem>>, vector<1x32xf32>,
    %1403 = vector.extract_strided_slice %1374 {offsets = [1, 0], sizes = [1, 32], strides = [1, 1]} : vector<2x32xf32> to vector<1x32xf32>
    %c13_658 = arith.constant 13 : index
    %c0_659 = arith.constant 0 : index
    %1404 = vector.load %arg19[%c13_658, %c0_659] : memref<16x32xf32, #tpu.memory_space<vmem>>, vector<1x32xf32>
    tpu.vector_store %arg19[%c13_658, %c0_659], %1403 {strides = array<i32>} : memref<16x32xf32, #tpu.memory_space<vmem>>, vector<1x32xf32>,
    %c8_660 = arith.constant 8 : index
    %c0_661 = arith.constant 0 : index
    %1405 = vector.load %arg18[%c8_660, %c0_661] : memref<16x32xf32, #tpu.memory_space<vmem>>, vector<8x32xf32>
    %c8_662 = arith.constant 8 : index
    %c0_663 = arith.constant 0 : index
    %1406 = vector.load %arg19[%c8_662, %c0_663] : memref<16x32xf32, #tpu.memory_space<vmem>>, vector<8x32xf32>
    %1407 = vector.extract_strided_slice %1372 {offsets = [1, 0], sizes = [1, 32], strides = [1, 1]} : vector<2x32xf32> to vector<1x32xf32>
    %1408 = tpu.transpose %1405, [1, 0] : vector<8x32xf32> -> vector<32x8xf32>
    %cst_664 = arith.constant dense<0.000000e+00> : vector<1x8xf32>
    %1409 = tpu.matmul %1407, %1408, %cst_664 {dimension_numbers = #tpu.dot_dimension_numbers<[1], [0], [0], [1], [0, 0, 1, 1], [], []>} : vector<1x32xf32>, vector<32x8xf32>, vector<1x8xf32> -> vector<1x8xf32>
    %cst_665 = arith.constant 0.176776692 : f32
    %1410 = vector.broadcast %cst_665 : f32 to vector<1x8xf32>
    %1411 = arith.mulf %1409, %1410 : vector<1x8xf32>
    %c6_i32_666 = arith.constant 6 : i32
    %1412 = vector.broadcast %c6_i32_666 : i32 to vector<1x8xi32>
    %1413 = arith.cmpi slt, %16, %1412 : vector<1x8xi32>
    %cst_667 = arith.constant -1.000000e+30 : f32
    %1414 = vector.broadcast %cst_667 : f32 to vector<1x8xf32>
    %1415 = arith.select %1413, %1411, %1414 : vector<1x8xi1>, vector<1x8xf32>
    %cst_668 = arith.constant dense<0xFF800000> : vector<1xf32>
    %1416 = vector.multi_reduction <maximumf>, %1415, %cst_668 [1] : vector<1x8xf32> to vector<1xf32>
    %1417 = vector.shape_cast %1416 : vector<1xf32> to vector<1x1xf32>
    %1418 = vector.broadcast %1417 : vector<1x1xf32> to vector<1x8xf32>
    %1419 = arith.subf %1415, %1418 : vector<1x8xf32>
    %1420 = math.exp %1419 : vector<1x8xf32>
    %cst_669 = arith.constant dense<0.000000e+00> : vector<1xf32>
    %1421 = vector.multi_reduction <add>, %1420, %cst_669 [1] : vector<1x8xf32> to vector<1xf32>
    %1422 = vector.shape_cast %1421 : vector<1xf32> to vector<1x1xf32>
    %1423 = tpu.reciprocal %1422 {approx = true} : vector<1x1xf32> -> vector<1x1xf32>
    %1424 = vector.broadcast %1423 : vector<1x1xf32> to vector<1x8xf32>
    %1425 = arith.mulf %1420, %1424 : vector<1x8xf32>
    %cst_670 = arith.constant dense<0.000000e+00> : vector<1x32xf32>
    %1426 = tpu.matmul %1425, %1406, %cst_670 {dimension_numbers = #tpu.dot_dimension_numbers<[1], [0], [0], [1], [0, 0, 1, 1], [], []>} : vector<1x8xf32>, vector<8x32xf32>, vector<1x32xf32> -> vector<1x32xf32>
    %1427 = tpu.concatenate %1400, %1426 in 0 : vector<1x32xf32>, vector<1x32xf32> -> vector<2x32xf32>
    %c0_671 = arith.constant 0 : index
    %c0_672 = arith.constant 0 : index
    %1428 = vector.load %arg7[%c0_671, %c0_672] : memref<32x32xf32, #tpu.memory_space<vmem>>, vector<32x32xf32>
    %cst_673 = arith.constant dense<0.000000e+00> : vector<2x32xf32>
    %1429 = tpu.matmul %1427, %1428, %cst_673 {dimension_numbers = #tpu.dot_dimension_numbers<[1], [0], [0], [1], [0, 0, 1, 1], [], []>} : vector<2x32xf32>, vector<32x32xf32>, vector<2x32xf32> -> vector<2x32xf32>
    %1430 = vector.broadcast %0 : vector<1x32xf32> to vector<2x32xf32>
    %1431 = arith.addf %1429, %1430 : vector<2x32xf32>
    %1432 = arith.addf %1431, %1366 : vector<2x32xf32>
    %c2_674 = arith.constant 2 : index
    %c0_675 = arith.constant 0 : index
    %1433 = vector.load %arg3[%c2_674, %c0_675] : memref<10x32xf32, #tpu.memory_space<vmem>>, vector<1x32xf32>
    %c3_676 = arith.constant 3 : index
    %c0_677 = arith.constant 0 : index
    %1434 = vector.load %arg3[%c3_676, %c0_677] : memref<10x32xf32, #tpu.memory_space<vmem>>, vector<1x32xf32>
    %cst_678 = arith.constant dense<0.000000e+00> : vector<2xf32>
    %1435 = vector.multi_reduction <add>, %1432, %cst_678 [1] : vector<2x32xf32> to vector<2xf32>
    %1436 = vector.shape_cast %1435 : vector<2xf32> to vector<2x1xf32>
    %cst_679 = arith.constant 3.200000e+01 : f32
    %1437 = vector.broadcast %cst_679 : f32 to vector<2x1xf32>
    %1438 = arith.divf %1436, %1437 : vector<2x1xf32>
    %1439 = vector.broadcast %1438 : vector<2x1xf32> to vector<2x32xf32>
    %1440 = arith.subf %1432, %1439 : vector<2x32xf32>
    %1441 = arith.mulf %1440, %1440 : vector<2x32xf32>
    %cst_680 = arith.constant dense<0.000000e+00> : vector<2xf32>
    %1442 = vector.multi_reduction <add>, %1441, %cst_680 [1] : vector<2x32xf32> to vector<2xf32>
    %1443 = vector.shape_cast %1442 : vector<2xf32> to vector<2x1xf32>
    %cst_681 = arith.constant 3.200000e+01 : f32
    %1444 = vector.broadcast %cst_681 : f32 to vector<2x1xf32>
    %1445 = arith.divf %1443, %1444 : vector<2x1xf32>
    %1446 = vector.broadcast %1438 : vector<2x1xf32> to vector<2x32xf32>
    %1447 = arith.subf %1432, %1446 : vector<2x32xf32>
    %cst_682 = arith.constant 9.99999996E-13 : f32
    %1448 = vector.broadcast %cst_682 : f32 to vector<2x1xf32>
    %1449 = arith.addf %1445, %1448 : vector<2x1xf32>
    %1450 = math.rsqrt %1449 : vector<2x1xf32>
    %1451 = vector.broadcast %1450 : vector<2x1xf32> to vector<2x32xf32>
    %1452 = arith.mulf %1447, %1451 : vector<2x32xf32>
    %1453 = vector.broadcast %1433 : vector<1x32xf32> to vector<2x32xf32>
    %1454 = arith.mulf %1452, %1453 : vector<2x32xf32>
    %1455 = vector.broadcast %1434 : vector<1x32xf32> to vector<2x32xf32>
    %1456 = arith.addf %1454, %1455 : vector<2x32xf32>
    %1457 = arith.addf %14, %1456 : vector<2x32xf32>
    %c4_683 = arith.constant 4 : index
    %c0_684 = arith.constant 0 : index
    %1458 = vector.load %arg3[%c4_683, %c0_684] : memref<10x32xf32, #tpu.memory_space<vmem>>, vector<1x32xf32>
    %c5_685 = arith.constant 5 : index
    %c0_686 = arith.constant 0 : index
    %1459 = vector.load %arg3[%c5_685, %c0_686] : memref<10x32xf32, #tpu.memory_space<vmem>>, vector<1x32xf32>
    %cst_687 = arith.constant dense<0.000000e+00> : vector<2xf32>
    %1460 = vector.multi_reduction <add>, %1457, %cst_687 [1] : vector<2x32xf32> to vector<2xf32>
    %1461 = vector.shape_cast %1460 : vector<2xf32> to vector<2x1xf32>
    %cst_688 = arith.constant 3.200000e+01 : f32
    %1462 = vector.broadcast %cst_688 : f32 to vector<2x1xf32>
    %1463 = arith.divf %1461, %1462 : vector<2x1xf32>
    %1464 = vector.broadcast %1463 : vector<2x1xf32> to vector<2x32xf32>
    %1465 = arith.subf %1457, %1464 : vector<2x32xf32>
    %1466 = arith.mulf %1465, %1465 : vector<2x32xf32>
    %cst_689 = arith.constant dense<0.000000e+00> : vector<2xf32>
    %1467 = vector.multi_reduction <add>, %1466, %cst_689 [1] : vector<2x32xf32> to vector<2xf32>
    %1468 = vector.shape_cast %1467 : vector<2xf32> to vector<2x1xf32>
    %cst_690 = arith.constant 3.200000e+01 : f32
    %1469 = vector.broadcast %cst_690 : f32 to vector<2x1xf32>
    %1470 = arith.divf %1468, %1469 : vector<2x1xf32>
    %1471 = vector.broadcast %1463 : vector<2x1xf32> to vector<2x32xf32>
    %1472 = arith.subf %1457, %1471 : vector<2x32xf32>
    %cst_691 = arith.constant 9.99999996E-13 : f32
    %1473 = vector.broadcast %cst_691 : f32 to vector<2x1xf32>
    %1474 = arith.addf %1470, %1473 : vector<2x1xf32>
    %1475 = math.rsqrt %1474 : vector<2x1xf32>
    %1476 = vector.broadcast %1475 : vector<2x1xf32> to vector<2x32xf32>
    %1477 = arith.mulf %1472, %1476 : vector<2x32xf32>
    %1478 = vector.broadcast %1458 : vector<1x32xf32> to vector<2x32xf32>
    %1479 = arith.mulf %1477, %1478 : vector<2x32xf32>
    %1480 = vector.broadcast %1459 : vector<1x32xf32> to vector<2x32xf32>
    %1481 = arith.addf %1479, %1480 : vector<2x32xf32>
    %c0_692 = arith.constant 0 : index
    %c0_693 = arith.constant 0 : index
    %1482 = vector.load %arg10[%c0_692, %c0_693] : memref<32x64xf32, #tpu.memory_space<vmem>>, vector<32x64xf32>
    %cst_694 = arith.constant dense<0.000000e+00> : vector<2x64xf32>
    %1483 = tpu.matmul %1481, %1482, %cst_694 {dimension_numbers = #tpu.dot_dimension_numbers<[1], [0], [0], [1], [0, 0, 1, 1], [], []>} : vector<2x32xf32>, vector<32x64xf32>, vector<2x64xf32> -> vector<2x64xf32>
    %c0_695 = arith.constant 0 : index
    %c0_696 = arith.constant 0 : index
    %1484 = vector.load %arg11[%c0_695, %c0_696] : memref<1x64xf32, #tpu.memory_space<vmem>>, vector<1x64xf32>
    %1485 = vector.broadcast %1484 : vector<1x64xf32> to vector<2x64xf32>
    %1486 = arith.addf %1483, %1485 : vector<2x64xf32>
    %1487 = arith.mulf %1486, %1486 : vector<2x64xf32>
    %1488 = arith.mulf %1486, %1487 : vector<2x64xf32>
    %cst_697 = arith.constant 4.471500e-02 : f32
    %1489 = vector.broadcast %cst_697 : f32 to vector<2x64xf32>
    %1490 = arith.mulf %1489, %1488 : vector<2x64xf32>
    %1491 = arith.addf %1486, %1490 : vector<2x64xf32>
    %cst_698 = arith.constant 0.797884583 : f32
    %1492 = vector.broadcast %cst_698 : f32 to vector<2x64xf32>
    %1493 = arith.mulf %1492, %1491 : vector<2x64xf32>
    %1494 = math.tanh %1493 : vector<2x64xf32>
    %cst_699 = arith.constant 1.000000e+00 : f32
    %1495 = vector.broadcast %cst_699 : f32 to vector<2x64xf32>
    %1496 = arith.addf %1495, %1494 : vector<2x64xf32>
    %cst_700 = arith.constant 5.000000e-01 : f32
    %1497 = vector.broadcast %cst_700 : f32 to vector<2x64xf32>
    %1498 = arith.mulf %1497, %1496 : vector<2x64xf32>
    %1499 = arith.mulf %1486, %1498 : vector<2x64xf32>
    %c0_701 = arith.constant 0 : index
    %c0_702 = arith.constant 0 : index
    %1500 = vector.load %arg12[%c0_701, %c0_702] : memref<64x32xf32, #tpu.memory_space<vmem>>, vector<64x32xf32>
    %cst_703 = arith.constant dense<0.000000e+00> : vector<2x32xf32>
    %1501 = tpu.matmul %1499, %1500, %cst_703 {dimension_numbers = #tpu.dot_dimension_numbers<[1], [0], [0], [1], [0, 0, 1, 1], [], []>} : vector<2x64xf32>, vector<64x32xf32>, vector<2x32xf32> -> vector<2x32xf32>
    %1502 = vector.broadcast %3 : vector<1x32xf32> to vector<2x32xf32>
    %1503 = arith.addf %1501, %1502 : vector<2x32xf32>
    %1504 = arith.addf %1503, %1481 : vector<2x32xf32>
    %c6_704 = arith.constant 6 : index
    %c0_705 = arith.constant 0 : index
    %1505 = vector.load %arg3[%c6_704, %c0_705] : memref<10x32xf32, #tpu.memory_space<vmem>>, vector<1x32xf32>
    %c7_706 = arith.constant 7 : index
    %c0_707 = arith.constant 0 : index
    %1506 = vector.load %arg3[%c7_706, %c0_707] : memref<10x32xf32, #tpu.memory_space<vmem>>, vector<1x32xf32>
    %cst_708 = arith.constant dense<0.000000e+00> : vector<2xf32>
    %1507 = vector.multi_reduction <add>, %1504, %cst_708 [1] : vector<2x32xf32> to vector<2xf32>
    %1508 = vector.shape_cast %1507 : vector<2xf32> to vector<2x1xf32>
    %cst_709 = arith.constant 3.200000e+01 : f32
    %1509 = vector.broadcast %cst_709 : f32 to vector<2x1xf32>
    %1510 = arith.divf %1508, %1509 : vector<2x1xf32>
    %1511 = vector.broadcast %1510 : vector<2x1xf32> to vector<2x32xf32>
    %1512 = arith.subf %1504, %1511 : vector<2x32xf32>
    %1513 = arith.mulf %1512, %1512 : vector<2x32xf32>
    %cst_710 = arith.constant dense<0.000000e+00> : vector<2xf32>
    %1514 = vector.multi_reduction <add>, %1513, %cst_710 [1] : vector<2x32xf32> to vector<2xf32>
    %1515 = vector.shape_cast %1514 : vector<2xf32> to vector<2x1xf32>
    %cst_711 = arith.constant 3.200000e+01 : f32
    %1516 = vector.broadcast %cst_711 : f32 to vector<2x1xf32>
    %1517 = arith.divf %1515, %1516 : vector<2x1xf32>
    %1518 = vector.broadcast %1510 : vector<2x1xf32> to vector<2x32xf32>
    %1519 = arith.subf %1504, %1518 : vector<2x32xf32>
    %cst_712 = arith.constant 9.99999996E-13 : f32
    %1520 = vector.broadcast %cst_712 : f32 to vector<2x1xf32>
    %1521 = arith.addf %1517, %1520 : vector<2x1xf32>
    %1522 = math.rsqrt %1521 : vector<2x1xf32>
    %1523 = vector.broadcast %1522 : vector<2x1xf32> to vector<2x32xf32>
    %1524 = arith.mulf %1519, %1523 : vector<2x32xf32>
    %1525 = vector.broadcast %1505 : vector<1x32xf32> to vector<2x32xf32>
    %1526 = arith.mulf %1524, %1525 : vector<2x32xf32>
    %1527 = vector.broadcast %1506 : vector<1x32xf32> to vector<2x32xf32>
    %1528 = arith.addf %1526, %1527 : vector<2x32xf32>
    %c0_713 = arith.constant 0 : index
    %c0_714 = arith.constant 0 : index
    %1529 = vector.load %arg13[%c0_713, %c0_714] : memref<32x32xf32, #tpu.memory_space<vmem>>, vector<32x32xf32>
    %cst_715 = arith.constant dense<0.000000e+00> : vector<2x32xf32>
    %1530 = tpu.matmul %1528, %1529, %cst_715 {dimension_numbers = #tpu.dot_dimension_numbers<[1], [0], [0], [1], [0, 0, 1, 1], [], []>} : vector<2x32xf32>, vector<32x32xf32>, vector<2x32xf32> -> vector<2x32xf32>
    %1531 = vector.broadcast %4 : vector<1x32xf32> to vector<2x32xf32>
    %1532 = arith.addf %1530, %1531 : vector<2x32xf32>
    %1533 = arith.mulf %1532, %1532 : vector<2x32xf32>
    %1534 = arith.mulf %1532, %1533 : vector<2x32xf32>
    %cst_716 = arith.constant 4.471500e-02 : f32
    %1535 = vector.broadcast %cst_716 : f32 to vector<2x32xf32>
    %1536 = arith.mulf %1535, %1534 : vector<2x32xf32>
    %1537 = arith.addf %1532, %1536 : vector<2x32xf32>
    %cst_717 = arith.constant 0.797884583 : f32
    %1538 = vector.broadcast %cst_717 : f32 to vector<2x32xf32>
    %1539 = arith.mulf %1538, %1537 : vector<2x32xf32>
    %1540 = math.tanh %1539 : vector<2x32xf32>
    %cst_718 = arith.constant 1.000000e+00 : f32
    %1541 = vector.broadcast %cst_718 : f32 to vector<2x32xf32>
    %1542 = arith.addf %1541, %1540 : vector<2x32xf32>
    %cst_719 = arith.constant 5.000000e-01 : f32
    %1543 = vector.broadcast %cst_719 : f32 to vector<2x32xf32>
    %1544 = arith.mulf %1543, %1542 : vector<2x32xf32>
    %1545 = arith.mulf %1532, %1544 : vector<2x32xf32>
    %c8_720 = arith.constant 8 : index
    %c0_721 = arith.constant 0 : index
    %1546 = vector.load %arg3[%c8_720, %c0_721] : memref<10x32xf32, #tpu.memory_space<vmem>>, vector<1x32xf32>
    %c9_722 = arith.constant 9 : index
    %c0_723 = arith.constant 0 : index
    %1547 = vector.load %arg3[%c9_722, %c0_723] : memref<10x32xf32, #tpu.memory_space<vmem>>, vector<1x32xf32>
    %cst_724 = arith.constant dense<0.000000e+00> : vector<2xf32>
    %1548 = vector.multi_reduction <add>, %1545, %cst_724 [1] : vector<2x32xf32> to vector<2xf32>
    %1549 = vector.shape_cast %1548 : vector<2xf32> to vector<2x1xf32>
    %cst_725 = arith.constant 3.200000e+01 : f32
    %1550 = vector.broadcast %cst_725 : f32 to vector<2x1xf32>
    %1551 = arith.divf %1549, %1550 : vector<2x1xf32>
    %1552 = vector.broadcast %1551 : vector<2x1xf32> to vector<2x32xf32>
    %1553 = arith.subf %1545, %1552 : vector<2x32xf32>
    %1554 = arith.mulf %1553, %1553 : vector<2x32xf32>
    %cst_726 = arith.constant dense<0.000000e+00> : vector<2xf32>
    %1555 = vector.multi_reduction <add>, %1554, %cst_726 [1] : vector<2x32xf32> to vector<2xf32>
    %1556 = vector.shape_cast %1555 : vector<2xf32> to vector<2x1xf32>
    %cst_727 = arith.constant 3.200000e+01 : f32
    %1557 = vector.broadcast %cst_727 : f32 to vector<2x1xf32>
    %1558 = arith.divf %1556, %1557 : vector<2x1xf32>
    %1559 = vector.broadcast %1551 : vector<2x1xf32> to vector<2x32xf32>
    %1560 = arith.subf %1545, %1559 : vector<2x32xf32>
    %cst_728 = arith.constant 9.99999996E-13 : f32
    %1561 = vector.broadcast %cst_728 : f32 to vector<2x1xf32>
    %1562 = arith.addf %1558, %1561 : vector<2x1xf32>
    %1563 = math.rsqrt %1562 : vector<2x1xf32>
    %1564 = vector.broadcast %1563 : vector<2x1xf32> to vector<2x32xf32>
    %1565 = arith.mulf %1560, %1564 : vector<2x32xf32>
    %1566 = vector.broadcast %1546 : vector<1x32xf32> to vector<2x32xf32>
    %1567 = arith.mulf %1565, %1566 : vector<2x32xf32>
    %1568 = vector.broadcast %1547 : vector<1x32xf32> to vector<2x32xf32>
    %1569 = arith.addf %1567, %1568 : vector<2x32xf32>
    %c0_729 = arith.constant 0 : index
    %c0_730 = arith.constant 0 : index
    %1570 = vector.load %arg14[%c0_729, %c0_730] : memref<32x128xf32, #tpu.memory_space<vmem>>, vector<32x128xf32>
    %cst_731 = arith.constant dense<0.000000e+00> : vector<2x128xf32>
    %1571 = tpu.matmul %1569, %1570, %cst_731 {dimension_numbers = #tpu.dot_dimension_numbers<[1], [0], [0], [1], [0, 0, 1, 1], [], []>} : vector<2x32xf32>, vector<32x128xf32>, vector<2x128xf32> -> vector<2x128xf32>
    %c0_732 = arith.constant 0 : index
    %c0_733 = arith.constant 0 : index
    %1572 = vector.load %arg15[%c0_732, %c0_733] : memref<1x128xf32, #tpu.memory_space<vmem>>, vector<1x128xf32>
    %1573 = vector.broadcast %1572 : vector<1x128xf32> to vector<2x128xf32>
    %1574 = arith.addf %1571, %1573 : vector<2x128xf32>
    %c64_i32_734 = arith.constant 64 : i32
    %1575 = vector.broadcast %c64_i32_734 : i32 to vector<2x128xi32>
    %1576 = arith.cmpi slt, %15, %1575 : vector<2x128xi32>
    %cst_735 = arith.constant -1.000000e+30 : f32
    %1577 = vector.broadcast %cst_735 : f32 to vector<2x128xf32>
    %1578 = arith.select %1576, %1574, %1577 : vector<2x128xi1>, vector<2x128xf32>
    %c6_736 = arith.constant 6 : index
    %c0_737 = arith.constant 0 : index
    %c0_738 = arith.constant 0 : index
    %1579 = vector.load %arg17[%c6_736, %c0_737, %c0_738] : memref<8x2x128xf32, #tpu.memory_space<vmem>>, vector<1x2x128xf32>
    %1580 = vector.shape_cast %1579 : vector<1x2x128xf32> to vector<2x128xf32>
    %1581 = vector.shape_cast %1578 : vector<2x128xf32> to vector<1x2x128xf32>
    tpu.vector_store %arg17[%c6_736, %c0_737, %c0_738], %1581 {strides = array<i32>} : memref<8x2x128xf32, #tpu.memory_space<vmem>>, vector<1x2x128xf32>,
    %cst_739 = arith.constant dense<0xFF800000> : vector<2xf32>
    %1582 = vector.multi_reduction <maximumf>, %1578, %cst_739 [1] : vector<2x128xf32> to vector<2xf32>
    %1583 = vector.shape_cast %1582 : vector<2xf32> to vector<2x1xf32>
    %1584 = vector.broadcast %1583 : vector<2x1xf32> to vector<2x128xf32>
    %1585 = arith.cmpf oge, %1578, %1584 : vector<2x128xf32>
    %1586 = arith.sitofp %15 : vector<2x128xi32> to vector<2x128xf32>
    %cst_740 = arith.constant 1.280000e+02 : f32
    %1587 = vector.broadcast %cst_740 : f32 to vector<2x128xf32>
    %1588 = arith.select %1585, %1586, %1587 : vector<2x128xi1>, vector<2x128xf32>
    %cst_741 = arith.constant dense<0x7F800000> : vector<2xf32>
    %1589 = vector.multi_reduction <minimumf>, %1588, %cst_741 [1] : vector<2x128xf32> to vector<2xf32>
    %1590 = vector.shape_cast %1589 : vector<2xf32> to vector<2x1xf32>
    %1591 = arith.fptosi %1590 : vector<2x1xf32> to vector<2x1xi32>
    %c0_742 = arith.constant 0 : index
    %c6_743 = arith.constant 6 : index
    %1592 = vector.load %arg16[%c0_742, %c6_743] : memref<2x8xi32, #tpu.memory_space<vmem>>, vector<2x1xi32>
    tpu.vector_store %arg16[%c0_742, %c6_743], %1591 {strides = array<i32>} : memref<2x8xi32, #tpu.memory_space<vmem>>, vector<2x1xi32>,
    %1593 = vector.broadcast %1591 : vector<2x1xi32> to vector<2x128xi32>
    %1594 = arith.cmpi eq, %15, %1593 : vector<2x128xi32>
    %1595 = arith.extui %1594 : vector<2x128xi1> to vector<2x128xi32>
    %1596 = arith.sitofp %1595 : vector<2x128xi32> to vector<2x128xf32>
    %c0_744 = arith.constant 0 : index
    %c0_745 = arith.constant 0 : index
    %1597 = vector.load %arg1[%c0_744, %c0_745] : memref<128x32xf32, #tpu.memory_space<vmem>>, vector<128x32xf32>
    %cst_746 = arith.constant dense<0.000000e+00> : vector<2x32xf32>
    %1598 = tpu.matmul %1596, %1597, %cst_746 {dimension_numbers = #tpu.dot_dimension_numbers<[1], [0], [0], [1], [0, 0, 1, 1], [], []>} : vector<2x128xf32>, vector<128x32xf32>, vector<2x32xf32> -> vector<2x32xf32>
    %c6_747 = arith.constant 6 : index
    %c0_748 = arith.constant 0 : index
    %1599 = vector.load %arg2[%c6_747, %c0_748] : memref<8x32xf32, #tpu.memory_space<vmem>>, vector<1x32xf32>
    %1600 = vector.broadcast %1599 : vector<1x32xf32> to vector<2x32xf32>
    %1601 = arith.addf %1598, %1600 : vector<2x32xf32>
    %1602 = vector.broadcast %5 : vector<1x32xf32> to vector<2x32xf32>
    %1603 = arith.addf %1601, %1602 : vector<2x32xf32>
    %c0_749 = arith.constant 0 : index
    %c0_750 = arith.constant 0 : index
    %1604 = vector.load %arg3[%c0_749, %c0_750] : memref<10x32xf32, #tpu.memory_space<vmem>>, vector<1x32xf32>
    %c1_751 = arith.constant 1 : index
    %c0_752 = arith.constant 0 : index
    %1605 = vector.load %arg3[%c1_751, %c0_752] : memref<10x32xf32, #tpu.memory_space<vmem>>, vector<1x32xf32>
    %cst_753 = arith.constant dense<0.000000e+00> : vector<2xf32>
    %1606 = vector.multi_reduction <add>, %1603, %cst_753 [1] : vector<2x32xf32> to vector<2xf32>
    %1607 = vector.shape_cast %1606 : vector<2xf32> to vector<2x1xf32>
    %cst_754 = arith.constant 3.200000e+01 : f32
    %1608 = vector.broadcast %cst_754 : f32 to vector<2x1xf32>
    %1609 = arith.divf %1607, %1608 : vector<2x1xf32>
    %1610 = vector.broadcast %1609 : vector<2x1xf32> to vector<2x32xf32>
    %1611 = arith.subf %1603, %1610 : vector<2x32xf32>
    %1612 = arith.mulf %1611, %1611 : vector<2x32xf32>
    %cst_755 = arith.constant dense<0.000000e+00> : vector<2xf32>
    %1613 = vector.multi_reduction <add>, %1612, %cst_755 [1] : vector<2x32xf32> to vector<2xf32>
    %1614 = vector.shape_cast %1613 : vector<2xf32> to vector<2x1xf32>
    %cst_756 = arith.constant 3.200000e+01 : f32
    %1615 = vector.broadcast %cst_756 : f32 to vector<2x1xf32>
    %1616 = arith.divf %1614, %1615 : vector<2x1xf32>
    %1617 = vector.broadcast %1609 : vector<2x1xf32> to vector<2x32xf32>
    %1618 = arith.subf %1603, %1617 : vector<2x32xf32>
    %cst_757 = arith.constant 9.99999996E-13 : f32
    %1619 = vector.broadcast %cst_757 : f32 to vector<2x1xf32>
    %1620 = arith.addf %1616, %1619 : vector<2x1xf32>
    %1621 = math.rsqrt %1620 : vector<2x1xf32>
    %1622 = vector.broadcast %1621 : vector<2x1xf32> to vector<2x32xf32>
    %1623 = arith.mulf %1618, %1622 : vector<2x32xf32>
    %1624 = vector.broadcast %1604 : vector<1x32xf32> to vector<2x32xf32>
    %1625 = arith.mulf %1623, %1624 : vector<2x32xf32>
    %1626 = vector.broadcast %1605 : vector<1x32xf32> to vector<2x32xf32>
    %1627 = arith.addf %1625, %1626 : vector<2x32xf32>
    %c0_758 = arith.constant 0 : index
    %c0_759 = arith.constant 0 : index
    %1628 = vector.load %arg5[%c0_758, %c0_759] : memref<32x96xf32, #tpu.memory_space<vmem>>, vector<32x96xf32>
    %cst_760 = arith.constant dense<0.000000e+00> : vector<2x96xf32>
    %1629 = tpu.matmul %1627, %1628, %cst_760 {dimension_numbers = #tpu.dot_dimension_numbers<[1], [0], [0], [1], [0, 0, 1, 1], [], []>} : vector<2x32xf32>, vector<32x96xf32>, vector<2x96xf32> -> vector<2x96xf32>
    %c0_761 = arith.constant 0 : index
    %c0_762 = arith.constant 0 : index
    %1630 = vector.load %arg6[%c0_761, %c0_762] : memref<1x96xf32, #tpu.memory_space<vmem>>, vector<1x96xf32>
    %1631 = vector.broadcast %1630 : vector<1x96xf32> to vector<2x96xf32>
    %1632 = arith.addf %1629, %1631 : vector<2x96xf32>
    %1633 = vector.extract_strided_slice %1632 {offsets = [0, 0], sizes = [2, 32], strides = [1, 1]} : vector<2x96xf32> to vector<2x32xf32>
    %1634 = vector.extract_strided_slice %1632 {offsets = [0, 32], sizes = [2, 32], strides = [1, 1]} : vector<2x96xf32> to vector<2x32xf32>
    %1635 = vector.extract_strided_slice %1632 {offsets = [0, 64], sizes = [2, 32], strides = [1, 1]} : vector<2x96xf32> to vector<2x32xf32>
    %1636 = vector.extract_strided_slice %1634 {offsets = [0, 0], sizes = [1, 32], strides = [1, 1]} : vector<2x32xf32> to vector<1x32xf32>
    %c6_763 = arith.constant 6 : index
    %c0_764 = arith.constant 0 : index
    %1637 = vector.load %arg18[%c6_763, %c0_764] : memref<16x32xf32, #tpu.memory_space<vmem>>, vector<1x32xf32>
    tpu.vector_store %arg18[%c6_763, %c0_764], %1636 {strides = array<i32>} : memref<16x32xf32, #tpu.memory_space<vmem>>, vector<1x32xf32>,
    %1638 = vector.extract_strided_slice %1635 {offsets = [0, 0], sizes = [1, 32], strides = [1, 1]} : vector<2x32xf32> to vector<1x32xf32>
    %c6_765 = arith.constant 6 : index
    %c0_766 = arith.constant 0 : index
    %1639 = vector.load %arg19[%c6_765, %c0_766] : memref<16x32xf32, #tpu.memory_space<vmem>>, vector<1x32xf32>
    tpu.vector_store %arg19[%c6_765, %c0_766], %1638 {strides = array<i32>} : memref<16x32xf32, #tpu.memory_space<vmem>>, vector<1x32xf32>,
    %c0_767 = arith.constant 0 : index
    %c0_768 = arith.constant 0 : index
    %1640 = vector.load %arg18[%c0_767, %c0_768] : memref<16x32xf32, #tpu.memory_space<vmem>>, vector<8x32xf32>
    %c0_769 = arith.constant 0 : index
    %c0_770 = arith.constant 0 : index
    %1641 = vector.load %arg19[%c0_769, %c0_770] : memref<16x32xf32, #tpu.memory_space<vmem>>, vector<8x32xf32>
    %1642 = vector.extract_strided_slice %1633 {offsets = [0, 0], sizes = [1, 32], strides = [1, 1]} : vector<2x32xf32> to vector<1x32xf32>
    %1643 = tpu.transpose %1640, [1, 0] : vector<8x32xf32> -> vector<32x8xf32>
    %cst_771 = arith.constant dense<0.000000e+00> : vector<1x8xf32>
    %1644 = tpu.matmul %1642, %1643, %cst_771 {dimension_numbers = #tpu.dot_dimension_numbers<[1], [0], [0], [1], [0, 0, 1, 1], [], []>} : vector<1x32xf32>, vector<32x8xf32>, vector<1x8xf32> -> vector<1x8xf32>
    %cst_772 = arith.constant 0.176776692 : f32
    %1645 = vector.broadcast %cst_772 : f32 to vector<1x8xf32>
    %1646 = arith.mulf %1644, %1645 : vector<1x8xf32>
    %c7_i32 = arith.constant 7 : i32
    %1647 = vector.broadcast %c7_i32 : i32 to vector<1x8xi32>
    %1648 = arith.cmpi slt, %16, %1647 : vector<1x8xi32>
    %cst_773 = arith.constant -1.000000e+30 : f32
    %1649 = vector.broadcast %cst_773 : f32 to vector<1x8xf32>
    %1650 = arith.select %1648, %1646, %1649 : vector<1x8xi1>, vector<1x8xf32>
    %cst_774 = arith.constant dense<0xFF800000> : vector<1xf32>
    %1651 = vector.multi_reduction <maximumf>, %1650, %cst_774 [1] : vector<1x8xf32> to vector<1xf32>
    %1652 = vector.shape_cast %1651 : vector<1xf32> to vector<1x1xf32>
    %1653 = vector.broadcast %1652 : vector<1x1xf32> to vector<1x8xf32>
    %1654 = arith.subf %1650, %1653 : vector<1x8xf32>
    %1655 = math.exp %1654 : vector<1x8xf32>
    %cst_775 = arith.constant dense<0.000000e+00> : vector<1xf32>
    %1656 = vector.multi_reduction <add>, %1655, %cst_775 [1] : vector<1x8xf32> to vector<1xf32>
    %1657 = vector.shape_cast %1656 : vector<1xf32> to vector<1x1xf32>
    %1658 = tpu.reciprocal %1657 {approx = true} : vector<1x1xf32> -> vector<1x1xf32>
    %1659 = vector.broadcast %1658 : vector<1x1xf32> to vector<1x8xf32>
    %1660 = arith.mulf %1655, %1659 : vector<1x8xf32>
    %cst_776 = arith.constant dense<0.000000e+00> : vector<1x32xf32>
    %1661 = tpu.matmul %1660, %1641, %cst_776 {dimension_numbers = #tpu.dot_dimension_numbers<[1], [0], [0], [1], [0, 0, 1, 1], [], []>} : vector<1x8xf32>, vector<8x32xf32>, vector<1x32xf32> -> vector<1x32xf32>
    %1662 = vector.extract_strided_slice %1634 {offsets = [1, 0], sizes = [1, 32], strides = [1, 1]} : vector<2x32xf32> to vector<1x32xf32>
    %c14 = arith.constant 14 : index
    %c0_777 = arith.constant 0 : index
    %1663 = vector.load %arg18[%c14, %c0_777] : memref<16x32xf32, #tpu.memory_space<vmem>>, vector<1x32xf32>
    tpu.vector_store %arg18[%c14, %c0_777], %1662 {strides = array<i32>} : memref<16x32xf32, #tpu.memory_space<vmem>>, vector<1x32xf32>,
    %1664 = vector.extract_strided_slice %1635 {offsets = [1, 0], sizes = [1, 32], strides = [1, 1]} : vector<2x32xf32> to vector<1x32xf32>
    %c14_778 = arith.constant 14 : index
    %c0_779 = arith.constant 0 : index
    %1665 = vector.load %arg19[%c14_778, %c0_779] : memref<16x32xf32, #tpu.memory_space<vmem>>, vector<1x32xf32>
    tpu.vector_store %arg19[%c14_778, %c0_779], %1664 {strides = array<i32>} : memref<16x32xf32, #tpu.memory_space<vmem>>, vector<1x32xf32>,
    %c8_780 = arith.constant 8 : index
    %c0_781 = arith.constant 0 : index
    %1666 = vector.load %arg18[%c8_780, %c0_781] : memref<16x32xf32, #tpu.memory_space<vmem>>, vector<8x32xf32>
    %c8_782 = arith.constant 8 : index
    %c0_783 = arith.constant 0 : index
    %1667 = vector.load %arg19[%c8_782, %c0_783] : memref<16x32xf32, #tpu.memory_space<vmem>>, vector<8x32xf32>
    %1668 = vector.extract_strided_slice %1633 {offsets = [1, 0], sizes = [1, 32], strides = [1, 1]} : vector<2x32xf32> to vector<1x32xf32>
    %1669 = tpu.transpose %1666, [1, 0] : vector<8x32xf32> -> vector<32x8xf32>
    %cst_784 = arith.constant dense<0.000000e+00> : vector<1x8xf32>
    %1670 = tpu.matmul %1668, %1669, %cst_784 {dimension_numbers = #tpu.dot_dimension_numbers<[1], [0], [0], [1], [0, 0, 1, 1], [], []>} : vector<1x32xf32>, vector<32x8xf32>, vector<1x8xf32> -> vector<1x8xf32>
    %cst_785 = arith.constant 0.176776692 : f32
    %1671 = vector.broadcast %cst_785 : f32 to vector<1x8xf32>
    %1672 = arith.mulf %1670, %1671 : vector<1x8xf32>
    %c7_i32_786 = arith.constant 7 : i32
    %1673 = vector.broadcast %c7_i32_786 : i32 to vector<1x8xi32>
    %1674 = arith.cmpi slt, %16, %1673 : vector<1x8xi32>
    %cst_787 = arith.constant -1.000000e+30 : f32
    %1675 = vector.broadcast %cst_787 : f32 to vector<1x8xf32>
    %1676 = arith.select %1674, %1672, %1675 : vector<1x8xi1>, vector<1x8xf32>
    %cst_788 = arith.constant dense<0xFF800000> : vector<1xf32>
    %1677 = vector.multi_reduction <maximumf>, %1676, %cst_788 [1] : vector<1x8xf32> to vector<1xf32>
    %1678 = vector.shape_cast %1677 : vector<1xf32> to vector<1x1xf32>
    %1679 = vector.broadcast %1678 : vector<1x1xf32> to vector<1x8xf32>
    %1680 = arith.subf %1676, %1679 : vector<1x8xf32>
    %1681 = math.exp %1680 : vector<1x8xf32>
    %cst_789 = arith.constant dense<0.000000e+00> : vector<1xf32>
    %1682 = vector.multi_reduction <add>, %1681, %cst_789 [1] : vector<1x8xf32> to vector<1xf32>
    %1683 = vector.shape_cast %1682 : vector<1xf32> to vector<1x1xf32>
    %1684 = tpu.reciprocal %1683 {approx = true} : vector<1x1xf32> -> vector<1x1xf32>
    %1685 = vector.broadcast %1684 : vector<1x1xf32> to vector<1x8xf32>
    %1686 = arith.mulf %1681, %1685 : vector<1x8xf32>
    %cst_790 = arith.constant dense<0.000000e+00> : vector<1x32xf32>
    %1687 = tpu.matmul %1686, %1667, %cst_790 {dimension_numbers = #tpu.dot_dimension_numbers<[1], [0], [0], [1], [0, 0, 1, 1], [], []>} : vector<1x8xf32>, vector<8x32xf32>, vector<1x32xf32> -> vector<1x32xf32>
    %1688 = tpu.concatenate %1661, %1687 in 0 : vector<1x32xf32>, vector<1x32xf32> -> vector<2x32xf32>
    %c0_791 = arith.constant 0 : index
    %c0_792 = arith.constant 0 : index
    %1689 = vector.load %arg7[%c0_791, %c0_792] : memref<32x32xf32, #tpu.memory_space<vmem>>, vector<32x32xf32>
    %cst_793 = arith.constant dense<0.000000e+00> : vector<2x32xf32>
    %1690 = tpu.matmul %1688, %1689, %cst_793 {dimension_numbers = #tpu.dot_dimension_numbers<[1], [0], [0], [1], [0, 0, 1, 1], [], []>} : vector<2x32xf32>, vector<32x32xf32>, vector<2x32xf32> -> vector<2x32xf32>
    %1691 = vector.broadcast %0 : vector<1x32xf32> to vector<2x32xf32>
    %1692 = arith.addf %1690, %1691 : vector<2x32xf32>
    %1693 = arith.addf %1692, %1627 : vector<2x32xf32>
    %c2_794 = arith.constant 2 : index
    %c0_795 = arith.constant 0 : index
    %1694 = vector.load %arg3[%c2_794, %c0_795] : memref<10x32xf32, #tpu.memory_space<vmem>>, vector<1x32xf32>
    %c3_796 = arith.constant 3 : index
    %c0_797 = arith.constant 0 : index
    %1695 = vector.load %arg3[%c3_796, %c0_797] : memref<10x32xf32, #tpu.memory_space<vmem>>, vector<1x32xf32>
    %cst_798 = arith.constant dense<0.000000e+00> : vector<2xf32>
    %1696 = vector.multi_reduction <add>, %1693, %cst_798 [1] : vector<2x32xf32> to vector<2xf32>
    %1697 = vector.shape_cast %1696 : vector<2xf32> to vector<2x1xf32>
    %cst_799 = arith.constant 3.200000e+01 : f32
    %1698 = vector.broadcast %cst_799 : f32 to vector<2x1xf32>
    %1699 = arith.divf %1697, %1698 : vector<2x1xf32>
    %1700 = vector.broadcast %1699 : vector<2x1xf32> to vector<2x32xf32>
    %1701 = arith.subf %1693, %1700 : vector<2x32xf32>
    %1702 = arith.mulf %1701, %1701 : vector<2x32xf32>
    %cst_800 = arith.constant dense<0.000000e+00> : vector<2xf32>
    %1703 = vector.multi_reduction <add>, %1702, %cst_800 [1] : vector<2x32xf32> to vector<2xf32>
    %1704 = vector.shape_cast %1703 : vector<2xf32> to vector<2x1xf32>
    %cst_801 = arith.constant 3.200000e+01 : f32
    %1705 = vector.broadcast %cst_801 : f32 to vector<2x1xf32>
    %1706 = arith.divf %1704, %1705 : vector<2x1xf32>
    %1707 = vector.broadcast %1699 : vector<2x1xf32> to vector<2x32xf32>
    %1708 = arith.subf %1693, %1707 : vector<2x32xf32>
    %cst_802 = arith.constant 9.99999996E-13 : f32
    %1709 = vector.broadcast %cst_802 : f32 to vector<2x1xf32>
    %1710 = arith.addf %1706, %1709 : vector<2x1xf32>
    %1711 = math.rsqrt %1710 : vector<2x1xf32>
    %1712 = vector.broadcast %1711 : vector<2x1xf32> to vector<2x32xf32>
    %1713 = arith.mulf %1708, %1712 : vector<2x32xf32>
    %1714 = vector.broadcast %1694 : vector<1x32xf32> to vector<2x32xf32>
    %1715 = arith.mulf %1713, %1714 : vector<2x32xf32>
    %1716 = vector.broadcast %1695 : vector<1x32xf32> to vector<2x32xf32>
    %1717 = arith.addf %1715, %1716 : vector<2x32xf32>
    %1718 = arith.addf %14, %1717 : vector<2x32xf32>
    %c4_803 = arith.constant 4 : index
    %c0_804 = arith.constant 0 : index
    %1719 = vector.load %arg3[%c4_803, %c0_804] : memref<10x32xf32, #tpu.memory_space<vmem>>, vector<1x32xf32>
    %c5_805 = arith.constant 5 : index
    %c0_806 = arith.constant 0 : index
    %1720 = vector.load %arg3[%c5_805, %c0_806] : memref<10x32xf32, #tpu.memory_space<vmem>>, vector<1x32xf32>
    %cst_807 = arith.constant dense<0.000000e+00> : vector<2xf32>
    %1721 = vector.multi_reduction <add>, %1718, %cst_807 [1] : vector<2x32xf32> to vector<2xf32>
    %1722 = vector.shape_cast %1721 : vector<2xf32> to vector<2x1xf32>
    %cst_808 = arith.constant 3.200000e+01 : f32
    %1723 = vector.broadcast %cst_808 : f32 to vector<2x1xf32>
    %1724 = arith.divf %1722, %1723 : vector<2x1xf32>
    %1725 = vector.broadcast %1724 : vector<2x1xf32> to vector<2x32xf32>
    %1726 = arith.subf %1718, %1725 : vector<2x32xf32>
    %1727 = arith.mulf %1726, %1726 : vector<2x32xf32>
    %cst_809 = arith.constant dense<0.000000e+00> : vector<2xf32>
    %1728 = vector.multi_reduction <add>, %1727, %cst_809 [1] : vector<2x32xf32> to vector<2xf32>
    %1729 = vector.shape_cast %1728 : vector<2xf32> to vector<2x1xf32>
    %cst_810 = arith.constant 3.200000e+01 : f32
    %1730 = vector.broadcast %cst_810 : f32 to vector<2x1xf32>
    %1731 = arith.divf %1729, %1730 : vector<2x1xf32>
    %1732 = vector.broadcast %1724 : vector<2x1xf32> to vector<2x32xf32>
    %1733 = arith.subf %1718, %1732 : vector<2x32xf32>
    %cst_811 = arith.constant 9.99999996E-13 : f32
    %1734 = vector.broadcast %cst_811 : f32 to vector<2x1xf32>
    %1735 = arith.addf %1731, %1734 : vector<2x1xf32>
    %1736 = math.rsqrt %1735 : vector<2x1xf32>
    %1737 = vector.broadcast %1736 : vector<2x1xf32> to vector<2x32xf32>
    %1738 = arith.mulf %1733, %1737 : vector<2x32xf32>
    %1739 = vector.broadcast %1719 : vector<1x32xf32> to vector<2x32xf32>
    %1740 = arith.mulf %1738, %1739 : vector<2x32xf32>
    %1741 = vector.broadcast %1720 : vector<1x32xf32> to vector<2x32xf32>
    %1742 = arith.addf %1740, %1741 : vector<2x32xf32>
    %c0_812 = arith.constant 0 : index
    %c0_813 = arith.constant 0 : index
    %1743 = vector.load %arg10[%c0_812, %c0_813] : memref<32x64xf32, #tpu.memory_space<vmem>>, vector<32x64xf32>
    %cst_814 = arith.constant dense<0.000000e+00> : vector<2x64xf32>
    %1744 = tpu.matmul %1742, %1743, %cst_814 {dimension_numbers = #tpu.dot_dimension_numbers<[1], [0], [0], [1], [0, 0, 1, 1], [], []>} : vector<2x32xf32>, vector<32x64xf32>, vector<2x64xf32> -> vector<2x64xf32>
    %c0_815 = arith.constant 0 : index
    %c0_816 = arith.constant 0 : index
    %1745 = vector.load %arg11[%c0_815, %c0_816] : memref<1x64xf32, #tpu.memory_space<vmem>>, vector<1x64xf32>
    %1746 = vector.broadcast %1745 : vector<1x64xf32> to vector<2x64xf32>
    %1747 = arith.addf %1744, %1746 : vector<2x64xf32>
    %1748 = arith.mulf %1747, %1747 : vector<2x64xf32>
    %1749 = arith.mulf %1747, %1748 : vector<2x64xf32>
    %cst_817 = arith.constant 4.471500e-02 : f32
    %1750 = vector.broadcast %cst_817 : f32 to vector<2x64xf32>
    %1751 = arith.mulf %1750, %1749 : vector<2x64xf32>
    %1752 = arith.addf %1747, %1751 : vector<2x64xf32>
    %cst_818 = arith.constant 0.797884583 : f32
    %1753 = vector.broadcast %cst_818 : f32 to vector<2x64xf32>
    %1754 = arith.mulf %1753, %1752 : vector<2x64xf32>
    %1755 = math.tanh %1754 : vector<2x64xf32>
    %cst_819 = arith.constant 1.000000e+00 : f32
    %1756 = vector.broadcast %cst_819 : f32 to vector<2x64xf32>
    %1757 = arith.addf %1756, %1755 : vector<2x64xf32>
    %cst_820 = arith.constant 5.000000e-01 : f32
    %1758 = vector.broadcast %cst_820 : f32 to vector<2x64xf32>
    %1759 = arith.mulf %1758, %1757 : vector<2x64xf32>
    %1760 = arith.mulf %1747, %1759 : vector<2x64xf32>
    %c0_821 = arith.constant 0 : index
    %c0_822 = arith.constant 0 : index
    %1761 = vector.load %arg12[%c0_821, %c0_822] : memref<64x32xf32, #tpu.memory_space<vmem>>, vector<64x32xf32>
    %cst_823 = arith.constant dense<0.000000e+00> : vector<2x32xf32>
    %1762 = tpu.matmul %1760, %1761, %cst_823 {dimension_numbers = #tpu.dot_dimension_numbers<[1], [0], [0], [1], [0, 0, 1, 1], [], []>} : vector<2x64xf32>, vector<64x32xf32>, vector<2x32xf32> -> vector<2x32xf32>
    %1763 = vector.broadcast %3 : vector<1x32xf32> to vector<2x32xf32>
    %1764 = arith.addf %1762, %1763 : vector<2x32xf32>
    %1765 = arith.addf %1764, %1742 : vector<2x32xf32>
    %c6_824 = arith.constant 6 : index
    %c0_825 = arith.constant 0 : index
    %1766 = vector.load %arg3[%c6_824, %c0_825] : memref<10x32xf32, #tpu.memory_space<vmem>>, vector<1x32xf32>
    %c7_826 = arith.constant 7 : index
    %c0_827 = arith.constant 0 : index
    %1767 = vector.load %arg3[%c7_826, %c0_827] : memref<10x32xf32, #tpu.memory_space<vmem>>, vector<1x32xf32>
    %cst_828 = arith.constant dense<0.000000e+00> : vector<2xf32>
    %1768 = vector.multi_reduction <add>, %1765, %cst_828 [1] : vector<2x32xf32> to vector<2xf32>
    %1769 = vector.shape_cast %1768 : vector<2xf32> to vector<2x1xf32>
    %cst_829 = arith.constant 3.200000e+01 : f32
    %1770 = vector.broadcast %cst_829 : f32 to vector<2x1xf32>
    %1771 = arith.divf %1769, %1770 : vector<2x1xf32>
    %1772 = vector.broadcast %1771 : vector<2x1xf32> to vector<2x32xf32>
    %1773 = arith.subf %1765, %1772 : vector<2x32xf32>
    %1774 = arith.mulf %1773, %1773 : vector<2x32xf32>
    %cst_830 = arith.constant dense<0.000000e+00> : vector<2xf32>
    %1775 = vector.multi_reduction <add>, %1774, %cst_830 [1] : vector<2x32xf32> to vector<2xf32>
    %1776 = vector.shape_cast %1775 : vector<2xf32> to vector<2x1xf32>
    %cst_831 = arith.constant 3.200000e+01 : f32
    %1777 = vector.broadcast %cst_831 : f32 to vector<2x1xf32>
    %1778 = arith.divf %1776, %1777 : vector<2x1xf32>
    %1779 = vector.broadcast %1771 : vector<2x1xf32> to vector<2x32xf32>
    %1780 = arith.subf %1765, %1779 : vector<2x32xf32>
    %cst_832 = arith.constant 9.99999996E-13 : f32
    %1781 = vector.broadcast %cst_832 : f32 to vector<2x1xf32>
    %1782 = arith.addf %1778, %1781 : vector<2x1xf32>
    %1783 = math.rsqrt %1782 : vector<2x1xf32>
    %1784 = vector.broadcast %1783 : vector<2x1xf32> to vector<2x32xf32>
    %1785 = arith.mulf %1780, %1784 : vector<2x32xf32>
    %1786 = vector.broadcast %1766 : vector<1x32xf32> to vector<2x32xf32>
    %1787 = arith.mulf %1785, %1786 : vector<2x32xf32>
    %1788 = vector.broadcast %1767 : vector<1x32xf32> to vector<2x32xf32>
    %1789 = arith.addf %1787, %1788 : vector<2x32xf32>
    %c0_833 = arith.constant 0 : index
    %c0_834 = arith.constant 0 : index
    %1790 = vector.load %arg13[%c0_833, %c0_834] : memref<32x32xf32, #tpu.memory_space<vmem>>, vector<32x32xf32>
    %cst_835 = arith.constant dense<0.000000e+00> : vector<2x32xf32>
    %1791 = tpu.matmul %1789, %1790, %cst_835 {dimension_numbers = #tpu.dot_dimension_numbers<[1], [0], [0], [1], [0, 0, 1, 1], [], []>} : vector<2x32xf32>, vector<32x32xf32>, vector<2x32xf32> -> vector<2x32xf32>
    %1792 = vector.broadcast %4 : vector<1x32xf32> to vector<2x32xf32>
    %1793 = arith.addf %1791, %1792 : vector<2x32xf32>
    %1794 = arith.mulf %1793, %1793 : vector<2x32xf32>
    %1795 = arith.mulf %1793, %1794 : vector<2x32xf32>
    %cst_836 = arith.constant 4.471500e-02 : f32
    %1796 = vector.broadcast %cst_836 : f32 to vector<2x32xf32>
    %1797 = arith.mulf %1796, %1795 : vector<2x32xf32>
    %1798 = arith.addf %1793, %1797 : vector<2x32xf32>
    %cst_837 = arith.constant 0.797884583 : f32
    %1799 = vector.broadcast %cst_837 : f32 to vector<2x32xf32>
    %1800 = arith.mulf %1799, %1798 : vector<2x32xf32>
    %1801 = math.tanh %1800 : vector<2x32xf32>
    %cst_838 = arith.constant 1.000000e+00 : f32
    %1802 = vector.broadcast %cst_838 : f32 to vector<2x32xf32>
    %1803 = arith.addf %1802, %1801 : vector<2x32xf32>
    %cst_839 = arith.constant 5.000000e-01 : f32
    %1804 = vector.broadcast %cst_839 : f32 to vector<2x32xf32>
    %1805 = arith.mulf %1804, %1803 : vector<2x32xf32>
    %1806 = arith.mulf %1793, %1805 : vector<2x32xf32>
    %c8_840 = arith.constant 8 : index
    %c0_841 = arith.constant 0 : index
    %1807 = vector.load %arg3[%c8_840, %c0_841] : memref<10x32xf32, #tpu.memory_space<vmem>>, vector<1x32xf32>
    %c9_842 = arith.constant 9 : index
    %c0_843 = arith.constant 0 : index
    %1808 = vector.load %arg3[%c9_842, %c0_843] : memref<10x32xf32, #tpu.memory_space<vmem>>, vector<1x32xf32>
    %cst_844 = arith.constant dense<0.000000e+00> : vector<2xf32>
    %1809 = vector.multi_reduction <add>, %1806, %cst_844 [1] : vector<2x32xf32> to vector<2xf32>
    %1810 = vector.shape_cast %1809 : vector<2xf32> to vector<2x1xf32>
    %cst_845 = arith.constant 3.200000e+01 : f32
    %1811 = vector.broadcast %cst_845 : f32 to vector<2x1xf32>
    %1812 = arith.divf %1810, %1811 : vector<2x1xf32>
    %1813 = vector.broadcast %1812 : vector<2x1xf32> to vector<2x32xf32>
    %1814 = arith.subf %1806, %1813 : vector<2x32xf32>
    %1815 = arith.mulf %1814, %1814 : vector<2x32xf32>
    %cst_846 = arith.constant dense<0.000000e+00> : vector<2xf32>
    %1816 = vector.multi_reduction <add>, %1815, %cst_846 [1] : vector<2x32xf32> to vector<2xf32>
    %1817 = vector.shape_cast %1816 : vector<2xf32> to vector<2x1xf32>
    %cst_847 = arith.constant 3.200000e+01 : f32
    %1818 = vector.broadcast %cst_847 : f32 to vector<2x1xf32>
    %1819 = arith.divf %1817, %1818 : vector<2x1xf32>
    %1820 = vector.broadcast %1812 : vector<2x1xf32> to vector<2x32xf32>
    %1821 = arith.subf %1806, %1820 : vector<2x32xf32>
    %cst_848 = arith.constant 9.99999996E-13 : f32
    %1822 = vector.broadcast %cst_848 : f32 to vector<2x1xf32>
    %1823 = arith.addf %1819, %1822 : vector<2x1xf32>
    %1824 = math.rsqrt %1823 : vector<2x1xf32>
    %1825 = vector.broadcast %1824 : vector<2x1xf32> to vector<2x32xf32>
    %1826 = arith.mulf %1821, %1825 : vector<2x32xf32>
    %1827 = vector.broadcast %1807 : vector<1x32xf32> to vector<2x32xf32>
    %1828 = arith.mulf %1826, %1827 : vector<2x32xf32>
    %1829 = vector.broadcast %1808 : vector<1x32xf32> to vector<2x32xf32>
    %1830 = arith.addf %1828, %1829 : vector<2x32xf32>
    %c0_849 = arith.constant 0 : index
    %c0_850 = arith.constant 0 : index
    %1831 = vector.load %arg14[%c0_849, %c0_850] : memref<32x128xf32, #tpu.memory_space<vmem>>, vector<32x128xf32>
    %cst_851 = arith.constant dense<0.000000e+00> : vector<2x128xf32>
    %1832 = tpu.matmul %1830, %1831, %cst_851 {dimension_numbers = #tpu.dot_dimension_numbers<[1], [0], [0], [1], [0, 0, 1, 1], [], []>} : vector<2x32xf32>, vector<32x128xf32>, vector<2x128xf32> -> vector<2x128xf32>
    %c0_852 = arith.constant 0 : index
    %c0_853 = arith.constant 0 : index
    %1833 = vector.load %arg15[%c0_852, %c0_853] : memref<1x128xf32, #tpu.memory_space<vmem>>, vector<1x128xf32>
    %1834 = vector.broadcast %1833 : vector<1x128xf32> to vector<2x128xf32>
    %1835 = arith.addf %1832, %1834 : vector<2x128xf32>
    %c64_i32_854 = arith.constant 64 : i32
    %1836 = vector.broadcast %c64_i32_854 : i32 to vector<2x128xi32>
    %1837 = arith.cmpi slt, %15, %1836 : vector<2x128xi32>
    %cst_855 = arith.constant -1.000000e+30 : f32
    %1838 = vector.broadcast %cst_855 : f32 to vector<2x128xf32>
    %1839 = arith.select %1837, %1835, %1838 : vector<2x128xi1>, vector<2x128xf32>
    %c7_856 = arith.constant 7 : index
    %c0_857 = arith.constant 0 : index
    %c0_858 = arith.constant 0 : index
    %1840 = vector.load %arg17[%c7_856, %c0_857, %c0_858] : memref<8x2x128xf32, #tpu.memory_space<vmem>>, vector<1x2x128xf32>
    %1841 = vector.shape_cast %1840 : vector<1x2x128xf32> to vector<2x128xf32>
    %1842 = vector.shape_cast %1839 : vector<2x128xf32> to vector<1x2x128xf32>
    tpu.vector_store %arg17[%c7_856, %c0_857, %c0_858], %1842 {strides = array<i32>} : memref<8x2x128xf32, #tpu.memory_space<vmem>>, vector<1x2x128xf32>,
    %cst_859 = arith.constant dense<0xFF800000> : vector<2xf32>
    %1843 = vector.multi_reduction <maximumf>, %1839, %cst_859 [1] : vector<2x128xf32> to vector<2xf32>
    %1844 = vector.shape_cast %1843 : vector<2xf32> to vector<2x1xf32>
    %1845 = vector.broadcast %1844 : vector<2x1xf32> to vector<2x128xf32>
    %1846 = arith.cmpf oge, %1839, %1845 : vector<2x128xf32>
    %1847 = arith.sitofp %15 : vector<2x128xi32> to vector<2x128xf32>
    %cst_860 = arith.constant 1.280000e+02 : f32
    %1848 = vector.broadcast %cst_860 : f32 to vector<2x128xf32>
    %1849 = arith.select %1846, %1847, %1848 : vector<2x128xi1>, vector<2x128xf32>
    %cst_861 = arith.constant dense<0x7F800000> : vector<2xf32>
    %1850 = vector.multi_reduction <minimumf>, %1849, %cst_861 [1] : vector<2x128xf32> to vector<2xf32>
    %1851 = vector.shape_cast %1850 : vector<2xf32> to vector<2x1xf32>
    %1852 = arith.fptosi %1851 : vector<2x1xf32> to vector<2x1xi32>
    %c0_862 = arith.constant 0 : index
    %c7_863 = arith.constant 7 : index
    %1853 = vector.load %arg16[%c0_862, %c7_863] : memref<2x8xi32, #tpu.memory_space<vmem>>, vector<2x1xi32>
    tpu.vector_store %arg16[%c0_862, %c7_863], %1852 {strides = array<i32>} : memref<2x8xi32, #tpu.memory_space<vmem>>, vector<2x1xi32>,
    return
  }
}

</mosaic_0001>

<bundles_post_ra>
// kernel: multitask_forward.2
= control target key start
LH: loop header
LB: loop body
LE: loop exit
PB: predicated region body
PF: predicated region fallthrough
CT: control target
= control target key end

     0   :  { %v338_v3 = vmov 0.0|0.0   ;;  %vm339_vm0 = vmmov 0   ;;  %v340_v6 = vmov 0.0   ;;  %s453_s0 = inlined_call_operand.vmem [shape: f32[4,2,32], index: 0, kind: input, shape index: {}]   ;;  %s454_s1 = inlined_call_operand.vmem [shape: f32[32,32], index: 1, kind: input, shape index: {}]   ;;  %s455_s2 = inlined_call_operand.vmem [shape: f32[1,32], index: 2, kind: input, shape index: {}]   ;;  %s456_s3 = inlined_call_operand.vmem [shape: f32[4,32], index: 3, kind: input, shape index: {}]   ;;  %s457_s4 = inlined_call_operand.vmem [shape: f32[32,5], index: 4, kind: input, shape index: {}]   ;;  %s458_s5 = inlined_call_operand.vmem [shape: f32[1,5], index: 5, kind: input, shape index: {}]   ;;  %s459_s6 = inlined_call_operand.vmem [shape: f32[2,32], index: 6, kind: output, shape index: {0}]   ;;  %s460_s7 = inlined_call_operand.hbm [shape: f32[2,5], index: 7, kind: output, shape index: {1}]  }
   0x1   :  { %v36_v0 = vld [vmem:[%s454_s1] sm:$0xff]  ;;  %v37_v1 = vld [vmem:[%s454_s1 + $0x8] sm:$0xff]  ;;  %v38_v2 = vld [vmem:[%s454_s1 + $0x10] sm:$0xff]  ;;  %296 = vmatprep.subr.bf16.mxu0 %v338_v3  ;;  %282 = vmatprep.mubr.msk.f32.mxu0 %vm339_vm0, %v340_v6 }
   0x2   :  { %v297_v4 = vpack.c.bf16 %v37_v1, %v36_v0  ;;  %v39_v5 = vld [vmem:[%s454_s1 + $0x18] sm:$0xff]  ;;  %v26_v7 = vld [vmem:[%s453_s0] sm:$0x3]  ;;  %v254_v8 = vld [vmem:[%s453_s0 + $0x2] sm:$0x3]  ;;  %302 = vmatprep.subr.bf16.mxu1 %v338_v3  ;;  %293 = vmatprep.mubr.msk.f32.mxu1 %vm339_vm0, %v340_v6 }
   0x3   :  { %v29_v9 = vmax.f32 %v26_v7, %v254_v8  ;;  %v255_v10 = vld [vmem:[%s453_s0 + $0x4] sm:$0x3]  ;;  %v300_v11 = vpack.c.bf16 %v39_v5, %v38_v2  ;;  %v256_v12 = vld [vmem:[%s453_s0 + $0x6] sm:$0x3] }
   0x4   :  { %298 = vmatpush3.bf16.msra.mxu0 %v297_v4 }
   0x5   :  { %13 = vsyncpa [#allocation3], 0  ;;  %299 = vmatprep.subr.bf16.mxu0 %v338_v3  ;;  %v32_v13 = vmax.f32 %v29_v9, %v255_v10  ;;  %vm47_vm1 = vcmask 261120   ;;  %v150_v15 = vld [vmem:[%s457_s4] sm:$0xff]  ;;  %v151_v16 = vld [vmem:[%s457_s4 + $0x8] sm:$0xff]  ;;  %v132_v23 = vlaneseq  ;;  %vm148_vm2 = vcmask 254976  }
   0x6   :  { %v303_v17 = vpack.c.bf16 %v151_v16, %v150_v15  ;;  %v152_v18 = vld [vmem:[%s457_s4 + $0x10] sm:$0xff]  ;;  %v153_v19 = vld [vmem:[%s457_s4 + $0x18] sm:$0xff]  ;;  %v124_v21 = vld [vmem:[%s456_s3 + $0x3] sm:$0x1]  ;;  %s341_s12 = smov [#allocation2]   ;;  %vm234_vm3 = vcmask 33792  }
   0x7   :  { %v35_v14 = vmax.f32 %v32_v13, %v256_v12  ;;  %v306_v20 = vpack.c.bf16 %v153_v19, %v152_v18  ;;  %v130_v22 = vadd.f32 1e-05, %v124_v21  ;;  %v133_v24 = vshrl.u32 %v132_v23, 7  ;;  %v257_v27 = vld [vmem:[%s455_s2] ss:$0 sm:$0xff]  ;;  %s244_s13 = sshll.u32 %s341_s12, 4  ;;  %s245_s13 = int_to_ptr.vmem [resolvable:$true] %s244_s13 }
   0x8   :  { %301 = vmatpush3.bf16.msra.mxu0 %v300_v11  ;;  %304 = vmatpush3.bf16.msra.mxu1 %v303_v17  ;;  %v259_v29 = vld [vmem:[%s456_s3 + $0x2] ss:$0 sm:$0xff]  ;;  %v260_v34 = vld [vmem:[%s456_s3] ss:$0 sm:$0xff]  ;;  %v261_v36 = vld [vmem:[%s456_s3 + $0x1] ss:$0 sm:$0xff]  ;;  %p319_p1 = scmp.lt.s32.totalorder %s245_s13, %s245_s13 }
   0x9   :  { %305 = vmatprep.subr.bf16.mxu1 %v338_v3  ;;  %312 = vrsqrt.f32 %v130_v22  ;;  %v134_v25 = vsub.s32 0, %v133_v24  ;;  %v262_v40 = vld [vmem:[%s458_s5] ss:$0 sm:$0xff]  ;;  %s314_s3 = scalar_lea.vmem %s245_s13, 32 }
   0xa   :  { %p315_p0 = scmp.ne.s32.totalorder %s245_s13, %s314_s3  ;;  %p320_p2 = scmp.lt.s32.totalorder %s314_s3, %s314_s3 }
   0xb   :  { %283 = vmatmul.mubr.msk.f32.vlgmr.msra.gmra.mrb[0].mxu0 %vm47_vm1, %v35_v14 }
   0xc   :  { %307 = vmatpush3.bf16.msra.mxu1 %v306_v20  ;;  %p321_p3 = por %p320_p2, %p319_p1 }
   0xe   :  { %p322_p4 = pnand %p321_p3, %p315_p0 }
  0x13   :  { %v313_v26 = vpop.eup %312 }
  0x14   :  { %v135_v31 = vrot.slane %v313_v26, %v134_v25 }
  0xde   :  { %v117_v28 = vpop.f32.mrb[0].mxu0 }
  0xdf   :  { %v118_v30 = vadd.f32 %v257_v27, %v117_v28  ;;  %v284_v32 = vpop.f32.mrb[1].mxu0 }
  0xe1   :  { %v129_v33 = vsub.f32 %v118_v30, %v259_v29 }
  0xe3   :  { %v136_v35 = vmul.f32 %v135_v31, %v129_v33 }
  0xe5   :  { %v141_v37 = vmul.f32 %v260_v34, %v136_v35 }
  0xe7   :  { %v146_v38 = vadd.f32 %v261_v36, %v141_v37 }
  0xe9   :  { %v147_v39 = vmax.f32 %v146_v38, 0.0 }
  0xeb   :  { %149 = vst.msk [vmem:[%s459_s6] sm:$0x3] %vm148_vm2, %v147_v39  ;;  %294 = vmatmul.mubr.msk.f32.vlgmr.msra.gmra.mrb[0].mxu1 %vm47_vm1, %v147_v39 }
 0x1be   :  { %v230_v41 = vpop.f32.mrb[0].mxu1 }
 0x1bf   :  { %v231_v42 = vadd.f32 %v262_v40, %v230_v41  ;;  %v295_v43 = vpop.f32.mrb[1].mxu1 }
 0x1c1   :  { %235 = vst.msk [vmem:[#allocation2] sm:$0x3] %vm234_vm3, %v231_v42 }
 0x1c2   :  { %325 = shalt.err (!%p322_p4)
}
 0x1c3   :  { %s326_s1 = scalar_lea.hbm %s460_s7, 32 }
 0x1c4   :  { %p327_p5 = scmp.ne.s32.totalorder %s460_s7, %s326_s1  ;;  %p330_p6 = scmp.lt.u32.totalorder %s326_s1, %s460_s7 }
 0x1c6   :  { %p332_p7 = pnand %p330_p6, %p327_p5 }
 0x1c8   :  { %335 = shalt.err (!%p332_p7)
}
 0x1c9   :  { %247 = dma.vmem_to_hbm [thread:$0]  %s245_s13, 32, %s460_s7, [#allocation3]  }
 0x1ca   :  { %336 = dma.done.wait [#allocation3], 32  }
 0x1cb   :  { %337 = vsyncadd [#allocation3], 4294967264 }
 0x1cc   :  { %253 = vsyncpa [#allocation3], 1 }

// kernel: multitask_forward.3
= control target key start
LH: loop header
LB: loop body
LE: loop exit
PB: predicated region body
PF: predicated region fallthrough
CT: control target
= control target key end

     0   :  { %s12224_s0 = inlined_call_operand.vmem [shape: f32[2,32], index: 0, kind: input, shape index: {}]   ;;  %s12225_s1 = inlined_call_operand.vmem [shape: f32[128,32], index: 1, kind: input, shape index: {}]   ;;  %s12226_s2 = inlined_call_operand.vmem [shape: f32[8,32], index: 2, kind: input, shape index: {}]   ;;  %s12227_s3 = inlined_call_operand.vmem [shape: f32[10,32], index: 3, kind: input, shape index: {}]   ;;  %s12228_s4 = inlined_call_operand.vmem [shape: f32[6,32], index: 4, kind: input, shape index: {}]   ;;  %s12229_s5 = inlined_call_operand.vmem [shape: f32[32,96], index: 5, kind: input, shape index: {}]   ;;  %s12230_s6 = inlined_call_operand.vmem [shape: f32[1,96], index: 6, kind: input, shape index: {}]   ;;  %s12231_s7 = inlined_call_operand.vmem [shape: f32[32,32], index: 7, kind: input, shape index: {}]   ;;  %s12232_s8 = inlined_call_operand.vmem [shape: f32[32,32], index: 8, kind: input, shape index: {}]   ;;  %s12233_s9 = inlined_call_operand.vmem [shape: f32[32,32], index: 9, kind: input, shape index: {}]   ;;  %s12234_s10 = inlined_call_operand.vmem [shape: f32[32,64], index: 10, kind: input, shape index: {}]   ;;  %s12235_s11 = inlined_call_operand.vmem [shape: f32[1,64], index: 11, kind: input, shape index: {}]   ;;  %s12236_s12 = inlined_call_operand.vmem [shape: f32[64,32], index: 12, kind: input, shape index: {}]   ;;  %s12237_s13 = inlined_call_operand.vmem [shape: f32[32,32], index: 13, kind: input, shape index: {}]   ;;  %s12238_s14 = inlined_call_operand.vmem [shape: f32[32,128], index: 14, kind: input, shape index: {}]   ;;  %s12239_s15 = inlined_call_operand.vmem [shape: f32[1,128], index: 15, kind: input, shape index: {}]   ;;  %s12240_s16 = inlined_call_operand.hbm [shape: s32[2,8], index: 16, kind: output, shape index: {0}]   ;;  %s12241_s17 = inlined_call_operand.vmem [shape: f32[8,2,128], index: 17, kind: output, shape index: {1}]  }
   0x1   :  { %12243 = sst [smem:[#allocation7_spill]] %s12224_s0 }
   0x2   :  { %12244 = sst [smem:[#allocation8_spill]] %s12225_s1 }
   0x3   :  { %v63_v0 = vld [vmem:[%s12232_s8] sm:$0xff]  ;;  %v64_v1 = vld [vmem:[%s12232_s8 + $0x8] sm:$0xff]  ;;  %v65_v2 = vld [vmem:[%s12232_s8 + $0x10] sm:$0xff]  ;;  %v10120_v3 = vmov 0.0|0.0   ;;  %vm10121_vm0 = vmmov 0   ;;  %v10122_v6 = vmov 0.0  }
   0x4   :  { %9434 = vmatprep.subr.bf16.mxu0 %v10120_v3  ;;  %v9435_v4 = vpack.c.bf16 %v64_v1, %v63_v0  ;;  %v66_v5 = vld [vmem:[%s12232_s8 + $0x18] sm:$0xff]  ;;  %8517 = vmatprep.mubr.msk.f32.mxu0 %vm10121_vm0, %v10122_v6  ;;  %230 = vst [vmem:[%s12241_s17] sm:$0x3] %v10122_v6  ;;  %vm71_vm1 = vcmask 261120   ;;  %s12245_s20 = sld [smem:[#allocation8_spill]]  ;;  %s12246_s25 = sld [smem:[#allocation7_spill]]  ;;  %v145_v12 = vld [vmem:[%s12233_s9] sm:$0xff] }
   0x5   :  { %231 = vst.msk [vmem:[#allocation2] sm:$0xff] %vm71_vm1, %v10122_v6  ;;  %232 = vst.msk [vmem:[#allocation2 + $0x8] sm:$0xff] %vm71_vm1, %v10122_v6  ;;  %9440 = vmatprep.subr.bf16.mxu1 %v10120_v3  ;;  %8528 = vmatprep.mubr.msk.f32.mxu1 %vm10121_vm0, %v10122_v6  ;;  %v9438_v7 = vpack.c.bf16 %v66_v5, %v65_v2  ;;  %v146_v13 = vld [vmem:[%s12233_s9 + $0x8] sm:$0xff] }
   0x6   :  { %233 = vst.msk [vmem:[#allocation3] sm:$0xff] %vm71_vm1, %v10122_v6  ;;  %234 = vst.msk [vmem:[#allocation3 + $0x8] sm:$0xff] %vm71_vm1, %v10122_v6  ;;  %9436 = vmatpush3.bf16.msra.mxu0 %v9435_v4  ;;  %v9441_v16 = vpack.c.bf16 %v146_v13, %v145_v12 }
   0x7   :  { %9437 = vmatprep.subr.bf16.mxu0 %v10120_v3 }
   0xa   :  { %v238_v8 = vld [vmem:[%s12245_s20] sm:$0xff]  ;;  %v239_v9 = vld [vmem:[%s12245_s20 + $0x8] sm:$0xff]  ;;  %9439 = vmatpush3.bf16.msra.mxu0 %v9438_v7  ;;  %v240_v14 = vld [vmem:[%s12245_s20 + $0x10] sm:$0xff] }
   0xb   :  { %v62_v10 = vld [vmem:[%s12246_s25] sm:$0x3]  ;;  %v10258_v11 = vpack.c.bf16 %v239_v9, %v238_v8  ;;  %9446 = vmatprep.subr.bf16.mxu0 %v10120_v3  ;;  %v241_v15 = vld [vmem:[%s12245_s20 + $0x18] sm:$0xff] }
   0xc   :  { %23 = vsyncpa [#allocation5], 0  ;;  %9442 = vmatpush3.bf16.msra.mxu1 %v9441_v16  ;;  %v10275_v17 = vpack.c.bf16 %v241_v15, %v240_v14  ;;  %v242_v18 = vld [vmem:[%s12245_s20 + $0x20] sm:$0xff]  ;;  %v243_v19 = vld [vmem:[%s12245_s20 + $0x28] sm:$0xff]  ;;  %v226_v33 = vlaneseq  ;;  %v10123_v38 = vmov 1.0   ;;  %vm336_vm3 = vcmask 254976  }
   0xd   :  { %8518 = vmatmul.mubr.msk.f32.vlgmr.msra.gmra.mrb[0].mxu0 %vm71_vm1, %v62_v10  ;;  %9443 = vmatprep.subr.bf16.mxu1 %v10120_v3  ;;  %v10288_v20 = vpack.c.bf16 %v243_v19, %v242_v18  ;;  %v244_v21 = vld [vmem:[%s12245_s20 + $0x30] sm:$0xff]  ;;  %v245_v22 = vld [vmem:[%s12245_s20 + $0x38] sm:$0xff]  ;;  %v246_v24 = vld [vmem:[%s12245_s20 + $0x40] sm:$0xff]  ;;  %vm449_vm4 = vcmask 253952   ;;  %vm621_vm5 = vcmask 254977   ;;  %vm535_vm7 = vcmask 57344  }
   0xe   :  { %9448 = vmatpush3.bf16.msra.mxu0 %v10258_v11  ;;  %8563 = vmatprep.mubr.msk.f32.mxu0 %vm10121_vm0, %v10122_v6  ;;  %v10298_v23 = vpack.c.bf16 %v245_v22, %v244_v21  ;;  %v247_v25 = vld [vmem:[%s12245_s20 + $0x48] sm:$0xff]  ;;  %v248_v27 = vld [vmem:[%s12245_s20 + $0x50] sm:$0xff]  ;;  %v249_v28 = vld [vmem:[%s12245_s20 + $0x58] sm:$0xff]  ;;  %v10340_v37 = vand.u32 127, %v226_v33  ;;  %s10125_s21 = smov 64   ;;  %vm547_vm8 = vcmask 64512  }
   0xf   :  { %9449 = vmatprep.subr.bf16.mxu0 %v10120_v3  ;;  %v10308_v26 = vpack.c.bf16 %v247_v25, %v246_v24  ;;  %v10318_v29 = vpack.c.bf16 %v249_v28, %v248_v27  ;;  %v250_v30 = vld [vmem:[%s12245_s20 + $0x60] sm:$0xff]  ;;  %v251_v31 = vld [vmem:[%s12245_s20 + $0x68] sm:$0xff]  ;;  %v252_v34 = vld [vmem:[%s12245_s20 + $0x70] sm:$0xff]  ;;  %vm791_vm9 = vcmask 1040384   ;;  %vm1031_vm10 = vcmask 523264  }
  0x10   :  { %v10328_v32 = vpack.c.bf16 %v251_v31, %v250_v30  ;;  %v253_v35 = vld [vmem:[%s12245_s20 + $0x78] sm:$0xff]  ;;  %vm235_vm2 = vcmp.eq.s32.totalorder %v10340_v37, 1  ;;  %v147_v39 = vld [vmem:[%s12233_s9 + $0x10] sm:$0xff]  ;;  %v7875_v42 = vld [vmem:[%s12228_s4 + $0x1] ss:$0 sm:$0xff]  ;;  %vm533_vm6 = vcmp.lt.s32.totalorder %v10340_v37, 1 }
  0x11   :  { %v10338_v36 = vpack.c.bf16 %v253_v35, %v252_v34  ;;  %v148_v40 = vld [vmem:[%s12233_s9 + $0x18] sm:$0xff]  ;;  %v7880_v46 = vld [vmem:[%s12226_s2] ss:$0 sm:$0xff]  ;;  %v10368_v48 = vld [vmem:[%s12228_s4 + $0x5] ss:$0 sm:$0xff]  ;;  %s10124_s9 = smov 96  }
  0x12   :  { %9451 = vmatpush3.bf16.msra.mxu0 %v10275_v17  ;;  %v9444_v41 = vpack.c.bf16 %v148_v40, %v147_v39  ;;  %v361_v58 = vld [vmem:[%s12229_s5] sm:$0xff]  ;;  %v362_v59 = vld [vmem:[%s12229_s5 + $0x8] sm:$0xff]  ;;  %v363_v63 = vld [vmem:[%s12229_s5 + $0x10] sm:$0xff]  ;;  %vm1330_vm11 = vcmp.lt.s32.totalorder %v10340_v37, 64  ;;  %vm1334_vm12 = vcmask 1041408   ;;  %vm228_vm13 = vcmask 1024  }
  0x13   :  { %9452 = vmatprep.subr.bf16.mxu0 %v10120_v3  ;;  %v10379_v60 = vpack.c.bf16 %v362_v59, %v361_v58  ;;  %v364_v0 = vld [vmem:[%s12229_s5 + $0x18] sm:$0xff]  ;;  %v10398_v8 = vld [vmem:[%s12227_s3] ss:$0 sm:$0xff]  ;;  %v10403_v10 = vld [vmem:[%s12227_s3 + $0x1] ss:$0 sm:$0xff]  ;;  %vm1345_vm15 = vcmask 9224  }
  0x14   :  { %9445 = vmatpush3.bf16.msra.mxu1 %v9444_v41  ;;  %v10391_v1 = vpack.c.bf16 %v364_v0, %v363_v63  ;;  %v10416_v14 = vld [vmem:[%s12230_s6] ss:$0 sm:$0xff]  ;;  %v794_v0 = vld [vmem:[%s12231_s7 + $0x8] sm:$0xff] }
  0x15   :  { %9470 = vmatprep.subr.bf16.mxu1 %v10120_v3  ;;  %v793_v63 = vld [vmem:[%s12231_s7] sm:$0xff] }
  0x16   :  { %9454 = vmatpush3.bf16.msra.mxu0 %v10288_v20 }
  0x17   :  { %9455 = vmatprep.subr.bf16.mxu0 %v10120_v3 }
  0x1a   :  { %9457 = vmatpush3.bf16.msra.mxu0 %v10298_v23 }
  0x1b   :  { %9458 = vmatprep.subr.bf16.mxu0 %v10120_v3 }
  0x1e   :  { %9460 = vmatpush3.bf16.msra.mxu0 %v10308_v26 }
  0x1f   :  { %9461 = vmatprep.subr.bf16.mxu0 %v10120_v3 }
  0x22   :  { %9463 = vmatpush3.bf16.msra.mxu0 %v10318_v29 }
  0x23   :  { %9464 = vmatprep.subr.bf16.mxu0 %v10120_v3 }
  0x26   :  { %9466 = vmatpush3.bf16.msra.mxu0 %v10328_v32 }
  0x27   :  { %9467 = vmatprep.subr.bf16.mxu0 %v10120_v3 }
  0x2a   :  { %9469 = vmatpush3.bf16.msra.mxu0 %v10338_v36 }
  0x2b   :  { %9482 = vmatprep.subr.bf16.mxu0 %v10120_v3 }
  0x2d   :  { %8564 = vmatmul.mubr.msk.f32.vlgmr.msra.gmra.mrb[2].mxu0 %vm235_vm2, %v10123_v38 }
  0x2e   :  { %8616 = vmatprep.mubr.msk.f32.mxu0 %vm10121_vm0, %v10122_v6 }
  0xe0   :  { %v141_v43 = vpop.f32.mrb[0].mxu0 }
  0xe1   :  { %v142_v44 = vadd.f32 %v7875_v42, %v141_v43  ;;  %v8519_v45 = vpop.f32.mrb[1].mxu0 }
  0xe3   :  { %8529 = vmatmul.mubr.msk.f32.vlgmr.msra.gmra.mrb[0].mxu1 %vm71_vm1, %v142_v44 }
  0xe4   :  { %8574 = vmatprep.mubr.msk.f32.mxu1 %vm10121_vm0, %v10122_v6  ;;  %9472 = vmatpush3.bf16.msra.mxu1 %v10379_v60 }
  0xe5   :  { %9473 = vmatprep.subr.bf16.mxu1 %v10120_v3 }
  0xe8   :  { %9475 = vmatpush3.bf16.msra.mxu1 %v10391_v1 }
  0xe9   :  { %8577 = vmatprep.subr.mxu1 %v10122_v6 }
 0x100   :  { %v325_v47 = vpop.f32.mrb[2].mxu0 }
 0x101   :  { %v326_v49 = vadd.f32 %v7880_v46, %v325_v47  ;;  %v8565_v50 = vpop.f32.mrb[3].mxu0 }
 0x103   :  { %v333_v51 = vadd.f32 %v10368_v48, %v326_v49 }
 0x105   :  { %v337_v52 = vsel %vm336_vm3, %v333_v51, 0.0 }
 0x106   :  { %338 = vadd.xlane.f32.xlu0 %v337_v52 }
 0x193   :  { %v339_v53 = vpop.xlane.xlu0 %338 }
 0x194   :  { %v341_v54 = vmul.f32 0.03125, %v339_v53 }
 0x196   :  { %v342_v55 = vsub.f32 %v333_v51, %v341_v54 }
 0x198   :  { %v343_v56 = vmul.f32 %v342_v55, %v342_v55 }
 0x19a   :  { %v344_v57 = vsel %vm336_vm3, %v343_v56, 0.0 }
 0x19b   :  { %345 = vadd.xlane.f32.xlu0 %v344_v57 }
 0x1b6   :  { %v10381_v61 = vpop.f32.mrb[0].mxu1 }
 0x1b7   :  { %v8530_v62 = vpop.f32.mrb[1].mxu1 }
 0x228   :  { %v346_v2 = vpop.xlane.xlu0 %345 }
 0x229   :  { %v347_v4 = vmul.f32 0.03125, %v346_v2 }
 0x22b   :  { %v348_v5 = vadd.f32 1e-12, %v347_v4  ;;  %v10455_v4 = vpack.c.bf16 %v794_v0, %v793_v63 }
 0x22d   :  { %9930 = vrsqrt.f32 %v348_v5 }
 0x237   :  { %v9931_v7 = vpop.eup %9930 }
 0x238   :  { %v350_v9 = vmul.f32 %v9931_v7, %v342_v55  ;;  %v795_v7 = vld [vmem:[%s12231_s7 + $0x10] sm:$0xff] }
 0x23a   :  { %v355_v12 = vmul.f32 %v10398_v8, %v350_v9  ;;  %v796_v9 = vld [vmem:[%s12231_s7 + $0x18] sm:$0xff] }
 0x23c   :  { %v10407_v13 = vadd.f32 %v10403_v10, %v355_v12  ;;  %v10468_v12 = vpack.c.bf16 %v796_v9, %v795_v7  ;;  %v10529_v9 = vld [vmem:[%s12227_s3 + $0x4] ss:$0 sm:$0xff] }
 0x23e   :  { %8575 = vmatmul.mubr.msk.f32.vlgmr.msra.gmra.mrb[2].mxu1 %vm71_vm1, %v10407_v13 }
 0x23f   :  { %8579 = vmatprep.mubr.msk.f32.mxu1 %vm10121_vm0, %v10122_v6 }
 0x311   :  { %v441_v15 = vpop.f32.mrb[2].mxu1 }
 0x312   :  { %v442_v16 = vadd.f32 %v10416_v14, %v441_v15  ;;  %v8576_v18 = vpop.f32.mrb[3].mxu1 }
 0x314   :  { %446 = vrot.lane.b32.xlu1 %v442_v16, %s10124_s9  ;;  %v626_v45 = vrot.slane %v442_v16, 1 }
 0x386   :  { %v447_v19 = vpop.permute.xlu1 %446 }
 0x387   :  { %450 = vst.msk [vmem:[#allocation2] sm:$0x1] %vm449_vm4, %v447_v19 }
 0x388   :  { %622 = vst.msk [vmem:[#allocation2 + $0x7] sm:$0x2] %vm621_vm5, %v447_v19 }
 0x38e   :  { %v455_v21 = vld [vmem:[#allocation2] sm:$0xff] }
 0x38f   :  { %8578 = vmatpush3.xpose.msk.msra.mxu1 %vm71_vm1, %v455_v21  ;;  %v624_v44 = vld [vmem:[#allocation2 + $0x8] sm:$0xff]  ;;  %v10479_v21 = vld [vmem:[%s12228_s4] ss:$0 sm:$0xff] }
 0x390   :  { %8582 = vmatprep.subr.mxu1 %v10122_v6 }
 0x392   :  { %8580 = vmatmul.mubr.msk.f32.vlgmr.msra.gmra.mrb[4].mxu1 %vm71_vm1, %v442_v16 }
 0x393   :  { %8584 = vmatprep.mubr.msk.f32.mxu1 %vm10121_vm0, %v10122_v6 }
 0x465   :  { %v528_v22 = vpop.f32.mrb[4].mxu1 }
 0x466   :  { %v532_v24 = vmul.f32 0.17677669, %v528_v22  ;;  %v8581_v25 = vpop.f32.mrb[5].mxu1 }
 0x468   :  { %v534_v27 = vsel %vm533_vm6, %v532_v24, -1e+30 }
 0x469   :  { %v536_v28 = vsel %vm535_vm7, %v534_v27, -inf }
 0x46a   :  { %537 = vmax.xlane.f32.xlu1 %v536_v28 }
 0x4f7   :  { %v538_v30 = vpop.xlane.xlu1 %537 }
 0x4f8   :  { %v539_v31 = vsub.f32 %v534_v27, %v538_v30 }
 0x4fa   :  { %v540_v33 = vmul.f32 1.442695, %v539_v31 }
 0x4fc   :  { %9932 = vpow2.f32 %v540_v33 }
 0x506   :  { %v9933_v34 = vpop.eup %9932 }
 0x507   :  { %v542_v35 = vsel %vm535_vm7, %v9933_v34, 0.0 }
 0x508   :  { %543 = vadd.xlane.f32.xlu0 %v542_v35 }
 0x51e   :  { %451 = vrot.lane.b32.xlu0 %v442_v16, %s10125_s21 }
 0x595   :  { %v544_v39 = vpop.xlane.xlu0 %543 }
 0x596   :  { %9934 = vrcp.f32 %v544_v39 }
 0x599   :  { %v452_v40 = vpop.permute.xlu0 %451 }
 0x59a   :  { %454 = vst.msk [vmem:[#allocation3] sm:$0x1] %vm449_vm4, %v452_v40 }
 0x59b   :  { %623 = vst.msk [vmem:[#allocation3 + $0x7] sm:$0x2] %vm621_vm5, %v452_v40 }
 0x5a0   :  { %v9935_v41 = vpop.eup %9934 }
 0x5a1   :  { %v456_v42 = vld [vmem:[#allocation3] sm:$0xff]  ;;  %v546_v43 = vmul.f32 %v9935_v41, %v9933_v34 }
 0x5a2   :  { %8583 = vmatpush3.msra.mxu1 %v456_v42  ;;  %v625_v46 = vld [vmem:[#allocation3 + $0x8] sm:$0xff] }
 0x5a3   :  { %8585 = vmatmul.mubr.msk.f32.vlgmr.msra.gmra.mrb[6].mxu1 %vm547_vm8, %v546_v43  ;;  %8587 = vmatprep.subr.mxu1 %v10122_v6  ;;  %v10488_v43 = vld [vmem:[%s12227_s3 + $0x2] ss:$0 sm:$0xff] }
 0x5a4   :  { %8589 = vmatprep.mubr.msk.f32.mxu1 %vm10121_vm0, %v10122_v6 }
 0x5a9   :  { %8588 = vmatpush3.xpose.msk.msra.mxu1 %vm71_vm1, %v624_v44  ;;  %v7877_v44 = vld [vmem:[%s12228_s4 + $0x2] ss:$0 sm:$0xff] }
 0x5aa   :  { %8592 = vmatprep.subr.mxu1 %v10122_v6 }
 0x5ac   :  { %8590 = vmatmul.mubr.msk.f32.vlgmr.msra.gmra.mrb[8].mxu1 %vm71_vm1, %v626_v45  ;;  %v10496_v45 = vld [vmem:[%s12227_s3 + $0x3] ss:$0 sm:$0xff] }
 0x5ad   :  { %8593 = vmatpush3.msra.mxu1 %v625_v46  ;;  %8594 = vmatprep.mubr.msk.f32.mxu1 %vm10121_vm0, %v10122_v6 }
 0x5ae   :  { %9476 = vmatprep.subr.bf16.mxu1 %v10120_v3 }
 0x676   :  { %v617_v47 = vpop.f32.mrb[6].mxu1 }
 0x677   :  { %v8586_v49 = vpop.f32.mrb[7].mxu1 }
 0x67f   :  { %v698_v50 = vpop.f32.mrb[8].mxu1 }
 0x680   :  { %v702_v51 = vmul.f32 0.17677669, %v698_v50  ;;  %v8591_v52 = vpop.f32.mrb[9].mxu1 }
 0x682   :  { %v703_v53 = vsel %vm533_vm6, %v702_v51, -1e+30  ;;  %vm1638_vm6 = vcmp.lt.s32.totalorder %v10340_v37, 2 }
 0x683   :  { %v704_v54 = vsel %vm535_vm7, %v703_v53, -inf }
 0x684   :  { %705 = vmax.xlane.f32.xlu0 %v704_v54 }
 0x711   :  { %v706_v55 = vpop.xlane.xlu0 %705 }
 0x712   :  { %v707_v56 = vsub.f32 %v703_v53, %v706_v55 }
 0x714   :  { %v708_v57 = vmul.f32 1.442695, %v707_v56 }
 0x716   :  { %9936 = vpow2.f32 %v708_v57  ;;  %v926_v57 = vld [vmem:[%s12234_s10] sm:$0xff] }
 0x720   :  { %v9937_v58 = vpop.eup %9936 }
 0x721   :  { %v710_v59 = vsel %vm535_vm7, %v9937_v58, 0.0 }
 0x722   :  { %711 = vadd.xlane.f32.xlu1 %v710_v59  ;;  %v928_v59 = vld [vmem:[%s12234_s10 + $0x10] sm:$0xff] }
 0x7af   :  { %v712_v62 = vpop.xlane.xlu1 %711 }
 0x7b0   :  { %9938 = vrcp.f32 %v712_v62  ;;  %v929_v62 = vld [vmem:[%s12234_s10 + $0x18] sm:$0xff] }
 0x7b1   :  { %v10522_v63 = vpack.c.bf16 %v929_v62, %v928_v59  ;;  %v1131_v62 = vld [vmem:[%s12237_s13] sm:$0xff] }
 0x7ba   :  { %v9939_v2 = vpop.eup %9938 }
 0x7bb   :  { %v714_v5 = vmul.f32 %v9939_v2, %v9937_v58 }
 0x7bd   :  { %8595 = vmatmul.mubr.msk.f32.vlgmr.msra.gmra.mrb[10].mxu1 %vm547_vm8, %v714_v5 }
 0x7be   :  { %9478 = vmatpush3.bf16.msra.mxu1 %v10455_v4  ;;  %8605 = vmatprep.mubr.msk.f32.mxu1 %vm10121_vm0, %v10122_v6 }
 0x7bf   :  { %9479 = vmatprep.subr.bf16.mxu1 %v10120_v3 }
 0x7c2   :  { %9481 = vmatpush3.bf16.msra.mxu1 %v10468_v12 }
 0x7c3   :  { %9488 = vmatprep.subr.bf16.mxu1 %v10120_v3 }
 0x890   :  { %v784_v15 = vpop.f32.mrb[10].mxu1 }
 0x891   :  { %v789_v16 = vrot.slane %v784_v15, 7  ;;  %v8596_v18 = vpop.f32.mrb[11].mxu1 }
 0x893   :  { %v792_v19 = vsel %vm791_vm9, %v617_v47, %v789_v16  ;;  %v10500_v47 = vadd.f32 %v7877_v44, %v10381_v61  ;;  %v927_v61 = vld [vmem:[%s12234_s10 + $0x8] sm:$0xff]  ;;  %v10534_v16 = vld [vmem:[%s12227_s3 + $0x5] ss:$0 sm:$0xff] }
 0x894   :  { %8606 = vmatmul.mubr.msk.f32.vlgmr.msra.gmra.mrb[12].mxu1 %vm71_vm1, %v792_v19  ;;  %v10512_v58 = vpack.c.bf16 %v927_v61, %v926_v57 }
 0x895   :  { %8635 = vmatprep.mubr.msk.f32.mxu1 %vm10121_vm0, %v10122_v6 }
 0x896   :  { %9484 = vmatpush3.bf16.msra.mxu0 %v10512_v58 }
 0x897   :  { %9485 = vmatprep.subr.bf16.mxu0 %v10120_v3 }
 0x89a   :  { %9487 = vmatpush3.bf16.msra.mxu0 %v10522_v63 }
 0x89b   :  { %9500 = vmatprep.subr.bf16.mxu0 %v10120_v3 }
 0x967   :  { %v870_v22 = vpop.f32.mrb[12].mxu1 }
 0x968   :  { %v871_v24 = vadd.f32 %v10479_v21, %v870_v22  ;;  %v8607_v25 = vpop.f32.mrb[13].mxu1  ;;  %v1019_v22 = vld [vmem:[%s12236_s12] sm:$0xff] }
 0x96a   :  { %v874_v27 = vadd.f32 %v871_v24, %v10407_v13  ;;  %v1020_v24 = vld [vmem:[%s12236_s12 + $0x8] sm:$0xff] }
 0x96b   :  { %v10547_v25 = vpack.c.bf16 %v1020_v24, %v1019_v22 }
 0x96c   :  { %v877_v28 = vsel %vm336_vm3, %v874_v27, 0.0 }
 0x96d   :  { %878 = vadd.xlane.f32.xlu1 %v877_v28  ;;  %9490 = vmatpush3.bf16.msra.mxu1 %v10547_v25  ;;  %v1022_v28 = vld [vmem:[%s12236_s12 + $0x18] sm:$0xff] }
 0x96e   :  { %9491 = vmatprep.subr.bf16.mxu1 %v10120_v3 }
 0x9fa   :  { %v879_v30 = vpop.xlane.xlu1 %878 }
 0x9fb   :  { %v880_v31 = vmul.f32 0.03125, %v879_v30 }
 0x9fd   :  { %v881_v33 = vsub.f32 %v874_v27, %v880_v31  ;;  %v1021_v27 = vld [vmem:[%s12236_s12 + $0x10] sm:$0xff]  ;;  %v1023_v31 = vld [vmem:[%s12236_s12 + $0x20] sm:$0xff] }
 0x9fe   :  { %v10557_v30 = vpack.c.bf16 %v1022_v28, %v1021_v27  ;;  %v10637_v27 = vld [vmem:[%s12227_s3 + $0x6] ss:$0 sm:$0xff] }
 0x9ff   :  { %v882_v34 = vmul.f32 %v881_v33, %v881_v33 }
 0xa00   :  { %9493 = vmatpush3.bf16.msra.mxu1 %v10557_v30 }
 0xa01   :  { %v883_v35 = vsel %vm336_vm3, %v882_v34, 0.0  ;;  %9494 = vmatprep.subr.bf16.mxu1 %v10120_v3 }
 0xa02   :  { %884 = vadd.xlane.f32.xlu1 %v883_v35  ;;  %v1025_v35 = vld [vmem:[%s12236_s12 + $0x30] sm:$0xff] }
 0xa8f   :  { %v885_v39 = vpop.xlane.xlu1 %884 }
 0xa90   :  { %v886_v40 = vmul.f32 0.03125, %v885_v39  ;;  %v1026_v39 = vld [vmem:[%s12236_s12 + $0x38] sm:$0xff] }
 0xa92   :  { %v887_v41 = vadd.f32 1e-12, %v886_v40  ;;  %v10577_v40 = vpack.c.bf16 %v1026_v39, %v1025_v35  ;;  %v10652_v39 = vld [vmem:[%s12228_s4 + $0x4] ss:$0 sm:$0xff] }
 0xa94   :  { %9940 = vrsqrt.f32 %v887_v41  ;;  %v10584_v41 = vld [vmem:[%s12235_s11] ss:$0 sm:$0xff] }
 0xa9e   :  { %v9941_v42 = vpop.eup %9940 }
 0xa9f   :  { %v889_v13 = vmul.f32 %v9941_v42, %v881_v33  ;;  %v1024_v33 = vld [vmem:[%s12236_s12 + $0x28] sm:$0xff] }
 0xaa0   :  { %v10567_v34 = vpack.c.bf16 %v1024_v33, %v1023_v31  ;;  %v10642_v31 = vld [vmem:[%s12227_s3 + $0x7] ss:$0 sm:$0xff] }
 0xaa1   :  { %v894_v46 = vmul.f32 %v10488_v43, %v889_v13 }
 0xaa2   :  { %9496 = vmatpush3.bf16.msra.mxu1 %v10567_v34 }
 0xaa3   :  { %v899_v49 = vadd.f32 %v10496_v45, %v894_v46  ;;  %9497 = vmatprep.subr.bf16.mxu1 %v10120_v3 }
 0xaa5   :  { %v900_v50 = vadd.f32 %v899_v49, %v10500_v47 }
 0xaa6   :  { %9499 = vmatpush3.bf16.msra.mxu1 %v10577_v40 }
 0xaa7   :  { %v903_v51 = vsel %vm336_vm3, %v900_v50, 0.0  ;;  %9512 = vmatprep.subr.bf16.mxu1 %v10120_v3 }
 0xaa8   :  { %904 = vadd.xlane.f32.xlu1 %v903_v51 }
 0xb35   :  { %v905_v52 = vpop.xlane.xlu1 %904 }
 0xb36   :  { %v906_v53 = vmul.f32 0.03125, %v905_v52 }
 0xb38   :  { %v907_v54 = vsub.f32 %v900_v50, %v906_v53 }
 0xb3a   :  { %v908_v55 = vmul.f32 %v907_v54, %v907_v54 }
 0xb3c   :  { %v909_v56 = vsel %vm336_vm3, %v908_v55, 0.0 }
 0xb3d   :  { %910 = vadd.xlane.f32.xlu1 %v909_v56 }
 0xbca   :  { %v911_v0 = vpop.xlane.xlu1 %910 }
 0xbcb   :  { %v912_v2 = vmul.f32 0.03125, %v911_v0  ;;  %v1132_v0 = vld [vmem:[%s12237_s13 + $0x8] sm:$0xff] }
 0xbcd   :  { %v913_v5 = vadd.f32 1e-12, %v912_v2  ;;  %v10620_v2 = vpack.c.bf16 %v1132_v0, %v1131_v62  ;;  %v1249_v62 = vld [vmem:[%s12238_s14 + $0x18] sm:$0xff] }
 0xbcf   :  { %9942 = vrsqrt.f32 %v913_v5  ;;  %v1133_v5 = vld [vmem:[%s12237_s13 + $0x10] sm:$0xff] }
 0xbd9   :  { %v9943_v7 = vpop.eup %9942 }
 0xbda   :  { %v915_v15 = vmul.f32 %v9943_v7, %v907_v54  ;;  %v1134_v7 = vld [vmem:[%s12237_s13 + $0x18] sm:$0xff] }
 0xbdc   :  { %v920_v18 = vmul.f32 %v10529_v9, %v915_v15  ;;  %v10630_v15 = vpack.c.bf16 %v1134_v7, %v1133_v5 }
 0xbde   :  { %v925_v19 = vadd.f32 %v10534_v16, %v920_v18 }
 0xbe0   :  { %8617 = vmatmul.mubr.msk.f32.vlgmr.msra.gmra.mrb[4].mxu0 %vm71_vm1, %v925_v19 }
 0xbe1   :  { %8646 = vmatprep.mubr.msk.f32.mxu0 %vm10121_vm0, %v10122_v6  ;;  %9502 = vmatpush3.bf16.msra.mxu0 %v10620_v2 }
 0xbe2   :  { %9503 = vmatprep.subr.bf16.mxu0 %v10120_v3 }
 0xbe5   :  { %9505 = vmatpush3.bf16.msra.mxu0 %v10630_v15 }
 0xbe6   :  { %9506 = vmatprep.subr.bf16.mxu0 %v10120_v3 }
 0xcb3   :  { %v1006_v42 = vpop.f32.mrb[4].mxu0 }
 0xcb4   :  { %v1007_v13 = vadd.f32 %v10584_v41, %v1006_v42  ;;  %v8618_v44 = vpop.f32.mrb[5].mxu0 }
 0xcb6   :  { %v1010_v46 = vmul.f32 %v1007_v13, %v1007_v13 }
 0xcb8   :  { %v1011_v49 = vmul.f32 %v1010_v46, %v1007_v13 }
 0xcba   :  { %v1012_v50 = vmul.f32 0.044715, %v1011_v49 }
 0xcbc   :  { %v1013_v51 = vadd.f32 %v1012_v50, %v1007_v13 }
 0xcbe   :  { %v1014_v52 = vmul.f32 0.7978846, %v1013_v51 }
 0xcc0   :  { %9944 = vtanh.f32 %v1014_v52 }
 0xcca   :  { %v9945_v53 = vpop.eup %9944 }
 0xccb   :  { %v1016_v54 = vadd.f32 1.0, %v9945_v53 }
 0xccd   :  { %v1017_v55 = vmul.f32 0.5, %v1016_v54 }
 0xccf   :  { %v1018_v56 = vmul.f32 %v1017_v55, %v1007_v13 }
 0xcd1   :  { %8636 = vmatmul.mubr.msk.f32.vlgmr.msra.gmra.mrb[14].mxu1 %vm1031_vm10, %v1018_v56 }
 0xcd2   :  { %9514 = vmatpush3.bf16.msra.mxu1 %v10258_v11  ;;  %8692 = vmatprep.mubr.msk.f32.mxu1 %vm10121_vm0, %v10122_v6  ;;  %v10609_v11 = vld [vmem:[%s12228_s4 + $0x3] ss:$0 sm:$0xff] }
 0xcd3   :  { %9515 = vmatprep.subr.bf16.mxu1 %v10120_v3 }
 0xcd6   :  { %9517 = vmatpush3.bf16.msra.mxu1 %v10275_v17 }
 0xcd7   :  { %9518 = vmatprep.subr.bf16.mxu1 %v10120_v3 }
 0xcda   :  { %9520 = vmatpush3.bf16.msra.mxu1 %v10288_v20 }
 0xcdb   :  { %9521 = vmatprep.subr.bf16.mxu1 %v10120_v3 }
 0xcde   :  { %9523 = vmatpush3.bf16.msra.mxu1 %v10298_v23 }
 0xcdf   :  { %9524 = vmatprep.subr.bf16.mxu1 %v10120_v3 }
 0xce2   :  { %9526 = vmatpush3.bf16.msra.mxu1 %v10308_v26 }
 0xce3   :  { %9527 = vmatprep.subr.bf16.mxu1 %v10120_v3 }
 0xce6   :  { %9529 = vmatpush3.bf16.msra.mxu1 %v10318_v29 }
 0xce7   :  { %9530 = vmatprep.subr.bf16.mxu1 %v10120_v3 }
 0xcea   :  { %9532 = vmatpush3.bf16.msra.mxu1 %v10328_v32 }
 0xceb   :  { %9533 = vmatprep.subr.bf16.mxu1 %v10120_v3 }
 0xcee   :  { %9535 = vmatpush3.bf16.msra.mxu1 %v10338_v36 }
 0xcef   :  { %8706 = vmatprep.subr.mxu1 %v10122_v6 }
 0xda4   :  { %v1101_v17 = vpop.f32.mrb[14].mxu1 }
 0xda5   :  { %v1102_v20 = vadd.f32 %v10609_v11, %v1101_v17  ;;  %v8637_v23 = vpop.f32.mrb[15].mxu1 }
 0xda7   :  { %v1105_v26 = vadd.f32 %v1102_v20, %v925_v19 }
 0xda9   :  { %v1108_v29 = vsel %vm336_vm3, %v1105_v26, 0.0 }
 0xdaa   :  { %1109 = vadd.xlane.f32.xlu1 %v1108_v29 }
 0xe37   :  { %v1110_v32 = vpop.xlane.xlu1 %1109 }
 0xe38   :  { %v1111_v57 = vmul.f32 0.03125, %v1110_v32 }
 0xe3a   :  { %v1112_v61 = vsub.f32 %v1105_v26, %v1111_v57  ;;  %v1246_v57 = vld [vmem:[%s12238_s14] sm:$0xff] }
 0xe3c   :  { %v1113_v59 = vmul.f32 %v1112_v61, %v1112_v61 }
 0xe3e   :  { %v1114_v36 = vsel %vm336_vm3, %v1113_v59, 0.0 }
 0xe3f   :  { %1115 = vadd.xlane.f32.xlu1 %v1114_v36  ;;  %v1248_v36 = vld [vmem:[%s12238_s14 + $0x10] sm:$0xff] }
 0xe40   :  { %v10673_v0 = vpack.c.bf16 %v1249_v62, %v1248_v36 }
 0xecc   :  { %v1116_v18 = vpop.xlane.xlu1 %1115 }
 0xecd   :  { %v1117_v19 = vmul.f32 0.03125, %v1116_v18 }
 0xecf   :  { %v1118_v22 = vadd.f32 1e-12, %v1117_v19 }
 0xed1   :  { %9946 = vrsqrt.f32 %v1118_v22  ;;  %v10680_v22 = vld [vmem:[%s12227_s3 + $0x8] ss:$0 sm:$0xff] }
 0xedb   :  { %v9947_v24 = vpop.eup %9946 }
 0xedc   :  { %v1120_v28 = vmul.f32 %v9947_v24, %v1112_v61  ;;  %v1247_v61 = vld [vmem:[%s12238_s14 + $0x8] sm:$0xff] }
 0xedd   :  { %v10663_v59 = vpack.c.bf16 %v1247_v61, %v1246_v57 }
 0xede   :  { %v1125_v33 = vmul.f32 %v10637_v27, %v1120_v28  ;;  %v10685_v28 = vld [vmem:[%s12227_s3 + $0x9] ss:$0 sm:$0xff] }
 0xee0   :  { %v1130_v35 = vadd.f32 %v10642_v31, %v1125_v33 }
 0xee2   :  { %8647 = vmatmul.mubr.msk.f32.vlgmr.msra.gmra.mrb[6].mxu0 %vm71_vm1, %v1130_v35 }
 0xee3   :  { %8657 = vmatprep.mubr.msk.f32.mxu0 %vm10121_vm0, %v10122_v6  ;;  %9508 = vmatpush3.bf16.msra.mxu0 %v10663_v59 }
 0xee4   :  { %9509 = vmatprep.subr.bf16.mxu0 %v10120_v3 }
 0xee7   :  { %9511 = vmatpush3.bf16.msra.mxu0 %v10673_v0 }
 0xee8   :  { %9536 = vmatprep.subr.bf16.mxu0 %v10120_v3 }
 0xfb5   :  { %v1208_v42 = vpop.f32.mrb[6].mxu0 }
 0xfb6   :  { %v1209_v13 = vadd.f32 %v10652_v39, %v1208_v42  ;;  %v8648_v44 = vpop.f32.mrb[7].mxu0  ;;  %v10699_v42 = vld [vmem:[%s12239_s15] ss:$0 sm:$0xff] }
 0xfb8   :  { %v1212_v46 = vmul.f32 %v1209_v13, %v1209_v13 }
 0xfba   :  { %v1213_v49 = vmul.f32 %v1212_v46, %v1209_v13 }
 0xfbc   :  { %v1214_v50 = vmul.f32 0.044715, %v1213_v49  ;;  %v10126_v49 = vmov 1  }
 0xfbd   :  { %229 = vst.msk [vmem:[#allocation4] sm:$0x3] %vm228_vm13, %v10126_v49 }
 0xfbe   :  { %v1215_v51 = vadd.f32 %v1214_v50, %v1209_v13  ;;  %v10710_v50 = vcvt.s32.f32 %v10340_v37 }
 0xfc0   :  { %v1216_v52 = vmul.f32 0.7978846, %v1215_v51 }
 0xfc2   :  { %9948 = vtanh.f32 %v1216_v52 }
 0xfcc   :  { %v9949_v53 = vpop.eup %9948 }
 0xfcd   :  { %v1218_v54 = vadd.f32 1.0, %v9949_v53 }
 0xfcf   :  { %v1219_v55 = vmul.f32 0.5, %v1218_v54 }
 0xfd1   :  { %v1220_v56 = vmul.f32 %v1219_v55, %v1209_v13 }
 0xfd3   :  { %v1223_v17 = vsel %vm336_vm3, %v1220_v56, 0.0 }
 0xfd4   :  { %1224 = vadd.xlane.f32.xlu0 %v1223_v17  ;;  %v7913_v17 = vld [vmem:[%s12226_s2 + $0x1] ss:$0 sm:$0xff] }
0x1061   :  { %v1225_v20 = vpop.xlane.xlu0 %1224 }
0x1062   :  { %v1226_v23 = vmul.f32 0.03125, %v1225_v20 }
0x1064   :  { %v1227_v26 = vsub.f32 %v1220_v56, %v1226_v23 }
0x1066   :  { %v1228_v29 = vmul.f32 %v1227_v26, %v1227_v26 }
0x1068   :  { %v1229_v32 = vsel %vm336_vm3, %v1228_v29, 0.0 }
0x1069   :  { %1230 = vadd.xlane.f32.xlu1 %v1229_v32 }
0x10f6   :  { %v1231_v5 = vpop.xlane.xlu1 %1230 }
0x10f7   :  { %v1232_v7 = vmul.f32 0.03125, %v1231_v5 }
0x10f9   :  { %v1233_v18 = vadd.f32 1e-12, %v1232_v7 }
0x10fb   :  { %9950 = vrsqrt.f32 %v1233_v18 }
0x1105   :  { %v9951_v19 = vpop.eup %9950 }
0x1106   :  { %v1235_v24 = vmul.f32 %v9951_v19, %v1227_v26 }
0x1108   :  { %v1240_v33 = vmul.f32 %v10680_v22, %v1235_v24 }
0x110a   :  { %v1245_v35 = vadd.f32 %v10685_v28, %v1240_v33 }
0x110c   :  { %8658 = vmatmul.mubr.msk.f32.vlgmr.msra.gmra.mrb[8].mxu0 %vm71_vm1, %v1245_v35 }
0x110d   :  { %9538 = vmatpush3.bf16.msra.mxu0 %v10379_v60  ;;  %8703 = vmatprep.mubr.msk.f32.mxu0 %vm10121_vm0, %v10122_v6 }
0x110e   :  { %9539 = vmatprep.subr.bf16.mxu0 %v10120_v3 }
0x1111   :  { %9541 = vmatpush3.bf16.msra.mxu0 %v10391_v1 }
0x1112   :  { %8711 = vmatprep.subr.mxu0 %v10122_v6 }
0x11df   :  { %v1326_v13 = vpop.f32.mrb[8].mxu0 }
0x11e0   :  { %v1327_v44 = vadd.f32 %v10699_v42, %v1326_v13  ;;  %v8659_v60 = vpop.f32.mrb[9].mxu0 }
0x11e2   :  { %v1331_v46 = vsel %vm1330_vm11, %v1327_v44, -1e+30 }
0x11e3   :  { %7911 = vst [vmem:[%s12241_s17 + $0x2] sm:$0x3] %v1331_v46  ;;  %v1335_v1 = vsel %vm1334_vm12, %v1331_v46, -inf }
0x11e4   :  { %1336 = vmax.xlane.f32.xlu0 %v1335_v1 }
0x1271   :  { %v1337_v51 = vpop.xlane.xlu0 %1336 }
0x1272   :  { %vm1338_vm14 = vcmp.ge.f32.partialorder %v1331_v46, %v1337_v51 }
0x1273   :  { %v1340_v52 = vsel %vm1338_vm14, %v10710_v50, 128.0  ;;  %vm2430_vm14 = vcmask 17424  }
0x1274   :  { %v1341_v53 = vsel %vm1334_vm12, %v1340_v52, inf }
0x1275   :  { %1342 = vmin.xlane.f32.xlu1 %v1341_v53 }
0x1302   :  { %v1343_v54 = vpop.xlane.xlu1 %1342 }
0x1303   :  { %v9908_v55 = vtrunc.f32 %v1343_v54 }
0x1305   :  { %v9909_v56 = vcvt.f32.s32 %v9908_v55 }
0x1307   :  { %1346 = vst.msk [vmem:[#allocation4] sm:$0x3] %vm1345_vm15, %v9909_v56  ;;  %vm1347_vm2 = vcmp.eq.s32.totalorder %v10340_v37, %v9909_v56 }
0x1308   :  { %8693 = vmatmul.mubr.msk.f32.vlgmr.msra.gmra.mrb[16].mxu1 %vm1347_vm2, %v10123_v38  ;;  %vm2723_vm2 = vcmp.lt.s32.totalorder %v10340_v37, 3 }
0x1309   :  { %8708 = vmatprep.mubr.msk.f32.mxu1 %vm10121_vm0, %v10122_v6 }
0x13db   :  { %v1437_v20 = vpop.f32.mrb[16].mxu1 }
0x13dc   :  { %v1438_v23 = vadd.f32 %v7913_v17, %v1437_v20  ;;  %v8694_v26 = vpop.f32.mrb[17].mxu1 }
0x13de   :  { %v1441_v29 = vadd.f32 %v10368_v48, %v1438_v23 }
0x13e0   :  { %v1444_v32 = vsel %vm336_vm3, %v1441_v29, 0.0 }
0x13e1   :  { %1445 = vadd.xlane.f32.xlu0 %v1444_v32 }
0x146e   :  { %v1446_v57 = vpop.xlane.xlu0 %1445 }
0x146f   :  { %v1447_v61 = vmul.f32 0.03125, %v1446_v57 }
0x1471   :  { %v1448_v36 = vsub.f32 %v1441_v29, %v1447_v61 }
0x1473   :  { %v1449_v62 = vmul.f32 %v1448_v36, %v1448_v36 }
0x1475   :  { %v1450_v5 = vsel %vm336_vm3, %v1449_v62, 0.0 }
0x1476   :  { %1451 = vadd.xlane.f32.xlu1 %v1450_v5 }
0x1503   :  { %v1452_v7 = vpop.xlane.xlu1 %1451 }
0x1504   :  { %v1453_v18 = vmul.f32 0.03125, %v1452_v7 }
0x1506   :  { %v1454_v19 = vadd.f32 1e-12, %v1453_v18 }
0x1508   :  { %9952 = vrsqrt.f32 %v1454_v19 }
0x1512   :  { %v9953_v24 = vpop.eup %9952 }
0x1513   :  { %v1456_v33 = vmul.f32 %v9953_v24, %v1448_v36 }
0x1515   :  { %v1461_v35 = vmul.f32 %v10398_v8, %v1456_v33 }
0x1517   :  { %v10726_v48 = vadd.f32 %v10403_v10, %v1461_v35 }
0x1519   :  { %8704 = vmatmul.mubr.msk.f32.vlgmr.msra.gmra.mrb[10].mxu0 %vm71_vm1, %v10726_v48 }
0x151a   :  { %8713 = vmatprep.mubr.msk.f32.mxu0 %vm10121_vm0, %v10122_v6 }
0x15ec   :  { %v1547_v13 = vpop.f32.mrb[10].mxu0 }
0x15ed   :  { %v1548_v44 = vadd.f32 %v10416_v14, %v1547_v13  ;;  %v8705_v60 = vpop.f32.mrb[11].mxu0 }
0x15ef   :  { %1552 = vrot.lane.b32.xlu0 %v1548_v44, %s10124_s9  ;;  %v1728_v29 = vrot.slane %v1548_v44, 1 }
0x1661   :  { %v1553_v46 = vpop.permute.xlu0 %1552 }
0x1662   :  { %1555 = vst.msk [vmem:[#allocation2 + $0x1] sm:$0x1] %vm449_vm4, %v1553_v46 }
0x1663   :  { %1724 = vst.msk [vmem:[#allocation2 + $0x8] sm:$0x2] %vm621_vm5, %v1553_v46 }
0x1669   :  { %v1560_v8 = vld [vmem:[#allocation2] sm:$0xff] }
0x166a   :  { %8707 = vmatpush3.xpose.msk.msra.mxu1 %vm71_vm1, %v1560_v8  ;;  %v1726_v26 = vld [vmem:[#allocation2 + $0x8] sm:$0xff] }
0x166b   :  { %9548 = vmatprep.subr.bf16.mxu1 %v10120_v3 }
0x166d   :  { %8709 = vmatmul.mubr.msk.f32.vlgmr.msra.gmra.mrb[18].mxu1 %vm71_vm1, %v1548_v44 }
0x166e   :  { %9550 = vmatpush3.bf16.msra.mxu1 %v10512_v58  ;;  %8745 = vmatprep.mubr.msk.f32.mxu1 %vm10121_vm0, %v10122_v6 }
0x166f   :  { %9551 = vmatprep.subr.bf16.mxu1 %v10120_v3 }
0x1672   :  { %9553 = vmatpush3.bf16.msra.mxu1 %v10522_v63 }
0x1673   :  { %9566 = vmatprep.subr.bf16.mxu1 %v10120_v3 }
0x1740   :  { %v1633_v10 = vpop.f32.mrb[18].mxu1 }
0x1741   :  { %v1637_v14 = vmul.f32 0.17677669, %v1633_v10  ;;  %v8710_v1 = vpop.f32.mrb[19].mxu1 }
0x1743   :  { %v1639_v49 = vsel %vm1638_vm6, %v1637_v14, -1e+30 }
0x1744   :  { %v1640_v51 = vsel %vm535_vm7, %v1639_v49, -inf }
0x1745   :  { %1641 = vmax.xlane.f32.xlu1 %v1640_v51 }
0x17d2   :  { %v1642_v58 = vpop.xlane.xlu1 %1641 }
0x17d3   :  { %v1643_v52 = vsub.f32 %v1639_v49, %v1642_v58 }
0x17d5   :  { %v1644_v53 = vmul.f32 1.442695, %v1643_v52 }
0x17d7   :  { %9954 = vpow2.f32 %v1644_v53 }
0x17e1   :  { %v9955_v54 = vpop.eup %9954 }
0x17e2   :  { %v1646_v63 = vsel %vm535_vm7, %v9955_v54, 0.0 }
0x17e3   :  { %1647 = vadd.xlane.f32.xlu1 %v1646_v63 }
0x17f4   :  { %1556 = vrot.lane.b32.xlu1 %v1548_v44, %s10125_s21 }
0x1870   :  { %v1648_v55 = vpop.xlane.xlu1 %1647 }
0x1871   :  { %9956 = vrcp.f32 %v1648_v55 }
0x1874   :  { %v1557_v56 = vpop.permute.xlu1 %1556 }
0x1875   :  { %1559 = vst.msk [vmem:[#allocation3 + $0x1] sm:$0x1] %vm449_vm4, %v1557_v56 }
0x1876   :  { %1725 = vst.msk [vmem:[#allocation3 + $0x8] sm:$0x2] %vm621_vm5, %v1557_v56 }
0x187b   :  { %v9957_v17 = vpop.eup %9956 }
0x187c   :  { %v1561_v20 = vld [vmem:[#allocation3] sm:$0xff]  ;;  %v1650_v23 = vmul.f32 %v9957_v17, %v9955_v54 }
0x187d   :  { %8712 = vmatpush3.msra.mxu0 %v1561_v20  ;;  %v1727_v32 = vld [vmem:[#allocation3 + $0x8] sm:$0xff] }
0x187e   :  { %8714 = vmatmul.mubr.msk.f32.vlgmr.msra.gmra.mrb[12].mxu0 %vm547_vm8, %v1650_v23  ;;  %8716 = vmatprep.subr.mxu0 %v10122_v6 }
0x187f   :  { %8718 = vmatprep.mubr.msk.f32.mxu0 %vm10121_vm0, %v10122_v6 }
0x1884   :  { %8717 = vmatpush3.xpose.msk.msra.mxu0 %vm71_vm1, %v1726_v26 }
0x1885   :  { %8721 = vmatprep.subr.mxu0 %v10122_v6 }
0x1887   :  { %8719 = vmatmul.mubr.msk.f32.vlgmr.msra.gmra.mrb[14].mxu0 %vm71_vm1, %v1728_v29 }
0x1888   :  { %8722 = vmatpush3.msra.mxu0 %v1727_v32  ;;  %8723 = vmatprep.mubr.msk.f32.mxu0 %vm10121_vm0, %v10122_v6 }
0x1889   :  { %9542 = vmatprep.subr.bf16.mxu0 %v10120_v3 }
0x1951   :  { %v1720_v57 = vpop.f32.mrb[12].mxu0 }
0x1952   :  { %v8715_v61 = vpop.f32.mrb[13].mxu0 }
0x195a   :  { %v1800_v36 = vpop.f32.mrb[14].mxu0 }
0x195b   :  { %v1804_v62 = vmul.f32 0.17677669, %v1800_v36  ;;  %v8720_v5 = vpop.f32.mrb[15].mxu0 }
0x195d   :  { %v1805_v7 = vsel %vm1638_vm6, %v1804_v62, -1e+30 }
0x195e   :  { %v1806_v18 = vsel %vm535_vm7, %v1805_v7, -inf }
0x195f   :  { %1807 = vmax.xlane.f32.xlu0 %v1806_v18 }
0x19ec   :  { %v1808_v19 = vpop.xlane.xlu0 %1807 }
0x19ed   :  { %v1809_v24 = vsub.f32 %v1805_v7, %v1808_v19 }
0x19ef   :  { %v1810_v33 = vmul.f32 1.442695, %v1809_v24 }
0x19f1   :  { %9958 = vpow2.f32 %v1810_v33 }
0x19fb   :  { %v9959_v35 = vpop.eup %9958 }
0x19fc   :  { %v1812_v13 = vsel %vm535_vm7, %v9959_v35, 0.0 }
0x19fd   :  { %1813 = vadd.xlane.f32.xlu1 %v1812_v13 }
0x1a8a   :  { %v1814_v44 = vpop.xlane.xlu1 %1813 }
0x1a8b   :  { %9960 = vrcp.f32 %v1814_v44 }
0x1a95   :  { %v9961_v60 = vpop.eup %9960 }
0x1a96   :  { %v1816_v46 = vmul.f32 %v9961_v60, %v9959_v35 }
0x1a98   :  { %8724 = vmatmul.mubr.msk.f32.vlgmr.msra.gmra.mrb[16].mxu0 %vm547_vm8, %v1816_v46 }
0x1a99   :  { %9544 = vmatpush3.bf16.msra.mxu0 %v10455_v4  ;;  %8734 = vmatprep.mubr.msk.f32.mxu0 %vm10121_vm0, %v10122_v6 }
0x1a9a   :  { %9545 = vmatprep.subr.bf16.mxu0 %v10120_v3 }
0x1a9d   :  { %9547 = vmatpush3.bf16.msra.mxu0 %v10468_v12 }
0x1a9e   :  { %9554 = vmatprep.subr.bf16.mxu0 %v10120_v3 }
0x1b6b   :  { %v1886_v8 = vpop.f32.mrb[16].mxu0 }
0x1b6c   :  { %v1891_v10 = vrot.slane %v1886_v8, 7  ;;  %v8725_v14 = vpop.f32.mrb[17].mxu0 }
0x1b6e   :  { %v1893_v1 = vsel %vm791_vm9, %v1720_v57, %v1891_v10 }
0x1b6f   :  { %8735 = vmatmul.mubr.msk.f32.vlgmr.msra.gmra.mrb[18].mxu0 %vm71_vm1, %v1893_v1 }
0x1b70   :  { %9556 = vmatpush3.bf16.msra.mxu0 %v10547_v25  ;;  %8764 = vmatprep.mubr.msk.f32.mxu0 %vm10121_vm0, %v10122_v6 }
0x1b71   :  { %9557 = vmatprep.subr.bf16.mxu0 %v10120_v3 }
0x1b74   :  { %9559 = vmatpush3.bf16.msra.mxu0 %v10557_v30 }
0x1b75   :  { %9560 = vmatprep.subr.bf16.mxu0 %v10120_v3 }
0x1b78   :  { %9562 = vmatpush3.bf16.msra.mxu0 %v10567_v34 }
0x1b79   :  { %9563 = vmatprep.subr.bf16.mxu0 %v10120_v3 }
0x1b7c   :  { %9565 = vmatpush3.bf16.msra.mxu0 %v10577_v40 }
0x1b7d   :  { %9578 = vmatprep.subr.bf16.mxu0 %v10120_v3 }
0x1c42   :  { %v1967_v4 = vpop.f32.mrb[18].mxu0 }
0x1c43   :  { %v1968_v12 = vadd.f32 %v10479_v21, %v1967_v4  ;;  %v8736_v25 = vpop.f32.mrb[19].mxu0 }
0x1c45   :  { %v1971_v49 = vadd.f32 %v1968_v12, %v10726_v48 }
0x1c47   :  { %v1974_v51 = vsel %vm336_vm3, %v1971_v49, 0.0 }
0x1c48   :  { %1975 = vadd.xlane.f32.xlu0 %v1974_v51 }
0x1cd5   :  { %v1976_v30 = vpop.xlane.xlu0 %1975 }
0x1cd6   :  { %v1977_v58 = vmul.f32 0.03125, %v1976_v30 }
0x1cd8   :  { %v1978_v52 = vsub.f32 %v1971_v49, %v1977_v58 }
0x1cda   :  { %v1979_v53 = vmul.f32 %v1978_v52, %v1978_v52 }
0x1cdc   :  { %v1980_v34 = vsel %vm336_vm3, %v1979_v53, 0.0 }
0x1cdd   :  { %1981 = vadd.xlane.f32.xlu0 %v1980_v34 }
0x1d6a   :  { %v1982_v54 = vpop.xlane.xlu0 %1981 }
0x1d6b   :  { %v1983_v40 = vmul.f32 0.03125, %v1982_v54 }
0x1d6d   :  { %v1984_v63 = vadd.f32 1e-12, %v1983_v40 }
0x1d6f   :  { %9962 = vrsqrt.f32 %v1984_v63 }
0x1d79   :  { %v9963_v55 = vpop.eup %9962 }
0x1d7a   :  { %v1986_v56 = vmul.f32 %v9963_v55, %v1978_v52 }
0x1d7c   :  { %v1991_v21 = vmul.f32 %v10488_v43, %v1986_v56 }
0x1d7e   :  { %v1996_v48 = vadd.f32 %v10496_v45, %v1991_v21 }
0x1d80   :  { %v1997_v17 = vadd.f32 %v1996_v48, %v10500_v47 }
0x1d82   :  { %v2000_v20 = vsel %vm336_vm3, %v1997_v17, 0.0 }
0x1d83   :  { %2001 = vadd.xlane.f32.xlu0 %v2000_v20 }
0x1e10   :  { %v2002_v23 = vpop.xlane.xlu0 %2001 }
0x1e11   :  { %v2003_v26 = vmul.f32 0.03125, %v2002_v23 }
0x1e13   :  { %v2004_v29 = vsub.f32 %v1997_v17, %v2003_v26 }
0x1e15   :  { %v2005_v32 = vmul.f32 %v2004_v29, %v2004_v29 }
0x1e17   :  { %v2006_v57 = vsel %vm336_vm3, %v2005_v32, 0.0 }
0x1e18   :  { %2007 = vadd.xlane.f32.xlu1 %v2006_v57 }
0x1ea5   :  { %v2008_v61 = vpop.xlane.xlu1 %2007 }
0x1ea6   :  { %v2009_v36 = vmul.f32 0.03125, %v2008_v61 }
0x1ea8   :  { %v2010_v62 = vadd.f32 1e-12, %v2009_v36 }
0x1eaa   :  { %9964 = vrsqrt.f32 %v2010_v62 }
0x1eb4   :  { %v9965_v5 = vpop.eup %9964 }
0x1eb5   :  { %v2012_v43 = vmul.f32 %v9965_v5, %v2004_v29 }
0x1eb7   :  { %v2017_v45 = vmul.f32 %v10529_v9, %v2012_v43 }
0x1eb9   :  { %v2022_v7 = vadd.f32 %v10534_v16, %v2017_v45 }
0x1ebb   :  { %8746 = vmatmul.mubr.msk.f32.vlgmr.msra.gmra.mrb[20].mxu1 %vm71_vm1, %v2022_v7 }
0x1ebc   :  { %9568 = vmatpush3.bf16.msra.mxu1 %v10620_v2  ;;  %8775 = vmatprep.mubr.msk.f32.mxu1 %vm10121_vm0, %v10122_v6 }
0x1ebd   :  { %9569 = vmatprep.subr.bf16.mxu1 %v10120_v3 }
0x1ec0   :  { %9571 = vmatpush3.bf16.msra.mxu1 %v10630_v15 }
0x1ec1   :  { %9572 = vmatprep.subr.bf16.mxu1 %v10120_v3 }
0x1f8e   :  { %v2103_v18 = vpop.f32.mrb[20].mxu1 }
0x1f8f   :  { %v2104_v19 = vadd.f32 %v10584_v41, %v2103_v18  ;;  %v8747_v24 = vpop.f32.mrb[21].mxu1 }
0x1f91   :  { %v2107_v9 = vmul.f32 %v2104_v19, %v2104_v19 }
0x1f93   :  { %v2108_v33 = vmul.f32 %v2107_v9, %v2104_v19  ;;  %v2436_v9 = vld [vmem:[%s12245_s20 + $0x8] sm:$0xff] }
0x1f95   :  { %v2109_v16 = vmul.f32 0.044715, %v2108_v33 }
0x1f97   :  { %v2110_v35 = vadd.f32 %v2109_v16, %v2104_v19  ;;  %v2438_v16 = vld [vmem:[%s12245_s20 + $0x18] sm:$0xff] }
0x1f99   :  { %v2111_v13 = vmul.f32 0.7978846, %v2110_v35 }
0x1f9b   :  { %9966 = vtanh.f32 %v2111_v13  ;;  %v2439_v13 = vld [vmem:[%s12245_s20 + $0x20] sm:$0xff] }
0x1fa5   :  { %v9967_v2 = vpop.eup %9966 }
0x1fa6   :  { %v2113_v44 = vadd.f32 1.0, %v9967_v2  ;;  %v2440_v2 = vld [vmem:[%s12245_s20 + $0x28] sm:$0xff] }
0x1fa8   :  { %v2114_v60 = vmul.f32 0.5, %v2113_v44  ;;  %v10860_v44 = vpack.c.bf16 %v2440_v2, %v2439_v13 }
0x1faa   :  { %v2115_v46 = vmul.f32 %v2114_v60, %v2104_v19  ;;  %v2441_v60 = vld [vmem:[%s12245_s20 + $0x30] sm:$0xff] }
0x1fac   :  { %8765 = vmatmul.mubr.msk.f32.vlgmr.msra.gmra.mrb[20].mxu0 %vm1031_vm10, %v2115_v46  ;;  %v2442_v46 = vld [vmem:[%s12245_s20 + $0x38] sm:$0xff] }
0x1fad   :  { %8821 = vmatprep.mubr.msk.f32.mxu0 %vm10121_vm0, %v10122_v6 }
0x207f   :  { %v2193_v15 = vpop.f32.mrb[20].mxu0 }
0x2080   :  { %v2194_v8 = vadd.f32 %v10609_v11, %v2193_v15  ;;  %v8766_v41 = vpop.f32.mrb[21].mxu0  ;;  %v10870_v15 = vpack.c.bf16 %v2442_v46, %v2441_v60 }
0x2081   :  { %v2444_v41 = vld [vmem:[%s12245_s20 + $0x48] sm:$0xff] }
0x2082   :  { %v2197_v10 = vadd.f32 %v2194_v8, %v2022_v7  ;;  %v2443_v8 = vld [vmem:[%s12245_s20 + $0x40] sm:$0xff] }
0x2084   :  { %v2200_v14 = vsel %vm336_vm3, %v2197_v10, 0.0 }
0x2085   :  { %2201 = vadd.xlane.f32.xlu0 %v2200_v14  ;;  %v2445_v14 = vld [vmem:[%s12245_s20 + $0x50] sm:$0xff] }
0x2112   :  { %v2202_v1 = vpop.xlane.xlu0 %2201 }
0x2113   :  { %v2203_v4 = vmul.f32 0.03125, %v2202_v1  ;;  %v2446_v1 = vld [vmem:[%s12245_s20 + $0x58] sm:$0xff] }
0x2115   :  { %v2204_v12 = vsub.f32 %v2197_v10, %v2203_v4  ;;  %v10880_v10 = vpack.c.bf16 %v2444_v41, %v2443_v8  ;;  %v10890_v4 = vpack.c.bf16 %v2446_v1, %v2445_v14 }
0x2117   :  { %v2205_v25 = vmul.f32 %v2204_v12, %v2204_v12 }
0x2119   :  { %v2206_v49 = vsel %vm336_vm3, %v2205_v25, 0.0  ;;  %v2448_v25 = vld [vmem:[%s12245_s20 + $0x68] sm:$0xff] }
0x211a   :  { %2207 = vadd.xlane.f32.xlu1 %v2206_v49 }
0x21a7   :  { %v2208_v51 = vpop.xlane.xlu1 %2207 }
0x21a8   :  { %v2209_v30 = vmul.f32 0.03125, %v2208_v51 }
0x21aa   :  { %v2210_v58 = vadd.f32 1e-12, %v2209_v30 }
0x21ac   :  { %9968 = vrsqrt.f32 %v2210_v58 }
0x21b6   :  { %v9969_v52 = vpop.eup %9968 }
0x21b7   :  { %v2212_v53 = vmul.f32 %v9969_v52, %v2204_v12  ;;  %v2447_v12 = vld [vmem:[%s12245_s20 + $0x60] sm:$0xff]  ;;  %v2449_v52 = vld [vmem:[%s12245_s20 + $0x70] sm:$0xff] }
0x21b8   :  { %v10900_v49 = vpack.c.bf16 %v2448_v25, %v2447_v12 }
0x21b9   :  { %v2217_v11 = vmul.f32 %v10637_v27, %v2212_v53  ;;  %v2450_v53 = vld [vmem:[%s12245_s20 + $0x78] sm:$0xff] }
0x21bb   :  { %v2222_v34 = vadd.f32 %v10642_v31, %v2217_v11  ;;  %v10913_v11 = vpack.c.bf16 %v2450_v53, %v2449_v52 }
0x21bd   :  { %8776 = vmatmul.mubr.msk.f32.vlgmr.msra.gmra.mrb[22].mxu1 %vm71_vm1, %v2222_v34 }
0x21be   :  { %9574 = vmatpush3.bf16.msra.mxu1 %v10663_v59  ;;  %8786 = vmatprep.mubr.msk.f32.mxu1 %vm10121_vm0, %v10122_v6 }
0x21bf   :  { %9575 = vmatprep.subr.bf16.mxu1 %v10120_v3 }
0x21c2   :  { %9577 = vmatpush3.bf16.msra.mxu1 %v10673_v0 }
0x21c3   :  { %9602 = vmatprep.subr.bf16.mxu1 %v10120_v3 }
0x2290   :  { %v2296_v54 = vpop.f32.mrb[22].mxu1 }
0x2291   :  { %v2297_v40 = vadd.f32 %v10652_v39, %v2296_v54  ;;  %v8777_v63 = vpop.f32.mrb[23].mxu1 }
0x2292   :  { %v7942_v63 = vld [vmem:[%s12226_s2 + $0x2] ss:$0 sm:$0xff] }
0x2293   :  { %v2300_v27 = vmul.f32 %v2297_v40, %v2297_v40 }
0x2295   :  { %v2301_v55 = vmul.f32 %v2300_v27, %v2297_v40 }
0x2297   :  { %v2302_v31 = vmul.f32 0.044715, %v2301_v55 }
0x2299   :  { %v2303_v56 = vadd.f32 %v2302_v31, %v2297_v40 }
0x229b   :  { %v2304_v21 = vmul.f32 0.7978846, %v2303_v56  ;;  %v10927_v56 = vld [vmem:[%s12228_s4 + $0x5] ss:$0 sm:$0xff] }
0x229d   :  { %9970 = vtanh.f32 %v2304_v21 }
0x22a7   :  { %v9971_v59 = vpop.eup %9970 }
0x22a8   :  { %v2306_v48 = vadd.f32 1.0, %v9971_v59 }
0x22aa   :  { %v2307_v17 = vmul.f32 0.5, %v2306_v48 }
0x22ac   :  { %v2308_v20 = vmul.f32 %v2307_v17, %v2297_v40 }
0x22ae   :  { %v2311_v23 = vsel %vm336_vm3, %v2308_v20, 0.0 }
0x22af   :  { %2312 = vadd.xlane.f32.xlu0 %v2311_v23 }
0x233c   :  { %v2313_v0 = vpop.xlane.xlu0 %2312 }
0x233d   :  { %v2314_v26 = vmul.f32 0.03125, %v2313_v0 }
0x233f   :  { %v2315_v29 = vsub.f32 %v2308_v20, %v2314_v26  ;;  %v2552_v26 = vld [vmem:[%s12229_s5] sm:$0xff] }
0x2341   :  { %v2316_v32 = vmul.f32 %v2315_v29, %v2315_v29 }
0x2343   :  { %v2317_v39 = vsel %vm336_vm3, %v2316_v32, 0.0 }
0x2344   :  { %2318 = vadd.xlane.f32.xlu1 %v2317_v39  ;;  %v2554_v39 = vld [vmem:[%s12229_s5 + $0x10] sm:$0xff] }
0x23d1   :  { %v2319_v57 = vpop.xlane.xlu1 %2318 }
0x23d2   :  { %v2320_v61 = vmul.f32 0.03125, %v2319_v57  ;;  %v2555_v57 = vld [vmem:[%s12229_s5 + $0x18] sm:$0xff] }
0x23d4   :  { %v2321_v36 = vadd.f32 1e-12, %v2320_v61  ;;  %v10948_v61 = vpack.c.bf16 %v2555_v57, %v2554_v39  ;;  %v2979_v57 = vld [vmem:[%s12231_s7] sm:$0xff] }
0x23d6   :  { %9972 = vrsqrt.f32 %v2321_v36 }
0x23e0   :  { %v9973_v62 = vpop.eup %9972 }
0x23e1   :  { %v2323_v5 = vmul.f32 %v9973_v62, %v2315_v29  ;;  %v2553_v29 = vld [vmem:[%s12229_s5 + $0x8] sm:$0xff] }
0x23e2   :  { %v10938_v32 = vpack.c.bf16 %v2553_v29, %v2552_v26 }
0x23e3   :  { %v2328_v43 = vmul.f32 %v10680_v22, %v2323_v5 }
0x23e5   :  { %v2333_v45 = vadd.f32 %v10685_v28, %v2328_v43  ;;  %v2435_v28 = vld [vmem:[%s12245_s20] sm:$0xff] }
0x23e6   :  { %v10844_v33 = vpack.c.bf16 %v2436_v9, %v2435_v28 }
0x23e7   :  { %8787 = vmatmul.mubr.msk.f32.vlgmr.msra.gmra.mrb[24].mxu1 %vm71_vm1, %v2333_v45  ;;  %v10955_v45 = vld [vmem:[%s12227_s3] ss:$0 sm:$0xff] }
0x23e8   :  { %8832 = vmatprep.mubr.msk.f32.mxu1 %vm10121_vm0, %v10122_v6  ;;  %9580 = vmatpush3.bf16.msra.mxu0 %v10844_v33 }
0x23e9   :  { %9581 = vmatprep.subr.bf16.mxu0 %v10120_v3  ;;  %9604 = vmatpush3.bf16.msra.mxu1 %v10938_v32 }
0x23ea   :  { %9605 = vmatprep.subr.bf16.mxu1 %v10120_v3 }
0x23ed   :  { %9607 = vmatpush3.bf16.msra.mxu1 %v10948_v61 }
0x23ee   :  { %8835 = vmatprep.subr.mxu1 %v10122_v6 }
0x24ba   :  { %v2414_v7 = vpop.f32.mrb[24].mxu1 }
0x24bb   :  { %v2415_v18 = vadd.f32 %v10699_v42, %v2414_v7  ;;  %v8788_v19 = vpop.f32.mrb[25].mxu1  ;;  %v2437_v42 = vld [vmem:[%s12245_s20 + $0x10] sm:$0xff] }
0x24bc   :  { %v10850_v35 = vpack.c.bf16 %v2438_v16, %v2437_v42 }
0x24bd   :  { %v2418_v24 = vsel %vm1330_vm11, %v2415_v18, -1e+30  ;;  %v10960_v18 = vld [vmem:[%s12227_s3 + $0x1] ss:$0 sm:$0xff] }
0x24be   :  { %7940 = vst [vmem:[%s12241_s17 + $0x4] sm:$0x3] %v2418_v24  ;;  %v2421_v22 = vsel %vm1334_vm12, %v2418_v24, -inf  ;;  %9583 = vmatpush3.bf16.msra.mxu0 %v10850_v35 }
0x24bf   :  { %2422 = vmax.xlane.f32.xlu0 %v2421_v22  ;;  %9584 = vmatprep.subr.bf16.mxu0 %v10120_v3  ;;  %v10973_v22 = vld [vmem:[%s12230_s6] ss:$0 sm:$0xff] }
0x24c2   :  { %9586 = vmatpush3.bf16.msra.mxu0 %v10860_v44 }
0x24c3   :  { %9587 = vmatprep.subr.bf16.mxu0 %v10120_v3 }
0x24c6   :  { %9589 = vmatpush3.bf16.msra.mxu0 %v10870_v15 }
0x24c7   :  { %9590 = vmatprep.subr.bf16.mxu0 %v10120_v3 }
0x24ca   :  { %9592 = vmatpush3.bf16.msra.mxu0 %v10880_v10 }
0x24cb   :  { %9593 = vmatprep.subr.bf16.mxu0 %v10120_v3 }
0x24ce   :  { %9595 = vmatpush3.bf16.msra.mxu0 %v10890_v4 }
0x24cf   :  { %9596 = vmatprep.subr.bf16.mxu0 %v10120_v3 }
0x24d2   :  { %9598 = vmatpush3.bf16.msra.mxu0 %v10900_v49 }
0x24d3   :  { %9599 = vmatprep.subr.bf16.mxu0 %v10120_v3 }
0x24d6   :  { %9601 = vmatpush3.bf16.msra.mxu0 %v10913_v11 }
0x24d7   :  { %9614 = vmatprep.subr.bf16.mxu0 %v10120_v3 }
0x254c   :  { %v2423_v51 = vpop.xlane.xlu0 %2422 }
0x254d   :  { %vm2424_vm13 = vcmp.ge.f32.partialorder %v2418_v24, %v2423_v51 }
0x254e   :  { %v2425_v30 = vsel %vm2424_vm13, %v10710_v50, 128.0  ;;  %vm3515_vm13 = vcmask 25624  }
0x254f   :  { %v2426_v58 = vsel %vm1334_vm12, %v2425_v30, inf }
0x2550   :  { %2427 = vmin.xlane.f32.xlu1 %v2426_v58 }
0x25dd   :  { %v2428_v34 = vpop.xlane.xlu1 %2427 }
0x25de   :  { %v9910_v54 = vtrunc.f32 %v2428_v34 }
0x25e0   :  { %v9911_v40 = vcvt.f32.s32 %v9910_v54 }
0x25e2   :  { %2431 = vst.msk [vmem:[#allocation4] sm:$0x3] %vm2430_vm14, %v9911_v40  ;;  %vm2432_vm15 = vcmp.eq.s32.totalorder %v10340_v37, %v9911_v40 }
0x25e3   :  { %8822 = vmatmul.mubr.msk.f32.vlgmr.msra.gmra.mrb[22].mxu0 %vm2432_vm15, %v10123_v38  ;;  %vm3808_vm15 = vcmp.lt.s32.totalorder %v10340_v37, 4 }
0x25e4   :  { %8874 = vmatprep.mubr.msk.f32.mxu0 %vm10121_vm0, %v10122_v6 }
0x26b6   :  { %v2522_v27 = vpop.f32.mrb[22].mxu0 }
0x26b7   :  { %v2523_v55 = vadd.f32 %v7942_v63, %v2522_v27  ;;  %v8823_v31 = vpop.f32.mrb[23].mxu0 }
0x26b9   :  { %v2526_v21 = vadd.f32 %v10927_v56, %v2523_v55 }
0x26bb   :  { %v2529_v59 = vsel %vm336_vm3, %v2526_v21, 0.0 }
0x26bc   :  { %2530 = vadd.xlane.f32.xlu0 %v2529_v59 }
0x2749   :  { %v2531_v48 = vpop.xlane.xlu0 %2530 }
0x274a   :  { %v2532_v17 = vmul.f32 0.03125, %v2531_v48 }
0x274c   :  { %v2533_v20 = vsub.f32 %v2526_v21, %v2532_v17 }
0x274e   :  { %v2534_v23 = vmul.f32 %v2533_v20, %v2533_v20 }
0x2750   :  { %v2535_v0 = vsel %vm336_vm3, %v2534_v23, 0.0 }
0x2751   :  { %2536 = vadd.xlane.f32.xlu1 %v2535_v0 }
0x27de   :  { %v2537_v36 = vpop.xlane.xlu1 %2536 }
0x27df   :  { %v2538_v62 = vmul.f32 0.03125, %v2537_v36  ;;  %v2980_v36 = vld [vmem:[%s12231_s7 + $0x8] sm:$0xff] }
0x27e1   :  { %v2539_v5 = vadd.f32 1e-12, %v2538_v62 }
0x27e3   :  { %9974 = vrsqrt.f32 %v2539_v5  ;;  %v11012_v5 = vpack.c.bf16 %v2980_v36, %v2979_v57 }
0x27ed   :  { %v9975_v43 = vpop.eup %9974 }
0x27ee   :  { %v2541_v7 = vmul.f32 %v9975_v43, %v2533_v20 }
0x27f0   :  { %v2546_v19 = vmul.f32 %v10955_v45, %v2541_v7  ;;  %v2981_v7 = vld [vmem:[%s12231_s7 + $0x10] sm:$0xff] }
0x27f2   :  { %v10964_v24 = vadd.f32 %v10960_v18, %v2546_v19  ;;  %v2982_v19 = vld [vmem:[%s12231_s7 + $0x18] sm:$0xff] }
0x27f4   :  { %8833 = vmatmul.mubr.msk.f32.vlgmr.msra.gmra.mrb[26].mxu1 %vm71_vm1, %v10964_v24 }
0x27f5   :  { %8837 = vmatprep.mubr.msk.f32.mxu1 %vm10121_vm0, %v10122_v6 }
0x28c7   :  { %v2632_v28 = vpop.f32.mrb[26].mxu1 }
0x28c8   :  { %v2633_v9 = vadd.f32 %v10973_v22, %v2632_v28  ;;  %v8834_v42 = vpop.f32.mrb[27].mxu1  ;;  %v11025_v28 = vpack.c.bf16 %v2982_v19, %v2981_v7  ;;  %v11080_v19 = vld [vmem:[%s12227_s3 + $0x4] ss:$0 sm:$0xff] }
0x28ca   :  { %2637 = vrot.lane.b32.xlu0 %v2633_v9, %s10124_s9  ;;  %v2813_v40 = vrot.slane %v2633_v9, 1 }
0x293c   :  { %v2638_v16 = vpop.permute.xlu0 %2637 }
0x293d   :  { %2640 = vst.msk [vmem:[#allocation2 + $0x2] sm:$0x1] %vm449_vm4, %v2638_v16 }
0x293e   :  { %2809 = vst.msk [vmem:[#allocation2 + $0x9] sm:$0x2] %vm621_vm5, %v2638_v16 }
0x2944   :  { %v2645_v13 = vld [vmem:[#allocation2] sm:$0xff] }
0x2945   :  { %8836 = vmatpush3.xpose.msk.msra.mxu1 %vm71_vm1, %v2645_v13  ;;  %v2811_v54 = vld [vmem:[#allocation2 + $0x8] sm:$0xff] }
0x2946   :  { %8840 = vmatprep.subr.mxu1 %v10122_v6 }
0x2948   :  { %8838 = vmatmul.mubr.msk.f32.vlgmr.msra.gmra.mrb[28].mxu1 %vm71_vm1, %v2633_v9 }
0x2949   :  { %8842 = vmatprep.mubr.msk.f32.mxu1 %vm10121_vm0, %v10122_v6 }
0x2a1b   :  { %v2718_v2 = vpop.f32.mrb[28].mxu1 }
0x2a1c   :  { %v2722_v60 = vmul.f32 0.17677669, %v2718_v2  ;;  %v8839_v46 = vpop.f32.mrb[29].mxu1 }
0x2a1e   :  { %v2724_v8 = vsel %vm2723_vm2, %v2722_v60, -1e+30  ;;  %v11036_v60 = vld [vmem:[%s12228_s4] ss:$0 sm:$0xff] }
0x2a1f   :  { %v2725_v41 = vsel %vm535_vm7, %v2724_v8, -inf }
0x2a20   :  { %2726 = vmax.xlane.f32.xlu1 %v2725_v41 }
0x2aad   :  { %v2727_v14 = vpop.xlane.xlu1 %2726 }
0x2aae   :  { %v2728_v1 = vsub.f32 %v2724_v8, %v2727_v14 }
0x2ab0   :  { %v2729_v12 = vmul.f32 1.442695, %v2728_v1 }
0x2ab2   :  { %9976 = vpow2.f32 %v2729_v12 }
0x2abc   :  { %v9977_v25 = vpop.eup %9976 }
0x2abd   :  { %v2731_v51 = vsel %vm535_vm7, %v9977_v25, 0.0 }
0x2abe   :  { %2732 = vadd.xlane.f32.xlu1 %v2731_v51 }
0x2acf   :  { %2641 = vrot.lane.b32.xlu1 %v2633_v9, %s10125_s21 }
0x2b4b   :  { %v2733_v30 = vpop.xlane.xlu1 %2732 }
0x2b4c   :  { %9978 = vrcp.f32 %v2733_v30 }
0x2b4f   :  { %v2642_v58 = vpop.permute.xlu1 %2641 }
0x2b50   :  { %2644 = vst.msk [vmem:[#allocation3 + $0x2] sm:$0x1] %vm449_vm4, %v2642_v58 }
0x2b51   :  { %2810 = vst.msk [vmem:[#allocation3 + $0x9] sm:$0x2] %vm621_vm5, %v2642_v58 }
0x2b56   :  { %v9979_v52 = vpop.eup %9978 }
0x2b57   :  { %v2735_v53 = vmul.f32 %v9979_v52, %v9977_v25  ;;  %v2646_v34 = vld [vmem:[#allocation3] sm:$0xff] }
0x2b58   :  { %8841 = vmatpush3.msra.mxu1 %v2646_v34  ;;  %v2812_v63 = vld [vmem:[#allocation3 + $0x8] sm:$0xff] }
0x2b59   :  { %8843 = vmatmul.mubr.msk.f32.vlgmr.msra.gmra.mrb[30].mxu1 %vm547_vm8, %v2735_v53  ;;  %8845 = vmatprep.subr.mxu1 %v10122_v6 }
0x2b5a   :  { %8847 = vmatprep.mubr.msk.f32.mxu1 %vm10121_vm0, %v10122_v6 }
0x2b5f   :  { %8846 = vmatpush3.xpose.msk.msra.mxu1 %vm71_vm1, %v2811_v54  ;;  %v11045_v54 = vld [vmem:[%s12227_s3 + $0x2] ss:$0 sm:$0xff] }
0x2b60   :  { %8850 = vmatprep.subr.mxu1 %v10122_v6 }
0x2b62   :  { %8848 = vmatmul.mubr.msk.f32.vlgmr.msra.gmra.mrb[32].mxu1 %vm71_vm1, %v2813_v40  ;;  %v11050_v40 = vld [vmem:[%s12227_s3 + $0x3] ss:$0 sm:$0xff] }
0x2b63   :  { %8851 = vmatpush3.msra.mxu1 %v2812_v63  ;;  %8852 = vmatprep.mubr.msk.f32.mxu1 %vm10121_vm0, %v10122_v6 }
0x2b64   :  { %9608 = vmatprep.subr.bf16.mxu1 %v10120_v3 }
0x2c2c   :  { %v2805_v27 = vpop.f32.mrb[30].mxu1 }
0x2c2d   :  { %v8844_v55 = vpop.f32.mrb[31].mxu1 }
0x2c35   :  { %v2885_v31 = vpop.f32.mrb[32].mxu1 }
0x2c36   :  { %v2889_v21 = vmul.f32 0.17677669, %v2885_v31  ;;  %v8849_v59 = vpop.f32.mrb[33].mxu1 }
0x2c38   :  { %v2890_v48 = vsel %vm2723_vm2, %v2889_v21, -1e+30 }
0x2c39   :  { %v2891_v17 = vsel %vm535_vm7, %v2890_v48, -inf }
0x2c3a   :  { %2892 = vmax.xlane.f32.xlu0 %v2891_v17 }
0x2cc7   :  { %v2893_v20 = vpop.xlane.xlu0 %2892 }
0x2cc8   :  { %v2894_v23 = vsub.f32 %v2890_v48, %v2893_v20 }
0x2cca   :  { %v2895_v0 = vmul.f32 1.442695, %v2894_v23  ;;  %v3108_v23 = vld [vmem:[%s12234_s10] sm:$0xff] }
0x2ccc   :  { %9980 = vpow2.f32 %v2895_v0  ;;  %v3109_v0 = vld [vmem:[%s12234_s10 + $0x8] sm:$0xff] }
0x2cd6   :  { %v9981_v26 = vpop.eup %9980 }
0x2cd7   :  { %v2897_v29 = vsel %vm535_vm7, %v9981_v26, 0.0 }
0x2cd8   :  { %2898 = vadd.xlane.f32.xlu1 %v2897_v29  ;;  %v3110_v29 = vld [vmem:[%s12234_s10 + $0x10] sm:$0xff] }
0x2d65   :  { %v2899_v39 = vpop.xlane.xlu1 %2898 }
0x2d66   :  { %9982 = vrcp.f32 %v2899_v39  ;;  %v3111_v39 = vld [vmem:[%s12234_s10 + $0x18] sm:$0xff] }
0x2d67   :  { %v11073_v57 = vpack.c.bf16 %v3111_v39, %v3110_v29 }
0x2d70   :  { %v9983_v62 = vpop.eup %9982 }
0x2d71   :  { %v2901_v43 = vmul.f32 %v9983_v62, %v9981_v26  ;;  %v11063_v26 = vpack.c.bf16 %v3109_v0, %v3108_v23 }
0x2d73   :  { %8853 = vmatmul.mubr.msk.f32.vlgmr.msra.gmra.mrb[34].mxu1 %vm547_vm8, %v2901_v43  ;;  %9616 = vmatpush3.bf16.msra.mxu0 %v11063_v26 }
0x2d74   :  { %9610 = vmatpush3.bf16.msra.mxu1 %v11012_v5  ;;  %8863 = vmatprep.mubr.msk.f32.mxu1 %vm10121_vm0, %v10122_v6 }
0x2d75   :  { %9611 = vmatprep.subr.bf16.mxu1 %v10120_v3  ;;  %9617 = vmatprep.subr.bf16.mxu0 %v10120_v3 }
0x2d77   :  { %9619 = vmatpush3.bf16.msra.mxu0 %v11073_v57 }
0x2d78   :  { %9613 = vmatpush3.bf16.msra.mxu1 %v11025_v28  ;;  %9632 = vmatprep.subr.bf16.mxu0 %v10120_v3 }
0x2d79   :  { %9620 = vmatprep.subr.bf16.mxu1 %v10120_v3 }
0x2e46   :  { %v2971_v9 = vpop.f32.mrb[34].mxu1 }
0x2e47   :  { %v2976_v42 = vrot.slane %v2971_v9, 7  ;;  %v8854_v16 = vpop.f32.mrb[35].mxu1 }
0x2e49   :  { %v2978_v13 = vsel %vm791_vm9, %v2805_v27, %v2976_v42  ;;  %v11085_v42 = vld [vmem:[%s12227_s3 + $0x5] ss:$0 sm:$0xff] }
0x2e4a   :  { %8864 = vmatmul.mubr.msk.f32.vlgmr.msra.gmra.mrb[36].mxu1 %vm71_vm1, %v2978_v13 }
0x2e4b   :  { %8893 = vmatprep.mubr.msk.f32.mxu1 %vm10121_vm0, %v10122_v6 }
0x2f1d   :  { %v3052_v2 = vpop.f32.mrb[36].mxu1 }
0x2f1e   :  { %v3053_v46 = vadd.f32 %v11036_v60, %v3052_v2  ;;  %v8865_v8 = vpop.f32.mrb[37].mxu1  ;;  %v3201_v2 = vld [vmem:[%s12236_s12] sm:$0xff] }
0x2f20   :  { %v3056_v41 = vadd.f32 %v3053_v46, %v10964_v24  ;;  %v3202_v46 = vld [vmem:[%s12236_s12 + $0x8] sm:$0xff] }
0x2f21   :  { %v11098_v8 = vpack.c.bf16 %v3202_v46, %v3201_v2 }
0x2f22   :  { %v3059_v14 = vsel %vm336_vm3, %v3056_v41, 0.0 }
0x2f23   :  { %3060 = vadd.xlane.f32.xlu0 %v3059_v14  ;;  %9622 = vmatpush3.bf16.msra.mxu1 %v11098_v8  ;;  %v3204_v14 = vld [vmem:[%s12236_s12 + $0x18] sm:$0xff] }
0x2f24   :  { %9623 = vmatprep.subr.bf16.mxu1 %v10120_v3 }
0x2fb0   :  { %v3061_v1 = vpop.xlane.xlu0 %3060 }
0x2fb1   :  { %v3062_v12 = vmul.f32 0.03125, %v3061_v1 }
0x2fb3   :  { %v3063_v25 = vsub.f32 %v3056_v41, %v3062_v12  ;;  %v3203_v41 = vld [vmem:[%s12236_s12 + $0x10] sm:$0xff]  ;;  %v3205_v12 = vld [vmem:[%s12236_s12 + $0x20] sm:$0xff] }
0x2fb4   :  { %v11108_v1 = vpack.c.bf16 %v3204_v14, %v3203_v41  ;;  %v11188_v14 = vld [vmem:[%s12227_s3 + $0x6] ss:$0 sm:$0xff] }
0x2fb5   :  { %v3064_v51 = vmul.f32 %v3063_v25, %v3063_v25 }
0x2fb6   :  { %9625 = vmatpush3.bf16.msra.mxu1 %v11108_v1 }
0x2fb7   :  { %v3065_v30 = vsel %vm336_vm3, %v3064_v51, 0.0  ;;  %9626 = vmatprep.subr.bf16.mxu1 %v10120_v3 }
0x2fb8   :  { %3066 = vadd.xlane.f32.xlu0 %v3065_v30  ;;  %v3207_v30 = vld [vmem:[%s12236_s12 + $0x30] sm:$0xff] }
0x3045   :  { %v3067_v58 = vpop.xlane.xlu0 %3066 }
0x3046   :  { %v3068_v52 = vmul.f32 0.03125, %v3067_v58  ;;  %v3208_v58 = vld [vmem:[%s12236_s12 + $0x38] sm:$0xff] }
0x3048   :  { %v3069_v53 = vadd.f32 1e-12, %v3068_v52  ;;  %v11128_v52 = vpack.c.bf16 %v3208_v58, %v3207_v30 }
0x304a   :  { %9984 = vrsqrt.f32 %v3069_v53  ;;  %v11135_v53 = vld [vmem:[%s12235_s11] ss:$0 sm:$0xff] }
0x3054   :  { %v9985_v34 = vpop.eup %9984 }
0x3055   :  { %v3071_v24 = vmul.f32 %v9985_v34, %v3063_v25  ;;  %v3206_v25 = vld [vmem:[%s12236_s12 + $0x28] sm:$0xff] }
0x3056   :  { %v11118_v51 = vpack.c.bf16 %v3206_v25, %v3205_v12  ;;  %v11193_v25 = vld [vmem:[%s12227_s3 + $0x7] ss:$0 sm:$0xff] }
0x3057   :  { %v3076_v63 = vmul.f32 %v11045_v54, %v3071_v24 }
0x3058   :  { %9628 = vmatpush3.bf16.msra.mxu1 %v11118_v51 }
0x3059   :  { %v3081_v27 = vadd.f32 %v11050_v40, %v3076_v63  ;;  %9629 = vmatprep.subr.bf16.mxu1 %v10120_v3 }
0x305b   :  { %v3082_v55 = vadd.f32 %v3081_v27, %v10500_v47 }
0x305c   :  { %9631 = vmatpush3.bf16.msra.mxu1 %v11128_v52 }
0x305d   :  { %v3085_v31 = vsel %vm336_vm3, %v3082_v55, 0.0  ;;  %9644 = vmatprep.subr.bf16.mxu1 %v10120_v3 }
0x305e   :  { %3086 = vadd.xlane.f32.xlu0 %v3085_v31 }
0x30eb   :  { %v3087_v21 = vpop.xlane.xlu0 %3086 }
0x30ec   :  { %v3088_v59 = vmul.f32 0.03125, %v3087_v21 }
0x30ee   :  { %v3089_v48 = vsub.f32 %v3082_v55, %v3088_v59 }
0x30f0   :  { %v3090_v17 = vmul.f32 %v3089_v48, %v3089_v48 }
0x30f2   :  { %v3091_v20 = vsel %vm336_vm3, %v3090_v17, 0.0 }
0x30f3   :  { %3092 = vadd.xlane.f32.xlu1 %v3091_v20 }
0x3180   :  { %v3093_v36 = vpop.xlane.xlu1 %3092 }
0x3181   :  { %v3094_v62 = vmul.f32 0.03125, %v3093_v36  ;;  %v3308_v36 = vld [vmem:[%s12237_s13] sm:$0xff] }
0x3183   :  { %v3095_v43 = vadd.f32 1e-12, %v3094_v62  ;;  %v3309_v62 = vld [vmem:[%s12237_s13 + $0x8] sm:$0xff] }
0x3185   :  { %9986 = vrsqrt.f32 %v3095_v43  ;;  %v11171_v43 = vpack.c.bf16 %v3309_v62, %v3308_v36  ;;  %v3421_v36 = vld [vmem:[%s12238_s14 + $0x10] sm:$0xff]  ;;  %v3422_v62 = vld [vmem:[%s12238_s14 + $0x18] sm:$0xff] }
0x318f   :  { %v9987_v7 = vpop.eup %9986 }
0x3190   :  { %v3097_v9 = vmul.f32 %v9987_v7, %v3089_v48  ;;  %v3310_v7 = vld [vmem:[%s12237_s13 + $0x10] sm:$0xff] }
0x3192   :  { %v3102_v16 = vmul.f32 %v11080_v19, %v3097_v9  ;;  %v3311_v9 = vld [vmem:[%s12237_s13 + $0x18] sm:$0xff] }
0x3194   :  { %v3107_v13 = vadd.f32 %v11085_v42, %v3102_v16  ;;  %v11181_v16 = vpack.c.bf16 %v3311_v9, %v3310_v7  ;;  %v11224_v7 = vpack.c.bf16 %v3422_v62, %v3421_v36 }
0x3196   :  { %8875 = vmatmul.mubr.msk.f32.vlgmr.msra.gmra.mrb[24].mxu0 %vm71_vm1, %v3107_v13 }
0x3197   :  { %8904 = vmatprep.mubr.msk.f32.mxu0 %vm10121_vm0, %v10122_v6  ;;  %9634 = vmatpush3.bf16.msra.mxu0 %v11171_v43 }
0x3198   :  { %9635 = vmatprep.subr.bf16.mxu0 %v10120_v3 }
0x319b   :  { %9637 = vmatpush3.bf16.msra.mxu0 %v11181_v16 }
0x319c   :  { %9638 = vmatprep.subr.bf16.mxu0 %v10120_v3 }
0x3269   :  { %v3188_v34 = vpop.f32.mrb[24].mxu0 }
0x326a   :  { %v3189_v24 = vadd.f32 %v11135_v53, %v3188_v34  ;;  %v8876_v63 = vpop.f32.mrb[25].mxu0 }
0x326c   :  { %v3192_v27 = vmul.f32 %v3189_v24, %v3189_v24 }
0x326e   :  { %v3193_v55 = vmul.f32 %v3192_v27, %v3189_v24 }
0x3270   :  { %v3194_v31 = vmul.f32 0.044715, %v3193_v55 }
0x3272   :  { %v3195_v21 = vadd.f32 %v3194_v31, %v3189_v24 }
0x3274   :  { %v3196_v59 = vmul.f32 0.7978846, %v3195_v21 }
0x3276   :  { %9988 = vtanh.f32 %v3196_v59 }
0x3280   :  { %v9989_v48 = vpop.eup %9988 }
0x3281   :  { %v3198_v17 = vadd.f32 1.0, %v9989_v48 }
0x3283   :  { %v3199_v20 = vmul.f32 0.5, %v3198_v17 }
0x3285   :  { %v3200_v23 = vmul.f32 %v3199_v20, %v3189_v24  ;;  %v11203_v24 = vld [vmem:[%s12228_s4 + $0x4] ss:$0 sm:$0xff] }
0x3287   :  { %8894 = vmatmul.mubr.msk.f32.vlgmr.msra.gmra.mrb[38].mxu1 %vm1031_vm10, %v3200_v23 }
0x3288   :  { %9646 = vmatpush3.bf16.msra.mxu1 %v10844_v33  ;;  %8950 = vmatprep.mubr.msk.f32.mxu1 %vm10121_vm0, %v10122_v6 }
0x3289   :  { %9647 = vmatprep.subr.bf16.mxu1 %v10120_v3 }
0x328c   :  { %9649 = vmatpush3.bf16.msra.mxu1 %v10850_v35  ;;  %v11160_v35 = vld [vmem:[%s12228_s4 + $0x3] ss:$0 sm:$0xff] }
0x328d   :  { %9650 = vmatprep.subr.bf16.mxu1 %v10120_v3 }
0x3290   :  { %9652 = vmatpush3.bf16.msra.mxu1 %v10860_v44 }
0x3291   :  { %9653 = vmatprep.subr.bf16.mxu1 %v10120_v3 }
0x3294   :  { %9655 = vmatpush3.bf16.msra.mxu1 %v10870_v15 }
0x3295   :  { %9656 = vmatprep.subr.bf16.mxu1 %v10120_v3 }
0x3298   :  { %9658 = vmatpush3.bf16.msra.mxu1 %v10880_v10 }
0x3299   :  { %9659 = vmatprep.subr.bf16.mxu1 %v10120_v3 }
0x329c   :  { %9661 = vmatpush3.bf16.msra.mxu1 %v10890_v4 }
0x329d   :  { %9662 = vmatprep.subr.bf16.mxu1 %v10120_v3 }
0x32a0   :  { %9664 = vmatpush3.bf16.msra.mxu1 %v10900_v49 }
0x32a1   :  { %9665 = vmatprep.subr.bf16.mxu1 %v10120_v3 }
0x32a4   :  { %9667 = vmatpush3.bf16.msra.mxu1 %v10913_v11 }
0x32a5   :  { %9680 = vmatprep.subr.bf16.mxu1 %v10120_v3 }
0x335a   :  { %v3278_v33 = vpop.f32.mrb[38].mxu1 }
0x335b   :  { %v3279_v44 = vadd.f32 %v11160_v35, %v3278_v33  ;;  %v8895_v15 = vpop.f32.mrb[39].mxu1 }
0x335d   :  { %v3282_v10 = vadd.f32 %v3279_v44, %v3107_v13 }
0x335f   :  { %v3285_v4 = vsel %vm336_vm3, %v3282_v10, 0.0 }
0x3360   :  { %3286 = vadd.xlane.f32.xlu0 %v3285_v4 }
0x33ed   :  { %v3287_v49 = vpop.xlane.xlu0 %3286 }
0x33ee   :  { %v3288_v0 = vmul.f32 0.03125, %v3287_v49 }
0x33f0   :  { %v3289_v29 = vsub.f32 %v3282_v10, %v3288_v0 }
0x33f2   :  { %v3290_v39 = vmul.f32 %v3289_v29, %v3289_v29 }
0x33f4   :  { %v3291_v11 = vsel %vm336_vm3, %v3290_v39, 0.0  ;;  %v3420_v39 = vld [vmem:[%s12238_s14 + $0x8] sm:$0xff] }
0x33f5   :  { %3292 = vadd.xlane.f32.xlu1 %v3291_v11 }
0x3482   :  { %v3293_v13 = vpop.xlane.xlu1 %3292 }
0x3483   :  { %v3294_v2 = vmul.f32 0.03125, %v3293_v13 }
0x3485   :  { %v3295_v46 = vadd.f32 1e-12, %v3294_v2 }
0x3487   :  { %9990 = vrsqrt.f32 %v3295_v46 }
0x3491   :  { %v9991_v41 = vpop.eup %9990 }
0x3492   :  { %v3297_v12 = vmul.f32 %v9991_v41, %v3289_v29  ;;  %v3419_v29 = vld [vmem:[%s12238_s14] sm:$0xff]  ;;  %v11231_v41 = vld [vmem:[%s12227_s3 + $0x8] ss:$0 sm:$0xff] }
0x3493   :  { %v11214_v11 = vpack.c.bf16 %v3420_v39, %v3419_v29 }
0x3494   :  { %v3302_v30 = vmul.f32 %v11188_v14, %v3297_v12 }
0x3496   :  { %v3307_v58 = vadd.f32 %v11193_v25, %v3302_v30  ;;  %v11236_v30 = vld [vmem:[%s12227_s3 + $0x9] ss:$0 sm:$0xff] }
0x3498   :  { %8905 = vmatmul.mubr.msk.f32.vlgmr.msra.gmra.mrb[26].mxu0 %vm71_vm1, %v3307_v58 }
0x3499   :  { %8915 = vmatprep.mubr.msk.f32.mxu0 %vm10121_vm0, %v10122_v6  ;;  %9640 = vmatpush3.bf16.msra.mxu0 %v11214_v11 }
0x349a   :  { %9641 = vmatprep.subr.bf16.mxu0 %v10120_v3 }
0x349d   :  { %9643 = vmatpush3.bf16.msra.mxu0 %v11224_v7 }
0x349e   :  { %9668 = vmatprep.subr.bf16.mxu0 %v10120_v3 }
0x356b   :  { %v3381_v34 = vpop.f32.mrb[26].mxu0 }
0x356c   :  { %v3382_v63 = vadd.f32 %v11203_v24, %v3381_v34  ;;  %v8906_v27 = vpop.f32.mrb[27].mxu0 }
0x356e   :  { %v3385_v55 = vmul.f32 %v3382_v63, %v3382_v63 }
0x3570   :  { %v3386_v31 = vmul.f32 %v3385_v55, %v3382_v63 }
0x3572   :  { %v3387_v21 = vmul.f32 0.044715, %v3386_v31 }
0x3574   :  { %v3388_v59 = vadd.f32 %v3387_v21, %v3382_v63 }
0x3576   :  { %v3389_v48 = vmul.f32 0.7978846, %v3388_v59 }
0x3578   :  { %9992 = vtanh.f32 %v3389_v48 }
0x3582   :  { %v9993_v17 = vpop.eup %9992 }
0x3583   :  { %v3391_v20 = vadd.f32 1.0, %v9993_v17 }
0x3585   :  { %v3392_v23 = vmul.f32 0.5, %v3391_v20 }
0x3587   :  { %v3393_v33 = vmul.f32 %v3392_v23, %v3382_v63  ;;  %v11250_v63 = vld [vmem:[%s12239_s15] ss:$0 sm:$0xff] }
0x3589   :  { %v3396_v44 = vsel %vm336_vm3, %v3393_v33, 0.0 }
0x358a   :  { %3397 = vadd.xlane.f32.xlu0 %v3396_v44 }
0x3617   :  { %v3398_v15 = vpop.xlane.xlu0 %3397 }
0x3618   :  { %v3399_v10 = vmul.f32 0.03125, %v3398_v15 }
0x361a   :  { %v3400_v4 = vsub.f32 %v3393_v33, %v3399_v10  ;;  %v7971_v33 = vld [vmem:[%s12226_s2 + $0x3] ss:$0 sm:$0xff] }
0x361c   :  { %v3401_v49 = vmul.f32 %v3400_v4, %v3400_v4 }
0x361e   :  { %v3402_v0 = vsel %vm336_vm3, %v3401_v49, 0.0 }
0x361f   :  { %3403 = vadd.xlane.f32.xlu1 %v3402_v0 }
0x36ac   :  { %v3404_v9 = vpop.xlane.xlu1 %3403 }
0x36ad   :  { %v3405_v13 = vmul.f32 0.03125, %v3404_v9 }
0x36af   :  { %v3406_v2 = vadd.f32 1e-12, %v3405_v13 }
0x36b1   :  { %9994 = vrsqrt.f32 %v3406_v2 }
0x36bb   :  { %v9995_v46 = vpop.eup %9994 }
0x36bc   :  { %v3408_v12 = vmul.f32 %v9995_v46, %v3400_v4 }
0x36be   :  { %v3413_v58 = vmul.f32 %v11231_v41, %v3408_v12 }
0x36c0   :  { %v3418_v34 = vadd.f32 %v11236_v30, %v3413_v58 }
0x36c2   :  { %8916 = vmatmul.mubr.msk.f32.vlgmr.msra.gmra.mrb[28].mxu0 %vm71_vm1, %v3418_v34 }
0x36c3   :  { %9670 = vmatpush3.bf16.msra.mxu0 %v10938_v32  ;;  %8961 = vmatprep.mubr.msk.f32.mxu0 %vm10121_vm0, %v10122_v6 }
0x36c4   :  { %9671 = vmatprep.subr.bf16.mxu0 %v10120_v3 }
0x36c7   :  { %9673 = vmatpush3.bf16.msra.mxu0 %v10948_v61 }
0x36c8   :  { %8964 = vmatprep.subr.mxu0 %v10122_v6 }
0x3795   :  { %v3499_v27 = vpop.f32.mrb[28].mxu0 }
0x3796   :  { %v3500_v55 = vadd.f32 %v11250_v63, %v3499_v27  ;;  %v8917_v31 = vpop.f32.mrb[29].mxu0 }
0x3798   :  { %v3503_v32 = vsel %vm1330_vm11, %v3500_v55, -1e+30 }
0x3799   :  { %7969 = vst [vmem:[%s12241_s17 + $0x6] sm:$0x3] %v3503_v32  ;;  %v3506_v61 = vsel %vm1334_vm12, %v3503_v32, -inf }
0x379a   :  { %3507 = vmax.xlane.f32.xlu0 %v3506_v61 }
0x3827   :  { %v3508_v21 = vpop.xlane.xlu0 %3507 }
0x3828   :  { %vm3509_vm6 = vcmp.ge.f32.partialorder %v3503_v32, %v3508_v21 }
0x3829   :  { %v3510_v59 = vsel %vm3509_vm6, %v10710_v50, 128.0  ;;  %vm4600_vm6 = vcmask 33824  }
0x382a   :  { %v3511_v48 = vsel %vm1334_vm12, %v3510_v59, inf }
0x382b   :  { %3512 = vmin.xlane.f32.xlu1 %v3511_v48 }
0x38b8   :  { %v3513_v17 = vpop.xlane.xlu1 %3512 }
0x38b9   :  { %v9912_v20 = vtrunc.f32 %v3513_v17 }
0x38bb   :  { %v9913_v23 = vcvt.f32.s32 %v9912_v20 }
0x38bd   :  { %3516 = vst.msk [vmem:[#allocation4] sm:$0x3] %vm3515_vm13, %v9913_v23  ;;  %vm3517_vm14 = vcmp.eq.s32.totalorder %v10340_v37, %v9913_v23 }
0x38be   :  { %8951 = vmatmul.mubr.msk.f32.vlgmr.msra.gmra.mrb[40].mxu1 %vm3517_vm14, %v10123_v38  ;;  %vm4893_vm14 = vcmp.lt.s32.totalorder %v10340_v37, 5 }
0x38bf   :  { %9682 = vmatpush3.bf16.msra.mxu1 %v11063_v26  ;;  %9003 = vmatprep.mubr.msk.f32.mxu1 %vm10121_vm0, %v10122_v6 }
0x38c0   :  { %9683 = vmatprep.subr.bf16.mxu1 %v10120_v3 }
0x38c3   :  { %9685 = vmatpush3.bf16.msra.mxu1 %v11073_v57 }
0x38c4   :  { %9698 = vmatprep.subr.bf16.mxu1 %v10120_v3 }
0x3991   :  { %v3607_v44 = vpop.f32.mrb[40].mxu1 }
0x3992   :  { %v3608_v15 = vadd.f32 %v7971_v33, %v3607_v44  ;;  %v8952_v10 = vpop.f32.mrb[41].mxu1 }
0x3994   :  { %v3611_v4 = vadd.f32 %v10927_v56, %v3608_v15 }
0x3996   :  { %v3614_v26 = vsel %vm336_vm3, %v3611_v4, 0.0 }
0x3997   :  { %3615 = vadd.xlane.f32.xlu0 %v3614_v26 }
0x3a24   :  { %v3616_v49 = vpop.xlane.xlu0 %3615 }
0x3a25   :  { %v3617_v0 = vmul.f32 0.03125, %v3616_v49 }
0x3a27   :  { %v3618_v29 = vsub.f32 %v3611_v4, %v3617_v0 }
0x3a29   :  { %v3619_v39 = vmul.f32 %v3618_v29, %v3618_v29 }
0x3a2b   :  { %v3620_v57 = vsel %vm336_vm3, %v3619_v39, 0.0 }
0x3a2c   :  { %3621 = vadd.xlane.f32.xlu1 %v3620_v57 }
0x3ab9   :  { %v3622_v36 = vpop.xlane.xlu1 %3621 }
0x3aba   :  { %v3623_v62 = vmul.f32 0.03125, %v3622_v36 }
0x3abc   :  { %v3624_v9 = vadd.f32 1e-12, %v3623_v62 }
0x3abe   :  { %9996 = vrsqrt.f32 %v3624_v9 }
0x3ac8   :  { %v9997_v13 = vpop.eup %9996 }
0x3ac9   :  { %v3626_v2 = vmul.f32 %v9997_v13, %v3618_v29 }
0x3acb   :  { %v3631_v46 = vmul.f32 %v10955_v45, %v3626_v2 }
0x3acd   :  { %v11277_v56 = vadd.f32 %v10960_v18, %v3631_v46 }
0x3acf   :  { %8962 = vmatmul.mubr.msk.f32.vlgmr.msra.gmra.mrb[30].mxu0 %vm71_vm1, %v11277_v56 }
0x3ad0   :  { %8966 = vmatprep.mubr.msk.f32.mxu0 %vm10121_vm0, %v10122_v6 }
0x3ba2   :  { %v3717_v12 = vpop.f32.mrb[30].mxu0 }
0x3ba3   :  { %v3718_v58 = vadd.f32 %v10973_v22, %v3717_v12  ;;  %v8963_v34 = vpop.f32.mrb[31].mxu0 }
0x3ba5   :  { %3722 = vrot.lane.b32.xlu0 %v3718_v58, %s10124_s9  ;;  %v3898_v4 = vrot.slane %v3718_v58, 1 }
0x3c17   :  { %v3723_v27 = vpop.permute.xlu0 %3722 }
0x3c18   :  { %3725 = vst.msk [vmem:[#allocation2 + $0x3] sm:$0x1] %vm449_vm4, %v3723_v27 }
0x3c19   :  { %3894 = vst.msk [vmem:[#allocation2 + $0xa] sm:$0x2] %vm621_vm5, %v3723_v27 }
0x3c1f   :  { %v3730_v45 = vld [vmem:[#allocation2] sm:$0xff] }
0x3c20   :  { %8965 = vmatpush3.xpose.msk.msra.mxu0 %vm71_vm1, %v3730_v45  ;;  %v3896_v10 = vld [vmem:[#allocation2 + $0x8] sm:$0xff] }
0x3c21   :  { %8969 = vmatprep.subr.mxu0 %v10122_v6 }
0x3c23   :  { %8967 = vmatmul.mubr.msk.f32.vlgmr.msra.gmra.mrb[32].mxu0 %vm71_vm1, %v3718_v58 }
0x3c24   :  { %8971 = vmatprep.mubr.msk.f32.mxu0 %vm10121_vm0, %v10122_v6 }
0x3cf6   :  { %v3803_v18 = vpop.f32.mrb[32].mxu0 }
0x3cf7   :  { %v3807_v22 = vmul.f32 0.17677669, %v3803_v18  ;;  %v8968_v55 = vpop.f32.mrb[33].mxu0 }
0x3cf9   :  { %v3809_v31 = vsel %vm3808_vm15, %v3807_v22, -1e+30 }
0x3cfa   :  { %v3810_v32 = vsel %vm535_vm7, %v3809_v31, -inf }
0x3cfb   :  { %3811 = vmax.xlane.f32.xlu1 %v3810_v32 }
0x3d88   :  { %v3812_v61 = vpop.xlane.xlu1 %3811 }
0x3d89   :  { %v3813_v21 = vsub.f32 %v3809_v31, %v3812_v61 }
0x3d8b   :  { %v3814_v59 = vmul.f32 1.442695, %v3813_v21 }
0x3d8d   :  { %9998 = vpow2.f32 %v3814_v59 }
0x3d97   :  { %v9999_v48 = vpop.eup %9998 }
0x3d98   :  { %v3816_v17 = vsel %vm535_vm7, %v9999_v48, 0.0 }
0x3d99   :  { %3817 = vadd.xlane.f32.xlu1 %v3816_v17 }
0x3daa   :  { %3726 = vrot.lane.b32.xlu1 %v3718_v58, %s10125_s21 }
0x3e26   :  { %v3818_v20 = vpop.xlane.xlu1 %3817 }
0x3e27   :  { %10000 = vrcp.f32 %v3818_v20 }
0x3e2a   :  { %v3727_v23 = vpop.permute.xlu1 %3726 }
0x3e2b   :  { %3729 = vst.msk [vmem:[#allocation3 + $0x3] sm:$0x1] %vm449_vm4, %v3727_v23 }
0x3e2c   :  { %3895 = vst.msk [vmem:[#allocation3 + $0xa] sm:$0x2] %vm621_vm5, %v3727_v23 }
0x3e31   :  { %v10001_v33 = vpop.eup %10000 }
0x3e32   :  { %v3820_v44 = vmul.f32 %v10001_v33, %v9999_v48  ;;  %v3731_v15 = vld [vmem:[#allocation3] sm:$0xff] }
0x3e33   :  { %8970 = vmatpush3.msra.mxu0 %v3731_v15  ;;  %v3897_v26 = vld [vmem:[#allocation3 + $0x8] sm:$0xff] }
0x3e34   :  { %8972 = vmatmul.mubr.msk.f32.vlgmr.msra.gmra.mrb[34].mxu0 %vm547_vm8, %v3820_v44  ;;  %8974 = vmatprep.subr.mxu0 %v10122_v6 }
0x3e35   :  { %8976 = vmatprep.mubr.msk.f32.mxu0 %vm10121_vm0, %v10122_v6 }
0x3e3a   :  { %8975 = vmatpush3.xpose.msk.msra.mxu0 %vm71_vm1, %v3896_v10 }
0x3e3b   :  { %8979 = vmatprep.subr.mxu0 %v10122_v6 }
0x3e3d   :  { %8977 = vmatmul.mubr.msk.f32.vlgmr.msra.gmra.mrb[36].mxu0 %vm71_vm1, %v3898_v4 }
0x3e3e   :  { %8980 = vmatpush3.msra.mxu0 %v3897_v26  ;;  %8981 = vmatprep.mubr.msk.f32.mxu0 %vm10121_vm0, %v10122_v6 }
0x3e3f   :  { %9674 = vmatprep.subr.bf16.mxu0 %v10120_v3 }
0x3f07   :  { %v3890_v49 = vpop.f32.mrb[34].mxu0 }
0x3f08   :  { %v8973_v0 = vpop.f32.mrb[35].mxu0 }
0x3f10   :  { %v3970_v29 = vpop.f32.mrb[36].mxu0 }
0x3f11   :  { %v3974_v39 = vmul.f32 0.17677669, %v3970_v29  ;;  %v8978_v57 = vpop.f32.mrb[37].mxu0 }
0x3f13   :  { %v3975_v36 = vsel %vm3808_vm15, %v3974_v39, -1e+30 }
0x3f14   :  { %v3976_v62 = vsel %vm535_vm7, %v3975_v36, -inf }
0x3f15   :  { %3977 = vmax.xlane.f32.xlu0 %v3976_v62 }
0x3fa2   :  { %v3978_v9 = vpop.xlane.xlu0 %3977 }
0x3fa3   :  { %v3979_v13 = vsub.f32 %v3975_v36, %v3978_v9 }
0x3fa5   :  { %v3980_v2 = vmul.f32 1.442695, %v3979_v13 }
0x3fa7   :  { %10002 = vpow2.f32 %v3980_v2 }
0x3fb1   :  { %v10003_v46 = vpop.eup %10002 }
0x3fb2   :  { %v3982_v12 = vsel %vm535_vm7, %v10003_v46, 0.0 }
0x3fb3   :  { %3983 = vadd.xlane.f32.xlu1 %v3982_v12 }
0x4040   :  { %v3984_v58 = vpop.xlane.xlu1 %3983 }
0x4041   :  { %10004 = vrcp.f32 %v3984_v58 }
0x404b   :  { %v10005_v34 = vpop.eup %10004 }
0x404c   :  { %v3986_v27 = vmul.f32 %v10005_v34, %v10003_v46 }
0x404e   :  { %8982 = vmatmul.mubr.msk.f32.vlgmr.msra.gmra.mrb[38].mxu0 %vm547_vm8, %v3986_v27 }
0x404f   :  { %9676 = vmatpush3.bf16.msra.mxu0 %v11012_v5  ;;  %8992 = vmatprep.mubr.msk.f32.mxu0 %vm10121_vm0, %v10122_v6 }
0x4050   :  { %9677 = vmatprep.subr.bf16.mxu0 %v10120_v3 }
0x4053   :  { %9679 = vmatpush3.bf16.msra.mxu0 %v11025_v28 }
0x4054   :  { %9686 = vmatprep.subr.bf16.mxu0 %v10120_v3 }
0x4121   :  { %v4056_v45 = vpop.f32.mrb[38].mxu0 }
0x4122   :  { %v4061_v18 = vrot.slane %v4056_v45, 7  ;;  %v8983_v22 = vpop.f32.mrb[39].mxu0 }
0x4124   :  { %v4063_v55 = vsel %vm791_vm9, %v3890_v49, %v4061_v18 }
0x4125   :  { %8993 = vmatmul.mubr.msk.f32.vlgmr.msra.gmra.mrb[40].mxu0 %vm71_vm1, %v4063_v55 }
0x4126   :  { %9688 = vmatpush3.bf16.msra.mxu0 %v11098_v8  ;;  %9022 = vmatprep.mubr.msk.f32.mxu0 %vm10121_vm0, %v10122_v6 }
0x4127   :  { %9689 = vmatprep.subr.bf16.mxu0 %v10120_v3 }
0x412a   :  { %9691 = vmatpush3.bf16.msra.mxu0 %v11108_v1 }
0x412b   :  { %9692 = vmatprep.subr.bf16.mxu0 %v10120_v3 }
0x412e   :  { %9694 = vmatpush3.bf16.msra.mxu0 %v11118_v51 }
0x412f   :  { %9695 = vmatprep.subr.bf16.mxu0 %v10120_v3 }
0x4132   :  { %9697 = vmatpush3.bf16.msra.mxu0 %v11128_v52 }
0x4133   :  { %9710 = vmatprep.subr.bf16.mxu0 %v10120_v3 }
0x41f8   :  { %v4137_v5 = vpop.f32.mrb[40].mxu0 }
0x41f9   :  { %v4138_v28 = vadd.f32 %v11036_v60, %v4137_v5  ;;  %v8994_v8 = vpop.f32.mrb[41].mxu0 }
0x41fb   :  { %v4141_v31 = vadd.f32 %v4138_v28, %v11277_v56 }
0x41fd   :  { %v4144_v32 = vsel %vm336_vm3, %v4141_v31, 0.0 }
0x41fe   :  { %4145 = vadd.xlane.f32.xlu0 %v4144_v32 }
0x428b   :  { %v4146_v1 = vpop.xlane.xlu0 %4145 }
0x428c   :  { %v4147_v61 = vmul.f32 0.03125, %v4146_v1 }
0x428e   :  { %v4148_v21 = vsub.f32 %v4141_v31, %v4147_v61 }
0x4290   :  { %v4149_v59 = vmul.f32 %v4148_v21, %v4148_v21 }
0x4292   :  { %v4150_v51 = vsel %vm336_vm3, %v4149_v59, 0.0 }
0x4293   :  { %4151 = vadd.xlane.f32.xlu0 %v4150_v51 }
0x4320   :  { %v4152_v48 = vpop.xlane.xlu0 %4151 }
0x4321   :  { %v4153_v52 = vmul.f32 0.03125, %v4152_v48 }
0x4323   :  { %v4154_v17 = vadd.f32 1e-12, %v4153_v52 }
0x4325   :  { %10006 = vrsqrt.f32 %v4154_v17 }
0x432f   :  { %v10007_v20 = vpop.eup %10006 }
0x4330   :  { %v4156_v23 = vmul.f32 %v10007_v20, %v4148_v21 }
0x4332   :  { %v4161_v60 = vmul.f32 %v11045_v54, %v4156_v23 }
0x4334   :  { %v4166_v56 = vadd.f32 %v11050_v40, %v4161_v60 }
0x4336   :  { %v4167_v33 = vadd.f32 %v4166_v56, %v10500_v47 }
0x4338   :  { %v4170_v44 = vsel %vm336_vm3, %v4167_v33, 0.0 }
0x4339   :  { %4171 = vadd.xlane.f32.xlu0 %v4170_v44 }
0x43c6   :  { %v4172_v15 = vpop.xlane.xlu0 %4171 }
0x43c7   :  { %v4173_v10 = vmul.f32 0.03125, %v4172_v15 }
0x43c9   :  { %v4174_v4 = vsub.f32 %v4167_v33, %v4173_v10 }
0x43cb   :  { %v4175_v26 = vmul.f32 %v4174_v4, %v4174_v4 }
0x43cd   :  { %v4176_v49 = vsel %vm336_vm3, %v4175_v26, 0.0 }
0x43ce   :  { %4177 = vadd.xlane.f32.xlu1 %v4176_v49 }
0x445b   :  { %v4178_v0 = vpop.xlane.xlu1 %4177 }
0x445c   :  { %v4179_v29 = vmul.f32 0.03125, %v4178_v0 }
0x445e   :  { %v4180_v39 = vadd.f32 1e-12, %v4179_v29 }
0x4460   :  { %10008 = vrsqrt.f32 %v4180_v39 }
0x446a   :  { %v10009_v57 = vpop.eup %10008 }
0x446b   :  { %v4182_v54 = vmul.f32 %v10009_v57, %v4174_v4 }
0x446d   :  { %v4187_v40 = vmul.f32 %v11080_v19, %v4182_v54 }
0x446f   :  { %v4192_v36 = vadd.f32 %v11085_v42, %v4187_v40 }
0x4471   :  { %9004 = vmatmul.mubr.msk.f32.vlgmr.msra.gmra.mrb[42].mxu1 %vm71_vm1, %v4192_v36 }
0x4472   :  { %9700 = vmatpush3.bf16.msra.mxu1 %v11171_v43  ;;  %9033 = vmatprep.mubr.msk.f32.mxu1 %vm10121_vm0, %v10122_v6 }
0x4473   :  { %9701 = vmatprep.subr.bf16.mxu1 %v10120_v3 }
0x4476   :  { %9703 = vmatpush3.bf16.msra.mxu1 %v11181_v16 }
0x4477   :  { %9704 = vmatprep.subr.bf16.mxu1 %v10120_v3 }
0x4544   :  { %v4273_v62 = vpop.f32.mrb[42].mxu1 }
0x4545   :  { %v4274_v9 = vadd.f32 %v11135_v53, %v4273_v62  ;;  %v9005_v13 = vpop.f32.mrb[43].mxu1 }
0x4547   :  { %v4277_v19 = vmul.f32 %v4274_v9, %v4274_v9 }
0x4549   :  { %v4278_v2 = vmul.f32 %v4277_v19, %v4274_v9  ;;  %v4606_v19 = vld [vmem:[%s12245_s20 + $0x8] sm:$0xff] }
0x454b   :  { %v4279_v42 = vmul.f32 0.044715, %v4278_v2 }
0x454d   :  { %v4280_v46 = vadd.f32 %v4279_v42, %v4274_v9  ;;  %v4608_v42 = vld [vmem:[%s12245_s20 + $0x18] sm:$0xff] }
0x454f   :  { %v4281_v12 = vmul.f32 0.7978846, %v4280_v46 }
0x4551   :  { %10010 = vtanh.f32 %v4281_v12  ;;  %v4609_v12 = vld [vmem:[%s12245_s20 + $0x20] sm:$0xff] }
0x455b   :  { %v10011_v43 = vpop.eup %10010 }
0x455c   :  { %v4283_v58 = vadd.f32 1.0, %v10011_v43  ;;  %v4610_v43 = vld [vmem:[%s12245_s20 + $0x28] sm:$0xff] }
0x455e   :  { %v4284_v34 = vmul.f32 0.5, %v4283_v58  ;;  %v11407_v58 = vpack.c.bf16 %v4610_v43, %v4609_v12 }
0x4560   :  { %v4285_v27 = vmul.f32 %v4284_v34, %v4274_v9  ;;  %v4611_v34 = vld [vmem:[%s12245_s20 + $0x30] sm:$0xff] }
0x4562   :  { %9023 = vmatmul.mubr.msk.f32.vlgmr.msra.gmra.mrb[42].mxu0 %vm1031_vm10, %v4285_v27  ;;  %v4612_v27 = vld [vmem:[%s12245_s20 + $0x38] sm:$0xff] }
0x4563   :  { %9079 = vmatprep.mubr.msk.f32.mxu0 %vm10121_vm0, %v10122_v6 }
0x4635   :  { %v4363_v16 = vpop.f32.mrb[42].mxu0 }
0x4636   :  { %v4364_v45 = vadd.f32 %v11160_v35, %v4363_v16  ;;  %v9024_v53 = vpop.f32.mrb[43].mxu0  ;;  %v11417_v16 = vpack.c.bf16 %v4612_v27, %v4611_v34 }
0x4637   :  { %v4614_v53 = vld [vmem:[%s12245_s20 + $0x48] sm:$0xff] }
0x4638   :  { %v4367_v18 = vadd.f32 %v4364_v45, %v4192_v36  ;;  %v4613_v45 = vld [vmem:[%s12245_s20 + $0x40] sm:$0xff] }
0x463a   :  { %v4370_v22 = vsel %vm336_vm3, %v4367_v18, 0.0 }
0x463b   :  { %4371 = vadd.xlane.f32.xlu0 %v4370_v22  ;;  %v4615_v22 = vld [vmem:[%s12245_s20 + $0x50] sm:$0xff] }
0x46c8   :  { %v4372_v55 = vpop.xlane.xlu0 %4371 }
0x46c9   :  { %v4373_v5 = vmul.f32 0.03125, %v4372_v55  ;;  %v4616_v55 = vld [vmem:[%s12245_s20 + $0x58] sm:$0xff] }
0x46cb   :  { %v4374_v28 = vsub.f32 %v4367_v18, %v4373_v5  ;;  %v11427_v18 = vpack.c.bf16 %v4614_v53, %v4613_v45  ;;  %v11437_v5 = vpack.c.bf16 %v4616_v55, %v4615_v22 }
0x46cd   :  { %v4375_v8 = vmul.f32 %v4374_v28, %v4374_v28 }
0x46cf   :  { %v4376_v31 = vsel %vm336_vm3, %v4375_v8, 0.0  ;;  %v4618_v8 = vld [vmem:[%s12245_s20 + $0x68] sm:$0xff] }
0x46d0   :  { %4377 = vadd.xlane.f32.xlu1 %v4376_v31 }
0x475d   :  { %v4378_v32 = vpop.xlane.xlu1 %4377 }
0x475e   :  { %v4379_v1 = vmul.f32 0.03125, %v4378_v32 }
0x4760   :  { %v4380_v61 = vadd.f32 1e-12, %v4379_v1 }
0x4762   :  { %10012 = vrsqrt.f32 %v4380_v61 }
0x476c   :  { %v10013_v21 = vpop.eup %10012 }
0x476d   :  { %v4382_v59 = vmul.f32 %v10013_v21, %v4374_v28  ;;  %v4617_v28 = vld [vmem:[%s12245_s20 + $0x60] sm:$0xff]  ;;  %v4619_v21 = vld [vmem:[%s12245_s20 + $0x70] sm:$0xff] }
0x476e   :  { %v11447_v31 = vpack.c.bf16 %v4618_v8, %v4617_v28 }
0x476f   :  { %v4387_v35 = vmul.f32 %v11188_v14, %v4382_v59  ;;  %v4620_v59 = vld [vmem:[%s12245_s20 + $0x78] sm:$0xff] }
0x4771   :  { %v4392_v51 = vadd.f32 %v11193_v25, %v4387_v35  ;;  %v11460_v35 = vpack.c.bf16 %v4620_v59, %v4619_v21 }
0x4773   :  { %9034 = vmatmul.mubr.msk.f32.vlgmr.msra.gmra.mrb[44].mxu1 %vm71_vm1, %v4392_v51 }
0x4774   :  { %9706 = vmatpush3.bf16.msra.mxu1 %v11214_v11  ;;  %9044 = vmatprep.mubr.msk.f32.mxu1 %vm10121_vm0, %v10122_v6 }
0x4775   :  { %9707 = vmatprep.subr.bf16.mxu1 %v10120_v3 }
0x4778   :  { %9709 = vmatpush3.bf16.msra.mxu1 %v11224_v7 }
0x4779   :  { %9734 = vmatprep.subr.bf16.mxu1 %v10120_v3 }
0x4846   :  { %v4466_v48 = vpop.f32.mrb[44].mxu1 }
0x4847   :  { %v4467_v52 = vadd.f32 %v11203_v24, %v4466_v48  ;;  %v9035_v17 = vpop.f32.mrb[45].mxu1 }
0x4848   :  { %v8000_v17 = vld [vmem:[%s12226_s2 + $0x4] ss:$0 sm:$0xff] }
0x4849   :  { %v4470_v14 = vmul.f32 %v4467_v52, %v4467_v52 }
0x484b   :  { %v4471_v20 = vmul.f32 %v4470_v14, %v4467_v52 }
0x484d   :  { %v4472_v25 = vmul.f32 0.044715, %v4471_v20 }
0x484f   :  { %v4473_v23 = vadd.f32 %v4472_v25, %v4467_v52 }
0x4851   :  { %v4474_v60 = vmul.f32 0.7978846, %v4473_v23  ;;  %v11474_v23 = vld [vmem:[%s12228_s4 + $0x5] ss:$0 sm:$0xff] }
0x4853   :  { %10014 = vtanh.f32 %v4474_v60 }
0x485d   :  { %v10015_v11 = vpop.eup %10014 }
0x485e   :  { %v4476_v56 = vadd.f32 1.0, %v10015_v11 }
0x4860   :  { %v4477_v33 = vmul.f32 0.5, %v4476_v56 }
0x4862   :  { %v4478_v44 = vmul.f32 %v4477_v33, %v4467_v52 }
0x4864   :  { %v4481_v15 = vsel %vm336_vm3, %v4478_v44, 0.0 }
0x4865   :  { %4482 = vadd.xlane.f32.xlu0 %v4481_v15 }
0x48f2   :  { %v4483_v7 = vpop.xlane.xlu0 %4482 }
0x48f3   :  { %v4484_v10 = vmul.f32 0.03125, %v4483_v7 }
0x48f5   :  { %v4485_v4 = vsub.f32 %v4478_v44, %v4484_v10  ;;  %v4722_v10 = vld [vmem:[%s12229_s5] sm:$0xff] }
0x48f7   :  { %v4486_v26 = vmul.f32 %v4485_v4, %v4485_v4 }
0x48f9   :  { %v4487_v24 = vsel %vm336_vm3, %v4486_v26, 0.0 }
0x48fa   :  { %4488 = vadd.xlane.f32.xlu1 %v4487_v24  ;;  %v4724_v24 = vld [vmem:[%s12229_s5 + $0x10] sm:$0xff] }
0x4987   :  { %v4489_v49 = vpop.xlane.xlu1 %4488 }
0x4988   :  { %v4490_v0 = vmul.f32 0.03125, %v4489_v49  ;;  %v4725_v49 = vld [vmem:[%s12229_s5 + $0x18] sm:$0xff] }
0x498a   :  { %v4491_v29 = vadd.f32 1e-12, %v4490_v0  ;;  %v11495_v0 = vpack.c.bf16 %v4725_v49, %v4724_v24  ;;  %v5149_v49 = vld [vmem:[%s12231_s7] sm:$0xff] }
0x498c   :  { %10016 = vrsqrt.f32 %v4491_v29 }
0x4996   :  { %v10017_v39 = vpop.eup %10016 }
0x4997   :  { %v4493_v57 = vmul.f32 %v10017_v39, %v4485_v4  ;;  %v4723_v4 = vld [vmem:[%s12229_s5 + $0x8] sm:$0xff] }
0x4998   :  { %v11485_v26 = vpack.c.bf16 %v4723_v4, %v4722_v10 }
0x4999   :  { %v4498_v54 = vmul.f32 %v11231_v41, %v4493_v57 }
0x499b   :  { %v4503_v40 = vadd.f32 %v11236_v30, %v4498_v54  ;;  %v4605_v30 = vld [vmem:[%s12245_s20] sm:$0xff] }
0x499c   :  { %v11391_v2 = vpack.c.bf16 %v4606_v19, %v4605_v30 }
0x499d   :  { %9045 = vmatmul.mubr.msk.f32.vlgmr.msra.gmra.mrb[46].mxu1 %vm71_vm1, %v4503_v40  ;;  %v11502_v40 = vld [vmem:[%s12227_s3] ss:$0 sm:$0xff] }
0x499e   :  { %9090 = vmatprep.mubr.msk.f32.mxu1 %vm10121_vm0, %v10122_v6  ;;  %9712 = vmatpush3.bf16.msra.mxu0 %v11391_v2 }
0x499f   :  { %9713 = vmatprep.subr.bf16.mxu0 %v10120_v3  ;;  %9736 = vmatpush3.bf16.msra.mxu1 %v11485_v26 }
0x49a0   :  { %9737 = vmatprep.subr.bf16.mxu1 %v10120_v3 }
0x49a3   :  { %9739 = vmatpush3.bf16.msra.mxu1 %v11495_v0 }
0x49a4   :  { %9093 = vmatprep.subr.mxu1 %v10122_v6 }
0x4a70   :  { %v4584_v36 = vpop.f32.mrb[46].mxu1 }
0x4a71   :  { %v4585_v62 = vadd.f32 %v11250_v63, %v4584_v36  ;;  %v9046_v9 = vpop.f32.mrb[47].mxu1  ;;  %v4607_v63 = vld [vmem:[%s12245_s20 + $0x10] sm:$0xff] }
0x4a72   :  { %v11397_v46 = vpack.c.bf16 %v4608_v42, %v4607_v63 }
0x4a73   :  { %v4588_v13 = vsel %vm1330_vm11, %v4585_v62, -1e+30  ;;  %v11507_v62 = vld [vmem:[%s12227_s3 + $0x1] ss:$0 sm:$0xff] }
0x4a74   :  { %7998 = vst [vmem:[%s12241_s17 + $0x8] sm:$0x3] %v4588_v13  ;;  %v4591_v41 = vsel %vm1334_vm12, %v4588_v13, -inf  ;;  %9715 = vmatpush3.bf16.msra.mxu0 %v11397_v46 }
0x4a75   :  { %4592 = vmax.xlane.f32.xlu0 %v4591_v41  ;;  %9716 = vmatprep.subr.bf16.mxu0 %v10120_v3  ;;  %v11520_v41 = vld [vmem:[%s12230_s6] ss:$0 sm:$0xff] }
0x4a78   :  { %9718 = vmatpush3.bf16.msra.mxu0 %v11407_v58 }
0x4a79   :  { %9719 = vmatprep.subr.bf16.mxu0 %v10120_v3 }
0x4a7c   :  { %9721 = vmatpush3.bf16.msra.mxu0 %v11417_v16 }
0x4a7d   :  { %9722 = vmatprep.subr.bf16.mxu0 %v10120_v3 }
0x4a80   :  { %9724 = vmatpush3.bf16.msra.mxu0 %v11427_v18 }
0x4a81   :  { %9725 = vmatprep.subr.bf16.mxu0 %v10120_v3 }
0x4a84   :  { %9727 = vmatpush3.bf16.msra.mxu0 %v11437_v5 }
0x4a85   :  { %9728 = vmatprep.subr.bf16.mxu0 %v10120_v3 }
0x4a88   :  { %9730 = vmatpush3.bf16.msra.mxu0 %v11447_v31 }
0x4a89   :  { %9731 = vmatprep.subr.bf16.mxu0 %v10120_v3 }
0x4a8c   :  { %9733 = vmatpush3.bf16.msra.mxu0 %v11460_v35 }
0x4a8d   :  { %9746 = vmatprep.subr.bf16.mxu0 %v10120_v3 }
0x4b02   :  { %v4593_v32 = vpop.xlane.xlu0 %4592 }
0x4b03   :  { %vm4594_vm2 = vcmp.ge.f32.partialorder %v4588_v13, %v4593_v32 }
0x4b04   :  { %v4595_v1 = vsel %vm4594_vm2, %v10710_v50, 128.0  ;;  %vm5685_vm2 = vcmask 42024  }
0x4b05   :  { %v4596_v61 = vsel %vm1334_vm12, %v4595_v1, inf }
0x4b06   :  { %4597 = vmin.xlane.f32.xlu1 %v4596_v61 }
0x4b93   :  { %v4598_v51 = vpop.xlane.xlu1 %4597 }
0x4b94   :  { %v9914_v48 = vtrunc.f32 %v4598_v51 }
0x4b96   :  { %v9915_v52 = vcvt.f32.s32 %v9914_v48 }
0x4b98   :  { %4601 = vst.msk [vmem:[#allocation4] sm:$0x3] %vm4600_vm6, %v9915_v52  ;;  %vm4602_vm13 = vcmp.eq.s32.totalorder %v10340_v37, %v9915_v52 }
0x4b99   :  { %9080 = vmatmul.mubr.msk.f32.vlgmr.msra.gmra.mrb[44].mxu0 %vm4602_vm13, %v10123_v38  ;;  %vm5978_vm13 = vcmp.lt.s32.totalorder %v10340_v37, 6 }
0x4b9a   :  { %9132 = vmatprep.mubr.msk.f32.mxu0 %vm10121_vm0, %v10122_v6 }
0x4c6c   :  { %v4692_v14 = vpop.f32.mrb[44].mxu0 }
0x4c6d   :  { %v4693_v20 = vadd.f32 %v8000_v17, %v4692_v14  ;;  %v9081_v25 = vpop.f32.mrb[45].mxu0 }
0x4c6f   :  { %v4696_v60 = vadd.f32 %v11474_v23, %v4693_v20 }
0x4c71   :  { %v4699_v11 = vsel %vm336_vm3, %v4696_v60, 0.0 }
0x4c72   :  { %4700 = vadd.xlane.f32.xlu0 %v4699_v11 }
0x4cff   :  { %v4701_v56 = vpop.xlane.xlu0 %4700 }
0x4d00   :  { %v4702_v33 = vmul.f32 0.03125, %v4701_v56 }
0x4d02   :  { %v4703_v44 = vsub.f32 %v4696_v60, %v4702_v33 }
0x4d04   :  { %v4704_v15 = vmul.f32 %v4703_v44, %v4703_v44 }
0x4d06   :  { %v4705_v7 = vsel %vm336_vm3, %v4704_v15, 0.0 }
0x4d07   :  { %4706 = vadd.xlane.f32.xlu1 %v4705_v7 }
0x4d94   :  { %v4707_v29 = vpop.xlane.xlu1 %4706 }
0x4d95   :  { %v4708_v39 = vmul.f32 0.03125, %v4707_v29  ;;  %v5150_v29 = vld [vmem:[%s12231_s7 + $0x8] sm:$0xff] }
0x4d97   :  { %v4709_v57 = vadd.f32 1e-12, %v4708_v39 }
0x4d99   :  { %10018 = vrsqrt.f32 %v4709_v57  ;;  %v11559_v57 = vpack.c.bf16 %v5150_v29, %v5149_v49 }
0x4da3   :  { %v10019_v54 = vpop.eup %10018 }
0x4da4   :  { %v4711_v36 = vmul.f32 %v10019_v54, %v4703_v44 }
0x4da6   :  { %v4716_v9 = vmul.f32 %v11502_v40, %v4711_v36  ;;  %v5151_v36 = vld [vmem:[%s12231_s7 + $0x10] sm:$0xff] }
0x4da8   :  { %v11511_v13 = vadd.f32 %v11507_v62, %v4716_v9  ;;  %v5152_v9 = vld [vmem:[%s12231_s7 + $0x18] sm:$0xff] }
0x4daa   :  { %9091 = vmatmul.mubr.msk.f32.vlgmr.msra.gmra.mrb[48].mxu1 %vm71_vm1, %v11511_v13 }
0x4dab   :  { %9095 = vmatprep.mubr.msk.f32.mxu1 %vm10121_vm0, %v10122_v6 }
0x4e7d   :  { %v4802_v30 = vpop.f32.mrb[48].mxu1 }
0x4e7e   :  { %v4803_v19 = vadd.f32 %v11520_v41, %v4802_v30  ;;  %v9092_v63 = vpop.f32.mrb[49].mxu1  ;;  %v11572_v30 = vpack.c.bf16 %v5152_v9, %v5151_v36  ;;  %v11627_v9 = vld [vmem:[%s12227_s3 + $0x4] ss:$0 sm:$0xff] }
0x4e80   :  { %4807 = vrot.lane.b32.xlu0 %v4803_v19, %s10124_s9  ;;  %v4983_v52 = vrot.slane %v4803_v19, 1 }
0x4ef2   :  { %v4808_v42 = vpop.permute.xlu0 %4807 }
0x4ef3   :  { %4810 = vst.msk [vmem:[#allocation2 + $0x4] sm:$0x1] %vm449_vm4, %v4808_v42 }
0x4ef4   :  { %4979 = vst.msk [vmem:[#allocation2 + $0xb] sm:$0x2] %vm621_vm5, %v4808_v42 }
0x4efa   :  { %v4815_v12 = vld [vmem:[#allocation2] sm:$0xff] }
0x4efb   :  { %9094 = vmatpush3.xpose.msk.msra.mxu1 %vm71_vm1, %v4815_v12  ;;  %v4981_v48 = vld [vmem:[#allocation2 + $0x8] sm:$0xff] }
0x4efc   :  { %9098 = vmatprep.subr.mxu1 %v10122_v6 }
0x4efe   :  { %9096 = vmatmul.mubr.msk.f32.vlgmr.msra.gmra.mrb[50].mxu1 %vm71_vm1, %v4803_v19 }
0x4eff   :  { %9100 = vmatprep.mubr.msk.f32.mxu1 %vm10121_vm0, %v10122_v6 }
0x4fd1   :  { %v4888_v43 = vpop.f32.mrb[50].mxu1 }
0x4fd2   :  { %v4892_v34 = vmul.f32 0.17677669, %v4888_v43  ;;  %v9097_v27 = vpop.f32.mrb[51].mxu1 }
0x4fd4   :  { %v4894_v45 = vsel %vm4893_vm14, %v4892_v34, -1e+30  ;;  %v11583_v34 = vld [vmem:[%s12228_s4] ss:$0 sm:$0xff] }
0x4fd5   :  { %v4895_v53 = vsel %vm535_vm7, %v4894_v45, -inf }
0x4fd6   :  { %4896 = vmax.xlane.f32.xlu1 %v4895_v53 }
0x5063   :  { %v4897_v22 = vpop.xlane.xlu1 %4896 }
0x5064   :  { %v4898_v55 = vsub.f32 %v4894_v45, %v4897_v22 }
0x5066   :  { %v4899_v28 = vmul.f32 1.442695, %v4898_v55 }
0x5068   :  { %10020 = vpow2.f32 %v4899_v28 }
0x5072   :  { %v10021_v8 = vpop.eup %10020 }
0x5073   :  { %v4901_v32 = vsel %vm535_vm7, %v10021_v8, 0.0 }
0x5074   :  { %4902 = vadd.xlane.f32.xlu1 %v4901_v32 }
0x5085   :  { %4811 = vrot.lane.b32.xlu1 %v4803_v19, %s10125_s21 }
0x5101   :  { %v4903_v1 = vpop.xlane.xlu1 %4902 }
0x5102   :  { %10022 = vrcp.f32 %v4903_v1 }
0x5105   :  { %v4812_v61 = vpop.permute.xlu1 %4811 }
0x5106   :  { %4814 = vst.msk [vmem:[#allocation3 + $0x4] sm:$0x1] %vm449_vm4, %v4812_v61 }
0x5107   :  { %4980 = vst.msk [vmem:[#allocation3 + $0xb] sm:$0x2] %vm621_vm5, %v4812_v61 }
0x510c   :  { %v10023_v21 = vpop.eup %10022 }
0x510d   :  { %v4905_v59 = vmul.f32 %v10023_v21, %v10021_v8  ;;  %v4816_v51 = vld [vmem:[#allocation3] sm:$0xff] }
0x510e   :  { %9099 = vmatpush3.msra.mxu1 %v4816_v51  ;;  %v4982_v17 = vld [vmem:[#allocation3 + $0x8] sm:$0xff] }
0x510f   :  { %9101 = vmatmul.mubr.msk.f32.vlgmr.msra.gmra.mrb[52].mxu1 %vm547_vm8, %v4905_v59  ;;  %9103 = vmatprep.subr.mxu1 %v10122_v6 }
0x5110   :  { %9105 = vmatprep.mubr.msk.f32.mxu1 %vm10121_vm0, %v10122_v6 }
0x5115   :  { %9104 = vmatpush3.xpose.msk.msra.mxu1 %vm71_vm1, %v4981_v48  ;;  %v11592_v48 = vld [vmem:[%s12227_s3 + $0x2] ss:$0 sm:$0xff] }
0x5116   :  { %9108 = vmatprep.subr.mxu1 %v10122_v6 }
0x5118   :  { %9106 = vmatmul.mubr.msk.f32.vlgmr.msra.gmra.mrb[54].mxu1 %vm71_vm1, %v4983_v52  ;;  %v11597_v52 = vld [vmem:[%s12227_s3 + $0x3] ss:$0 sm:$0xff] }
0x5119   :  { %9109 = vmatpush3.msra.mxu1 %v4982_v17  ;;  %9110 = vmatprep.mubr.msk.f32.mxu1 %vm10121_vm0, %v10122_v6 }
0x511a   :  { %9740 = vmatprep.subr.bf16.mxu1 %v10120_v3 }
0x51e2   :  { %v4975_v14 = vpop.f32.mrb[52].mxu1 }
0x51e3   :  { %v9102_v20 = vpop.f32.mrb[53].mxu1 }
0x51eb   :  { %v5055_v25 = vpop.f32.mrb[54].mxu1 }
0x51ec   :  { %v5059_v60 = vmul.f32 0.17677669, %v5055_v25  ;;  %v9107_v11 = vpop.f32.mrb[55].mxu1 }
0x51ee   :  { %v5060_v56 = vsel %vm4893_vm14, %v5059_v60, -1e+30 }
0x51ef   :  { %v5061_v33 = vsel %vm535_vm7, %v5060_v56, -inf }
0x51f0   :  { %5062 = vmax.xlane.f32.xlu0 %v5061_v33 }
0x527d   :  { %v5063_v44 = vpop.xlane.xlu0 %5062 }
0x527e   :  { %v5064_v15 = vsub.f32 %v5060_v56, %v5063_v44 }
0x5280   :  { %v5065_v7 = vmul.f32 1.442695, %v5064_v15  ;;  %v5278_v15 = vld [vmem:[%s12234_s10] sm:$0xff] }
0x5282   :  { %10024 = vpow2.f32 %v5065_v7  ;;  %v5279_v7 = vld [vmem:[%s12234_s10 + $0x8] sm:$0xff] }
0x528c   :  { %v10025_v10 = vpop.eup %10024 }
0x528d   :  { %v5067_v4 = vsel %vm535_vm7, %v10025_v10, 0.0 }
0x528e   :  { %5068 = vadd.xlane.f32.xlu1 %v5067_v4  ;;  %v5280_v4 = vld [vmem:[%s12234_s10 + $0x10] sm:$0xff] }
0x531b   :  { %v5069_v24 = vpop.xlane.xlu1 %5068 }
0x531c   :  { %10026 = vrcp.f32 %v5069_v24  ;;  %v5281_v24 = vld [vmem:[%s12234_s10 + $0x18] sm:$0xff] }
0x531d   :  { %v11620_v49 = vpack.c.bf16 %v5281_v24, %v5280_v4 }
0x5326   :  { %v10027_v39 = vpop.eup %10026 }
0x5327   :  { %v5071_v54 = vmul.f32 %v10027_v39, %v10025_v10  ;;  %v11610_v10 = vpack.c.bf16 %v5279_v7, %v5278_v15 }
0x5329   :  { %9111 = vmatmul.mubr.msk.f32.vlgmr.msra.gmra.mrb[56].mxu1 %vm547_vm8, %v5071_v54  ;;  %9748 = vmatpush3.bf16.msra.mxu0 %v11610_v10 }
0x532a   :  { %9742 = vmatpush3.bf16.msra.mxu1 %v11559_v57  ;;  %9121 = vmatprep.mubr.msk.f32.mxu1 %vm10121_vm0, %v10122_v6 }
0x532b   :  { %9743 = vmatprep.subr.bf16.mxu1 %v10120_v3  ;;  %9749 = vmatprep.subr.bf16.mxu0 %v10120_v3 }
0x532d   :  { %9751 = vmatpush3.bf16.msra.mxu0 %v11620_v49 }
0x532e   :  { %9745 = vmatpush3.bf16.msra.mxu1 %v11572_v30  ;;  %9764 = vmatprep.subr.bf16.mxu0 %v10120_v3 }
0x532f   :  { %9752 = vmatprep.subr.bf16.mxu1 %v10120_v3 }
0x53fc   :  { %v5141_v19 = vpop.f32.mrb[56].mxu1 }
0x53fd   :  { %v5146_v63 = vrot.slane %v5141_v19, 7  ;;  %v9112_v42 = vpop.f32.mrb[57].mxu1 }
0x53ff   :  { %v5148_v12 = vsel %vm791_vm9, %v4975_v14, %v5146_v63  ;;  %v11632_v63 = vld [vmem:[%s12227_s3 + $0x5] ss:$0 sm:$0xff] }
0x5400   :  { %9122 = vmatmul.mubr.msk.f32.vlgmr.msra.gmra.mrb[58].mxu1 %vm71_vm1, %v5148_v12 }
0x5401   :  { %9151 = vmatprep.mubr.msk.f32.mxu1 %vm10121_vm0, %v10122_v6 }
0x54d3   :  { %v5222_v43 = vpop.f32.mrb[58].mxu1 }
0x54d4   :  { %v5223_v27 = vadd.f32 %v11583_v34, %v5222_v43  ;;  %v9123_v45 = vpop.f32.mrb[59].mxu1  ;;  %v5371_v43 = vld [vmem:[%s12236_s12] sm:$0xff] }
0x54d6   :  { %v5226_v53 = vadd.f32 %v5223_v27, %v11511_v13  ;;  %v5372_v27 = vld [vmem:[%s12236_s12 + $0x8] sm:$0xff] }
0x54d7   :  { %v11645_v45 = vpack.c.bf16 %v5372_v27, %v5371_v43 }
0x54d8   :  { %v5229_v22 = vsel %vm336_vm3, %v5226_v53, 0.0 }
0x54d9   :  { %5230 = vadd.xlane.f32.xlu0 %v5229_v22  ;;  %9754 = vmatpush3.bf16.msra.mxu1 %v11645_v45  ;;  %v5374_v22 = vld [vmem:[%s12236_s12 + $0x18] sm:$0xff] }
0x54da   :  { %9755 = vmatprep.subr.bf16.mxu1 %v10120_v3 }
0x5566   :  { %v5231_v55 = vpop.xlane.xlu0 %5230 }
0x5567   :  { %v5232_v28 = vmul.f32 0.03125, %v5231_v55 }
0x5569   :  { %v5233_v8 = vsub.f32 %v5226_v53, %v5232_v28  ;;  %v5373_v53 = vld [vmem:[%s12236_s12 + $0x10] sm:$0xff]  ;;  %v5375_v28 = vld [vmem:[%s12236_s12 + $0x20] sm:$0xff] }
0x556a   :  { %v11655_v55 = vpack.c.bf16 %v5374_v22, %v5373_v53  ;;  %v11735_v22 = vld [vmem:[%s12227_s3 + $0x6] ss:$0 sm:$0xff] }
0x556b   :  { %v5234_v32 = vmul.f32 %v5233_v8, %v5233_v8 }
0x556c   :  { %9757 = vmatpush3.bf16.msra.mxu1 %v11655_v55 }
0x556d   :  { %v5235_v1 = vsel %vm336_vm3, %v5234_v32, 0.0  ;;  %9758 = vmatprep.subr.bf16.mxu1 %v10120_v3 }
0x556e   :  { %5236 = vadd.xlane.f32.xlu0 %v5235_v1  ;;  %v5377_v1 = vld [vmem:[%s12236_s12 + $0x30] sm:$0xff] }
0x55fb   :  { %v5237_v61 = vpop.xlane.xlu0 %5236 }
0x55fc   :  { %v5238_v21 = vmul.f32 0.03125, %v5237_v61  ;;  %v5378_v61 = vld [vmem:[%s12236_s12 + $0x38] sm:$0xff] }
0x55fe   :  { %v5239_v59 = vadd.f32 1e-12, %v5238_v21  ;;  %v11675_v21 = vpack.c.bf16 %v5378_v61, %v5377_v1 }
0x5600   :  { %10028 = vrsqrt.f32 %v5239_v59  ;;  %v11682_v59 = vld [vmem:[%s12235_s11] ss:$0 sm:$0xff] }
0x560a   :  { %v10029_v51 = vpop.eup %10028 }
0x560b   :  { %v5241_v13 = vmul.f32 %v10029_v51, %v5233_v8  ;;  %v5376_v8 = vld [vmem:[%s12236_s12 + $0x28] sm:$0xff] }
0x560c   :  { %v11665_v32 = vpack.c.bf16 %v5376_v8, %v5375_v28  ;;  %v11740_v8 = vld [vmem:[%s12227_s3 + $0x7] ss:$0 sm:$0xff] }
0x560d   :  { %v5246_v17 = vmul.f32 %v11592_v48, %v5241_v13 }
0x560e   :  { %9760 = vmatpush3.bf16.msra.mxu1 %v11665_v32 }
0x560f   :  { %v5251_v14 = vadd.f32 %v11597_v52, %v5246_v17  ;;  %9761 = vmatprep.subr.bf16.mxu1 %v10120_v3 }
0x5611   :  { %v5252_v20 = vadd.f32 %v5251_v14, %v10500_v47 }
0x5612   :  { %9763 = vmatpush3.bf16.msra.mxu1 %v11675_v21 }
0x5613   :  { %v5255_v25 = vsel %vm336_vm3, %v5252_v20, 0.0  ;;  %9776 = vmatprep.subr.bf16.mxu1 %v10120_v3 }
0x5614   :  { %5256 = vadd.xlane.f32.xlu0 %v5255_v25 }
0x56a1   :  { %v5257_v60 = vpop.xlane.xlu0 %5256 }
0x56a2   :  { %v5258_v11 = vmul.f32 0.03125, %v5257_v60 }
0x56a4   :  { %v5259_v56 = vsub.f32 %v5252_v20, %v5258_v11 }
0x56a6   :  { %v5260_v33 = vmul.f32 %v5259_v56, %v5259_v56 }
0x56a8   :  { %v5261_v44 = vsel %vm336_vm3, %v5260_v33, 0.0 }
0x56a9   :  { %5262 = vadd.xlane.f32.xlu1 %v5261_v44 }
0x5736   :  { %v5263_v29 = vpop.xlane.xlu1 %5262 }
0x5737   :  { %v5264_v39 = vmul.f32 0.03125, %v5263_v29  ;;  %v5478_v29 = vld [vmem:[%s12237_s13] sm:$0xff] }
0x5739   :  { %v5265_v54 = vadd.f32 1e-12, %v5264_v39  ;;  %v5479_v39 = vld [vmem:[%s12237_s13 + $0x8] sm:$0xff] }
0x573b   :  { %10030 = vrsqrt.f32 %v5265_v54  ;;  %v11718_v54 = vpack.c.bf16 %v5479_v39, %v5478_v29  ;;  %v5591_v29 = vld [vmem:[%s12238_s14 + $0x10] sm:$0xff]  ;;  %v5592_v39 = vld [vmem:[%s12238_s14 + $0x18] sm:$0xff] }
0x5745   :  { %v10031_v36 = vpop.eup %10030 }
0x5746   :  { %v5267_v19 = vmul.f32 %v10031_v36, %v5259_v56  ;;  %v5480_v36 = vld [vmem:[%s12237_s13 + $0x10] sm:$0xff] }
0x5748   :  { %v5272_v42 = vmul.f32 %v11627_v9, %v5267_v19  ;;  %v5481_v19 = vld [vmem:[%s12237_s13 + $0x18] sm:$0xff] }
0x574a   :  { %v5277_v12 = vadd.f32 %v11632_v63, %v5272_v42  ;;  %v11728_v42 = vpack.c.bf16 %v5481_v19, %v5480_v36  ;;  %v11771_v36 = vpack.c.bf16 %v5592_v39, %v5591_v29 }
0x574c   :  { %9133 = vmatmul.mubr.msk.f32.vlgmr.msra.gmra.mrb[46].mxu0 %vm71_vm1, %v5277_v12 }
0x574d   :  { %9162 = vmatprep.mubr.msk.f32.mxu0 %vm10121_vm0, %v10122_v6  ;;  %9766 = vmatpush3.bf16.msra.mxu0 %v11718_v54 }
0x574e   :  { %9767 = vmatprep.subr.bf16.mxu0 %v10120_v3 }
0x5751   :  { %9769 = vmatpush3.bf16.msra.mxu0 %v11728_v42 }
0x5752   :  { %9770 = vmatprep.subr.bf16.mxu0 %v10120_v3 }
0x581f   :  { %v5358_v51 = vpop.f32.mrb[46].mxu0 }
0x5820   :  { %v5359_v13 = vadd.f32 %v11682_v59, %v5358_v51  ;;  %v9134_v17 = vpop.f32.mrb[47].mxu0 }
0x5822   :  { %v5362_v14 = vmul.f32 %v5359_v13, %v5359_v13 }
0x5824   :  { %v5363_v20 = vmul.f32 %v5362_v14, %v5359_v13 }
0x5826   :  { %v5364_v25 = vmul.f32 0.044715, %v5363_v20 }
0x5828   :  { %v5365_v60 = vadd.f32 %v5364_v25, %v5359_v13 }
0x582a   :  { %v5366_v11 = vmul.f32 0.7978846, %v5365_v60 }
0x582c   :  { %10032 = vtanh.f32 %v5366_v11 }
0x5836   :  { %v10033_v56 = vpop.eup %10032 }
0x5837   :  { %v5368_v33 = vadd.f32 1.0, %v10033_v56 }
0x5839   :  { %v5369_v44 = vmul.f32 0.5, %v5368_v33 }
0x583b   :  { %v5370_v15 = vmul.f32 %v5369_v44, %v5359_v13  ;;  %v11750_v13 = vld [vmem:[%s12228_s4 + $0x4] ss:$0 sm:$0xff] }
0x583d   :  { %9152 = vmatmul.mubr.msk.f32.vlgmr.msra.gmra.mrb[60].mxu1 %vm1031_vm10, %v5370_v15 }
0x583e   :  { %9778 = vmatpush3.bf16.msra.mxu1 %v11391_v2  ;;  %9208 = vmatprep.mubr.msk.f32.mxu1 %vm10121_vm0, %v10122_v6 }
0x583f   :  { %9779 = vmatprep.subr.bf16.mxu1 %v10120_v3 }
0x5842   :  { %9781 = vmatpush3.bf16.msra.mxu1 %v11397_v46  ;;  %v11707_v46 = vld [vmem:[%s12228_s4 + $0x3] ss:$0 sm:$0xff] }
0x5843   :  { %9782 = vmatprep.subr.bf16.mxu1 %v10120_v3 }
0x5846   :  { %9784 = vmatpush3.bf16.msra.mxu1 %v11407_v58 }
0x5847   :  { %9785 = vmatprep.subr.bf16.mxu1 %v10120_v3 }
0x584a   :  { %9787 = vmatpush3.bf16.msra.mxu1 %v11417_v16 }
0x584b   :  { %9788 = vmatprep.subr.bf16.mxu1 %v10120_v3 }
0x584e   :  { %9790 = vmatpush3.bf16.msra.mxu1 %v11427_v18 }
0x584f   :  { %9791 = vmatprep.subr.bf16.mxu1 %v10120_v3 }
0x5852   :  { %9793 = vmatpush3.bf16.msra.mxu1 %v11437_v5 }
0x5853   :  { %9794 = vmatprep.subr.bf16.mxu1 %v10120_v3 }
0x5856   :  { %9796 = vmatpush3.bf16.msra.mxu1 %v11447_v31 }
0x5857   :  { %9797 = vmatprep.subr.bf16.mxu1 %v10120_v3 }
0x585a   :  { %9799 = vmatpush3.bf16.msra.mxu1 %v11460_v35 }
0x585b   :  { %9812 = vmatprep.subr.bf16.mxu1 %v10120_v3 }
0x5910   :  { %v5448_v2 = vpop.f32.mrb[60].mxu1 }
0x5911   :  { %v5449_v58 = vadd.f32 %v11707_v46, %v5448_v2  ;;  %v9153_v16 = vpop.f32.mrb[61].mxu1 }
0x5913   :  { %v5452_v18 = vadd.f32 %v5449_v58, %v5277_v12 }
0x5915   :  { %v5455_v5 = vsel %vm336_vm3, %v5452_v18, 0.0 }
0x5916   :  { %5456 = vadd.xlane.f32.xlu0 %v5455_v5 }
0x59a3   :  { %v5457_v31 = vpop.xlane.xlu0 %5456 }
0x59a4   :  { %v5458_v7 = vmul.f32 0.03125, %v5457_v31 }
0x59a6   :  { %v5459_v4 = vsub.f32 %v5452_v18, %v5458_v7 }
0x59a8   :  { %v5460_v24 = vmul.f32 %v5459_v4, %v5459_v4 }
0x59aa   :  { %v5461_v35 = vsel %vm336_vm3, %v5460_v24, 0.0  ;;  %v5590_v24 = vld [vmem:[%s12238_s14 + $0x8] sm:$0xff] }
0x59ab   :  { %5462 = vadd.xlane.f32.xlu1 %v5461_v35 }
0x5a38   :  { %v5463_v12 = vpop.xlane.xlu1 %5462 }
0x5a39   :  { %v5464_v43 = vmul.f32 0.03125, %v5463_v12 }
0x5a3b   :  { %v5465_v27 = vadd.f32 1e-12, %v5464_v43 }
0x5a3d   :  { %10034 = vrsqrt.f32 %v5465_v27 }
0x5a47   :  { %v10035_v53 = vpop.eup %10034 }
0x5a48   :  { %v5467_v28 = vmul.f32 %v10035_v53, %v5459_v4  ;;  %v5589_v4 = vld [vmem:[%s12238_s14] sm:$0xff]  ;;  %v11778_v53 = vld [vmem:[%s12227_s3 + $0x8] ss:$0 sm:$0xff] }
0x5a49   :  { %v11761_v35 = vpack.c.bf16 %v5590_v24, %v5589_v4 }
0x5a4a   :  { %v5472_v1 = vmul.f32 %v11735_v22, %v5467_v28 }
0x5a4c   :  { %v5477_v61 = vadd.f32 %v11740_v8, %v5472_v1  ;;  %v11783_v1 = vld [vmem:[%s12227_s3 + $0x9] ss:$0 sm:$0xff] }
0x5a4e   :  { %9163 = vmatmul.mubr.msk.f32.vlgmr.msra.gmra.mrb[48].mxu0 %vm71_vm1, %v5477_v61 }
0x5a4f   :  { %9173 = vmatprep.mubr.msk.f32.mxu0 %vm10121_vm0, %v10122_v6  ;;  %9772 = vmatpush3.bf16.msra.mxu0 %v11761_v35 }
0x5a50   :  { %9773 = vmatprep.subr.bf16.mxu0 %v10120_v3 }
0x5a53   :  { %9775 = vmatpush3.bf16.msra.mxu0 %v11771_v36 }
0x5a54   :  { %9800 = vmatprep.subr.bf16.mxu0 %v10120_v3 }
0x5b21   :  { %v5551_v51 = vpop.f32.mrb[48].mxu0 }
0x5b22   :  { %v5552_v17 = vadd.f32 %v11750_v13, %v5551_v51  ;;  %v9164_v14 = vpop.f32.mrb[49].mxu0 }
0x5b24   :  { %v5555_v20 = vmul.f32 %v5552_v17, %v5552_v17 }
0x5b26   :  { %v5556_v25 = vmul.f32 %v5555_v20, %v5552_v17 }
0x5b28   :  { %v5557_v60 = vmul.f32 0.044715, %v5556_v25 }
0x5b2a   :  { %v5558_v11 = vadd.f32 %v5557_v60, %v5552_v17 }
0x5b2c   :  { %v5559_v56 = vmul.f32 0.7978846, %v5558_v11 }
0x5b2e   :  { %10036 = vtanh.f32 %v5559_v56 }
0x5b38   :  { %v10037_v33 = vpop.eup %10036 }
0x5b39   :  { %v5561_v44 = vadd.f32 1.0, %v10037_v33 }
0x5b3b   :  { %v5562_v15 = vmul.f32 0.5, %v5561_v44 }
0x5b3d   :  { %v5563_v2 = vmul.f32 %v5562_v15, %v5552_v17  ;;  %v11797_v17 = vld [vmem:[%s12239_s15] ss:$0 sm:$0xff] }
0x5b3f   :  { %v5566_v58 = vsel %vm336_vm3, %v5563_v2, 0.0 }
0x5b40   :  { %5567 = vadd.xlane.f32.xlu0 %v5566_v58 }
0x5bcd   :  { %v5568_v16 = vpop.xlane.xlu0 %5567 }
0x5bce   :  { %v5569_v18 = vmul.f32 0.03125, %v5568_v16 }
0x5bd0   :  { %v5570_v5 = vsub.f32 %v5563_v2, %v5569_v18  ;;  %v8029_v2 = vld [vmem:[%s12226_s2 + $0x5] ss:$0 sm:$0xff] }
0x5bd2   :  { %v5571_v31 = vmul.f32 %v5570_v5, %v5570_v5 }
0x5bd4   :  { %v5572_v7 = vsel %vm336_vm3, %v5571_v31, 0.0 }
0x5bd5   :  { %5573 = vadd.xlane.f32.xlu1 %v5572_v7 }
0x5c62   :  { %v5574_v19 = vpop.xlane.xlu1 %5573 }
0x5c63   :  { %v5575_v12 = vmul.f32 0.03125, %v5574_v19 }
0x5c65   :  { %v5576_v43 = vadd.f32 1e-12, %v5575_v12 }
0x5c67   :  { %10038 = vrsqrt.f32 %v5576_v43 }
0x5c71   :  { %v10039_v27 = vpop.eup %10038 }
0x5c72   :  { %v5578_v28 = vmul.f32 %v10039_v27, %v5570_v5 }
0x5c74   :  { %v5583_v61 = vmul.f32 %v11778_v53, %v5578_v28 }
0x5c76   :  { %v5588_v51 = vadd.f32 %v11783_v1, %v5583_v61 }
0x5c78   :  { %9174 = vmatmul.mubr.msk.f32.vlgmr.msra.gmra.mrb[50].mxu0 %vm71_vm1, %v5588_v51 }
0x5c79   :  { %9802 = vmatpush3.bf16.msra.mxu0 %v11485_v26  ;;  %9219 = vmatprep.mubr.msk.f32.mxu0 %vm10121_vm0, %v10122_v6 }
0x5c7a   :  { %9803 = vmatprep.subr.bf16.mxu0 %v10120_v3 }
0x5c7d   :  { %9805 = vmatpush3.bf16.msra.mxu0 %v11495_v0 }
0x5c7e   :  { %9222 = vmatprep.subr.mxu0 %v10122_v6 }
0x5d4b   :  { %v5669_v14 = vpop.f32.mrb[50].mxu0 }
0x5d4c   :  { %v5670_v20 = vadd.f32 %v11797_v17, %v5669_v14  ;;  %v9175_v25 = vpop.f32.mrb[51].mxu0 }
0x5d4e   :  { %v5673_v26 = vsel %vm1330_vm11, %v5670_v20, -1e+30 }
0x5d4f   :  { %8027 = vst [vmem:[%s12241_s17 + $0xa] sm:$0x3] %v5673_v26  ;;  %v5676_v0 = vsel %vm1334_vm12, %v5673_v26, -inf }
0x5d50   :  { %5677 = vmax.xlane.f32.xlu0 %v5676_v0 }
0x5ddd   :  { %v5678_v60 = vpop.xlane.xlu0 %5677 }
0x5dde   :  { %vm5679_vm15 = vcmp.ge.f32.partialorder %v5673_v26, %v5678_v60 }
0x5ddf   :  { %v5680_v11 = vsel %vm5679_vm15, %v10710_v50, 128.0  ;;  %vm6770_vm15 = vcmask 50224  }
0x5de0   :  { %v5681_v56 = vsel %vm1334_vm12, %v5680_v11, inf }
0x5de1   :  { %5682 = vmin.xlane.f32.xlu1 %v5681_v56 }
0x5e6e   :  { %v5683_v33 = vpop.xlane.xlu1 %5682 }
0x5e6f   :  { %v9916_v44 = vtrunc.f32 %v5683_v33 }
0x5e71   :  { %v9917_v15 = vcvt.f32.s32 %v9916_v44 }
0x5e73   :  { %5686 = vst.msk [vmem:[#allocation4] sm:$0x3] %vm5685_vm2, %v9917_v15  ;;  %vm5687_vm6 = vcmp.eq.s32.totalorder %v10340_v37, %v9917_v15 }
0x5e74   :  { %9209 = vmatmul.mubr.msk.f32.vlgmr.msra.gmra.mrb[62].mxu1 %vm5687_vm6, %v10123_v38  ;;  %vm7063_vm6 = vcmp.lt.s32.totalorder %v10340_v37, 7 }
0x5e75   :  { %9814 = vmatpush3.bf16.msra.mxu1 %v11610_v10  ;;  %9261 = vmatprep.mubr.msk.f32.mxu1 %vm10121_vm0, %v10122_v6 }
0x5e76   :  { %9815 = vmatprep.subr.bf16.mxu1 %v10120_v3 }
0x5e79   :  { %9817 = vmatpush3.bf16.msra.mxu1 %v11620_v49 }
0x5e7a   :  { %9830 = vmatprep.subr.bf16.mxu1 %v10120_v3 }
0x5f47   :  { %v5777_v58 = vpop.f32.mrb[62].mxu1 }
0x5f48   :  { %v5778_v16 = vadd.f32 %v8029_v2, %v5777_v58  ;;  %v9210_v18 = vpop.f32.mrb[63].mxu1 }
0x5f4a   :  { %v5781_v5 = vadd.f32 %v11474_v23, %v5778_v16 }
0x5f4c   :  { %v5784_v10 = vsel %vm336_vm3, %v5781_v5, 0.0 }
0x5f4d   :  { %5785 = vadd.xlane.f32.xlu0 %v5784_v10 }
0x5fda   :  { %v5786_v31 = vpop.xlane.xlu0 %5785 }
0x5fdb   :  { %v5787_v7 = vmul.f32 0.03125, %v5786_v31 }
0x5fdd   :  { %v5788_v4 = vsub.f32 %v5781_v5, %v5787_v7 }
0x5fdf   :  { %v5789_v24 = vmul.f32 %v5788_v4, %v5788_v4 }
0x5fe1   :  { %v5790_v49 = vsel %vm336_vm3, %v5789_v24, 0.0 }
0x5fe2   :  { %5791 = vadd.xlane.f32.xlu1 %v5790_v49 }
0x606f   :  { %v5792_v29 = vpop.xlane.xlu1 %5791 }
0x6070   :  { %v5793_v39 = vmul.f32 0.03125, %v5792_v29 }
0x6072   :  { %v5794_v19 = vadd.f32 1e-12, %v5793_v39 }
0x6074   :  { %10040 = vrsqrt.f32 %v5794_v19 }
0x607e   :  { %v10041_v12 = vpop.eup %10040 }
0x607f   :  { %v5796_v43 = vmul.f32 %v10041_v12, %v5788_v4 }
0x6081   :  { %v5801_v27 = vmul.f32 %v11502_v40, %v5796_v43 }
0x6083   :  { %v11824_v23 = vadd.f32 %v11507_v62, %v5801_v27 }
0x6085   :  { %9220 = vmatmul.mubr.msk.f32.vlgmr.msra.gmra.mrb[52].mxu0 %vm71_vm1, %v11824_v23 }
0x6086   :  { %9224 = vmatprep.mubr.msk.f32.mxu0 %vm10121_vm0, %v10122_v6 }
0x6158   :  { %v5887_v28 = vpop.f32.mrb[52].mxu0 }
0x6159   :  { %v5888_v61 = vadd.f32 %v11520_v41, %v5887_v28  ;;  %v9221_v51 = vpop.f32.mrb[53].mxu0 }
0x615b   :  { %5892 = vrot.lane.b32.xlu0 %v5888_v61, %s10124_s9  ;;  %v6068_v5 = vrot.slane %v5888_v61, 1 }
0x61cd   :  { %v5893_v14 = vpop.permute.xlu0 %5892 }
0x61ce   :  { %5895 = vst.msk [vmem:[#allocation2 + $0x5] sm:$0x1] %vm449_vm4, %v5893_v14 }
0x61cf   :  { %6064 = vst.msk [vmem:[#allocation2 + $0xc] sm:$0x2] %vm621_vm5, %v5893_v14 }
0x61d5   :  { %v5900_v40 = vld [vmem:[#allocation2] sm:$0xff] }
0x61d6   :  { %9223 = vmatpush3.xpose.msk.msra.mxu0 %vm71_vm1, %v5900_v40  ;;  %v6066_v18 = vld [vmem:[#allocation2 + $0x8] sm:$0xff] }
0x61d7   :  { %9227 = vmatprep.subr.mxu0 %v10122_v6 }
0x61d9   :  { %9225 = vmatmul.mubr.msk.f32.vlgmr.msra.gmra.mrb[54].mxu0 %vm71_vm1, %v5888_v61 }
0x61da   :  { %9229 = vmatprep.mubr.msk.f32.mxu0 %vm10121_vm0, %v10122_v6 }
0x62ac   :  { %v5973_v62 = vpop.f32.mrb[54].mxu0 }
0x62ad   :  { %v5977_v41 = vmul.f32 0.17677669, %v5973_v62  ;;  %v9226_v20 = vpop.f32.mrb[55].mxu0 }
0x62af   :  { %v5979_v25 = vsel %vm5978_vm13, %v5977_v41, -1e+30 }
0x62b0   :  { %v5980_v26 = vsel %vm535_vm7, %v5979_v25, -inf }
0x62b1   :  { %5981 = vmax.xlane.f32.xlu1 %v5980_v26 }
0x633e   :  { %v5982_v0 = vpop.xlane.xlu1 %5981 }
0x633f   :  { %v5983_v60 = vsub.f32 %v5979_v25, %v5982_v0 }
0x6341   :  { %v5984_v11 = vmul.f32 1.442695, %v5983_v60 }
0x6343   :  { %10042 = vpow2.f32 %v5984_v11 }
0x634d   :  { %v10043_v56 = vpop.eup %10042 }
0x634e   :  { %v5986_v33 = vsel %vm535_vm7, %v10043_v56, 0.0 }
0x634f   :  { %5987 = vadd.xlane.f32.xlu1 %v5986_v33 }
0x6360   :  { %5896 = vrot.lane.b32.xlu1 %v5888_v61, %s10125_s21 }
0x63dc   :  { %v5988_v44 = vpop.xlane.xlu1 %5987 }
0x63dd   :  { %10044 = vrcp.f32 %v5988_v44 }
0x63e0   :  { %v5897_v15 = vpop.permute.xlu1 %5896 }
0x63e1   :  { %5899 = vst.msk [vmem:[#allocation3 + $0x5] sm:$0x1] %vm449_vm4, %v5897_v15 }
0x63e2   :  { %6065 = vst.msk [vmem:[#allocation3 + $0xc] sm:$0x2] %vm621_vm5, %v5897_v15 }
0x63e7   :  { %v10045_v2 = vpop.eup %10044 }
0x63e8   :  { %v5990_v58 = vmul.f32 %v10045_v2, %v10043_v56  ;;  %v5901_v16 = vld [vmem:[#allocation3] sm:$0xff] }
0x63e9   :  { %9228 = vmatpush3.msra.mxu0 %v5901_v16  ;;  %v6067_v10 = vld [vmem:[#allocation3 + $0x8] sm:$0xff] }
0x63ea   :  { %9230 = vmatmul.mubr.msk.f32.vlgmr.msra.gmra.mrb[56].mxu0 %vm547_vm8, %v5990_v58  ;;  %9232 = vmatprep.subr.mxu0 %v10122_v6 }
0x63eb   :  { %9234 = vmatprep.mubr.msk.f32.mxu0 %vm10121_vm0, %v10122_v6 }
0x63f0   :  { %9233 = vmatpush3.xpose.msk.msra.mxu0 %vm71_vm1, %v6066_v18 }
0x63f1   :  { %9237 = vmatprep.subr.mxu0 %v10122_v6 }
0x63f3   :  { %9235 = vmatmul.mubr.msk.f32.vlgmr.msra.gmra.mrb[58].mxu0 %vm71_vm1, %v6068_v5 }
0x63f4   :  { %9238 = vmatpush3.msra.mxu0 %v6067_v10  ;;  %9239 = vmatprep.mubr.msk.f32.mxu0 %vm10121_vm0, %v10122_v6 }
0x63f5   :  { %9806 = vmatprep.subr.bf16.mxu0 %v10120_v3 }
0x64bd   :  { %v6060_v31 = vpop.f32.mrb[56].mxu0 }
0x64be   :  { %v9231_v7 = vpop.f32.mrb[57].mxu0 }
0x64c6   :  { %v6140_v4 = vpop.f32.mrb[58].mxu0 }
0x64c7   :  { %v6144_v24 = vmul.f32 0.17677669, %v6140_v4  ;;  %v9236_v49 = vpop.f32.mrb[59].mxu0 }
0x64c9   :  { %v6145_v29 = vsel %vm5978_vm13, %v6144_v24, -1e+30 }
0x64ca   :  { %v6146_v39 = vsel %vm535_vm7, %v6145_v29, -inf }
0x64cb   :  { %6147 = vmax.xlane.f32.xlu0 %v6146_v39 }
0x6558   :  { %v6148_v19 = vpop.xlane.xlu0 %6147 }
0x6559   :  { %v6149_v12 = vsub.f32 %v6145_v29, %v6148_v19 }
0x655b   :  { %v6150_v43 = vmul.f32 1.442695, %v6149_v12 }
0x655d   :  { %10046 = vpow2.f32 %v6150_v43 }
0x6567   :  { %v10047_v27 = vpop.eup %10046 }
0x6568   :  { %v6152_v28 = vsel %vm535_vm7, %v10047_v27, 0.0 }
0x6569   :  { %6153 = vadd.xlane.f32.xlu1 %v6152_v28 }
0x65f6   :  { %v6154_v61 = vpop.xlane.xlu1 %6153 }
0x65f7   :  { %10048 = vrcp.f32 %v6154_v61 }
0x6601   :  { %v10049_v51 = vpop.eup %10048 }
0x6602   :  { %v6156_v14 = vmul.f32 %v10049_v51, %v10047_v27 }
0x6604   :  { %9240 = vmatmul.mubr.msk.f32.vlgmr.msra.gmra.mrb[60].mxu0 %vm547_vm8, %v6156_v14 }
0x6605   :  { %9808 = vmatpush3.bf16.msra.mxu0 %v11559_v57  ;;  %9250 = vmatprep.mubr.msk.f32.mxu0 %vm10121_vm0, %v10122_v6 }
0x6606   :  { %9809 = vmatprep.subr.bf16.mxu0 %v10120_v3 }
0x6609   :  { %9811 = vmatpush3.bf16.msra.mxu0 %v11572_v30 }
0x660a   :  { %9818 = vmatprep.subr.bf16.mxu0 %v10120_v3 }
0x66d7   :  { %v6226_v40 = vpop.f32.mrb[60].mxu0 }
0x66d8   :  { %v6231_v62 = vrot.slane %v6226_v40, 7  ;;  %v9241_v41 = vpop.f32.mrb[61].mxu0 }
0x66da   :  { %v6233_v20 = vsel %vm791_vm9, %v6060_v31, %v6231_v62 }
0x66db   :  { %9251 = vmatmul.mubr.msk.f32.vlgmr.msra.gmra.mrb[62].mxu0 %vm71_vm1, %v6233_v20 }
0x66dc   :  { %9820 = vmatpush3.bf16.msra.mxu0 %v11645_v45  ;;  %9280 = vmatprep.mubr.msk.f32.mxu0 %vm10121_vm0, %v10122_v6 }
0x66dd   :  { %9821 = vmatprep.subr.bf16.mxu0 %v10120_v3 }
0x66e0   :  { %9823 = vmatpush3.bf16.msra.mxu0 %v11655_v55 }
0x66e1   :  { %9824 = vmatprep.subr.bf16.mxu0 %v10120_v3 }
0x66e4   :  { %9826 = vmatpush3.bf16.msra.mxu0 %v11665_v32 }
0x66e5   :  { %9827 = vmatprep.subr.bf16.mxu0 %v10120_v3 }
0x66e8   :  { %9829 = vmatpush3.bf16.msra.mxu0 %v11675_v21 }
0x66e9   :  { %9842 = vmatprep.subr.bf16.mxu0 %v10120_v3 }
0x67ae   :  { %v6307_v57 = vpop.f32.mrb[62].mxu0 }
0x67af   :  { %v6308_v30 = vadd.f32 %v11583_v34, %v6307_v57  ;;  %v9252_v45 = vpop.f32.mrb[63].mxu0 }
0x67b1   :  { %v6311_v25 = vadd.f32 %v6308_v30, %v11824_v23 }
0x67b3   :  { %v6314_v26 = vsel %vm336_vm3, %v6311_v25, 0.0 }
0x67b4   :  { %6315 = vadd.xlane.f32.xlu0 %v6314_v26 }
0x6841   :  { %v6316_v55 = vpop.xlane.xlu0 %6315 }
0x6842   :  { %v6317_v0 = vmul.f32 0.03125, %v6316_v55 }
0x6844   :  { %v6318_v60 = vsub.f32 %v6311_v25, %v6317_v0 }
0x6846   :  { %v6319_v11 = vmul.f32 %v6318_v60, %v6318_v60 }
0x6848   :  { %v6320_v32 = vsel %vm336_vm3, %v6319_v11, 0.0 }
0x6849   :  { %6321 = vadd.xlane.f32.xlu0 %v6320_v32 }
0x68d6   :  { %v6322_v56 = vpop.xlane.xlu0 %6321 }
0x68d7   :  { %v6323_v21 = vmul.f32 0.03125, %v6322_v56 }
0x68d9   :  { %v6324_v33 = vadd.f32 1e-12, %v6323_v21 }
0x68db   :  { %10050 = vrsqrt.f32 %v6324_v33 }
0x68e5   :  { %v10051_v44 = vpop.eup %10050 }
0x68e6   :  { %v6326_v15 = vmul.f32 %v10051_v44, %v6318_v60 }
0x68e8   :  { %v6331_v34 = vmul.f32 %v11592_v48, %v6326_v15 }
0x68ea   :  { %v6336_v23 = vadd.f32 %v11597_v52, %v6331_v34 }
0x68ec   :  { %v6337_v2 = vadd.f32 %v6336_v23, %v10500_v47 }
0x68ee   :  { %v6340_v58 = vsel %vm336_vm3, %v6337_v2, 0.0 }
0x68ef   :  { %6341 = vadd.xlane.f32.xlu0 %v6340_v58 }
0x697c   :  { %v6342_v16 = vpop.xlane.xlu0 %6341 }
0x697d   :  { %v6343_v18 = vmul.f32 0.03125, %v6342_v16 }
0x697f   :  { %v6344_v5 = vsub.f32 %v6337_v2, %v6343_v18 }
0x6981   :  { %v6345_v10 = vmul.f32 %v6344_v5, %v6344_v5 }
0x6983   :  { %v6346_v31 = vsel %vm336_vm3, %v6345_v10, 0.0 }
0x6984   :  { %6347 = vadd.xlane.f32.xlu1 %v6346_v31 }
0x6a11   :  { %v6348_v7 = vpop.xlane.xlu1 %6347 }
0x6a12   :  { %v6349_v4 = vmul.f32 0.03125, %v6348_v7 }
0x6a14   :  { %v6350_v24 = vadd.f32 1e-12, %v6349_v4 }
0x6a16   :  { %10052 = vrsqrt.f32 %v6350_v24 }
0x6a20   :  { %v10053_v49 = vpop.eup %10052 }
0x6a21   :  { %v6352_v48 = vmul.f32 %v10053_v49, %v6344_v5 }
0x6a23   :  { %v6357_v52 = vmul.f32 %v11627_v9, %v6352_v48 }
0x6a25   :  { %v6362_v29 = vadd.f32 %v11632_v63, %v6357_v52 }
0x6a27   :  { %9262 = vmatmul.mubr.msk.f32.vlgmr.msra.gmra.mrb[64].mxu1 %vm71_vm1, %v6362_v29 }
0x6a28   :  { %9832 = vmatpush3.bf16.msra.mxu1 %v11718_v54  ;;  %9291 = vmatprep.mubr.msk.f32.mxu1 %vm10121_vm0, %v10122_v6 }
0x6a29   :  { %9833 = vmatprep.subr.bf16.mxu1 %v10120_v3 }
0x6a2c   :  { %9835 = vmatpush3.bf16.msra.mxu1 %v11728_v42 }
0x6a2d   :  { %9836 = vmatprep.subr.bf16.mxu1 %v10120_v3 }
0x6afa   :  { %v6443_v39 = vpop.f32.mrb[64].mxu1 }
0x6afb   :  { %v6444_v19 = vadd.f32 %v11682_v59, %v6443_v39  ;;  %v9263_v12 = vpop.f32.mrb[65].mxu1 }
0x6afd   :  { %v6447_v9 = vmul.f32 %v6444_v19, %v6444_v19 }
0x6aff   :  { %v6448_v43 = vmul.f32 %v6447_v9, %v6444_v19  ;;  %v6776_v9 = vld [vmem:[%s12245_s20 + $0x8] sm:$0xff] }
0x6b01   :  { %v6449_v63 = vmul.f32 0.044715, %v6448_v43 }
0x6b03   :  { %v6450_v27 = vadd.f32 %v6449_v63, %v6444_v19  ;;  %v6778_v63 = vld [vmem:[%s12245_s20 + $0x18] sm:$0xff] }
0x6b05   :  { %v6451_v28 = vmul.f32 0.7978846, %v6450_v27 }
0x6b07   :  { %10054 = vtanh.f32 %v6451_v28  ;;  %v6779_v28 = vld [vmem:[%s12245_s20 + $0x20] sm:$0xff] }
0x6b11   :  { %v10055_v54 = vpop.eup %10054 }
0x6b12   :  { %v6453_v61 = vadd.f32 1.0, %v10055_v54  ;;  %v6780_v54 = vld [vmem:[%s12245_s20 + $0x28] sm:$0xff] }
0x6b14   :  { %v6454_v51 = vmul.f32 0.5, %v6453_v61  ;;  %v9849_v61 = vpack.c.bf16 %v6780_v54, %v6779_v28 }
0x6b16   :  { %v6455_v14 = vmul.f32 %v6454_v51, %v6444_v19  ;;  %v6781_v51 = vld [vmem:[%s12245_s20 + $0x30] sm:$0xff] }
0x6b18   :  { %9281 = vmatmul.mubr.msk.f32.vlgmr.msra.gmra.mrb[64].mxu0 %vm1031_vm10, %v6455_v14  ;;  %v6782_v14 = vld [vmem:[%s12245_s20 + $0x38] sm:$0xff] }
0x6b19   :  { %9337 = vmatprep.mubr.msk.f32.mxu0 %vm10121_vm0, %v10122_v6 }
0x6beb   :  { %v6533_v42 = vpop.f32.mrb[64].mxu0 }
0x6bec   :  { %v6534_v40 = vadd.f32 %v11707_v46, %v6533_v42  ;;  %v9282_v59 = vpop.f32.mrb[65].mxu0  ;;  %v9852_v42 = vpack.c.bf16 %v6782_v14, %v6781_v51 }
0x6bed   :  { %v6784_v59 = vld [vmem:[%s12245_s20 + $0x48] sm:$0xff] }
0x6bee   :  { %v6537_v62 = vadd.f32 %v6534_v40, %v6362_v29  ;;  %v6783_v40 = vld [vmem:[%s12245_s20 + $0x40] sm:$0xff] }
0x6bf0   :  { %v6540_v41 = vsel %vm336_vm3, %v6537_v62, 0.0 }
0x6bf1   :  { %6541 = vadd.xlane.f32.xlu0 %v6540_v41  ;;  %v6785_v41 = vld [vmem:[%s12245_s20 + $0x50] sm:$0xff] }
0x6c7e   :  { %v6542_v20 = vpop.xlane.xlu0 %6541 }
0x6c7f   :  { %v6543_v57 = vmul.f32 0.03125, %v6542_v20  ;;  %v6786_v20 = vld [vmem:[%s12245_s20 + $0x58] sm:$0xff] }
0x6c81   :  { %v6544_v30 = vsub.f32 %v6537_v62, %v6543_v57  ;;  %v9855_v62 = vpack.c.bf16 %v6784_v59, %v6783_v40  ;;  %v9858_v57 = vpack.c.bf16 %v6786_v20, %v6785_v41 }
0x6c83   :  { %v6545_v45 = vmul.f32 %v6544_v30, %v6544_v30 }
0x6c85   :  { %v6546_v25 = vsel %vm336_vm3, %v6545_v45, 0.0  ;;  %v6788_v45 = vld [vmem:[%s12245_s20 + $0x68] sm:$0xff] }
0x6c86   :  { %6547 = vadd.xlane.f32.xlu1 %v6546_v25 }
0x6d13   :  { %v6548_v26 = vpop.xlane.xlu1 %6547 }
0x6d14   :  { %v6549_v55 = vmul.f32 0.03125, %v6548_v26 }
0x6d16   :  { %v6550_v0 = vadd.f32 1e-12, %v6549_v55 }
0x6d18   :  { %10056 = vrsqrt.f32 %v6550_v0 }
0x6d22   :  { %v10057_v60 = vpop.eup %10056 }
0x6d23   :  { %v6552_v11 = vmul.f32 %v10057_v60, %v6544_v30  ;;  %v6787_v30 = vld [vmem:[%s12245_s20 + $0x60] sm:$0xff]  ;;  %v6789_v60 = vld [vmem:[%s12245_s20 + $0x70] sm:$0xff] }
0x6d24   :  { %v9861_v25 = vpack.c.bf16 %v6788_v45, %v6787_v30 }
0x6d25   :  { %v6557_v46 = vmul.f32 %v11735_v22, %v6552_v11  ;;  %v6790_v11 = vld [vmem:[%s12245_s20 + $0x78] sm:$0xff] }
0x6d27   :  { %v6562_v32 = vadd.f32 %v11740_v8, %v6557_v46  ;;  %v9864_v46 = vpack.c.bf16 %v6790_v11, %v6789_v60 }
0x6d29   :  { %9292 = vmatmul.mubr.msk.f32.vlgmr.msra.gmra.mrb[66].mxu1 %vm71_vm1, %v6562_v32 }
0x6d2a   :  { %9838 = vmatpush3.bf16.msra.mxu1 %v11761_v35  ;;  %9302 = vmatprep.mubr.msk.f32.mxu1 %vm10121_vm0, %v10122_v6 }
0x6d2b   :  { %9839 = vmatprep.subr.bf16.mxu1 %v10120_v3 }
0x6d2e   :  { %9841 = vmatpush3.bf16.msra.mxu1 %v11771_v36 }
0x6d2f   :  { %9866 = vmatprep.subr.bf16.mxu1 %v10120_v3 }
0x6dfc   :  { %v6636_v56 = vpop.f32.mrb[66].mxu1 }
0x6dfd   :  { %v6637_v21 = vadd.f32 %v11750_v13, %v6636_v56  ;;  %v9293_v33 = vpop.f32.mrb[67].mxu1 }
0x6dfe   :  { %v8058_v33 = vld [vmem:[%s12226_s2 + $0x6] ss:$0 sm:$0xff] }
0x6dff   :  { %v6640_v22 = vmul.f32 %v6637_v21, %v6637_v21 }
0x6e01   :  { %v6641_v44 = vmul.f32 %v6640_v22, %v6637_v21 }
0x6e03   :  { %v6642_v8 = vmul.f32 0.044715, %v6641_v44 }
0x6e05   :  { %v6643_v15 = vadd.f32 %v6642_v8, %v6637_v21 }
0x6e07   :  { %v6644_v34 = vmul.f32 0.7978846, %v6643_v15  ;;  %v10092_v15 = vld [vmem:[%s12228_s4 + $0x5] ss:$0 sm:$0xff] }
0x6e09   :  { %10058 = vtanh.f32 %v6644_v34 }
0x6e13   :  { %v10059_v35 = vpop.eup %10058 }
0x6e14   :  { %v6646_v23 = vadd.f32 1.0, %v10059_v35 }
0x6e16   :  { %v6647_v2 = vmul.f32 0.5, %v6646_v23 }
0x6e18   :  { %v6648_v58 = vmul.f32 %v6647_v2, %v6637_v21 }
0x6e1a   :  { %v6651_v16 = vsel %vm336_vm3, %v6648_v58, 0.0 }
0x6e1b   :  { %6652 = vadd.xlane.f32.xlu0 %v6651_v16 }
0x6ea8   :  { %v6653_v36 = vpop.xlane.xlu0 %6652 }
0x6ea9   :  { %v6654_v18 = vmul.f32 0.03125, %v6653_v36  ;;  %v6892_v36 = vld [vmem:[%s12229_s5] sm:$0xff] }
0x6eab   :  { %v6655_v5 = vsub.f32 %v6648_v58, %v6654_v18  ;;  %v6893_v18 = vld [vmem:[%s12229_s5 + $0x8] sm:$0xff] }
0x6ead   :  { %v6656_v10 = vmul.f32 %v6655_v5, %v6655_v5 }
0x6eaf   :  { %v6657_v13 = vsel %vm336_vm3, %v6656_v10, 0.0  ;;  %v6894_v10 = vld [vmem:[%s12229_s5 + $0x10] sm:$0xff] }
0x6eb0   :  { %6658 = vadd.xlane.f32.xlu1 %v6657_v13  ;;  %v6895_v13 = vld [vmem:[%s12229_s5 + $0x18] sm:$0xff] }
0x6f3d   :  { %v6659_v31 = vpop.xlane.xlu1 %6658 }
0x6f3e   :  { %v6660_v7 = vmul.f32 0.03125, %v6659_v31  ;;  %v9870_v31 = vpack.c.bf16 %v6895_v13, %v6894_v10 }
0x6f40   :  { %v6661_v4 = vadd.f32 1e-12, %v6660_v7 }
0x6f42   :  { %10060 = vrsqrt.f32 %v6661_v4 }
0x6f4c   :  { %v10061_v24 = vpop.eup %10060 }
0x6f4d   :  { %v6663_v49 = vmul.f32 %v10061_v24, %v6655_v5  ;;  %v9867_v5 = vpack.c.bf16 %v6893_v18, %v6892_v36 }
0x6f4f   :  { %v6668_v48 = vmul.f32 %v11778_v53, %v6663_v49 }
0x6f51   :  { %v6673_v52 = vadd.f32 %v11783_v1, %v6668_v48  ;;  %v6775_v1 = vld [vmem:[%s12245_s20] sm:$0xff] }
0x6f52   :  { %v9843_v43 = vpack.c.bf16 %v6776_v9, %v6775_v1  ;;  %v8060_v48 = vld [vmem:[%s12227_s3] ss:$0 sm:$0xff] }
0x6f53   :  { %9303 = vmatmul.mubr.msk.f32.vlgmr.msra.gmra.mrb[68].mxu1 %vm71_vm1, %v6673_v52 }
0x6f54   :  { %9348 = vmatprep.mubr.msk.f32.mxu1 %vm10121_vm0, %v10122_v6  ;;  %9844 = vmatpush3.bf16.msra.mxu0 %v9843_v43 }
0x6f55   :  { %9845 = vmatprep.subr.bf16.mxu0 %v10120_v3  ;;  %9868 = vmatpush3.bf16.msra.mxu1 %v9867_v5 }
0x6f56   :  { %9869 = vmatprep.subr.bf16.mxu1 %v10120_v3 }
0x6f59   :  { %9871 = vmatpush3.bf16.msra.mxu1 %v9870_v31 }
0x6f5a   :  { %9351 = vmatprep.subr.mxu1 %v10122_v6 }
0x7026   :  { %v6754_v29 = vpop.f32.mrb[68].mxu1 }
0x7027   :  { %v6755_v39 = vadd.f32 %v11797_v17, %v6754_v29  ;;  %v9304_v19 = vpop.f32.mrb[69].mxu1  ;;  %v6777_v17 = vld [vmem:[%s12245_s20 + $0x10] sm:$0xff]  ;;  %v8061_v29 = vld [vmem:[%s12227_s3 + $0x1] ss:$0 sm:$0xff] }
0x7028   :  { %v9846_v27 = vpack.c.bf16 %v6778_v63, %v6777_v17 }
0x7029   :  { %v6758_v12 = vsel %vm1330_vm11, %v6755_v39, -1e+30 }
0x702a   :  { %8056 = vst [vmem:[%s12241_s17 + $0xc] sm:$0x3] %v6758_v12  ;;  %v6761_v53 = vsel %vm1334_vm12, %v6758_v12, -inf  ;;  %9847 = vmatpush3.bf16.msra.mxu0 %v9846_v27 }
0x702b   :  { %6762 = vmax.xlane.f32.xlu0 %v6761_v53  ;;  %9848 = vmatprep.subr.bf16.mxu0 %v10120_v3 }
0x702e   :  { %9850 = vmatpush3.bf16.msra.mxu0 %v9849_v61 }
0x702f   :  { %9851 = vmatprep.subr.bf16.mxu0 %v10120_v3 }
0x7032   :  { %9853 = vmatpush3.bf16.msra.mxu0 %v9852_v42 }
0x7033   :  { %9854 = vmatprep.subr.bf16.mxu0 %v10120_v3 }
0x7036   :  { %9856 = vmatpush3.bf16.msra.mxu0 %v9855_v62 }
0x7037   :  { %9857 = vmatprep.subr.bf16.mxu0 %v10120_v3 }
0x703a   :  { %9859 = vmatpush3.bf16.msra.mxu0 %v9858_v57 }
0x703b   :  { %9860 = vmatprep.subr.bf16.mxu0 %v10120_v3 }
0x703e   :  { %9862 = vmatpush3.bf16.msra.mxu0 %v9861_v25 }
0x703f   :  { %9863 = vmatprep.subr.bf16.mxu0 %v10120_v3 }
0x7042   :  { %9865 = vmatpush3.bf16.msra.mxu0 %v9864_v46 }
0x7043   :  { %9878 = vmatprep.subr.bf16.mxu0 %v10120_v3 }
0x70b8   :  { %v6763_v26 = vpop.xlane.xlu0 %6762 }
0x70b9   :  { %vm6764_vm14 = vcmp.ge.f32.partialorder %v6758_v12, %v6763_v26  ;;  %v8062_v12 = vld [vmem:[%s12230_s6] ss:$0 sm:$0xff] }
0x70ba   :  { %v6765_v55 = vsel %vm6764_vm14, %v10710_v50, 128.0 }
0x70bb   :  { %v6766_v0 = vsel %vm1334_vm12, %v6765_v55, inf }
0x70bc   :  { %6767 = vmin.xlane.f32.xlu1 %v6766_v0 }
0x7149   :  { %v6768_v32 = vpop.xlane.xlu1 %6767 }
0x714a   :  { %v9918_v56 = vtrunc.f32 %v6768_v32 }
0x714c   :  { %v9919_v21 = vcvt.f32.s32 %v9918_v56 }
0x714e   :  { %vm6772_vm2 = vcmp.eq.s32.totalorder %v10340_v37, %v9919_v21  ;;  %6771 = vst.msk [vmem:[#allocation4] sm:$0x3] %vm6770_vm15, %v9919_v21 }
0x714f   :  { %9338 = vmatmul.mubr.msk.f32.vlgmr.msra.gmra.mrb[66].mxu0 %vm6772_vm2, %v10123_v38 }
0x7150   :  { %9390 = vmatprep.mubr.msk.f32.mxu0 %vm10121_vm0, %v10122_v6 }
0x7222   :  { %v6862_v22 = vpop.f32.mrb[66].mxu0 }
0x7223   :  { %v6863_v44 = vadd.f32 %v8058_v33, %v6862_v22  ;;  %v9339_v8 = vpop.f32.mrb[67].mxu0 }
0x7225   :  { %v6866_v34 = vadd.f32 %v10092_v15, %v6863_v44 }
0x7227   :  { %v6869_v35 = vsel %vm336_vm3, %v6866_v34, 0.0 }
0x7228   :  { %6870 = vadd.xlane.f32.xlu0 %v6869_v35  ;;  %v7320_v35 = vld [vmem:[%s12231_s7 + $0x8] sm:$0xff] }
0x72b5   :  { %v6871_v23 = vpop.xlane.xlu0 %6870 }
0x72b6   :  { %v6872_v38 = vmul.f32 0.03125, %v6871_v23 }
0x72b8   :  { %v6873_v2 = vsub.f32 %v6866_v34, %v6872_v38  ;;  %v7319_v34 = vld [vmem:[%s12231_s7] sm:$0xff] }
0x72b9   :  { %v9873_v38 = vpack.c.bf16 %v7320_v35, %v7319_v34  ;;  %v7545_v34 = vld [vmem:[%s12236_s12 + $0x20] sm:$0xff]  ;;  %v7546_v35 = vld [vmem:[%s12236_s12 + $0x28] sm:$0xff] }
0x72ba   :  { %v6874_v58 = vmul.f32 %v6873_v2, %v6873_v2 }
0x72bc   :  { %v6875_v16 = vsel %vm336_vm3, %v6874_v58, 0.0  ;;  %v7321_v58 = vld [vmem:[%s12231_s7 + $0x10] sm:$0xff] }
0x72bd   :  { %6876 = vadd.xlane.f32.xlu1 %v6875_v16  ;;  %v7322_v16 = vld [vmem:[%s12231_s7 + $0x18] sm:$0xff] }
0x72be   :  { %v9876_v36 = vpack.c.bf16 %v7322_v16, %v7321_v58  ;;  %v8075_v16 = vld [vmem:[%s12235_s11] ss:$0 sm:$0xff] }
0x734a   :  { %v6877_v7 = vpop.xlane.xlu1 %6876 }
0x734b   :  { %v6878_v4 = vmul.f32 0.03125, %v6877_v7  ;;  %v10093_v7 = vld [vmem:[%s12228_s4] ss:$0 sm:$0xff] }
0x734d   :  { %v6879_v24 = vadd.f32 1e-12, %v6878_v4 }
0x734f   :  { %10062 = vrsqrt.f32 %v6879_v24 }
0x7359   :  { %v10063_v49 = vpop.eup %10062 }
0x735a   :  { %v6881_v52 = vmul.f32 %v10063_v49, %v6873_v2 }
0x735c   :  { %v6886_v39 = vmul.f32 %v8060_v48, %v6881_v52 }
0x735e   :  { %v12019_v19 = vadd.f32 %v8061_v29, %v6886_v39 }
0x7360   :  { %9349 = vmatmul.mubr.msk.f32.vlgmr.msra.gmra.mrb[70].mxu1 %vm71_vm1, %v12019_v19 }
0x7361   :  { %9353 = vmatprep.mubr.msk.f32.mxu1 %vm10121_vm0, %v10122_v6 }
0x7433   :  { %v6972_v53 = vpop.f32.mrb[70].mxu1 }
0x7434   :  { %v6973_v1 = vadd.f32 %v8062_v12, %v6972_v53  ;;  %v9350_v9 = vpop.f32.mrb[71].mxu1 }
0x7436   :  { %6977 = vrot.lane.b32.xlu0 %v6973_v1, %s10124_s9  ;;  %v7153_v25 = vrot.slane %v6973_v1, 1 }
0x74a8   :  { %v6978_v17 = vpop.permute.xlu0 %6977 }
0x74a9   :  { %6980 = vst.msk [vmem:[#allocation2 + $0x6] sm:$0x1] %vm449_vm4, %v6978_v17 }
0x74aa   :  { %7149 = vst.msk [vmem:[#allocation2 + $0xd] sm:$0x2] %vm621_vm5, %v6978_v17 }
0x74b0   :  { %v6985_v43 = vld [vmem:[#allocation2] sm:$0xff] }
0x74b1   :  { %9352 = vmatpush3.xpose.msk.msra.mxu1 %vm71_vm1, %v6985_v43  ;;  %v7151_v45 = vld [vmem:[#allocation2 + $0x8] sm:$0xff] }
0x74b2   :  { %9356 = vmatprep.subr.mxu1 %v10122_v6 }
0x74b4   :  { %9354 = vmatmul.mubr.msk.f32.vlgmr.msra.gmra.mrb[72].mxu1 %vm71_vm1, %v6973_v1 }
0x74b5   :  { %9358 = vmatprep.mubr.msk.f32.mxu1 %vm10121_vm0, %v10122_v6 }
0x7587   :  { %v7058_v63 = vpop.f32.mrb[72].mxu1 }
0x7588   :  { %v7062_v27 = vmul.f32 0.17677669, %v7058_v63  ;;  %v9355_v28 = vpop.f32.mrb[73].mxu1  ;;  %v8071_v63 = vld [vmem:[%s12227_s3 + $0x2] ss:$0 sm:$0xff] }
0x758a   :  { %v7064_v54 = vsel %vm7063_vm6, %v7062_v27, -1e+30  ;;  %v8072_v27 = vld [vmem:[%s12227_s3 + $0x3] ss:$0 sm:$0xff] }
0x758b   :  { %v7065_v61 = vsel %vm535_vm7, %v7064_v54, -inf }
0x758c   :  { %7066 = vmax.xlane.f32.xlu1 %v7065_v61 }
0x7619   :  { %v7067_v51 = vpop.xlane.xlu1 %7066 }
0x761a   :  { %v7068_v14 = vsub.f32 %v7064_v54, %v7067_v51 }
0x761c   :  { %v7069_v42 = vmul.f32 1.442695, %v7068_v14 }
0x761e   :  { %10064 = vpow2.f32 %v7069_v42 }
0x7628   :  { %v10065_v40 = vpop.eup %10064 }
0x7629   :  { %v7071_v59 = vsel %vm535_vm7, %v10065_v40, 0.0 }
0x762a   :  { %7072 = vadd.xlane.f32.xlu1 %v7071_v59 }
0x763b   :  { %6981 = vrot.lane.b32.xlu1 %v6973_v1, %s10125_s21 }
0x76b7   :  { %v7073_v62 = vpop.xlane.xlu1 %7072 }
0x76b8   :  { %10066 = vrcp.f32 %v7073_v62 }
0x76bb   :  { %v6982_v41 = vpop.permute.xlu1 %6981 }
0x76bc   :  { %6984 = vst.msk [vmem:[#allocation3 + $0x6] sm:$0x1] %vm449_vm4, %v6982_v41 }
0x76bd   :  { %7150 = vst.msk [vmem:[#allocation3 + $0xd] sm:$0x2] %vm621_vm5, %v6982_v41  ;;  %v7448_v41 = vld [vmem:[%s12234_s10] sm:$0xff] }
0x76c2   :  { %v10067_v20 = vpop.eup %10066 }
0x76c3   :  { %v7075_v57 = vmul.f32 %v10067_v20, %v10065_v40  ;;  %v6986_v30 = vld [vmem:[#allocation3] sm:$0xff]  ;;  %v7449_v20 = vld [vmem:[%s12234_s10 + $0x8] sm:$0xff] }
0x76c4   :  { %9357 = vmatpush3.msra.mxu1 %v6986_v30  ;;  %v7152_v26 = vld [vmem:[#allocation3 + $0x8] sm:$0xff] }
0x76c5   :  { %9359 = vmatmul.mubr.msk.f32.vlgmr.msra.gmra.mrb[74].mxu1 %vm547_vm8, %v7075_v57  ;;  %9361 = vmatprep.subr.mxu1 %v10122_v6  ;;  %v9879_v57 = vpack.c.bf16 %v7449_v20, %v7448_v41  ;;  %v7451_v30 = vld [vmem:[%s12234_s10 + $0x18] sm:$0xff]  ;;  %v8078_v20 = vld [vmem:[%s12227_s3 + $0x6] ss:$0 sm:$0xff] }
0x76c6   :  { %9363 = vmatprep.mubr.msk.f32.mxu1 %vm10121_vm0, %v10122_v6 }
0x76c7   :  { %9880 = vmatpush3.bf16.msra.mxu0 %v9879_v57 }
0x76c8   :  { %9881 = vmatprep.subr.bf16.mxu0 %v10120_v3 }
0x76cb   :  { %9362 = vmatpush3.xpose.msk.msra.mxu1 %vm71_vm1, %v7151_v45 }
0x76cc   :  { %9366 = vmatprep.subr.mxu1 %v10122_v6 }
0x76ce   :  { %9364 = vmatmul.mubr.msk.f32.vlgmr.msra.gmra.mrb[76].mxu1 %vm71_vm1, %v7153_v25 }
0x76cf   :  { %9367 = vmatpush3.msra.mxu1 %v7152_v26  ;;  %9368 = vmatprep.mubr.msk.f32.mxu1 %vm10121_vm0, %v10122_v6 }
0x76d0   :  { %9872 = vmatprep.subr.bf16.mxu1 %v10120_v3 }
0x7798   :  { %v7145_v55 = vpop.f32.mrb[74].mxu1 }
0x7799   :  { %v9360_v0 = vpop.f32.mrb[75].mxu1 }
0x77a1   :  { %v7225_v60 = vpop.f32.mrb[76].mxu1 }
0x77a2   :  { %v7229_v11 = vmul.f32 0.17677669, %v7225_v60  ;;  %v9365_v46 = vpop.f32.mrb[77].mxu1  ;;  %v8073_v60 = vld [vmem:[%s12227_s3 + $0x4] ss:$0 sm:$0xff] }
0x77a3   :  { %v8074_v46 = vld [vmem:[%s12227_s3 + $0x5] ss:$0 sm:$0xff] }
0x77a4   :  { %v7230_v32 = vsel %vm7063_vm6, %v7229_v11, -1e+30 }
0x77a5   :  { %v7231_v56 = vsel %vm535_vm7, %v7230_v32, -inf }
0x77a6   :  { %7232 = vmax.xlane.f32.xlu0 %v7231_v56 }
0x7833   :  { %v7233_v21 = vpop.xlane.xlu0 %7232 }
0x7834   :  { %v7234_v33 = vsub.f32 %v7230_v32, %v7233_v21  ;;  %v7541_v21 = vld [vmem:[%s12236_s12] sm:$0xff] }
0x7836   :  { %v7235_v22 = vmul.f32 1.442695, %v7234_v33  ;;  %v7542_v33 = vld [vmem:[%s12236_s12 + $0x8] sm:$0xff] }
0x7838   :  { %10068 = vpow2.f32 %v7235_v22  ;;  %v9885_v22 = vpack.c.bf16 %v7542_v33, %v7541_v21 }
0x7842   :  { %v10069_v44 = vpop.eup %10068 }
0x7843   :  { %v7237_v8 = vsel %vm535_vm7, %v10069_v44, 0.0 }
0x7844   :  { %7238 = vadd.xlane.f32.xlu1 %v7237_v8  ;;  %v7544_v8 = vld [vmem:[%s12236_s12 + $0x18] sm:$0xff] }
0x78d1   :  { %v7239_v15 = vpop.xlane.xlu1 %7238 }
0x78d2   :  { %10070 = vrcp.f32 %v7239_v15 }
0x78dc   :  { %v10071_v23 = vpop.eup %10070 }
0x78dd   :  { %v7241_v2 = vmul.f32 %v10071_v23, %v10069_v44  ;;  %v7543_v44 = vld [vmem:[%s12236_s12 + $0x10] sm:$0xff]  ;;  %v9891_v23 = vpack.c.bf16 %v7546_v35, %v7545_v34 }
0x78de   :  { %v9888_v15 = vpack.c.bf16 %v7544_v8, %v7543_v44 }
0x78df   :  { %9369 = vmatmul.mubr.msk.f32.vlgmr.msra.gmra.mrb[78].mxu1 %vm547_vm8, %v7241_v2  ;;  %v7548_v2 = vld [vmem:[%s12236_s12 + $0x38] sm:$0xff] }
0x78e0   :  { %9874 = vmatpush3.bf16.msra.mxu1 %v9873_v38  ;;  %9379 = vmatprep.mubr.msk.f32.mxu1 %vm10121_vm0, %v10122_v6  ;;  %v7547_v38 = vld [vmem:[%s12236_s12 + $0x30] sm:$0xff] }
0x78e1   :  { %9875 = vmatprep.subr.bf16.mxu1 %v10120_v3  ;;  %v9894_v58 = vpack.c.bf16 %v7548_v2, %v7547_v38  ;;  %v7759_v38 = vld [vmem:[%s12238_s14] sm:$0xff]  ;;  %v7760_v2 = vld [vmem:[%s12238_s14 + $0x8] sm:$0xff] }
0x78e4   :  { %9877 = vmatpush3.bf16.msra.mxu1 %v9876_v36 }
0x78e5   :  { %9884 = vmatprep.subr.bf16.mxu1 %v10120_v3 }
0x79b2   :  { %v7311_v18 = vpop.f32.mrb[78].mxu1 }
0x79b3   :  { %v7316_v5 = vrot.slane %v7311_v18, 7  ;;  %v9370_v10 = vpop.f32.mrb[79].mxu1 }
0x79b5   :  { %v7318_v13 = vsel %vm791_vm9, %v7145_v55, %v7316_v5 }
0x79b6   :  { %9380 = vmatmul.mubr.msk.f32.vlgmr.msra.gmra.mrb[80].mxu1 %vm71_vm1, %v7318_v13 }
0x79b7   :  { %9409 = vmatprep.mubr.msk.f32.mxu1 %vm10121_vm0, %v10122_v6  ;;  %9886 = vmatpush3.bf16.msra.mxu1 %v9885_v22 }
0x79b8   :  { %9887 = vmatprep.subr.bf16.mxu1 %v10120_v3 }
0x79bb   :  { %9889 = vmatpush3.bf16.msra.mxu1 %v9888_v15 }
0x79bc   :  { %9890 = vmatprep.subr.bf16.mxu1 %v10120_v3 }
0x79bf   :  { %9892 = vmatpush3.bf16.msra.mxu1 %v9891_v23 }
0x79c0   :  { %9893 = vmatprep.subr.bf16.mxu1 %v10120_v3 }
0x79c3   :  { %9895 = vmatpush3.bf16.msra.mxu1 %v9894_v58  ;;  %v9903_v58 = vpack.c.bf16 %v7760_v2, %v7759_v38 }
0x7a89   :  { %v7392_v31 = vpop.f32.mrb[80].mxu1 }
0x7a8a   :  { %v7393_v4 = vadd.f32 %v10093_v7, %v7392_v31  ;;  %v9381_v24 = vpop.f32.mrb[81].mxu1 }
0x7a8c   :  { %v7396_v49 = vadd.f32 %v7393_v4, %v12019_v19 }
0x7a8e   :  { %v7399_v48 = vsel %vm336_vm3, %v7396_v49, 0.0 }
0x7a8f   :  { %7400 = vadd.xlane.f32.xlu0 %v7399_v48 }
0x7b1c   :  { %v7401_v52 = vpop.xlane.xlu0 %7400 }
0x7b1d   :  { %v7402_v29 = vmul.f32 0.03125, %v7401_v52 }
0x7b1f   :  { %v7403_v39 = vsub.f32 %v7396_v49, %v7402_v29 }
0x7b21   :  { %v7404_v12 = vmul.f32 %v7403_v39, %v7403_v39 }
0x7b23   :  { %v7405_v53 = vsel %vm336_vm3, %v7404_v12, 0.0 }
0x7b24   :  { %7406 = vadd.xlane.f32.xlu0 %v7405_v53 }
0x7bb1   :  { %v7407_v1 = vpop.xlane.xlu0 %7406 }
0x7bb2   :  { %v7408_v9 = vmul.f32 0.03125, %v7407_v1 }
0x7bb4   :  { %v7409_v17 = vadd.f32 1e-12, %v7408_v9 }
0x7bb6   :  { %10072 = vrsqrt.f32 %v7409_v17 }
0x7bc0   :  { %v10073_v43 = vpop.eup %10072 }
0x7bc1   :  { %v7411_v19 = vmul.f32 %v10073_v43, %v7403_v39  ;;  %v10094_v39 = vld [vmem:[%s12228_s4 + $0x3] ss:$0 sm:$0xff] }
0x7bc3   :  { %v7416_v28 = vmul.f32 %v8071_v63, %v7411_v19 }
0x7bc5   :  { %v7421_v54 = vadd.f32 %v8072_v27, %v7416_v28  ;;  %v7648_v28 = vld [vmem:[%s12237_s13] sm:$0xff] }
0x7bc7   :  { %v7422_v61 = vadd.f32 %v7421_v54, %v10500_v47  ;;  %v7450_v47 = vld [vmem:[%s12234_s10 + $0x10] sm:$0xff]  ;;  %v7649_v54 = vld [vmem:[%s12237_s13 + $0x8] sm:$0xff] }
0x7bc8   :  { %v9882_v45 = vpack.c.bf16 %v7451_v30, %v7450_v47  ;;  %v8079_v47 = vld [vmem:[%s12227_s3 + $0x7] ss:$0 sm:$0xff] }
0x7bc9   :  { %v7425_v51 = vsel %vm336_vm3, %v7422_v61, 0.0 }
0x7bca   :  { %7426 = vadd.xlane.f32.xlu0 %v7425_v51  ;;  %9883 = vmatpush3.bf16.msra.mxu0 %v9882_v45  ;;  %v7650_v51 = vld [vmem:[%s12237_s13 + $0x10] sm:$0xff] }
0x7bcb   :  { %9896 = vmatprep.subr.bf16.mxu0 %v10120_v3 }
0x7c57   :  { %v7427_v14 = vpop.xlane.xlu0 %7426 }
0x7c58   :  { %v7428_v42 = vmul.f32 0.03125, %v7427_v14  ;;  %v7651_v14 = vld [vmem:[%s12237_s13 + $0x18] sm:$0xff] }
0x7c5a   :  { %v7429_v40 = vsub.f32 %v7422_v61, %v7428_v42  ;;  %v9897_v61 = vpack.c.bf16 %v7649_v54, %v7648_v28  ;;  %v9900_v42 = vpack.c.bf16 %v7651_v14, %v7650_v51 }
0x7c5c   :  { %v7430_v59 = vmul.f32 %v7429_v40, %v7429_v40 }
0x7c5e   :  { %v7431_v62 = vsel %vm336_vm3, %v7430_v59, 0.0 }
0x7c5f   :  { %7432 = vadd.xlane.f32.xlu1 %v7431_v62 }
0x7cec   :  { %v7433_v25 = vpop.xlane.xlu1 %7432 }
0x7ced   :  { %v7434_v26 = vmul.f32 0.03125, %v7433_v25 }
0x7cef   :  { %v7435_v55 = vadd.f32 1e-12, %v7434_v26  ;;  %v10095_v26 = vld [vmem:[%s12228_s4 + $0x4] ss:$0 sm:$0xff] }
0x7cf1   :  { %10074 = vrsqrt.f32 %v7435_v55 }
0x7cfb   :  { %v10075_v0 = vpop.eup %10074 }
0x7cfc   :  { %v7437_v11 = vmul.f32 %v10075_v0, %v7429_v40 }
0x7cfe   :  { %v7442_v32 = vmul.f32 %v8073_v60, %v7437_v11 }
0x7d00   :  { %v7447_v56 = vadd.f32 %v8074_v46, %v7442_v32 }
0x7d02   :  { %9391 = vmatmul.mubr.msk.f32.vlgmr.msra.gmra.mrb[68].mxu0 %vm71_vm1, %v7447_v56 }
0x7d03   :  { %9420 = vmatprep.mubr.msk.f32.mxu0 %vm10121_vm0, %v10122_v6  ;;  %9898 = vmatpush3.bf16.msra.mxu0 %v9897_v61 }
0x7d04   :  { %9899 = vmatprep.subr.bf16.mxu0 %v10120_v3 }
0x7d07   :  { %9901 = vmatpush3.bf16.msra.mxu0 %v9900_v42 }
0x7d08   :  { %9902 = vmatprep.subr.bf16.mxu0 %v10120_v3 }
0x7dd5   :  { %v7528_v36 = vpop.f32.mrb[68].mxu0 }
0x7dd6   :  { %v7529_v18 = vadd.f32 %v8075_v16, %v7528_v36  ;;  %v9392_v5 = vpop.f32.mrb[69].mxu0  ;;  %v7761_v16 = vld [vmem:[%s12238_s14 + $0x10] sm:$0xff]  ;;  %v7762_v36 = vld [vmem:[%s12238_s14 + $0x18] sm:$0xff] }
0x7dd8   :  { %v7532_v10 = vmul.f32 %v7529_v18, %v7529_v18 }
0x7dda   :  { %v7533_v13 = vmul.f32 %v7532_v10, %v7529_v18 }
0x7ddc   :  { %v7534_v31 = vmul.f32 0.044715, %v7533_v13 }
0x7dde   :  { %v7535_v7 = vadd.f32 %v7534_v31, %v7529_v18 }
0x7de0   :  { %v7536_v4 = vmul.f32 0.7978846, %v7535_v7  ;;  %v8081_v7 = vld [vmem:[%s12227_s3 + $0x8] ss:$0 sm:$0xff] }
0x7de2   :  { %10076 = vtanh.f32 %v7536_v4  ;;  %v8082_v4 = vld [vmem:[%s12227_s3 + $0x9] ss:$0 sm:$0xff]  ;;  %s10127_s3 = smov [#allocation4]  }
0x7dec   :  { %v10077_v24 = vpop.eup %10076 }
0x7ded   :  { %v7538_v49 = vadd.f32 1.0, %v10077_v24 }
0x7def   :  { %v7539_v48 = vmul.f32 0.5, %v7538_v49 }
0x7df1   :  { %v7540_v52 = vmul.f32 %v7539_v48, %v7529_v18  ;;  %v9906_v18 = vpack.c.bf16 %v7762_v36, %v7761_v16  ;;  %v8083_v48 = vld [vmem:[%s12239_s15] ss:$0 sm:$0xff]  ;;  %s7863_s15 = sshll.u32 %s10127_s3, 4  ;;  %s7864_s15 = int_to_ptr.vmem [resolvable:$true] %s7863_s15 }
0x7df2   :  { %s10096_s20 = scalar_lea.vmem %s7864_s15, 32  ;;  %p10101_p1 = scmp.lt.s32.totalorder %s7864_s15, %s7864_s15 }
0x7df3   :  { %9410 = vmatmul.mubr.msk.f32.vlgmr.msra.gmra.mrb[82].mxu1 %vm1031_vm10, %v7540_v52  ;;  %p10097_p0 = scmp.ne.s32.totalorder %s7864_s15, %s10096_s20  ;;  %p10102_p2 = scmp.lt.s32.totalorder %s10096_s20, %s10096_s20 }
0x7df5   :  { %p10103_p3 = por %p10102_p2, %p10101_p1 }
0x7df7   :  { %p10104_p4 = pnand %p10103_p3, %p10097_p0 }
0x7ec6   :  { %v7618_v29 = vpop.f32.mrb[82].mxu1 }
0x7ec7   :  { %v7619_v12 = vadd.f32 %v10094_v39, %v7618_v29  ;;  %v9411_v53 = vpop.f32.mrb[83].mxu1 }
0x7ec9   :  { %v7622_v1 = vadd.f32 %v7619_v12, %v7447_v56 }
0x7ecb   :  { %v7625_v9 = vsel %vm336_vm3, %v7622_v1, 0.0 }
0x7ecc   :  { %7626 = vadd.xlane.f32.xlu0 %v7625_v9 }
0x7f59   :  { %v7627_v17 = vpop.xlane.xlu0 %7626 }
0x7f5a   :  { %v7628_v43 = vmul.f32 0.03125, %v7627_v17 }
0x7f5c   :  { %v7629_v63 = vsub.f32 %v7622_v1, %v7628_v43 }
0x7f5e   :  { %v7630_v19 = vmul.f32 %v7629_v63, %v7629_v63 }
0x7f60   :  { %v7631_v27 = vsel %vm336_vm3, %v7630_v19, 0.0 }
0x7f61   :  { %7632 = vadd.xlane.f32.xlu1 %v7631_v27 }
0x7fee   :  { %v7633_v40 = vpop.xlane.xlu1 %7632 }
0x7fef   :  { %v7634_v59 = vmul.f32 0.03125, %v7633_v40 }
0x7ff1   :  { %v7635_v62 = vadd.f32 1e-12, %v7634_v59 }
0x7ff3   :  { %10078 = vrsqrt.f32 %v7635_v62 }
0x7ffd   :  { %v10079_v41 = vpop.eup %10078 }
0x7ffe   :  { %v7637_v57 = vmul.f32 %v10079_v41, %v7629_v63 }
0x8000   :  { %v7642_v30 = vmul.f32 %v8078_v20, %v7637_v57 }
0x8002   :  { %v7647_v45 = vadd.f32 %v8079_v47, %v7642_v30 }
0x8004   :  { %9421 = vmatmul.mubr.msk.f32.vlgmr.msra.gmra.mrb[70].mxu0 %vm71_vm1, %v7647_v45 }
0x8005   :  { %9431 = vmatprep.mubr.msk.f32.mxu0 %vm10121_vm0, %v10122_v6  ;;  %9904 = vmatpush3.bf16.msra.mxu0 %v9903_v58 }
0x8006   :  { %9905 = vmatprep.subr.bf16.mxu0 %v10120_v3 }
0x8009   :  { %9907 = vmatpush3.bf16.msra.mxu0 %v9906_v18 }
0x80d7   :  { %v7721_v25 = vpop.f32.mrb[70].mxu0 }
0x80d8   :  { %v7722_v55 = vadd.f32 %v10095_v26, %v7721_v25  ;;  %v9422_v0 = vpop.f32.mrb[71].mxu0 }
0x80da   :  { %v7725_v60 = vmul.f32 %v7722_v55, %v7722_v55 }
0x80dc   :  { %v7726_v11 = vmul.f32 %v7725_v60, %v7722_v55 }
0x80de   :  { %v7727_v46 = vmul.f32 0.044715, %v7726_v11 }
0x80e0   :  { %v7728_v32 = vadd.f32 %v7727_v46, %v7722_v55 }
0x80e2   :  { %v7729_v56 = vmul.f32 0.7978846, %v7728_v32 }
0x80e4   :  { %10080 = vtanh.f32 %v7729_v56 }
0x80ee   :  { %v10081_v21 = vpop.eup %10080 }
0x80ef   :  { %v7731_v33 = vadd.f32 1.0, %v10081_v21 }
0x80f1   :  { %v7732_v22 = vmul.f32 0.5, %v7731_v33 }
0x80f3   :  { %v7733_v44 = vmul.f32 %v7732_v22, %v7722_v55 }
0x80f5   :  { %v7736_v8 = vsel %vm336_vm3, %v7733_v44, 0.0 }
0x80f6   :  { %7737 = vadd.xlane.f32.xlu0 %v7736_v8 }
0x8183   :  { %v7738_v6 = vpop.xlane.xlu0 %7737 }
0x8184   :  { %v7739_v15 = vmul.f32 0.03125, %v7738_v6 }
0x8186   :  { %v7740_v34 = vsub.f32 %v7733_v44, %v7739_v15 }
0x8188   :  { %v7741_v35 = vmul.f32 %v7740_v34, %v7740_v34 }
0x818a   :  { %v7742_v23 = vsel %vm336_vm3, %v7741_v35, 0.0 }
0x818b   :  { %7743 = vadd.xlane.f32.xlu1 %v7742_v23 }
0x8218   :  { %v7744_v5 = vpop.xlane.xlu1 %7743 }
0x8219   :  { %v7745_v10 = vmul.f32 0.03125, %v7744_v5 }
0x821b   :  { %v7746_v13 = vadd.f32 1e-12, %v7745_v10 }
0x821d   :  { %10082 = vrsqrt.f32 %v7746_v13 }
0x8227   :  { %v10083_v31 = vpop.eup %10082 }
0x8228   :  { %v7748_v3 = vmul.f32 %v10083_v31, %v7740_v34 }
0x822a   :  { %v7753_v24 = vmul.f32 %v8081_v7, %v7748_v3 }
0x822c   :  { %v7758_v49 = vadd.f32 %v8082_v4, %v7753_v24 }
0x822e   :  { %9432 = vmatmul.mubr.msk.f32.vlgmr.msra.gmra.mrb[72].mxu0 %vm71_vm1, %v7758_v49  ;;  %vm7855_vm1 = vcmask 58424  }
0x8301   :  { %v7839_v52 = vpop.f32.mrb[72].mxu0 }
0x8302   :  { %v7840_v29 = vadd.f32 %v8083_v48, %v7839_v52  ;;  %v9433_v39 = vpop.f32.mrb[73].mxu0 }
0x8304   :  { %v7843_v12 = vsel %vm1330_vm11, %v7840_v29, -1e+30 }
0x8305   :  { %8085 = vst [vmem:[%s12241_s17 + $0xe] sm:$0x3] %v7843_v12  ;;  %v7846_v53 = vsel %vm1334_vm12, %v7843_v12, -inf }
0x8306   :  { %7847 = vmax.xlane.f32.xlu0 %v7846_v53 }
0x8393   :  { %v7848_v1 = vpop.xlane.xlu0 %7847 }
0x8394   :  { %vm7849_vm0 = vcmp.ge.f32.partialorder %v7843_v12, %v7848_v1 }
0x8395   :  { %v7850_v9 = vsel %vm7849_vm0, %v10710_v50, 128.0 }
0x8396   :  { %v7851_v17 = vsel %vm1334_vm12, %v7850_v9, inf }
0x8397   :  { %7852 = vmin.xlane.f32.xlu1 %v7851_v17 }
0x8424   :  { %v7853_v43 = vpop.xlane.xlu1 %7852 }
0x8425   :  { %v9920_v63 = vtrunc.f32 %v7853_v43 }
0x8427   :  { %v9921_v37 = vcvt.f32.s32 %v9920_v63 }
0x8429   :  { %7856 = vst.msk [vmem:[#allocation4] sm:$0x3] %vm7855_vm1, %v9921_v37 }
0x842a   :  { %10107 = shalt.err (!%p10104_p4)
}
0x842b   :  { %s10108_s8 = scalar_lea.hbm %s12240_s16, 32 }
0x842c   :  { %p10109_p5 = scmp.ne.s32.totalorder %s12240_s16, %s10108_s8  ;;  %p10112_p6 = scmp.lt.u32.totalorder %s10108_s8, %s12240_s16 }
0x842e   :  { %p10114_p7 = pnand %p10112_p6, %p10109_p5 }
0x8430   :  { %10117 = shalt.err (!%p10114_p7)
}
0x8431   :  { %7866 = dma.vmem_to_hbm [thread:$0]  %s7864_s15, 32, %s12240_s16, [#allocation5]  }
0x8432   :  { %10118 = dma.done.wait [#allocation5], 32  }
0x8433   :  { %10119 = vsyncadd [#allocation5], 4294967264 }
0x8434   :  { %7874 = vsyncpa [#allocation5], 1 }

</bundles_post_ra>
